<compile_context>
chip_gen: v7x
topology: tpu7x:2x2x1
jax: 0.10.0
libtpu: 0.0.40
codegen_flags: <defaults>
</compile_context>

<pallas_src>
import functools

import numpy as np
import jax
import jax.numpy as jnp
from jax import lax
from jax.experimental import pallas as pl
from jax.experimental.pallas import tpu as pltpu

LANES = 128        # every channel dim padded to one lane tile
CONV1_TAPS = 32    # 25 real conv1 taps padded to 32
P1_ROWS = 224      # 14*14 = 196 pooled conv1 positions padded to 224
T2_ROWS = 144      # conv2 out rows m = oh*14+ow (valid for oh,ow<10, max 135)
BLOCK_B = 8        # images per grid step (multiple of 8; keep <=32 for v7x VMEM)


# ---------------------------------------------------------------------------
# Fused kernel: one grid step == BLOCK_B images
# ---------------------------------------------------------------------------
def _lenet5_kernel(x1_ref, w1_ref, b1_ref, p1m_ref, w2_ref, b2_ref, p2m_ref,
                   w3_ref, b3_ref, wf1_ref, bf1_ref, wf2_ref, bf2_ref,
                   out_ref, p1_s, t2_s):
    f32 = jnp.float32
    bf16 = jnp.bfloat16
    BT = out_ref.shape[0]

    # -------- per image: conv1 + tanh + pool1, then conv2 (25 taps) + tanh ----
    def per_image(b, carry):
        # conv1: (784, 32) x (32, 128) on the MXU (im2col patch built in wrapper)
        y1 = jnp.dot(x1_ref[b], w1_ref[...], preferred_element_type=f32)
        t1 = jnp.tanh(y1 + b1_ref[...]).astype(bf16)                  # (784, 128)
        # avgpool(2): one (224, 784) x (784, 128) pool-matrix matmul
        p1_s[...] = jnp.dot(p1m_ref[...], t1, preferred_element_type=f32)

        # conv2: shift-and-accumulate over the 25 taps; acc row m = oh*14 + ow
        acc = jnp.zeros((T2_ROWS, LANES), f32)
        for kh in range(5):
            for kw in range(5):
                s = kh * 14 + kw
                lhs = p1_s[s:s + T2_ROWS, :].astype(bf16)             # (144, 128)
                acc = acc + jnp.dot(lhs, w2_ref[kh * 5 + kw],
                                    preferred_element_type=f32)
        t2_s[b] = jnp.tanh(acc + b2_ref[...]).astype(bf16)            # (144, 128)
        return carry

    lax.fori_loop(0, BT, per_image, 0)

    # -------- pool2 for the whole block in one matmul, tap-major output -------
    # row t*BT + b of p2 == pooled conv2 of image b at spatial tap t = ph*5+pw
    t2_all = t2_s[...].reshape(BT * T2_ROWS, LANES)                   # (BT*144,128)
    p2 = jnp.dot(p2m_ref[...], t2_all, preferred_element_type=f32)    # (25*BT,128)

    # -------- conv3 (5x5 -> 1x1): 25 accumulated (BT,128)x(128,128) matmuls ---
    acc3 = jnp.zeros((BT, LANES), f32)
    for t in range(25):
        acc3 = acc3 + jnp.dot(p2[t * BT:(t + 1) * BT, :].astype(bf16),
                              w3_ref[t], preferred_element_type=f32)
    h3 = jnp.tanh(acc3 + b3_ref[...]).astype(bf16)                    # (BT, 128)

    # -------- fc1 + tanh, fc2 (both stacked across the block, M = BT) ---------
    h4 = jnp.tanh(jnp.dot(h3, wf1_ref[...], preferred_element_type=f32)
                  + bf1_ref[...]).astype(bf16)
    out_ref[...] = (jnp.dot(h4, wf2_ref[...], preferred_element_type=f32)
                    + bf2_ref[...])


# ---------------------------------------------------------------------------
# Host-side constant pooling matrices
# ---------------------------------------------------------------------------
def _pool1_matrix():
    # (224, 784): row p = ph*14+pw (rows >=196 are zero), col = oh1*28 + ow1
    p = np.zeros((P1_ROWS, 28 * 28), np.float32)
    for ph in range(14):
        for pw in range(14):
            for dh in range(2):
                for dw in range(2):
                    p[ph * 14 + pw, (2 * ph + dh) * 28 + (2 * pw + dw)] = 0.25
    return p


def _pool2_matrix(bt):
    # per-image (25, 144) pool matrix, embedded block-wise into a batched
    # (25*bt, bt*144) matrix whose output rows are tap-major: row = t*bt + b.
    p2 = np.zeros((25, T2_ROWS), np.float32)
    for ph in range(5):
        for pw in range(5):
            for dh in range(2):
                for dw in range(2):
                    p2[ph * 5 + pw, (2 * ph + dh) * 14 + (2 * pw + dw)] = 0.25
    pb = np.zeros((25 * bt, bt * T2_ROWS), np.float32)
    for b in range(bt):
        pb[b::bt, b * T2_ROWS:(b + 1) * T2_ROWS] = p2
    return pb


# ---------------------------------------------------------------------------
# Weight preparation: PyTorch layouts -> lane-padded, tap-ordered matrices
# ---------------------------------------------------------------------------
def _prep_weights(params):
    bf16, f32 = jnp.bfloat16, jnp.float32
    # conv1: (120,1,5,5) -> (32, 128), row = kh*5+kw
    w1 = jnp.transpose(params["conv1_w"], (2, 3, 1, 0)).reshape(25, 120)
    w1 = jnp.pad(w1, ((0, CONV1_TAPS - 25), (0, LANES - 120))).astype(bf16)
    b1 = jnp.pad(params["conv1_b"], (0, LANES - 120)).reshape(1, LANES).astype(f32)
    # conv2: (60,120,5,5) -> (25, 128, 128)  [tap, cin, cout]
    w2 = jnp.transpose(params["conv2_w"], (2, 3, 1, 0)).reshape(25, 120, 60)
    w2 = jnp.pad(w2, ((0, 0), (0, LANES - 120), (0, LANES - 60))).astype(bf16)
    b2 = jnp.pad(params["conv2_b"], (0, LANES - 60)).reshape(1, LANES).astype(f32)
    # conv3: (60,60,5,5) -> (25, 128, 128)
    w3 = jnp.transpose(params["conv3_w"], (2, 3, 1, 0)).reshape(25, 60, 60)
    w3 = jnp.pad(w3, ((0, 0), (0, LANES - 60), (0, LANES - 60))).astype(bf16)
    b3 = jnp.pad(params["conv3_b"], (0, LANES - 60)).reshape(1, LANES).astype(f32)
    # fc weights stored (in, out)
    wf1 = jnp.pad(params["fc1_w"], ((0, LANES - 60), (0, LANES - 84))).astype(bf16)
    bf1 = jnp.pad(params["fc1_b"], (0, LANES - 84)).reshape(1, LANES).astype(f32)
    wf2 = jnp.pad(params["fc2_w"], ((0, LANES - 84), (0, LANES - 10))).astype(bf16)
    bf2 = jnp.pad(params["fc2_b"], (0, LANES - 10)).reshape(1, LANES).astype(f32)
    return (w1, b1, w2, b2, w3, b3, wf1, bf1, wf2, bf2)


# ---------------------------------------------------------------------------
# Forward pass (matches PyTorch lenet5.forward semantics)
# ---------------------------------------------------------------------------
@jax.jit
def lenet5_forward(params, x_nchw):
    B = x_nchw.shape[0]
    BT = BLOCK_B
    Bp = -(-B // BT) * BT  # pad batch to a multiple of the block

    # conv1 im2col in the wrapper: (B, 784, 32) bf16, col = kh*5+kw
    img = x_nchw[:, 0, :, :].astype(jnp.float32)                       # (B, 32, 32)
    patches = jnp.stack(
        [img[:, kh:kh + 28, kw:kw + 28].reshape(B, 28 * 28)
         for kh in range(5) for kw in range(5)], axis=-1)              # (B, 784, 25)
    patches = jnp.pad(patches, ((0, Bp - B), (0, 0), (0, CONV1_TAPS - 25)))
    patches = patches.astype(jnp.bfloat16)

    w1, b1, w2, b2, w3, b3, wf1, bf1, wf2, bf2 = _prep_weights(params)
    p1m = jnp.asarray(_pool1_matrix(), jnp.bfloat16)                   # (224, 784)
    p2m = jnp.asarray(_pool2_matrix(BT), jnp.bfloat16)                 # (25*BT, BT*144)

    inputs = (patches, w1, b1, p1m, w2, b2, p2m, w3, b3, wf1, bf1, wf2, bf2)

    def const_map(ndim):
        return lambda i: (0,) * ndim

    in_specs = [pl.BlockSpec((BT, 28 * 28, CONV1_TAPS), lambda i: (i, 0, 0))]
    for a in inputs[1:]:
        in_specs.append(pl.BlockSpec(a.shape, const_map(a.ndim)))

    num_steps = Bp // BT
    per_img_flops = 2 * (784 * CONV1_TAPS * LANES          # conv1
                         + P1_ROWS * 784 * LANES           # pool1 matmul
                         + 25 * T2_ROWS * LANES * LANES    # conv2
                         + 25 * LANES * LANES              # conv3
                         + 2 * LANES * LANES)              # fc1 + fc2
    pool2_flops = num_steps * 2 * (25 * BT) * (BT * T2_ROWS) * LANES
    flops = Bp * per_img_flops + pool2_flops
    trans = Bp * (784 * LANES + T2_ROWS * LANES + 2 * LANES)
    bytes_accessed = (int(patches.size) * 2
                      + sum(int(a.size) * a.dtype.itemsize for a in inputs[1:])
                      + Bp * LANES * 4)

    out = pl.pallas_call(
        _lenet5_kernel,
        out_shape=jax.ShapeDtypeStruct((Bp, LANES), jnp.float32),
        grid_spec=pltpu.PrefetchScalarGridSpec(
            num_scalar_prefetch=0,
            grid=(num_steps,),
            in_specs=in_specs,
            out_specs=pl.BlockSpec((BT, LANES), lambda i: (i, 0)),
            scratch_shapes=[
                pltpu.VMEM((P1_ROWS, LANES), jnp.float32),     # pooled conv1
                pltpu.VMEM((BT, T2_ROWS, LANES), jnp.bfloat16),  # tanh(conv2)
            ],
        ),
        compiler_params=pltpu.CompilerParams(
            dimension_semantics=("parallel",)),
        cost_estimate=pl.CostEstimate(
            flops=flops, transcendentals=trans, bytes_accessed=bytes_accessed),
    )(*inputs)
    return out[:B, :10]


# ---------------------------------------------------------------------------
# Parameters (deterministic, PyTorch-default-like uniform init)
# ---------------------------------------------------------------------------
def init_params(key):
    def uniform(k, shape, fan_in):
        bound = 1.0 / jnp.sqrt(jnp.float32(fan_in))
        return jax.random.uniform(k, shape, jnp.float32, -bound, bound)

    ks = jax.random.split(key, 10)
    return {
        "conv1_w": uniform(ks[0], (120, 1, 5, 5), 1 * 25),
        "conv1_b": uniform(ks[1], (120,), 1 * 25),
        "conv2_w": uniform(ks[2], (60, 120, 5, 5), 120 * 25),
        "conv2_b": uniform(ks[3], (60,), 120 * 25),
        "conv3_w": uniform(ks[4], (60, 60, 5, 5), 60 * 25),
        "conv3_b": uniform(ks[5], (60,), 60 * 25),
        "fc1_w": uniform(ks[6], (60, 84), 60),   # stored (in, out)
        "fc1_b": uniform(ks[7], (84,), 60),
        "fc2_w": uniform(ks[8], (84, 10), 84),
        "fc2_b": uniform(ks[9], (10,), 84),
    }


# ---------------------------------------------------------------------------
# Pure-JAX (XLA) reference with identical semantics, for validation
# ---------------------------------------------------------------------------
def lenet5_reference(params, x_nchw):
    x = jnp.transpose(x_nchw, (0, 2, 3, 1))

    def conv_tanh(x, w, b):
        cout, cin, kh, kw = w.shape
        B, H, W, C = x.shape
        oh, ow = H - kh + 1, W - kw + 1
        patches = jnp.stack([x[:, i:i + oh, j:j + ow, :]
                             for i in range(kh) for j in range(kw)], axis=3)
        patches = patches.reshape(B, oh, ow, kh * kw * cin)
        wmat = jnp.transpose(w, (2, 3, 1, 0)).reshape(kh * kw * cin, cout)
        return jnp.tanh(patches @ wmat + b)

    def pool(x):
        return 0.25 * (x[:, 0::2, 0::2, :] + x[:, 0::2, 1::2, :] +
                       x[:, 1::2, 0::2, :] + x[:, 1::2, 1::2, :])

    x = pool(conv_tanh(x, params["conv1_w"], params["conv1_b"]))
    x = pool(conv_tanh(x, params["conv2_w"], params["conv2_b"]))
    x = conv_tanh(x, params["conv3_w"], params["conv3_b"])
    x = x.reshape(x.shape[0], -1)
    x = jnp.tanh(x @ params["fc1_w"] + params["fc1_b"])
    return x @ params["fc2_w"] + params["fc2_b"]


if __name__ == "__main__":
    key = jax.random.PRNGKey(0)
    pkey, xkey = jax.random.split(key)
    params = init_params(pkey)
    # Classic LeNet-5 geometry: 1x32x32 input so conv3's output is 1x1 spatial.
    # B=16 with BLOCK_B=8 -> grid of 2 steps (even, so v7x's 2 TCs split evenly).
    x = jax.random.normal(xkey, (16, 1, 32, 32), jnp.float32)

    out = jax.block_until_ready(lenet5_forward(params, x))
    ref = jax.block_until_ready(jax.jit(lenet5_reference)(params, x))

    assert out.shape == (16, 10), out.shape
    assert bool(jnp.all(jnp.isfinite(out)))
    max_err = float(jnp.max(jnp.abs(out - ref)))
    assert max_err < 0.2, f"kernel/reference mismatch: {max_err}"
    print("KERNEL_OK")
</pallas_src>

<mosaic_0001>
module attributes {stable_mosaic.version = 11 : i64} {
  func.func @_lenet5_kernel(%arg0: i32, %arg1: memref<8x784x32xbf16, #tpu.memory_space<vmem>>, %arg2: memref<32x128xbf16, #tpu.memory_space<vmem>>, %arg3: memref<1x128xf32, #tpu.memory_space<vmem>>, %arg4: memref<224x784xbf16, #tpu.memory_space<vmem>>, %arg5: memref<25x128x128xbf16, #tpu.memory_space<vmem>>, %arg6: memref<1x128xf32, #tpu.memory_space<vmem>>, %arg7: memref<200x1152xbf16, #tpu.memory_space<vmem>>, %arg8: memref<25x128x128xbf16, #tpu.memory_space<vmem>>, %arg9: memref<1x128xf32, #tpu.memory_space<vmem>>, %arg10: memref<128x128xbf16, #tpu.memory_space<vmem>>, %arg11: memref<1x128xf32, #tpu.memory_space<vmem>>, %arg12: memref<128x128xbf16, #tpu.memory_space<vmem>>, %arg13: memref<1x128xf32, #tpu.memory_space<vmem>>, %arg14: memref<8x128xf32, #tpu.memory_space<vmem>>, %arg15: memref<224x128xf32, #tpu.memory_space<vmem>>, %arg16: memref<8x144x128xbf16, #tpu.memory_space<vmem>>) attributes {dimension_semantics = [#tpu.dimension_semantics<parallel>], iteration_bounds = array<i64: 2>, scalar_prefetch = 0 : i64, scratch_operands = 2 : i64, tpu.core_type = #tpu.core_type<tc>, window_params = [{transform_indices = @transform_0, window_bounds = array<i64: 8, 784, 32>}, {pipeline_mode = #tpu.pipeline_mode<synchronous>, transform_indices = @transform_1, window_bounds = array<i64: 32, 128>}, {pipeline_mode = #tpu.pipeline_mode<synchronous>, transform_indices = @transform_2, window_bounds = array<i64: 1, 128>}, {pipeline_mode = #tpu.pipeline_mode<synchronous>, transform_indices = @transform_3, window_bounds = array<i64: 224, 784>}, {pipeline_mode = #tpu.pipeline_mode<synchronous>, transform_indices = @transform_4, window_bounds = array<i64: 25, 128, 128>}, {pipeline_mode = #tpu.pipeline_mode<synchronous>, transform_indices = @transform_5, window_bounds = array<i64: 1, 128>}, {pipeline_mode = #tpu.pipeline_mode<synchronous>, transform_indices = @transform_6, window_bounds = array<i64: 200, 1152>}, {pipeline_mode = #tpu.pipeline_mode<synchronous>, transform_indices = @transform_7, window_bounds = array<i64: 25, 128, 128>}, {pipeline_mode = #tpu.pipeline_mode<synchronous>, transform_indices = @transform_8, window_bounds = array<i64: 1, 128>}, {pipeline_mode = #tpu.pipeline_mode<synchronous>, transform_indices = @transform_9, window_bounds = array<i64: 128, 128>}, {pipeline_mode = #tpu.pipeline_mode<synchronous>, transform_indices = @transform_10, window_bounds = array<i64: 1, 128>}, {pipeline_mode = #tpu.pipeline_mode<synchronous>, transform_indices = @transform_11, window_bounds = array<i64: 128, 128>}, {pipeline_mode = #tpu.pipeline_mode<synchronous>, transform_indices = @transform_12, window_bounds = array<i64: 1, 128>}, {transform_indices = @transform_13, window_bounds = array<i64: 8, 128>}]} {
    %c0_i32 = arith.constant 0 : i32
    %c8_i32 = arith.constant 8 : i32
    %0 = arith.addi %c0_i32, %c8_i32 : i32
    %c1_i32 = arith.constant 1 : i32
    scf.for %arg17 = %c0_i32 to %0 step %c1_i32  : i32 {
      %174 = arith.index_cast %arg17 : i32 to index
      %c0_96 = arith.constant 0 : index
      %c0_97 = arith.constant 0 : index
      %175 = vector.load %arg1[%174, %c0_96, %c0_97] : memref<8x784x32xbf16, #tpu.memory_space<vmem>>, vector<1x784x32xbf16>
      %176 = vector.shape_cast %175 : vector<1x784x32xbf16> to vector<784x32xbf16>
      %c0_98 = arith.constant 0 : index
      %c0_99 = arith.constant 0 : index
      %177 = vector.load %arg2[%c0_98, %c0_99] : memref<32x128xbf16, #tpu.memory_space<vmem>>, vector<32x128xbf16>
      %cst_100 = arith.constant dense<0.000000e+00> : vector<784x128xf32>
      %178 = tpu.matmul %176, %177, %cst_100 {dimension_numbers = #tpu.dot_dimension_numbers<[1], [0], [0], [1], [0, 0, 1, 1], [], []>} : vector<784x32xbf16>, vector<32x128xbf16>, vector<784x128xf32> -> vector<784x128xf32>
      %c0_101 = arith.constant 0 : index
      %c0_102 = arith.constant 0 : index
      %179 = vector.load %arg3[%c0_101, %c0_102] : memref<1x128xf32, #tpu.memory_space<vmem>>, vector<1x128xf32>
      %180 = vector.broadcast %179 : vector<1x128xf32> to vector<784x128xf32>
      %181 = arith.addf %178, %180 : vector<784x128xf32>
      %182 = math.tanh %181 : vector<784x128xf32>
      %183 = arith.truncf %182 : vector<784x128xf32> to vector<784x128xbf16>
      %c0_103 = arith.constant 0 : index
      %c0_104 = arith.constant 0 : index
      %184 = vector.load %arg4[%c0_103, %c0_104] : memref<224x784xbf16, #tpu.memory_space<vmem>>, vector<224x784xbf16>
      %cst_105 = arith.constant dense<0.000000e+00> : vector<224x128xf32>
      %185 = tpu.matmul %184, %183, %cst_105 {dimension_numbers = #tpu.dot_dimension_numbers<[1], [0], [0], [1], [0, 0, 1, 1], [], []>} : vector<224x784xbf16>, vector<784x128xbf16>, vector<224x128xf32> -> vector<224x128xf32>
      %c0_106 = arith.constant 0 : index
      %c0_107 = arith.constant 0 : index
      %186 = vector.load %arg15[%c0_106, %c0_107] : memref<224x128xf32, #tpu.memory_space<vmem>>, vector<224x128xf32>
      tpu.vector_store %arg15[%c0_106, %c0_107], %185 {strides = array<i32>} : memref<224x128xf32, #tpu.memory_space<vmem>>, vector<224x128xf32>,
      %cst_108 = arith.constant 0.000000e+00 : f32
      %187 = vector.broadcast %cst_108 : f32 to vector<144x128xf32>
      %c0_109 = arith.constant 0 : index
      %c0_110 = arith.constant 0 : index
      %188 = vector.load %arg15[%c0_109, %c0_110] : memref<224x128xf32, #tpu.memory_space<vmem>>, vector<144x128xf32>
      %189 = arith.truncf %188 : vector<144x128xf32> to vector<144x128xbf16>
      %c0_111 = arith.constant 0 : index
      %c0_112 = arith.constant 0 : index
      %c0_113 = arith.constant 0 : index
      %190 = vector.load %arg5[%c0_111, %c0_112, %c0_113] : memref<25x128x128xbf16, #tpu.memory_space<vmem>>, vector<1x128x128xbf16>
      %191 = vector.shape_cast %190 : vector<1x128x128xbf16> to vector<128x128xbf16>
      %cst_114 = arith.constant dense<0.000000e+00> : vector<144x128xf32>
      %192 = tpu.matmul %189, %191, %cst_114 {dimension_numbers = #tpu.dot_dimension_numbers<[1], [0], [0], [1], [0, 0, 1, 1], [], []>} : vector<144x128xbf16>, vector<128x128xbf16>, vector<144x128xf32> -> vector<144x128xf32>
      %193 = arith.addf %187, %192 : vector<144x128xf32>
      %c1_115 = arith.constant 1 : index
      %c0_116 = arith.constant 0 : index
      %194 = vector.load %arg15[%c1_115, %c0_116] : memref<224x128xf32, #tpu.memory_space<vmem>>, vector<144x128xf32>
      %195 = arith.truncf %194 : vector<144x128xf32> to vector<144x128xbf16>
      %c1_117 = arith.constant 1 : index
      %c0_118 = arith.constant 0 : index
      %c0_119 = arith.constant 0 : index
      %196 = vector.load %arg5[%c1_117, %c0_118, %c0_119] : memref<25x128x128xbf16, #tpu.memory_space<vmem>>, vector<1x128x128xbf16>
      %197 = vector.shape_cast %196 : vector<1x128x128xbf16> to vector<128x128xbf16>
      %cst_120 = arith.constant dense<0.000000e+00> : vector<144x128xf32>
      %198 = tpu.matmul %195, %197, %cst_120 {dimension_numbers = #tpu.dot_dimension_numbers<[1], [0], [0], [1], [0, 0, 1, 1], [], []>} : vector<144x128xbf16>, vector<128x128xbf16>, vector<144x128xf32> -> vector<144x128xf32>
      %199 = arith.addf %193, %198 : vector<144x128xf32>
      %c2_121 = arith.constant 2 : index
      %c0_122 = arith.constant 0 : index
      %200 = vector.load %arg15[%c2_121, %c0_122] : memref<224x128xf32, #tpu.memory_space<vmem>>, vector<144x128xf32>
      %201 = arith.truncf %200 : vector<144x128xf32> to vector<144x128xbf16>
      %c2_123 = arith.constant 2 : index
      %c0_124 = arith.constant 0 : index
      %c0_125 = arith.constant 0 : index
      %202 = vector.load %arg5[%c2_123, %c0_124, %c0_125] : memref<25x128x128xbf16, #tpu.memory_space<vmem>>, vector<1x128x128xbf16>
      %203 = vector.shape_cast %202 : vector<1x128x128xbf16> to vector<128x128xbf16>
      %cst_126 = arith.constant dense<0.000000e+00> : vector<144x128xf32>
      %204 = tpu.matmul %201, %203, %cst_126 {dimension_numbers = #tpu.dot_dimension_numbers<[1], [0], [0], [1], [0, 0, 1, 1], [], []>} : vector<144x128xbf16>, vector<128x128xbf16>, vector<144x128xf32> -> vector<144x128xf32>
      %205 = arith.addf %199, %204 : vector<144x128xf32>
      %c3_127 = arith.constant 3 : index
      %c0_128 = arith.constant 0 : index
      %206 = vector.load %arg15[%c3_127, %c0_128] : memref<224x128xf32, #tpu.memory_space<vmem>>, vector<144x128xf32>
      %207 = arith.truncf %206 : vector<144x128xf32> to vector<144x128xbf16>
      %c3_129 = arith.constant 3 : index
      %c0_130 = arith.constant 0 : index
      %c0_131 = arith.constant 0 : index
      %208 = vector.load %arg5[%c3_129, %c0_130, %c0_131] : memref<25x128x128xbf16, #tpu.memory_space<vmem>>, vector<1x128x128xbf16>
      %209 = vector.shape_cast %208 : vector<1x128x128xbf16> to vector<128x128xbf16>
      %cst_132 = arith.constant dense<0.000000e+00> : vector<144x128xf32>
      %210 = tpu.matmul %207, %209, %cst_132 {dimension_numbers = #tpu.dot_dimension_numbers<[1], [0], [0], [1], [0, 0, 1, 1], [], []>} : vector<144x128xbf16>, vector<128x128xbf16>, vector<144x128xf32> -> vector<144x128xf32>
      %211 = arith.addf %205, %210 : vector<144x128xf32>
      %c4_133 = arith.constant 4 : index
      %c0_134 = arith.constant 0 : index
      %212 = vector.load %arg15[%c4_133, %c0_134] : memref<224x128xf32, #tpu.memory_space<vmem>>, vector<144x128xf32>
      %213 = arith.truncf %212 : vector<144x128xf32> to vector<144x128xbf16>
      %c4_135 = arith.constant 4 : index
      %c0_136 = arith.constant 0 : index
      %c0_137 = arith.constant 0 : index
      %214 = vector.load %arg5[%c4_135, %c0_136, %c0_137] : memref<25x128x128xbf16, #tpu.memory_space<vmem>>, vector<1x128x128xbf16>
      %215 = vector.shape_cast %214 : vector<1x128x128xbf16> to vector<128x128xbf16>
      %cst_138 = arith.constant dense<0.000000e+00> : vector<144x128xf32>
      %216 = tpu.matmul %213, %215, %cst_138 {dimension_numbers = #tpu.dot_dimension_numbers<[1], [0], [0], [1], [0, 0, 1, 1], [], []>} : vector<144x128xbf16>, vector<128x128xbf16>, vector<144x128xf32> -> vector<144x128xf32>
      %217 = arith.addf %211, %216 : vector<144x128xf32>
      %c14_139 = arith.constant 14 : index
      %c0_140 = arith.constant 0 : index
      %218 = vector.load %arg15[%c14_139, %c0_140] : memref<224x128xf32, #tpu.memory_space<vmem>>, vector<144x128xf32>
      %219 = arith.truncf %218 : vector<144x128xf32> to vector<144x128xbf16>
      %c5_141 = arith.constant 5 : index
      %c0_142 = arith.constant 0 : index
      %c0_143 = arith.constant 0 : index
      %220 = vector.load %arg5[%c5_141, %c0_142, %c0_143] : memref<25x128x128xbf16, #tpu.memory_space<vmem>>, vector<1x128x128xbf16>
      %221 = vector.shape_cast %220 : vector<1x128x128xbf16> to vector<128x128xbf16>
      %cst_144 = arith.constant dense<0.000000e+00> : vector<144x128xf32>
      %222 = tpu.matmul %219, %221, %cst_144 {dimension_numbers = #tpu.dot_dimension_numbers<[1], [0], [0], [1], [0, 0, 1, 1], [], []>} : vector<144x128xbf16>, vector<128x128xbf16>, vector<144x128xf32> -> vector<144x128xf32>
      %223 = arith.addf %217, %222 : vector<144x128xf32>
      %c15_145 = arith.constant 15 : index
      %c0_146 = arith.constant 0 : index
      %224 = vector.load %arg15[%c15_145, %c0_146] : memref<224x128xf32, #tpu.memory_space<vmem>>, vector<144x128xf32>
      %225 = arith.truncf %224 : vector<144x128xf32> to vector<144x128xbf16>
      %c6_147 = arith.constant 6 : index
      %c0_148 = arith.constant 0 : index
      %c0_149 = arith.constant 0 : index
      %226 = vector.load %arg5[%c6_147, %c0_148, %c0_149] : memref<25x128x128xbf16, #tpu.memory_space<vmem>>, vector<1x128x128xbf16>
      %227 = vector.shape_cast %226 : vector<1x128x128xbf16> to vector<128x128xbf16>
      %cst_150 = arith.constant dense<0.000000e+00> : vector<144x128xf32>
      %228 = tpu.matmul %225, %227, %cst_150 {dimension_numbers = #tpu.dot_dimension_numbers<[1], [0], [0], [1], [0, 0, 1, 1], [], []>} : vector<144x128xbf16>, vector<128x128xbf16>, vector<144x128xf32> -> vector<144x128xf32>
      %229 = arith.addf %223, %228 : vector<144x128xf32>
      %c16_151 = arith.constant 16 : index
      %c0_152 = arith.constant 0 : index
      %230 = vector.load %arg15[%c16_151, %c0_152] : memref<224x128xf32, #tpu.memory_space<vmem>>, vector<144x128xf32>
      %231 = arith.truncf %230 : vector<144x128xf32> to vector<144x128xbf16>
      %c7_153 = arith.constant 7 : index
      %c0_154 = arith.constant 0 : index
      %c0_155 = arith.constant 0 : index
      %232 = vector.load %arg5[%c7_153, %c0_154, %c0_155] : memref<25x128x128xbf16, #tpu.memory_space<vmem>>, vector<1x128x128xbf16>
      %233 = vector.shape_cast %232 : vector<1x128x128xbf16> to vector<128x128xbf16>
      %cst_156 = arith.constant dense<0.000000e+00> : vector<144x128xf32>
      %234 = tpu.matmul %231, %233, %cst_156 {dimension_numbers = #tpu.dot_dimension_numbers<[1], [0], [0], [1], [0, 0, 1, 1], [], []>} : vector<144x128xbf16>, vector<128x128xbf16>, vector<144x128xf32> -> vector<144x128xf32>
      %235 = arith.addf %229, %234 : vector<144x128xf32>
      %c17_157 = arith.constant 17 : index
      %c0_158 = arith.constant 0 : index
      %236 = vector.load %arg15[%c17_157, %c0_158] : memref<224x128xf32, #tpu.memory_space<vmem>>, vector<144x128xf32>
      %237 = arith.truncf %236 : vector<144x128xf32> to vector<144x128xbf16>
      %c8_159 = arith.constant 8 : index
      %c0_160 = arith.constant 0 : index
      %c0_161 = arith.constant 0 : index
      %238 = vector.load %arg5[%c8_159, %c0_160, %c0_161] : memref<25x128x128xbf16, #tpu.memory_space<vmem>>, vector<1x128x128xbf16>
      %239 = vector.shape_cast %238 : vector<1x128x128xbf16> to vector<128x128xbf16>
      %cst_162 = arith.constant dense<0.000000e+00> : vector<144x128xf32>
      %240 = tpu.matmul %237, %239, %cst_162 {dimension_numbers = #tpu.dot_dimension_numbers<[1], [0], [0], [1], [0, 0, 1, 1], [], []>} : vector<144x128xbf16>, vector<128x128xbf16>, vector<144x128xf32> -> vector<144x128xf32>
      %241 = arith.addf %235, %240 : vector<144x128xf32>
      %c18_163 = arith.constant 18 : index
      %c0_164 = arith.constant 0 : index
      %242 = vector.load %arg15[%c18_163, %c0_164] : memref<224x128xf32, #tpu.memory_space<vmem>>, vector<144x128xf32>
      %243 = arith.truncf %242 : vector<144x128xf32> to vector<144x128xbf16>
      %c9_165 = arith.constant 9 : index
      %c0_166 = arith.constant 0 : index
      %c0_167 = arith.constant 0 : index
      %244 = vector.load %arg5[%c9_165, %c0_166, %c0_167] : memref<25x128x128xbf16, #tpu.memory_space<vmem>>, vector<1x128x128xbf16>
      %245 = vector.shape_cast %244 : vector<1x128x128xbf16> to vector<128x128xbf16>
      %cst_168 = arith.constant dense<0.000000e+00> : vector<144x128xf32>
      %246 = tpu.matmul %243, %245, %cst_168 {dimension_numbers = #tpu.dot_dimension_numbers<[1], [0], [0], [1], [0, 0, 1, 1], [], []>} : vector<144x128xbf16>, vector<128x128xbf16>, vector<144x128xf32> -> vector<144x128xf32>
      %247 = arith.addf %241, %246 : vector<144x128xf32>
      %c28 = arith.constant 28 : index
      %c0_169 = arith.constant 0 : index
      %248 = vector.load %arg15[%c28, %c0_169] : memref<224x128xf32, #tpu.memory_space<vmem>>, vector<144x128xf32>
      %249 = arith.truncf %248 : vector<144x128xf32> to vector<144x128xbf16>
      %c10_170 = arith.constant 10 : index
      %c0_171 = arith.constant 0 : index
      %c0_172 = arith.constant 0 : index
      %250 = vector.load %arg5[%c10_170, %c0_171, %c0_172] : memref<25x128x128xbf16, #tpu.memory_space<vmem>>, vector<1x128x128xbf16>
      %251 = vector.shape_cast %250 : vector<1x128x128xbf16> to vector<128x128xbf16>
      %cst_173 = arith.constant dense<0.000000e+00> : vector<144x128xf32>
      %252 = tpu.matmul %249, %251, %cst_173 {dimension_numbers = #tpu.dot_dimension_numbers<[1], [0], [0], [1], [0, 0, 1, 1], [], []>} : vector<144x128xbf16>, vector<128x128xbf16>, vector<144x128xf32> -> vector<144x128xf32>
      %253 = arith.addf %247, %252 : vector<144x128xf32>
      %c29 = arith.constant 29 : index
      %c0_174 = arith.constant 0 : index
      %254 = vector.load %arg15[%c29, %c0_174] : memref<224x128xf32, #tpu.memory_space<vmem>>, vector<144x128xf32>
      %255 = arith.truncf %254 : vector<144x128xf32> to vector<144x128xbf16>
      %c11_175 = arith.constant 11 : index
      %c0_176 = arith.constant 0 : index
      %c0_177 = arith.constant 0 : index
      %256 = vector.load %arg5[%c11_175, %c0_176, %c0_177] : memref<25x128x128xbf16, #tpu.memory_space<vmem>>, vector<1x128x128xbf16>
      %257 = vector.shape_cast %256 : vector<1x128x128xbf16> to vector<128x128xbf16>
      %cst_178 = arith.constant dense<0.000000e+00> : vector<144x128xf32>
      %258 = tpu.matmul %255, %257, %cst_178 {dimension_numbers = #tpu.dot_dimension_numbers<[1], [0], [0], [1], [0, 0, 1, 1], [], []>} : vector<144x128xbf16>, vector<128x128xbf16>, vector<144x128xf32> -> vector<144x128xf32>
      %259 = arith.addf %253, %258 : vector<144x128xf32>
      %c30 = arith.constant 30 : index
      %c0_179 = arith.constant 0 : index
      %260 = vector.load %arg15[%c30, %c0_179] : memref<224x128xf32, #tpu.memory_space<vmem>>, vector<144x128xf32>
      %261 = arith.truncf %260 : vector<144x128xf32> to vector<144x128xbf16>
      %c12_180 = arith.constant 12 : index
      %c0_181 = arith.constant 0 : index
      %c0_182 = arith.constant 0 : index
      %262 = vector.load %arg5[%c12_180, %c0_181, %c0_182] : memref<25x128x128xbf16, #tpu.memory_space<vmem>>, vector<1x128x128xbf16>
      %263 = vector.shape_cast %262 : vector<1x128x128xbf16> to vector<128x128xbf16>
      %cst_183 = arith.constant dense<0.000000e+00> : vector<144x128xf32>
      %264 = tpu.matmul %261, %263, %cst_183 {dimension_numbers = #tpu.dot_dimension_numbers<[1], [0], [0], [1], [0, 0, 1, 1], [], []>} : vector<144x128xbf16>, vector<128x128xbf16>, vector<144x128xf32> -> vector<144x128xf32>
      %265 = arith.addf %259, %264 : vector<144x128xf32>
      %c31 = arith.constant 31 : index
      %c0_184 = arith.constant 0 : index
      %266 = vector.load %arg15[%c31, %c0_184] : memref<224x128xf32, #tpu.memory_space<vmem>>, vector<144x128xf32>
      %267 = arith.truncf %266 : vector<144x128xf32> to vector<144x128xbf16>
      %c13_185 = arith.constant 13 : index
      %c0_186 = arith.constant 0 : index
      %c0_187 = arith.constant 0 : index
      %268 = vector.load %arg5[%c13_185, %c0_186, %c0_187] : memref<25x128x128xbf16, #tpu.memory_space<vmem>>, vector<1x128x128xbf16>
      %269 = vector.shape_cast %268 : vector<1x128x128xbf16> to vector<128x128xbf16>
      %cst_188 = arith.constant dense<0.000000e+00> : vector<144x128xf32>
      %270 = tpu.matmul %267, %269, %cst_188 {dimension_numbers = #tpu.dot_dimension_numbers<[1], [0], [0], [1], [0, 0, 1, 1], [], []>} : vector<144x128xbf16>, vector<128x128xbf16>, vector<144x128xf32> -> vector<144x128xf32>
      %271 = arith.addf %265, %270 : vector<144x128xf32>
      %c32 = arith.constant 32 : index
      %c0_189 = arith.constant 0 : index
      %272 = vector.load %arg15[%c32, %c0_189] : memref<224x128xf32, #tpu.memory_space<vmem>>, vector<144x128xf32>
      %273 = arith.truncf %272 : vector<144x128xf32> to vector<144x128xbf16>
      %c14_190 = arith.constant 14 : index
      %c0_191 = arith.constant 0 : index
      %c0_192 = arith.constant 0 : index
      %274 = vector.load %arg5[%c14_190, %c0_191, %c0_192] : memref<25x128x128xbf16, #tpu.memory_space<vmem>>, vector<1x128x128xbf16>
      %275 = vector.shape_cast %274 : vector<1x128x128xbf16> to vector<128x128xbf16>
      %cst_193 = arith.constant dense<0.000000e+00> : vector<144x128xf32>
      %276 = tpu.matmul %273, %275, %cst_193 {dimension_numbers = #tpu.dot_dimension_numbers<[1], [0], [0], [1], [0, 0, 1, 1], [], []>} : vector<144x128xbf16>, vector<128x128xbf16>, vector<144x128xf32> -> vector<144x128xf32>
      %277 = arith.addf %271, %276 : vector<144x128xf32>
      %c42 = arith.constant 42 : index
      %c0_194 = arith.constant 0 : index
      %278 = vector.load %arg15[%c42, %c0_194] : memref<224x128xf32, #tpu.memory_space<vmem>>, vector<144x128xf32>
      %279 = arith.truncf %278 : vector<144x128xf32> to vector<144x128xbf16>
      %c15_195 = arith.constant 15 : index
      %c0_196 = arith.constant 0 : index
      %c0_197 = arith.constant 0 : index
      %280 = vector.load %arg5[%c15_195, %c0_196, %c0_197] : memref<25x128x128xbf16, #tpu.memory_space<vmem>>, vector<1x128x128xbf16>
      %281 = vector.shape_cast %280 : vector<1x128x128xbf16> to vector<128x128xbf16>
      %cst_198 = arith.constant dense<0.000000e+00> : vector<144x128xf32>
      %282 = tpu.matmul %279, %281, %cst_198 {dimension_numbers = #tpu.dot_dimension_numbers<[1], [0], [0], [1], [0, 0, 1, 1], [], []>} : vector<144x128xbf16>, vector<128x128xbf16>, vector<144x128xf32> -> vector<144x128xf32>
      %283 = arith.addf %277, %282 : vector<144x128xf32>
      %c43 = arith.constant 43 : index
      %c0_199 = arith.constant 0 : index
      %284 = vector.load %arg15[%c43, %c0_199] : memref<224x128xf32, #tpu.memory_space<vmem>>, vector<144x128xf32>
      %285 = arith.truncf %284 : vector<144x128xf32> to vector<144x128xbf16>
      %c16_200 = arith.constant 16 : index
      %c0_201 = arith.constant 0 : index
      %c0_202 = arith.constant 0 : index
      %286 = vector.load %arg5[%c16_200, %c0_201, %c0_202] : memref<25x128x128xbf16, #tpu.memory_space<vmem>>, vector<1x128x128xbf16>
      %287 = vector.shape_cast %286 : vector<1x128x128xbf16> to vector<128x128xbf16>
      %cst_203 = arith.constant dense<0.000000e+00> : vector<144x128xf32>
      %288 = tpu.matmul %285, %287, %cst_203 {dimension_numbers = #tpu.dot_dimension_numbers<[1], [0], [0], [1], [0, 0, 1, 1], [], []>} : vector<144x128xbf16>, vector<128x128xbf16>, vector<144x128xf32> -> vector<144x128xf32>
      %289 = arith.addf %283, %288 : vector<144x128xf32>
      %c44 = arith.constant 44 : index
      %c0_204 = arith.constant 0 : index
      %290 = vector.load %arg15[%c44, %c0_204] : memref<224x128xf32, #tpu.memory_space<vmem>>, vector<144x128xf32>
      %291 = arith.truncf %290 : vector<144x128xf32> to vector<144x128xbf16>
      %c17_205 = arith.constant 17 : index
      %c0_206 = arith.constant 0 : index
      %c0_207 = arith.constant 0 : index
      %292 = vector.load %arg5[%c17_205, %c0_206, %c0_207] : memref<25x128x128xbf16, #tpu.memory_space<vmem>>, vector<1x128x128xbf16>
      %293 = vector.shape_cast %292 : vector<1x128x128xbf16> to vector<128x128xbf16>
      %cst_208 = arith.constant dense<0.000000e+00> : vector<144x128xf32>
      %294 = tpu.matmul %291, %293, %cst_208 {dimension_numbers = #tpu.dot_dimension_numbers<[1], [0], [0], [1], [0, 0, 1, 1], [], []>} : vector<144x128xbf16>, vector<128x128xbf16>, vector<144x128xf32> -> vector<144x128xf32>
      %295 = arith.addf %289, %294 : vector<144x128xf32>
      %c45 = arith.constant 45 : index
      %c0_209 = arith.constant 0 : index
      %296 = vector.load %arg15[%c45, %c0_209] : memref<224x128xf32, #tpu.memory_space<vmem>>, vector<144x128xf32>
      %297 = arith.truncf %296 : vector<144x128xf32> to vector<144x128xbf16>
      %c18_210 = arith.constant 18 : index
      %c0_211 = arith.constant 0 : index
      %c0_212 = arith.constant 0 : index
      %298 = vector.load %arg5[%c18_210, %c0_211, %c0_212] : memref<25x128x128xbf16, #tpu.memory_space<vmem>>, vector<1x128x128xbf16>
      %299 = vector.shape_cast %298 : vector<1x128x128xbf16> to vector<128x128xbf16>
      %cst_213 = arith.constant dense<0.000000e+00> : vector<144x128xf32>
      %300 = tpu.matmul %297, %299, %cst_213 {dimension_numbers = #tpu.dot_dimension_numbers<[1], [0], [0], [1], [0, 0, 1, 1], [], []>} : vector<144x128xbf16>, vector<128x128xbf16>, vector<144x128xf32> -> vector<144x128xf32>
      %301 = arith.addf %295, %300 : vector<144x128xf32>
      %c46 = arith.constant 46 : index
      %c0_214 = arith.constant 0 : index
      %302 = vector.load %arg15[%c46, %c0_214] : memref<224x128xf32, #tpu.memory_space<vmem>>, vector<144x128xf32>
      %303 = arith.truncf %302 : vector<144x128xf32> to vector<144x128xbf16>
      %c19_215 = arith.constant 19 : index
      %c0_216 = arith.constant 0 : index
      %c0_217 = arith.constant 0 : index
      %304 = vector.load %arg5[%c19_215, %c0_216, %c0_217] : memref<25x128x128xbf16, #tpu.memory_space<vmem>>, vector<1x128x128xbf16>
      %305 = vector.shape_cast %304 : vector<1x128x128xbf16> to vector<128x128xbf16>
      %cst_218 = arith.constant dense<0.000000e+00> : vector<144x128xf32>
      %306 = tpu.matmul %303, %305, %cst_218 {dimension_numbers = #tpu.dot_dimension_numbers<[1], [0], [0], [1], [0, 0, 1, 1], [], []>} : vector<144x128xbf16>, vector<128x128xbf16>, vector<144x128xf32> -> vector<144x128xf32>
      %307 = arith.addf %301, %306 : vector<144x128xf32>
      %c56 = arith.constant 56 : index
      %c0_219 = arith.constant 0 : index
      %308 = vector.load %arg15[%c56, %c0_219] : memref<224x128xf32, #tpu.memory_space<vmem>>, vector<144x128xf32>
      %309 = arith.truncf %308 : vector<144x128xf32> to vector<144x128xbf16>
      %c20_220 = arith.constant 20 : index
      %c0_221 = arith.constant 0 : index
      %c0_222 = arith.constant 0 : index
      %310 = vector.load %arg5[%c20_220, %c0_221, %c0_222] : memref<25x128x128xbf16, #tpu.memory_space<vmem>>, vector<1x128x128xbf16>
      %311 = vector.shape_cast %310 : vector<1x128x128xbf16> to vector<128x128xbf16>
      %cst_223 = arith.constant dense<0.000000e+00> : vector<144x128xf32>
      %312 = tpu.matmul %309, %311, %cst_223 {dimension_numbers = #tpu.dot_dimension_numbers<[1], [0], [0], [1], [0, 0, 1, 1], [], []>} : vector<144x128xbf16>, vector<128x128xbf16>, vector<144x128xf32> -> vector<144x128xf32>
      %313 = arith.addf %307, %312 : vector<144x128xf32>
      %c57 = arith.constant 57 : index
      %c0_224 = arith.constant 0 : index
      %314 = vector.load %arg15[%c57, %c0_224] : memref<224x128xf32, #tpu.memory_space<vmem>>, vector<144x128xf32>
      %315 = arith.truncf %314 : vector<144x128xf32> to vector<144x128xbf16>
      %c21_225 = arith.constant 21 : index
      %c0_226 = arith.constant 0 : index
      %c0_227 = arith.constant 0 : index
      %316 = vector.load %arg5[%c21_225, %c0_226, %c0_227] : memref<25x128x128xbf16, #tpu.memory_space<vmem>>, vector<1x128x128xbf16>
      %317 = vector.shape_cast %316 : vector<1x128x128xbf16> to vector<128x128xbf16>
      %cst_228 = arith.constant dense<0.000000e+00> : vector<144x128xf32>
      %318 = tpu.matmul %315, %317, %cst_228 {dimension_numbers = #tpu.dot_dimension_numbers<[1], [0], [0], [1], [0, 0, 1, 1], [], []>} : vector<144x128xbf16>, vector<128x128xbf16>, vector<144x128xf32> -> vector<144x128xf32>
      %319 = arith.addf %313, %318 : vector<144x128xf32>
      %c58 = arith.constant 58 : index
      %c0_229 = arith.constant 0 : index
      %320 = vector.load %arg15[%c58, %c0_229] : memref<224x128xf32, #tpu.memory_space<vmem>>, vector<144x128xf32>
      %321 = arith.truncf %320 : vector<144x128xf32> to vector<144x128xbf16>
      %c22_230 = arith.constant 22 : index
      %c0_231 = arith.constant 0 : index
      %c0_232 = arith.constant 0 : index
      %322 = vector.load %arg5[%c22_230, %c0_231, %c0_232] : memref<25x128x128xbf16, #tpu.memory_space<vmem>>, vector<1x128x128xbf16>
      %323 = vector.shape_cast %322 : vector<1x128x128xbf16> to vector<128x128xbf16>
      %cst_233 = arith.constant dense<0.000000e+00> : vector<144x128xf32>
      %324 = tpu.matmul %321, %323, %cst_233 {dimension_numbers = #tpu.dot_dimension_numbers<[1], [0], [0], [1], [0, 0, 1, 1], [], []>} : vector<144x128xbf16>, vector<128x128xbf16>, vector<144x128xf32> -> vector<144x128xf32>
      %325 = arith.addf %319, %324 : vector<144x128xf32>
      %c59 = arith.constant 59 : index
      %c0_234 = arith.constant 0 : index
      %326 = vector.load %arg15[%c59, %c0_234] : memref<224x128xf32, #tpu.memory_space<vmem>>, vector<144x128xf32>
      %327 = arith.truncf %326 : vector<144x128xf32> to vector<144x128xbf16>
      %c23_235 = arith.constant 23 : index
      %c0_236 = arith.constant 0 : index
      %c0_237 = arith.constant 0 : index
      %328 = vector.load %arg5[%c23_235, %c0_236, %c0_237] : memref<25x128x128xbf16, #tpu.memory_space<vmem>>, vector<1x128x128xbf16>
      %329 = vector.shape_cast %328 : vector<1x128x128xbf16> to vector<128x128xbf16>
      %cst_238 = arith.constant dense<0.000000e+00> : vector<144x128xf32>
      %330 = tpu.matmul %327, %329, %cst_238 {dimension_numbers = #tpu.dot_dimension_numbers<[1], [0], [0], [1], [0, 0, 1, 1], [], []>} : vector<144x128xbf16>, vector<128x128xbf16>, vector<144x128xf32> -> vector<144x128xf32>
      %331 = arith.addf %325, %330 : vector<144x128xf32>
      %c60 = arith.constant 60 : index
      %c0_239 = arith.constant 0 : index
      %332 = vector.load %arg15[%c60, %c0_239] : memref<224x128xf32, #tpu.memory_space<vmem>>, vector<144x128xf32>
      %333 = arith.truncf %332 : vector<144x128xf32> to vector<144x128xbf16>
      %c24_240 = arith.constant 24 : index
      %c0_241 = arith.constant 0 : index
      %c0_242 = arith.constant 0 : index
      %334 = vector.load %arg5[%c24_240, %c0_241, %c0_242] : memref<25x128x128xbf16, #tpu.memory_space<vmem>>, vector<1x128x128xbf16>
      %335 = vector.shape_cast %334 : vector<1x128x128xbf16> to vector<128x128xbf16>
      %cst_243 = arith.constant dense<0.000000e+00> : vector<144x128xf32>
      %336 = tpu.matmul %333, %335, %cst_243 {dimension_numbers = #tpu.dot_dimension_numbers<[1], [0], [0], [1], [0, 0, 1, 1], [], []>} : vector<144x128xbf16>, vector<128x128xbf16>, vector<144x128xf32> -> vector<144x128xf32>
      %337 = arith.addf %331, %336 : vector<144x128xf32>
      %c0_244 = arith.constant 0 : index
      %c0_245 = arith.constant 0 : index
      %338 = vector.load %arg6[%c0_244, %c0_245] : memref<1x128xf32, #tpu.memory_space<vmem>>, vector<1x128xf32>
      %339 = vector.broadcast %338 : vector<1x128xf32> to vector<144x128xf32>
      %340 = arith.addf %337, %339 : vector<144x128xf32>
      %341 = math.tanh %340 : vector<144x128xf32>
      %342 = arith.truncf %341 : vector<144x128xf32> to vector<144x128xbf16>
      %343 = arith.index_cast %arg17 : i32 to index
      %c0_246 = arith.constant 0 : index
      %c0_247 = arith.constant 0 : index
      %344 = vector.load %arg16[%343, %c0_246, %c0_247] : memref<8x144x128xbf16, #tpu.memory_space<vmem>>, vector<1x144x128xbf16>
      %345 = vector.shape_cast %344 : vector<1x144x128xbf16> to vector<144x128xbf16>
      %346 = vector.shape_cast %342 : vector<144x128xbf16> to vector<1x144x128xbf16>
      tpu.vector_store %arg16[%343, %c0_246, %c0_247], %346 {strides = array<i32>} : memref<8x144x128xbf16, #tpu.memory_space<vmem>>, vector<1x144x128xbf16>,
    }
    %c8_i32_0 = arith.constant 8 : i32
    %c0 = arith.constant 0 : index
    %c0_1 = arith.constant 0 : index
    %c0_2 = arith.constant 0 : index
    %1 = vector.load %arg16[%c0, %c0_1, %c0_2] : memref<8x144x128xbf16, #tpu.memory_space<vmem>>, vector<8x144x128xbf16>
    %2 = vector.shape_cast %1 : vector<8x144x128xbf16> to vector<1152x128xbf16>
    %c0_3 = arith.constant 0 : index
    %c0_4 = arith.constant 0 : index
    %3 = vector.load %arg7[%c0_3, %c0_4] : memref<200x1152xbf16, #tpu.memory_space<vmem>>, vector<200x1152xbf16>
    %cst = arith.constant dense<0.000000e+00> : vector<200x128xf32>
    %4 = tpu.matmul %3, %2, %cst {dimension_numbers = #tpu.dot_dimension_numbers<[1], [0], [0], [1], [0, 0, 1, 1], [], []>} : vector<200x1152xbf16>, vector<1152x128xbf16>, vector<200x128xf32> -> vector<200x128xf32>
    %cst_5 = arith.constant 0.000000e+00 : f32
    %5 = vector.broadcast %cst_5 : f32 to vector<8x128xf32>
    %6 = vector.extract_strided_slice %4 {offsets = [0, 0], sizes = [8, 128], strides = [1, 1]} : vector<200x128xf32> to vector<8x128xf32>
    %7 = arith.truncf %6 : vector<8x128xf32> to vector<8x128xbf16>
    %c0_6 = arith.constant 0 : index
    %c0_7 = arith.constant 0 : index
    %c0_8 = arith.constant 0 : index
    %8 = vector.load %arg8[%c0_6, %c0_7, %c0_8] : memref<25x128x128xbf16, #tpu.memory_space<vmem>>, vector<1x128x128xbf16>
    %9 = vector.shape_cast %8 : vector<1x128x128xbf16> to vector<128x128xbf16>
    %cst_9 = arith.constant dense<0.000000e+00> : vector<8x128xf32>
    %10 = tpu.matmul %7, %9, %cst_9 {dimension_numbers = #tpu.dot_dimension_numbers<[1], [0], [0], [1], [0, 0, 1, 1], [], []>} : vector<8x128xbf16>, vector<128x128xbf16>, vector<8x128xf32> -> vector<8x128xf32>
    %11 = arith.addf %5, %10 : vector<8x128xf32>
    %12 = vector.extract_strided_slice %4 {offsets = [8, 0], sizes = [8, 128], strides = [1, 1]} : vector<200x128xf32> to vector<8x128xf32>
    %13 = arith.truncf %12 : vector<8x128xf32> to vector<8x128xbf16>
    %c1 = arith.constant 1 : index
    %c0_10 = arith.constant 0 : index
    %c0_11 = arith.constant 0 : index
    %14 = vector.load %arg8[%c1, %c0_10, %c0_11] : memref<25x128x128xbf16, #tpu.memory_space<vmem>>, vector<1x128x128xbf16>
    %15 = vector.shape_cast %14 : vector<1x128x128xbf16> to vector<128x128xbf16>
    %cst_12 = arith.constant dense<0.000000e+00> : vector<8x128xf32>
    %16 = tpu.matmul %13, %15, %cst_12 {dimension_numbers = #tpu.dot_dimension_numbers<[1], [0], [0], [1], [0, 0, 1, 1], [], []>} : vector<8x128xbf16>, vector<128x128xbf16>, vector<8x128xf32> -> vector<8x128xf32>
    %17 = arith.addf %11, %16 : vector<8x128xf32>
    %18 = vector.extract_strided_slice %4 {offsets = [16, 0], sizes = [8, 128], strides = [1, 1]} : vector<200x128xf32> to vector<8x128xf32>
    %19 = arith.truncf %18 : vector<8x128xf32> to vector<8x128xbf16>
    %c2 = arith.constant 2 : index
    %c0_13 = arith.constant 0 : index
    %c0_14 = arith.constant 0 : index
    %20 = vector.load %arg8[%c2, %c0_13, %c0_14] : memref<25x128x128xbf16, #tpu.memory_space<vmem>>, vector<1x128x128xbf16>
    %21 = vector.shape_cast %20 : vector<1x128x128xbf16> to vector<128x128xbf16>
    %cst_15 = arith.constant dense<0.000000e+00> : vector<8x128xf32>
    %22 = tpu.matmul %19, %21, %cst_15 {dimension_numbers = #tpu.dot_dimension_numbers<[1], [0], [0], [1], [0, 0, 1, 1], [], []>} : vector<8x128xbf16>, vector<128x128xbf16>, vector<8x128xf32> -> vector<8x128xf32>
    %23 = arith.addf %17, %22 : vector<8x128xf32>
    %24 = vector.extract_strided_slice %4 {offsets = [24, 0], sizes = [8, 128], strides = [1, 1]} : vector<200x128xf32> to vector<8x128xf32>
    %25 = arith.truncf %24 : vector<8x128xf32> to vector<8x128xbf16>
    %c3 = arith.constant 3 : index
    %c0_16 = arith.constant 0 : index
    %c0_17 = arith.constant 0 : index
    %26 = vector.load %arg8[%c3, %c0_16, %c0_17] : memref<25x128x128xbf16, #tpu.memory_space<vmem>>, vector<1x128x128xbf16>
    %27 = vector.shape_cast %26 : vector<1x128x128xbf16> to vector<128x128xbf16>
    %cst_18 = arith.constant dense<0.000000e+00> : vector<8x128xf32>
    %28 = tpu.matmul %25, %27, %cst_18 {dimension_numbers = #tpu.dot_dimension_numbers<[1], [0], [0], [1], [0, 0, 1, 1], [], []>} : vector<8x128xbf16>, vector<128x128xbf16>, vector<8x128xf32> -> vector<8x128xf32>
    %29 = arith.addf %23, %28 : vector<8x128xf32>
    %30 = vector.extract_strided_slice %4 {offsets = [32, 0], sizes = [8, 128], strides = [1, 1]} : vector<200x128xf32> to vector<8x128xf32>
    %31 = arith.truncf %30 : vector<8x128xf32> to vector<8x128xbf16>
    %c4 = arith.constant 4 : index
    %c0_19 = arith.constant 0 : index
    %c0_20 = arith.constant 0 : index
    %32 = vector.load %arg8[%c4, %c0_19, %c0_20] : memref<25x128x128xbf16, #tpu.memory_space<vmem>>, vector<1x128x128xbf16>
    %33 = vector.shape_cast %32 : vector<1x128x128xbf16> to vector<128x128xbf16>
    %cst_21 = arith.constant dense<0.000000e+00> : vector<8x128xf32>
    %34 = tpu.matmul %31, %33, %cst_21 {dimension_numbers = #tpu.dot_dimension_numbers<[1], [0], [0], [1], [0, 0, 1, 1], [], []>} : vector<8x128xbf16>, vector<128x128xbf16>, vector<8x128xf32> -> vector<8x128xf32>
    %35 = arith.addf %29, %34 : vector<8x128xf32>
    %36 = vector.extract_strided_slice %4 {offsets = [40, 0], sizes = [8, 128], strides = [1, 1]} : vector<200x128xf32> to vector<8x128xf32>
    %37 = arith.truncf %36 : vector<8x128xf32> to vector<8x128xbf16>
    %c5 = arith.constant 5 : index
    %c0_22 = arith.constant 0 : index
    %c0_23 = arith.constant 0 : index
    %38 = vector.load %arg8[%c5, %c0_22, %c0_23] : memref<25x128x128xbf16, #tpu.memory_space<vmem>>, vector<1x128x128xbf16>
    %39 = vector.shape_cast %38 : vector<1x128x128xbf16> to vector<128x128xbf16>
    %cst_24 = arith.constant dense<0.000000e+00> : vector<8x128xf32>
    %40 = tpu.matmul %37, %39, %cst_24 {dimension_numbers = #tpu.dot_dimension_numbers<[1], [0], [0], [1], [0, 0, 1, 1], [], []>} : vector<8x128xbf16>, vector<128x128xbf16>, vector<8x128xf32> -> vector<8x128xf32>
    %41 = arith.addf %35, %40 : vector<8x128xf32>
    %42 = vector.extract_strided_slice %4 {offsets = [48, 0], sizes = [8, 128], strides = [1, 1]} : vector<200x128xf32> to vector<8x128xf32>
    %43 = arith.truncf %42 : vector<8x128xf32> to vector<8x128xbf16>
    %c6 = arith.constant 6 : index
    %c0_25 = arith.constant 0 : index
    %c0_26 = arith.constant 0 : index
    %44 = vector.load %arg8[%c6, %c0_25, %c0_26] : memref<25x128x128xbf16, #tpu.memory_space<vmem>>, vector<1x128x128xbf16>
    %45 = vector.shape_cast %44 : vector<1x128x128xbf16> to vector<128x128xbf16>
    %cst_27 = arith.constant dense<0.000000e+00> : vector<8x128xf32>
    %46 = tpu.matmul %43, %45, %cst_27 {dimension_numbers = #tpu.dot_dimension_numbers<[1], [0], [0], [1], [0, 0, 1, 1], [], []>} : vector<8x128xbf16>, vector<128x128xbf16>, vector<8x128xf32> -> vector<8x128xf32>
    %47 = arith.addf %41, %46 : vector<8x128xf32>
    %48 = vector.extract_strided_slice %4 {offsets = [56, 0], sizes = [8, 128], strides = [1, 1]} : vector<200x128xf32> to vector<8x128xf32>
    %49 = arith.truncf %48 : vector<8x128xf32> to vector<8x128xbf16>
    %c7 = arith.constant 7 : index
    %c0_28 = arith.constant 0 : index
    %c0_29 = arith.constant 0 : index
    %50 = vector.load %arg8[%c7, %c0_28, %c0_29] : memref<25x128x128xbf16, #tpu.memory_space<vmem>>, vector<1x128x128xbf16>
    %51 = vector.shape_cast %50 : vector<1x128x128xbf16> to vector<128x128xbf16>
    %cst_30 = arith.constant dense<0.000000e+00> : vector<8x128xf32>
    %52 = tpu.matmul %49, %51, %cst_30 {dimension_numbers = #tpu.dot_dimension_numbers<[1], [0], [0], [1], [0, 0, 1, 1], [], []>} : vector<8x128xbf16>, vector<128x128xbf16>, vector<8x128xf32> -> vector<8x128xf32>
    %53 = arith.addf %47, %52 : vector<8x128xf32>
    %54 = vector.extract_strided_slice %4 {offsets = [64, 0], sizes = [8, 128], strides = [1, 1]} : vector<200x128xf32> to vector<8x128xf32>
    %55 = arith.truncf %54 : vector<8x128xf32> to vector<8x128xbf16>
    %c8 = arith.constant 8 : index
    %c0_31 = arith.constant 0 : index
    %c0_32 = arith.constant 0 : index
    %56 = vector.load %arg8[%c8, %c0_31, %c0_32] : memref<25x128x128xbf16, #tpu.memory_space<vmem>>, vector<1x128x128xbf16>
    %57 = vector.shape_cast %56 : vector<1x128x128xbf16> to vector<128x128xbf16>
    %cst_33 = arith.constant dense<0.000000e+00> : vector<8x128xf32>
    %58 = tpu.matmul %55, %57, %cst_33 {dimension_numbers = #tpu.dot_dimension_numbers<[1], [0], [0], [1], [0, 0, 1, 1], [], []>} : vector<8x128xbf16>, vector<128x128xbf16>, vector<8x128xf32> -> vector<8x128xf32>
    %59 = arith.addf %53, %58 : vector<8x128xf32>
    %60 = vector.extract_strided_slice %4 {offsets = [72, 0], sizes = [8, 128], strides = [1, 1]} : vector<200x128xf32> to vector<8x128xf32>
    %61 = arith.truncf %60 : vector<8x128xf32> to vector<8x128xbf16>
    %c9 = arith.constant 9 : index
    %c0_34 = arith.constant 0 : index
    %c0_35 = arith.constant 0 : index
    %62 = vector.load %arg8[%c9, %c0_34, %c0_35] : memref<25x128x128xbf16, #tpu.memory_space<vmem>>, vector<1x128x128xbf16>
    %63 = vector.shape_cast %62 : vector<1x128x128xbf16> to vector<128x128xbf16>
    %cst_36 = arith.constant dense<0.000000e+00> : vector<8x128xf32>
    %64 = tpu.matmul %61, %63, %cst_36 {dimension_numbers = #tpu.dot_dimension_numbers<[1], [0], [0], [1], [0, 0, 1, 1], [], []>} : vector<8x128xbf16>, vector<128x128xbf16>, vector<8x128xf32> -> vector<8x128xf32>
    %65 = arith.addf %59, %64 : vector<8x128xf32>
    %66 = vector.extract_strided_slice %4 {offsets = [80, 0], sizes = [8, 128], strides = [1, 1]} : vector<200x128xf32> to vector<8x128xf32>
    %67 = arith.truncf %66 : vector<8x128xf32> to vector<8x128xbf16>
    %c10 = arith.constant 10 : index
    %c0_37 = arith.constant 0 : index
    %c0_38 = arith.constant 0 : index
    %68 = vector.load %arg8[%c10, %c0_37, %c0_38] : memref<25x128x128xbf16, #tpu.memory_space<vmem>>, vector<1x128x128xbf16>
    %69 = vector.shape_cast %68 : vector<1x128x128xbf16> to vector<128x128xbf16>
    %cst_39 = arith.constant dense<0.000000e+00> : vector<8x128xf32>
    %70 = tpu.matmul %67, %69, %cst_39 {dimension_numbers = #tpu.dot_dimension_numbers<[1], [0], [0], [1], [0, 0, 1, 1], [], []>} : vector<8x128xbf16>, vector<128x128xbf16>, vector<8x128xf32> -> vector<8x128xf32>
    %71 = arith.addf %65, %70 : vector<8x128xf32>
    %72 = vector.extract_strided_slice %4 {offsets = [88, 0], sizes = [8, 128], strides = [1, 1]} : vector<200x128xf32> to vector<8x128xf32>
    %73 = arith.truncf %72 : vector<8x128xf32> to vector<8x128xbf16>
    %c11 = arith.constant 11 : index
    %c0_40 = arith.constant 0 : index
    %c0_41 = arith.constant 0 : index
    %74 = vector.load %arg8[%c11, %c0_40, %c0_41] : memref<25x128x128xbf16, #tpu.memory_space<vmem>>, vector<1x128x128xbf16>
    %75 = vector.shape_cast %74 : vector<1x128x128xbf16> to vector<128x128xbf16>
    %cst_42 = arith.constant dense<0.000000e+00> : vector<8x128xf32>
    %76 = tpu.matmul %73, %75, %cst_42 {dimension_numbers = #tpu.dot_dimension_numbers<[1], [0], [0], [1], [0, 0, 1, 1], [], []>} : vector<8x128xbf16>, vector<128x128xbf16>, vector<8x128xf32> -> vector<8x128xf32>
    %77 = arith.addf %71, %76 : vector<8x128xf32>
    %78 = vector.extract_strided_slice %4 {offsets = [96, 0], sizes = [8, 128], strides = [1, 1]} : vector<200x128xf32> to vector<8x128xf32>
    %79 = arith.truncf %78 : vector<8x128xf32> to vector<8x128xbf16>
    %c12 = arith.constant 12 : index
    %c0_43 = arith.constant 0 : index
    %c0_44 = arith.constant 0 : index
    %80 = vector.load %arg8[%c12, %c0_43, %c0_44] : memref<25x128x128xbf16, #tpu.memory_space<vmem>>, vector<1x128x128xbf16>
    %81 = vector.shape_cast %80 : vector<1x128x128xbf16> to vector<128x128xbf16>
    %cst_45 = arith.constant dense<0.000000e+00> : vector<8x128xf32>
    %82 = tpu.matmul %79, %81, %cst_45 {dimension_numbers = #tpu.dot_dimension_numbers<[1], [0], [0], [1], [0, 0, 1, 1], [], []>} : vector<8x128xbf16>, vector<128x128xbf16>, vector<8x128xf32> -> vector<8x128xf32>
    %83 = arith.addf %77, %82 : vector<8x128xf32>
    %84 = vector.extract_strided_slice %4 {offsets = [104, 0], sizes = [8, 128], strides = [1, 1]} : vector<200x128xf32> to vector<8x128xf32>
    %85 = arith.truncf %84 : vector<8x128xf32> to vector<8x128xbf16>
    %c13 = arith.constant 13 : index
    %c0_46 = arith.constant 0 : index
    %c0_47 = arith.constant 0 : index
    %86 = vector.load %arg8[%c13, %c0_46, %c0_47] : memref<25x128x128xbf16, #tpu.memory_space<vmem>>, vector<1x128x128xbf16>
    %87 = vector.shape_cast %86 : vector<1x128x128xbf16> to vector<128x128xbf16>
    %cst_48 = arith.constant dense<0.000000e+00> : vector<8x128xf32>
    %88 = tpu.matmul %85, %87, %cst_48 {dimension_numbers = #tpu.dot_dimension_numbers<[1], [0], [0], [1], [0, 0, 1, 1], [], []>} : vector<8x128xbf16>, vector<128x128xbf16>, vector<8x128xf32> -> vector<8x128xf32>
    %89 = arith.addf %83, %88 : vector<8x128xf32>
    %90 = vector.extract_strided_slice %4 {offsets = [112, 0], sizes = [8, 128], strides = [1, 1]} : vector<200x128xf32> to vector<8x128xf32>
    %91 = arith.truncf %90 : vector<8x128xf32> to vector<8x128xbf16>
    %c14 = arith.constant 14 : index
    %c0_49 = arith.constant 0 : index
    %c0_50 = arith.constant 0 : index
    %92 = vector.load %arg8[%c14, %c0_49, %c0_50] : memref<25x128x128xbf16, #tpu.memory_space<vmem>>, vector<1x128x128xbf16>
    %93 = vector.shape_cast %92 : vector<1x128x128xbf16> to vector<128x128xbf16>
    %cst_51 = arith.constant dense<0.000000e+00> : vector<8x128xf32>
    %94 = tpu.matmul %91, %93, %cst_51 {dimension_numbers = #tpu.dot_dimension_numbers<[1], [0], [0], [1], [0, 0, 1, 1], [], []>} : vector<8x128xbf16>, vector<128x128xbf16>, vector<8x128xf32> -> vector<8x128xf32>
    %95 = arith.addf %89, %94 : vector<8x128xf32>
    %96 = vector.extract_strided_slice %4 {offsets = [120, 0], sizes = [8, 128], strides = [1, 1]} : vector<200x128xf32> to vector<8x128xf32>
    %97 = arith.truncf %96 : vector<8x128xf32> to vector<8x128xbf16>
    %c15 = arith.constant 15 : index
    %c0_52 = arith.constant 0 : index
    %c0_53 = arith.constant 0 : index
    %98 = vector.load %arg8[%c15, %c0_52, %c0_53] : memref<25x128x128xbf16, #tpu.memory_space<vmem>>, vector<1x128x128xbf16>
    %99 = vector.shape_cast %98 : vector<1x128x128xbf16> to vector<128x128xbf16>
    %cst_54 = arith.constant dense<0.000000e+00> : vector<8x128xf32>
    %100 = tpu.matmul %97, %99, %cst_54 {dimension_numbers = #tpu.dot_dimension_numbers<[1], [0], [0], [1], [0, 0, 1, 1], [], []>} : vector<8x128xbf16>, vector<128x128xbf16>, vector<8x128xf32> -> vector<8x128xf32>
    %101 = arith.addf %95, %100 : vector<8x128xf32>
    %102 = vector.extract_strided_slice %4 {offsets = [128, 0], sizes = [8, 128], strides = [1, 1]} : vector<200x128xf32> to vector<8x128xf32>
    %103 = arith.truncf %102 : vector<8x128xf32> to vector<8x128xbf16>
    %c16 = arith.constant 16 : index
    %c0_55 = arith.constant 0 : index
    %c0_56 = arith.constant 0 : index
    %104 = vector.load %arg8[%c16, %c0_55, %c0_56] : memref<25x128x128xbf16, #tpu.memory_space<vmem>>, vector<1x128x128xbf16>
    %105 = vector.shape_cast %104 : vector<1x128x128xbf16> to vector<128x128xbf16>
    %cst_57 = arith.constant dense<0.000000e+00> : vector<8x128xf32>
    %106 = tpu.matmul %103, %105, %cst_57 {dimension_numbers = #tpu.dot_dimension_numbers<[1], [0], [0], [1], [0, 0, 1, 1], [], []>} : vector<8x128xbf16>, vector<128x128xbf16>, vector<8x128xf32> -> vector<8x128xf32>
    %107 = arith.addf %101, %106 : vector<8x128xf32>
    %108 = vector.extract_strided_slice %4 {offsets = [136, 0], sizes = [8, 128], strides = [1, 1]} : vector<200x128xf32> to vector<8x128xf32>
    %109 = arith.truncf %108 : vector<8x128xf32> to vector<8x128xbf16>
    %c17 = arith.constant 17 : index
    %c0_58 = arith.constant 0 : index
    %c0_59 = arith.constant 0 : index
    %110 = vector.load %arg8[%c17, %c0_58, %c0_59] : memref<25x128x128xbf16, #tpu.memory_space<vmem>>, vector<1x128x128xbf16>
    %111 = vector.shape_cast %110 : vector<1x128x128xbf16> to vector<128x128xbf16>
    %cst_60 = arith.constant dense<0.000000e+00> : vector<8x128xf32>
    %112 = tpu.matmul %109, %111, %cst_60 {dimension_numbers = #tpu.dot_dimension_numbers<[1], [0], [0], [1], [0, 0, 1, 1], [], []>} : vector<8x128xbf16>, vector<128x128xbf16>, vector<8x128xf32> -> vector<8x128xf32>
    %113 = arith.addf %107, %112 : vector<8x128xf32>
    %114 = vector.extract_strided_slice %4 {offsets = [144, 0], sizes = [8, 128], strides = [1, 1]} : vector<200x128xf32> to vector<8x128xf32>
    %115 = arith.truncf %114 : vector<8x128xf32> to vector<8x128xbf16>
    %c18 = arith.constant 18 : index
    %c0_61 = arith.constant 0 : index
    %c0_62 = arith.constant 0 : index
    %116 = vector.load %arg8[%c18, %c0_61, %c0_62] : memref<25x128x128xbf16, #tpu.memory_space<vmem>>, vector<1x128x128xbf16>
    %117 = vector.shape_cast %116 : vector<1x128x128xbf16> to vector<128x128xbf16>
    %cst_63 = arith.constant dense<0.000000e+00> : vector<8x128xf32>
    %118 = tpu.matmul %115, %117, %cst_63 {dimension_numbers = #tpu.dot_dimension_numbers<[1], [0], [0], [1], [0, 0, 1, 1], [], []>} : vector<8x128xbf16>, vector<128x128xbf16>, vector<8x128xf32> -> vector<8x128xf32>
    %119 = arith.addf %113, %118 : vector<8x128xf32>
    %120 = vector.extract_strided_slice %4 {offsets = [152, 0], sizes = [8, 128], strides = [1, 1]} : vector<200x128xf32> to vector<8x128xf32>
    %121 = arith.truncf %120 : vector<8x128xf32> to vector<8x128xbf16>
    %c19 = arith.constant 19 : index
    %c0_64 = arith.constant 0 : index
    %c0_65 = arith.constant 0 : index
    %122 = vector.load %arg8[%c19, %c0_64, %c0_65] : memref<25x128x128xbf16, #tpu.memory_space<vmem>>, vector<1x128x128xbf16>
    %123 = vector.shape_cast %122 : vector<1x128x128xbf16> to vector<128x128xbf16>
    %cst_66 = arith.constant dense<0.000000e+00> : vector<8x128xf32>
    %124 = tpu.matmul %121, %123, %cst_66 {dimension_numbers = #tpu.dot_dimension_numbers<[1], [0], [0], [1], [0, 0, 1, 1], [], []>} : vector<8x128xbf16>, vector<128x128xbf16>, vector<8x128xf32> -> vector<8x128xf32>
    %125 = arith.addf %119, %124 : vector<8x128xf32>
    %126 = vector.extract_strided_slice %4 {offsets = [160, 0], sizes = [8, 128], strides = [1, 1]} : vector<200x128xf32> to vector<8x128xf32>
    %127 = arith.truncf %126 : vector<8x128xf32> to vector<8x128xbf16>
    %c20 = arith.constant 20 : index
    %c0_67 = arith.constant 0 : index
    %c0_68 = arith.constant 0 : index
    %128 = vector.load %arg8[%c20, %c0_67, %c0_68] : memref<25x128x128xbf16, #tpu.memory_space<vmem>>, vector<1x128x128xbf16>
    %129 = vector.shape_cast %128 : vector<1x128x128xbf16> to vector<128x128xbf16>
    %cst_69 = arith.constant dense<0.000000e+00> : vector<8x128xf32>
    %130 = tpu.matmul %127, %129, %cst_69 {dimension_numbers = #tpu.dot_dimension_numbers<[1], [0], [0], [1], [0, 0, 1, 1], [], []>} : vector<8x128xbf16>, vector<128x128xbf16>, vector<8x128xf32> -> vector<8x128xf32>
    %131 = arith.addf %125, %130 : vector<8x128xf32>
    %132 = vector.extract_strided_slice %4 {offsets = [168, 0], sizes = [8, 128], strides = [1, 1]} : vector<200x128xf32> to vector<8x128xf32>
    %133 = arith.truncf %132 : vector<8x128xf32> to vector<8x128xbf16>
    %c21 = arith.constant 21 : index
    %c0_70 = arith.constant 0 : index
    %c0_71 = arith.constant 0 : index
    %134 = vector.load %arg8[%c21, %c0_70, %c0_71] : memref<25x128x128xbf16, #tpu.memory_space<vmem>>, vector<1x128x128xbf16>
    %135 = vector.shape_cast %134 : vector<1x128x128xbf16> to vector<128x128xbf16>
    %cst_72 = arith.constant dense<0.000000e+00> : vector<8x128xf32>
    %136 = tpu.matmul %133, %135, %cst_72 {dimension_numbers = #tpu.dot_dimension_numbers<[1], [0], [0], [1], [0, 0, 1, 1], [], []>} : vector<8x128xbf16>, vector<128x128xbf16>, vector<8x128xf32> -> vector<8x128xf32>
    %137 = arith.addf %131, %136 : vector<8x128xf32>
    %138 = vector.extract_strided_slice %4 {offsets = [176, 0], sizes = [8, 128], strides = [1, 1]} : vector<200x128xf32> to vector<8x128xf32>
    %139 = arith.truncf %138 : vector<8x128xf32> to vector<8x128xbf16>
    %c22 = arith.constant 22 : index
    %c0_73 = arith.constant 0 : index
    %c0_74 = arith.constant 0 : index
    %140 = vector.load %arg8[%c22, %c0_73, %c0_74] : memref<25x128x128xbf16, #tpu.memory_space<vmem>>, vector<1x128x128xbf16>
    %141 = vector.shape_cast %140 : vector<1x128x128xbf16> to vector<128x128xbf16>
    %cst_75 = arith.constant dense<0.000000e+00> : vector<8x128xf32>
    %142 = tpu.matmul %139, %141, %cst_75 {dimension_numbers = #tpu.dot_dimension_numbers<[1], [0], [0], [1], [0, 0, 1, 1], [], []>} : vector<8x128xbf16>, vector<128x128xbf16>, vector<8x128xf32> -> vector<8x128xf32>
    %143 = arith.addf %137, %142 : vector<8x128xf32>
    %144 = vector.extract_strided_slice %4 {offsets = [184, 0], sizes = [8, 128], strides = [1, 1]} : vector<200x128xf32> to vector<8x128xf32>
    %145 = arith.truncf %144 : vector<8x128xf32> to vector<8x128xbf16>
    %c23 = arith.constant 23 : index
    %c0_76 = arith.constant 0 : index
    %c0_77 = arith.constant 0 : index
    %146 = vector.load %arg8[%c23, %c0_76, %c0_77] : memref<25x128x128xbf16, #tpu.memory_space<vmem>>, vector<1x128x128xbf16>
    %147 = vector.shape_cast %146 : vector<1x128x128xbf16> to vector<128x128xbf16>
    %cst_78 = arith.constant dense<0.000000e+00> : vector<8x128xf32>
    %148 = tpu.matmul %145, %147, %cst_78 {dimension_numbers = #tpu.dot_dimension_numbers<[1], [0], [0], [1], [0, 0, 1, 1], [], []>} : vector<8x128xbf16>, vector<128x128xbf16>, vector<8x128xf32> -> vector<8x128xf32>
    %149 = arith.addf %143, %148 : vector<8x128xf32>
    %150 = vector.extract_strided_slice %4 {offsets = [192, 0], sizes = [8, 128], strides = [1, 1]} : vector<200x128xf32> to vector<8x128xf32>
    %151 = arith.truncf %150 : vector<8x128xf32> to vector<8x128xbf16>
    %c24 = arith.constant 24 : index
    %c0_79 = arith.constant 0 : index
    %c0_80 = arith.constant 0 : index
    %152 = vector.load %arg8[%c24, %c0_79, %c0_80] : memref<25x128x128xbf16, #tpu.memory_space<vmem>>, vector<1x128x128xbf16>
    %153 = vector.shape_cast %152 : vector<1x128x128xbf16> to vector<128x128xbf16>
    %cst_81 = arith.constant dense<0.000000e+00> : vector<8x128xf32>
    %154 = tpu.matmul %151, %153, %cst_81 {dimension_numbers = #tpu.dot_dimension_numbers<[1], [0], [0], [1], [0, 0, 1, 1], [], []>} : vector<8x128xbf16>, vector<128x128xbf16>, vector<8x128xf32> -> vector<8x128xf32>
    %155 = arith.addf %149, %154 : vector<8x128xf32>
    %c0_82 = arith.constant 0 : index
    %c0_83 = arith.constant 0 : index
    %156 = vector.load %arg9[%c0_82, %c0_83] : memref<1x128xf32, #tpu.memory_space<vmem>>, vector<1x128xf32>
    %157 = vector.broadcast %156 : vector<1x128xf32> to vector<8x128xf32>
    %158 = arith.addf %155, %157 : vector<8x128xf32>
    %159 = math.tanh %158 : vector<8x128xf32>
    %160 = arith.truncf %159 : vector<8x128xf32> to vector<8x128xbf16>
    %c0_84 = arith.constant 0 : index
    %c0_85 = arith.constant 0 : index
    %161 = vector.load %arg10[%c0_84, %c0_85] : memref<128x128xbf16, #tpu.memory_space<vmem>>, vector<128x128xbf16>
    %cst_86 = arith.constant dense<0.000000e+00> : vector<8x128xf32>
    %162 = tpu.matmul %160, %161, %cst_86 {dimension_numbers = #tpu.dot_dimension_numbers<[1], [0], [0], [1], [0, 0, 1, 1], [], []>} : vector<8x128xbf16>, vector<128x128xbf16>, vector<8x128xf32> -> vector<8x128xf32>
    %c0_87 = arith.constant 0 : index
    %c0_88 = arith.constant 0 : index
    %163 = vector.load %arg11[%c0_87, %c0_88] : memref<1x128xf32, #tpu.memory_space<vmem>>, vector<1x128xf32>
    %164 = vector.broadcast %163 : vector<1x128xf32> to vector<8x128xf32>
    %165 = arith.addf %162, %164 : vector<8x128xf32>
    %166 = math.tanh %165 : vector<8x128xf32>
    %167 = arith.truncf %166 : vector<8x128xf32> to vector<8x128xbf16>
    %c0_89 = arith.constant 0 : index
    %c0_90 = arith.constant 0 : index
    %168 = vector.load %arg12[%c0_89, %c0_90] : memref<128x128xbf16, #tpu.memory_space<vmem>>, vector<128x128xbf16>
    %cst_91 = arith.constant dense<0.000000e+00> : vector<8x128xf32>
    %169 = tpu.matmul %167, %168, %cst_91 {dimension_numbers = #tpu.dot_dimension_numbers<[1], [0], [0], [1], [0, 0, 1, 1], [], []>} : vector<8x128xbf16>, vector<128x128xbf16>, vector<8x128xf32> -> vector<8x128xf32>
    %c0_92 = arith.constant 0 : index
    %c0_93 = arith.constant 0 : index
    %170 = vector.load %arg13[%c0_92, %c0_93] : memref<1x128xf32, #tpu.memory_space<vmem>>, vector<1x128xf32>
    %171 = vector.broadcast %170 : vector<1x128xf32> to vector<8x128xf32>
    %172 = arith.addf %169, %171 : vector<8x128xf32>
    %c0_94 = arith.constant 0 : index
    %c0_95 = arith.constant 0 : index
    %173 = vector.load %arg14[%c0_94, %c0_95] : memref<8x128xf32, #tpu.memory_space<vmem>>, vector<8x128xf32>
    tpu.vector_store %arg14[%c0_94, %c0_95], %172 {strides = array<i32>} : memref<8x128xf32, #tpu.memory_space<vmem>>, vector<8x128xf32>,
    return
  }
  func.func @transform_0(%arg0: i32) -> (i32, i32, i32) {
    %c0_i32 = arith.constant 0 : i32
    %c0_i32_0 = arith.constant 0 : i32
    %c0_i32_1 = arith.constant 0 : i32
    return %arg0, %c0_i32, %c0_i32_0 : i32, i32, i32
  }
  func.func @transform_1(%arg0: i32) -> (i32, i32) {
    %c0_i32 = arith.constant 0 : i32
    %c0_i32_0 = arith.constant 0 : i32
    %c0_i32_1 = arith.constant 0 : i32
    return %c0_i32, %c0_i32_0 : i32, i32
  }
  func.func @transform_2(%arg0: i32) -> (i32, i32) {
    %c0_i32 = arith.constant 0 : i32
    %c0_i32_0 = arith.constant 0 : i32
    %c0_i32_1 = arith.constant 0 : i32
    return %c0_i32, %c0_i32_0 : i32, i32
  }
  func.func @transform_3(%arg0: i32) -> (i32, i32) {
    %c0_i32 = arith.constant 0 : i32
    %c0_i32_0 = arith.constant 0 : i32
    %c0_i32_1 = arith.constant 0 : i32
    return %c0_i32, %c0_i32_0 : i32, i32
  }
  func.func @transform_4(%arg0: i32) -> (i32, i32, i32) {
    %c0_i32 = arith.constant 0 : i32
    %c0_i32_0 = arith.constant 0 : i32
    %c0_i32_1 = arith.constant 0 : i32
    %c0_i32_2 = arith.constant 0 : i32
    return %c0_i32, %c0_i32_0, %c0_i32_1 : i32, i32, i32
  }
  func.func @transform_5(%arg0: i32) -> (i32, i32) {
    %c0_i32 = arith.constant 0 : i32
    %c0_i32_0 = arith.constant 0 : i32
    %c0_i32_1 = arith.constant 0 : i32
    return %c0_i32, %c0_i32_0 : i32, i32
  }
  func.func @transform_6(%arg0: i32) -> (i32, i32) {
    %c0_i32 = arith.constant 0 : i32
    %c0_i32_0 = arith.constant 0 : i32
    %c0_i32_1 = arith.constant 0 : i32
    return %c0_i32, %c0_i32_0 : i32, i32
  }
  func.func @transform_7(%arg0: i32) -> (i32, i32, i32) {
    %c0_i32 = arith.constant 0 : i32
    %c0_i32_0 = arith.constant 0 : i32
    %c0_i32_1 = arith.constant 0 : i32
    %c0_i32_2 = arith.constant 0 : i32
    return %c0_i32, %c0_i32_0, %c0_i32_1 : i32, i32, i32
  }
  func.func @transform_8(%arg0: i32) -> (i32, i32) {
    %c0_i32 = arith.constant 0 : i32
    %c0_i32_0 = arith.constant 0 : i32
    %c0_i32_1 = arith.constant 0 : i32
    return %c0_i32, %c0_i32_0 : i32, i32
  }
  func.func @transform_9(%arg0: i32) -> (i32, i32) {
    %c0_i32 = arith.constant 0 : i32
    %c0_i32_0 = arith.constant 0 : i32
    %c0_i32_1 = arith.constant 0 : i32
    return %c0_i32, %c0_i32_0 : i32, i32
  }
  func.func @transform_10(%arg0: i32) -> (i32, i32) {
    %c0_i32 = arith.constant 0 : i32
    %c0_i32_0 = arith.constant 0 : i32
    %c0_i32_1 = arith.constant 0 : i32
    return %c0_i32, %c0_i32_0 : i32, i32
  }
  func.func @transform_11(%arg0: i32) -> (i32, i32) {
    %c0_i32 = arith.constant 0 : i32
    %c0_i32_0 = arith.constant 0 : i32
    %c0_i32_1 = arith.constant 0 : i32
    return %c0_i32, %c0_i32_0 : i32, i32
  }
  func.func @transform_12(%arg0: i32) -> (i32, i32) {
    %c0_i32 = arith.constant 0 : i32
    %c0_i32_0 = arith.constant 0 : i32
    %c0_i32_1 = arith.constant 0 : i32
    return %c0_i32, %c0_i32_0 : i32, i32
  }
  func.func @transform_13(%arg0: i32) -> (i32, i32) {
    %c0_i32 = arith.constant 0 : i32
    %c0_i32_0 = arith.constant 0 : i32
    return %arg0, %c0_i32 : i32, i32
  }
}

</mosaic_0001>

<bundles_post_ra>
// kernel: lenet5_forward.1
= control target key start
LH: loop header
LB: loop body
LE: loop exit
PB: predicated region body
PF: predicated region fallthrough
CT: control target
= control target key end

     0   :  { %s23782_s0 = inlined_call_operand.vmem [shape: bf16[16,784,32], index: 0, kind: input, shape index: {}]   ;;  %s23783_s1 = inlined_call_operand.vmem [shape: bf16[32,128], index: 1, kind: input, shape index: {}]   ;;  %s23784_s2 = inlined_call_operand.vmem [shape: f32[1,128], index: 2, kind: input, shape index: {}]   ;;  %s23785_s3 = inlined_call_operand.vmem [shape: bf16[224,784], index: 3, kind: input, shape index: {}]   ;;  %s23786_s4 = inlined_call_operand.vmem [shape: bf16[25,128,128], index: 4, kind: input, shape index: {}]   ;;  %s23787_s5 = inlined_call_operand.vmem [shape: f32[1,128], index: 5, kind: input, shape index: {}]   ;;  %s23788_s6 = inlined_call_operand.vmem [shape: bf16[200,1152], index: 6, kind: input, shape index: {}]   ;;  %s23789_s7 = inlined_call_operand.vmem [shape: bf16[25,128,128], index: 7, kind: input, shape index: {}]   ;;  %s23790_s8 = inlined_call_operand.vmem [shape: f32[1,128], index: 8, kind: input, shape index: {}]   ;;  %s23791_s9 = inlined_call_operand.vmem [shape: bf16[128,128], index: 9, kind: input, shape index: {}]   ;;  %s23792_s10 = inlined_call_operand.vmem [shape: f32[1,128], index: 10, kind: input, shape index: {}]   ;;  %s23793_s11 = inlined_call_operand.vmem [shape: bf16[128,128], index: 11, kind: input, shape index: {}]   ;;  %s23794_s12 = inlined_call_operand.vmem [shape: f32[1,128], index: 12, kind: input, shape index: {}]   ;;  %s23795_s13 = inlined_call_operand.hbm [shape: f32[16,128], index: 13, kind: output, shape index: {}]  }
   0x1   :  { %23798 = sst [smem:[#allocation9_spill]] %s23782_s0 }
   0x2   :  { %23799 = sst [smem:[#allocation10_spill]] %s23783_s1 }
   0x3   :  { %23800 = sst [smem:[#allocation11_spill]] %s23784_s2 }
   0x4   :  { %18 = vsyncpa [#allocation5], 0 }
   0x5   :  { %20 = vsyncpa [#allocation5 + $0x1], 0  ;;  %s18959_s25 = smov 0   ;;  %s18961_s26 = smov 0  }
   0x6   :  { %s18963_s27 = smov 0   ;;  %s18965_s28 = smov 0  }
   0x7 LB: > { %23801 = sst [smem:[#allocation7_spill]] %s18874_s27  ;;  %s18980_s29 = sadd.s32 4294967295, %s18878_s28   ;;  %s18878_s28 = sphi %s18965_s28, %s23815_s28   ;;  %s18874_s27 = sphi %s18963_s27, %s23812_s27   ;;  %s18870_s26 = sphi %s18961_s26, %s23814_s26   ;;  %s18866_s25 = sphi %s18959_s25, %s23813_s25  }
   0x8   : > { %s12645_s30 = sadd.s32 4294967294, %s18878_s28   ;;  %s18984_s14 = sadd.s32 1, %s18878_s28  }
   0x9   : > { %s311_s15 = sadd.s32 1, %s18874_s27  ;;  %s308_s16 = ssub.s32 %s18878_s28, %s18984_s14 }
   0xa   : > { %p321_p0 = scmp.ne.s32.totalorder %s18874_s27, %s18870_s26  ;;  %p309_p1 = scmp.eq.s32.totalorder %s308_s16, 0 }
   0xb   : > { %p322_p2 = scmp.eq.s32.totalorder %s18980_s29, 1  ;;  %p327_p3 = scmp.ne.s32.totalorder %s18870_s26, %s18866_s25 }
   0xc   : > { %p328_p4 = scmp.eq.s32.totalorder %s12645_s30, 1  ;;  %p12648_p7 = scmp.ge.s32.totalorder %s18878_s28, 1 }
   0xd   : > { %s18995_s17 = scalar_select %p309_p1, %s18874_s27, %s311_s15  }
   0xe   : > { %p18997_p5 = por %p322_p2, %p321_p0  ;;  %p19001_p6 = por %p328_p4, %p327_p3 }
   0xf   : > { %23802 = sst [smem:[#allocation8_spill]] %s18995_s17  ;;  %p392_p8 = scmp.lt.s32.totalorder %s18878_s28, 3 }
  0x11   : > { %p393_p9 = pnand %p12648_p7, %p392_p8 }
  0x12   : > { %s23796_s20 = sand.u32 (!%p393_p9), 1, %s18870_s26   ;;  %s12650_s21 = sshll.u32 (!%p393_p9), %s18980_s29, 3 }
  0x13   : > { %396 = sbr.rel (%p393_p9) target bundleno = 3708 (0xe7c), region = 72  ;;  %s19011_s22 = sshll.u32 (!%p393_p9), %s23796_s20, 3 }
  0x14   : > { %p438_p10 = scmp.lt.s32.totalorder (!%p393_p9), %s12650_s21, 15  ;;  %s23805_s0 = sld [smem:[#allocation9_spill]] (!%p393_p9) }
  0x15   : > { %s19019_s17 = smov (!%p393_p9), 0  }
  0x1a   : > { %s23817_s21 = smov (!%p438_p10, %s12650_s21), 15 }
  0x1b   : > { %s17751_s23 = smul.u32 392, %s23817_s21 }
  0x1d   : > { %s19016_s15 = scalar_lea.vmem %s23805_s0, %s17751_s23 }
  0x1e LB: >> { %s23806_s1 = sld [smem:[#allocation10_spill]]  ;;  %v18884_v1 = vmov 0.0   ;;  %vm18885_vm0 = vmmov 0   ;;  %s14176_s24 = smul.u32 392, %s18882_s17  ;;  %vm820_vm1 = vcmask 261120   ;;  %vm2142_vm2 = vcmask 130048   ;;  %s18882_s17 = sphi %s19019_s17, %s450_s17  }
  0x1f   : >> { %15609 = vmatprep.subr.bf16.mxu0 %v18884_v1  ;;  %17747 = vmatprep.subr.bf16.mxu1 %v18884_v1  ;;  %s23807_s2 = sld [smem:[#allocation11_spill]]  ;;  %s14177_s30 = smul.u32 72, %s18882_s17 }
  0x20   : >> { %15613 = vmatprep.mubr.msk.bf16.mxu0 %vm18885_vm0, %v18884_v1  ;;  %s19037_s27 = scalar_lea.vmem %s19016_s15, %s14176_s24  ;;  %15793 = vmatprep.mubr.msk.bf16.mxu1 %vm18885_vm0, %v18884_v1  ;;  %s450_s17 = sadd.s32 1, %s18882_s17  }
  0x21   : >> { %v17805_v3 = vld [vmem:[%s19037_s27] sm:$0xff]   ;;  %v17806_v4 = vld [vmem:[%s19037_s27 + $0x8] sm:$0xff]   ;;  %v17807_v5 = vld [vmem:[%s19037_s27 + $0x10] sm:$0xff]   ;;  %s22122_s21 = scalar_lea.vmem [#allocation3], %s14177_s30  ;;  %p447_p11 = scmp.ge.s32.totalorder %s450_s17, 8  }
  0x22   : >> { %v17808_v6 = vld [vmem:[%s19037_s27 + $0x18] sm:$0xff]   ;;  %v17809_v7 = vld [vmem:[%s19037_s27 + $0x20] sm:$0xff]   ;;  %v17810_v8 = vld [vmem:[%s19037_s27 + $0x28] sm:$0xff]   ;;  %vm18887_vm3 = vmmov (%p447_p11), 0   ;;  %s14173_s24 = sshll.u32 (%p447_p11), %s18980_s29, 7  ;;  %s23808_s20 = scalar_lea.vmem (%p447_p11), [#allocation4], %s19011_s22 }
  0x23   : >> { %v17811_v9 = vld [vmem:[%s19037_s27 + $0x30] sm:$0xff]   ;;  %v17812_v10 = vld [vmem:[%s19037_s27 + $0x38] sm:$0xff]   ;;  %v17813_v11 = vld [vmem:[%s19037_s27 + $0x40] sm:$0xff]   ;;  %s12577_s0 = sshll.u32 (%p447_p11), %s23808_s20, 4  ;;  %s23809_s30 = smov (%p447_p11), %s23808_s20  ;;  %s23738_s0 = int_to_ptr.vmem [resolvable:$true] %s12577_s0 }
  0x24   : >> { %v17803_v0 = vld [vmem:[%s23806_s1] sm:$0xff]   ;;  %v17804_v2 = vld [vmem:[%s23806_s1 + $0x8] sm:$0xff]   ;;  %v17815_v13 = vld [vmem:[%s19037_s27 + $0x50] sm:$0xff]   ;;  %s23810_s29 = sand.u32 (%p447_p11), 1, %s18870_s26   ;;  %s18812_s17 = scalar_lea.vmem (%p447_p11), %s23738_s0, 128 }
  0x25   : >> { %15610 = vmatpush3.bf16.msra.mxu0 %v17803_v0  ;;  %17749 = vmatpush3.bf16.msra.mxu1 %v17803_v0  ;;  %v17814_v12 = vld [vmem:[%s19037_s27 + $0x48] sm:$0xff]   ;;  %v17816_v14 = vld [vmem:[%s19037_s27 + $0x58] sm:$0xff]   ;;  %v17817_v15 = vld [vmem:[%s19037_s27 + $0x60] sm:$0xff]   ;;  %p18813_p12 = scmp.ne.s32.totalorder (%p447_p11), %s23738_s0, %s18812_s17  ;;  %s18888_s15 = smov (%p447_p11), [#allocation4]  }
  0x26   : >> { %15611 = vmatprep.subr.bf16.mxu0 %v18884_v1  ;;  %17748 = vmatprep.subr.bf16.mxu1 %v18884_v1  ;;  %v17818_v16 = vld [vmem:[%s19037_s27 + $0x68] sm:$0xff]   ;;  %v17819_v17 = vld [vmem:[%s19037_s27 + $0x70] sm:$0xff]   ;;  %v17820_v18 = vld [vmem:[%s19037_s27 + $0x78] sm:$0xff]  }
  0x27   : >> { %v17821_v19 = vld [vmem:[%s19037_s27 + $0x80] sm:$0xff]   ;;  %v17822_v20 = vld [vmem:[%s19037_s27 + $0x88] sm:$0xff]   ;;  %v17823_v21 = vld [vmem:[%s19037_s27 + $0x90] sm:$0xff]   ;;  %p18814_p13 = pnand (%p447_p11), %p18813_p12, %p18997_p5 }
  0x28   : >> { %v17824_v22 = vld [vmem:[%s19037_s27 + $0x98] sm:$0xff]   ;;  %v17825_v23 = vld [vmem:[%s19037_s27 + $0xa0] sm:$0xff]   ;;  %v17826_v24 = vld [vmem:[%s19037_s27 + $0xa8] sm:$0xff]  }
  0x29   : >> { %15612 = vmatpush3.bf16.msra.mxu0 %v17804_v2  ;;  %17750 = vmatpush3.bf16.msra.mxu1 %v17804_v2  ;;  %v17842_v25 = vld [vmem:[%s19037_s27 + $0x168] sm:$0xff]   ;;  %v17827_v26 = vld [vmem:[%s19037_s27 + $0xb0] sm:$0xff]   ;;  %v17828_v27 = vld [vmem:[%s19037_s27 + $0xb8] sm:$0xff]   ;;  %p18815_p0 = pneg (%p447_p11), %p18814_p13 }
  0x2a   : >> { %15839 = vmatprep.subr.bf16.mxu0 %v18884_v1  ;;  %v17829_v28 = vld [vmem:[%s19037_s27 + $0xc0] sm:$0xff]   ;;  %v17830_v29 = vld [vmem:[%s19037_s27 + $0xc8] sm:$0xff]   ;;  %v17831_v30 = vld [vmem:[%s19037_s27 + $0xd0] sm:$0xff]  }
  0x2b   : >> { %v19155_v31 = vld [vmem:[%s23807_s2] ss:$0 sm:$0xff]  ;;  %v17832_v35 = vld [vmem:[%s19037_s27 + $0xd8] sm:$0xff]   ;;  %v17850_v39 = vld [vmem:[%s19037_s27 + $0x170] sm:$0xff]  }
  0x2c   : >> { %15614 = vmatmul.mubr.msk.bf16.vlgmr.msra.gmra.mrb[0].mxu0 %vm820_vm1, %v17805_v3  ;;  %15794 = vmatmul.mubr.msk.bf16.vlgmr.msra.gmra.mrb[0].mxu1 %vm820_vm1, %v17842_v25  ;;  %v17833_v43 = vld [vmem:[%s19037_s27 + $0xe0] sm:$0xff]   ;;  %v17852_v47 = vld [vmem:[%s19037_s27 + $0x178] sm:$0xff]   ;;  %v17834_v54 = vld [vmem:[%s19037_s27 + $0xe8] sm:$0xff]  }
  0x2d   : >> { %15617 = vmatprep.mubr.msk.bf16.mxu0 %vm18885_vm0, %v18884_v1  ;;  %15797 = vmatprep.mubr.msk.bf16.mxu1 %vm18885_vm0, %v18884_v1  ;;  %v17853_v58 = vld [vmem:[%s19037_s27 + $0x180] sm:$0xff]   ;;  %v17835_v2 = vld [vmem:[%s19037_s27 + $0xf0] sm:$0xff]  }
  0x34   : >> { %15618 = vmatmul.mubr.msk.bf16.gmra.mrb[4].mxu0 %vm820_vm1, %v17806_v4  ;;  %15798 = vmatmul.mubr.msk.bf16.gmra.mrb[4].mxu1 %vm820_vm1, %v17850_v39 }
  0x35   : >> { %15621 = vmatprep.mubr.msk.bf16.mxu0 %vm18885_vm0, %v18884_v1  ;;  %15801 = vmatprep.mubr.msk.bf16.mxu1 %vm18885_vm0, %v18884_v1 }
  0x3c   : >> { %15622 = vmatmul.mubr.msk.bf16.gmra.mrb[8].mxu0 %vm820_vm1, %v17807_v5  ;;  %15802 = vmatmul.mubr.msk.bf16.gmra.mrb[8].mxu1 %vm820_vm1, %v17852_v47 }
  0x3d   : >> { %15625 = vmatprep.mubr.msk.bf16.mxu0 %vm18885_vm0, %v18884_v1  ;;  %15805 = vmatprep.mubr.msk.bf16.mxu1 %vm18885_vm0, %v18884_v1 }
  0x44   : >> { %15626 = vmatmul.mubr.msk.bf16.gmra.mrb[12].mxu0 %vm820_vm1, %v17808_v6  ;;  %15806 = vmatmul.mubr.msk.bf16.gmra.mrb[12].mxu1 %vm820_vm1, %v17853_v58  ;;  %v17856_v6 = vld [vmem:[%s23785_s3 + $0x4] ss:$28 sps:$4 sm:$0xff]  }
  0x45   : >> { %15629 = vmatprep.mubr.msk.bf16.mxu0 %vm18885_vm0, %v18884_v1  ;;  %2217 = vmatprep.mubr.bf16.mxu1 %v17856_v6 }
  0x4c   : >> { %15630 = vmatmul.mubr.msk.bf16.gmra.mrb[16].mxu0 %vm820_vm1, %v17809_v7 }
  0x4d   : >> { %15633 = vmatprep.mubr.msk.bf16.mxu0 %vm18885_vm0, %v18884_v1 }
  0x54   : >> { %15634 = vmatmul.mubr.msk.bf16.gmra.mrb[20].mxu0 %vm820_vm1, %v17810_v8 }
  0x55   : >> { %15637 = vmatprep.mubr.msk.bf16.mxu0 %vm18885_vm0, %v18884_v1 }
  0x5c   : >> { %15638 = vmatmul.mubr.msk.bf16.gmra.mrb[24].mxu0 %vm820_vm1, %v17811_v9 }
  0x5d   : >> { %15641 = vmatprep.mubr.msk.bf16.mxu0 %vm18885_vm0, %v18884_v1 }
  0x64   : >> { %15642 = vmatmul.mubr.msk.bf16.gmra.mrb[28].mxu0 %vm820_vm1, %v17812_v10 }
  0x65   : >> { %15645 = vmatprep.mubr.msk.bf16.mxu0 %vm18885_vm0, %v18884_v1 }
  0x6c   : >> { %15646 = vmatmul.mubr.msk.bf16.gmra.mrb[32].mxu0 %vm820_vm1, %v17813_v11 }
  0x6d   : >> { %15649 = vmatprep.mubr.msk.bf16.mxu0 %vm18885_vm0, %v18884_v1 }
  0x74   : >> { %15650 = vmatmul.mubr.msk.bf16.gmra.mrb[36].mxu0 %vm820_vm1, %v17814_v12 }
  0x75   : >> { %15653 = vmatprep.mubr.msk.bf16.mxu0 %vm18885_vm0, %v18884_v1 }
  0x7c   : >> { %15654 = vmatmul.mubr.msk.bf16.gmra.mrb[40].mxu0 %vm820_vm1, %v17815_v13  ;;  %v17836_v13 = vld [vmem:[%s19037_s27 + $0xf8] sm:$0xff]  }
  0x7d   : >> { %15657 = vmatprep.mubr.msk.bf16.mxu0 %vm18885_vm0, %v18884_v1 }
  0x84   : >> { %15658 = vmatmul.mubr.msk.bf16.gmra.mrb[44].mxu0 %vm820_vm1, %v17816_v14 }
  0x85   : >> { %15661 = vmatprep.mubr.msk.bf16.mxu0 %vm18885_vm0, %v18884_v1 }
  0x8c   : >> { %15662 = vmatmul.mubr.msk.bf16.gmra.mrb[48].mxu0 %vm820_vm1, %v17817_v15 }
  0x8d   : >> { %15665 = vmatprep.mubr.msk.bf16.mxu0 %vm18885_vm0, %v18884_v1 }
  0x94   : >> { %15666 = vmatmul.mubr.msk.bf16.gmra.mrb[52].mxu0 %vm820_vm1, %v17818_v16 }
  0x95   : >> { %15669 = vmatprep.mubr.msk.bf16.mxu0 %vm18885_vm0, %v18884_v1 }
  0x9c   : >> { %15670 = vmatmul.mubr.msk.bf16.gmra.mrb[56].mxu0 %vm820_vm1, %v17819_v17 }
  0x9d   : >> { %15673 = vmatprep.mubr.msk.bf16.mxu0 %vm18885_vm0, %v18884_v1 }
  0xa4   : >> { %15674 = vmatmul.mubr.msk.bf16.gmra.mrb[60].mxu0 %vm820_vm1, %v17820_v18 }
  0xa5   : >> { %15677 = vmatprep.mubr.msk.bf16.mxu0 %vm18885_vm0, %v18884_v1 }
  0xac   : >> { %15678 = vmatmul.mubr.msk.bf16.gmra.mrb[64].mxu0 %vm820_vm1, %v17821_v19 }
  0xad   : >> { %15681 = vmatprep.mubr.msk.bf16.mxu0 %vm18885_vm0, %v18884_v1 }
  0xb4   : >> { %15682 = vmatmul.mubr.msk.bf16.gmra.mrb[68].mxu0 %vm820_vm1, %v17822_v20 }
  0xb5   : >> { %15685 = vmatprep.mubr.msk.bf16.mxu0 %vm18885_vm0, %v18884_v1 }
  0xbc   : >> { %15686 = vmatmul.mubr.msk.bf16.gmra.mrb[72].mxu0 %vm820_vm1, %v17823_v21 }
  0xbd   : >> { %15689 = vmatprep.mubr.msk.bf16.mxu0 %vm18885_vm0, %v18884_v1 }
  0xc4   : >> { %15690 = vmatmul.mubr.msk.bf16.gmra.mrb[76].mxu0 %vm820_vm1, %v17824_v22 }
  0xc5   : >> { %15693 = vmatprep.mubr.msk.bf16.mxu0 %vm18885_vm0, %v18884_v1 }
  0xcc   : >> { %15694 = vmatmul.mubr.msk.bf16.gmra.mrb[80].mxu0 %vm820_vm1, %v17825_v23  ;;  %v17837_v23 = vld [vmem:[%s19037_s27 + $0x100] sm:$0xff]  }
  0xcd   : >> { %15697 = vmatprep.mubr.msk.bf16.mxu0 %vm18885_vm0, %v18884_v1 }
  0xd4   : >> { %15698 = vmatmul.mubr.msk.bf16.gmra.mrb[84].mxu0 %vm820_vm1, %v17826_v24 }
  0xd5   : >> { %15701 = vmatprep.mubr.msk.bf16.mxu0 %vm18885_vm0, %v18884_v1 }
  0xdc   : >> { %15702 = vmatmul.mubr.msk.bf16.gmra.mrb[88].mxu0 %vm820_vm1, %v17827_v26 }
  0xdd   : >> { %15705 = vmatprep.mubr.msk.bf16.mxu0 %vm18885_vm0, %v18884_v1 }
  0xe4   : >> { %15706 = vmatmul.mubr.msk.bf16.gmra.mrb[92].mxu0 %vm820_vm1, %v17828_v27 }
  0xe5   : >> { %15709 = vmatprep.mubr.msk.bf16.mxu0 %vm18885_vm0, %v18884_v1 }
  0xec   : >> { %15710 = vmatmul.mubr.msk.bf16.gmra.mrb[96].mxu0 %vm820_vm1, %v17829_v28 }
  0xed   : >> { %15713 = vmatprep.mubr.msk.bf16.mxu0 %vm18885_vm0, %v18884_v1 }
  0xf4   : >> { %15714 = vmatmul.mubr.msk.bf16.gmra.mrb[100].mxu0 %vm820_vm1, %v17830_v29 }
  0xf5   : >> { %15717 = vmatprep.mubr.msk.bf16.mxu0 %vm18885_vm0, %v18884_v1 }
  0xfc   : >> { %15718 = vmatmul.mubr.msk.bf16.gmra.mrb[104].mxu0 %vm820_vm1, %v17831_v30 }
  0xfd   : >> { %15721 = vmatprep.mubr.msk.bf16.mxu0 %vm18885_vm0, %v18884_v1 }
  0xff   : >> { %v1002_v32 = vpop.f32.mrb[0].mxu0 }
 0x100   : >> { %v1003_v33 = vadd.f32 %v19155_v31, %v1002_v32  ;;  %v15615_v34 = vpop.f32.mrb[1].mxu0 }
 0x101   : >> { %v1005_v36 = vpop.f32.mrb[2].mxu0  ;;  %v17838_v34 = vld [vmem:[%s19037_s27 + $0x108] sm:$0xff]  }
 0x102   : >> { %v1006_v37 = vadd.f32 %v19155_v31, %v1005_v36  ;;  %v15616_v38 = vpop.f32.mrb[3].mxu0  ;;  %18194 = vtanh.f32 %v1003_v33 }
 0x104   : >> { %18196 = vtanh.f32 %v1006_v37  ;;  %15722 = vmatmul.mubr.msk.bf16.gmra.mrb[108].mxu0 %vm820_vm1, %v17832_v35 }
 0x105   : >> { %15725 = vmatprep.mubr.msk.bf16.mxu0 %vm18885_vm0, %v18884_v1 }
 0x107   : >> { %v1010_v40 = vpop.f32.mrb[4].mxu0 }
 0x108   : >> { %v1011_v41 = vadd.f32 %v19155_v31, %v1010_v40  ;;  %v15619_v42 = vpop.f32.mrb[5].mxu0 }
 0x109   : >> { %v1013_v44 = vpop.f32.mrb[6].mxu0 }
 0x10a   : >> { %v1014_v45 = vadd.f32 %v19155_v31, %v1013_v44  ;;  %v15620_v46 = vpop.f32.mrb[7].mxu0  ;;  %18198 = vtanh.f32 %v1011_v41  ;;  %v17839_v44 = vld [vmem:[%s19037_s27 + $0x110] sm:$0xff]  }
 0x10c   : >> { %18200 = vtanh.f32 %v1014_v45  ;;  %15726 = vmatmul.mubr.msk.bf16.gmra.mrb[112].mxu0 %vm820_vm1, %v17833_v43  ;;  %v19175_v48 = vpop.eup %18194 }
 0x10d   : >> { %15729 = vmatprep.mubr.msk.bf16.mxu0 %vm18885_vm0, %v18884_v1 }
 0x10e   : >> { %v19180_v49 = vpop.eup %18196 }
 0x10f   : >> { %v1018_v50 = vpop.f32.mrb[8].mxu0  ;;  %v1491_v51 = vpack.c.bf16 %v19180_v49, %v19175_v48 }
 0x110   : >> { %v1019_v52 = vadd.f32 %v19155_v31, %v1018_v50  ;;  %v15623_v53 = vpop.f32.mrb[9].mxu0 }
 0x111   : >> { %v1021_v55 = vpop.f32.mrb[10].mxu0 }
 0x112   : >> { %v1022_v56 = vadd.f32 %v19155_v31, %v1021_v55  ;;  %v15624_v57 = vpop.f32.mrb[11].mxu0  ;;  %18202 = vtanh.f32 %v1019_v52 }
 0x113   : >> { %v17840_v57 = vld [vmem:[%s19037_s27 + $0x118] sm:$0xff]  }
 0x114   : >> { %18204 = vtanh.f32 %v1022_v56  ;;  %15730 = vmatmul.mubr.msk.bf16.gmra.mrb[116].mxu0 %vm820_vm1, %v17834_v54  ;;  %v19191_v59 = vpop.eup %18198 }
 0x115   : >> { %15733 = vmatprep.mubr.msk.bf16.mxu0 %vm18885_vm0, %v18884_v1 }
 0x116   : >> { %v19196_v60 = vpop.eup %18200 }
 0x117   : >> { %v1026_v61 = vpop.f32.mrb[12].mxu0  ;;  %v1492_v62 = vpack.c.bf16 %v19196_v60, %v19191_v59 }
 0x118   : >> { %v1027_v63 = vadd.f32 %v19155_v31, %v1026_v61  ;;  %v15627_v0 = vpop.f32.mrb[13].mxu0 }
 0x119   : >> { %v1029_v3 = vpop.f32.mrb[14].mxu0 }
 0x11a   : >> { %v1030_v4 = vadd.f32 %v19155_v31, %v1029_v3  ;;  %v15628_v5 = vpop.f32.mrb[15].mxu0  ;;  %18206 = vtanh.f32 %v1027_v63 }
 0x11c   : >> { %18208 = vtanh.f32 %v1030_v4  ;;  %15734 = vmatmul.mubr.msk.bf16.gmra.mrb[120].mxu0 %vm820_vm1, %v17835_v2  ;;  %v19207_v7 = vpop.eup %18202 }
 0x11d   : >> { %15737 = vmatprep.mubr.msk.bf16.mxu0 %vm18885_vm0, %v18884_v1 }
 0x11e   : >> { %v19211_v8 = vpop.eup %18204 }
 0x11f   : >> { %v1034_v9 = vpop.f32.mrb[16].mxu0  ;;  %v1493_v10 = vpack.c.bf16 %v19211_v8, %v19207_v7 }
 0x120   : >> { %v1035_v11 = vadd.f32 %v19155_v31, %v1034_v9  ;;  %v15631_v12 = vpop.f32.mrb[17].mxu0  ;;  %v17841_v9 = vld [vmem:[%s19037_s27 + $0x120] sm:$0xff]  }
 0x121   : >> { %v1037_v14 = vpop.f32.mrb[18].mxu0 }
 0x122   : >> { %v1038_v15 = vadd.f32 %v19155_v31, %v1037_v14  ;;  %v15632_v16 = vpop.f32.mrb[19].mxu0  ;;  %18210 = vtanh.f32 %v1035_v11 }
 0x124   : >> { %18212 = vtanh.f32 %v1038_v15  ;;  %15738 = vmatmul.mubr.msk.bf16.gmra.mrb[124].mxu0 %vm820_vm1, %v17836_v13  ;;  %v19219_v17 = vpop.eup %18206 }
 0x125   : >> { %15741 = vmatprep.mubr.msk.bf16.mxu0 %vm18885_vm0, %v18884_v1 }
 0x126   : >> { %v19223_v18 = vpop.eup %18208 }
 0x127   : >> { %v1042_v19 = vpop.f32.mrb[20].mxu0  ;;  %v1494_v20 = vpack.c.bf16 %v19223_v18, %v19219_v17 }
 0x128   : >> { %v1043_v21 = vadd.f32 %v19155_v31, %v1042_v19  ;;  %v15635_v22 = vpop.f32.mrb[21].mxu0 }
 0x129   : >> { %v1045_v24 = vpop.f32.mrb[22].mxu0 }
 0x12a   : >> { %v1046_v25 = vadd.f32 %v19155_v31, %v1045_v24  ;;  %v15636_v26 = vpop.f32.mrb[23].mxu0  ;;  %18214 = vtanh.f32 %v1043_v21 }
 0x12c   : >> { %18216 = vtanh.f32 %v1046_v25  ;;  %15742 = vmatmul.mubr.msk.bf16.gmra.mrb[128].mxu0 %vm820_vm1, %v17837_v23  ;;  %v19231_v27 = vpop.eup %18210  ;;  %v17843_v23 = vld [vmem:[%s19037_s27 + $0x128] sm:$0xff]  }
 0x12d   : >> { %15745 = vmatprep.mubr.msk.bf16.mxu0 %vm18885_vm0, %v18884_v1 }
 0x12e   : >> { %v19235_v28 = vpop.eup %18212 }
 0x12f   : >> { %v1050_v29 = vpop.f32.mrb[24].mxu0  ;;  %v1495_v30 = vpack.c.bf16 %v19235_v28, %v19231_v27 }
 0x130   : >> { %v1051_v32 = vadd.f32 %v19155_v31, %v1050_v29  ;;  %v15639_v33 = vpop.f32.mrb[25].mxu0 }
 0x131   : >> { %v1053_v35 = vpop.f32.mrb[26].mxu0 }
 0x132   : >> { %v1054_v36 = vadd.f32 %v19155_v31, %v1053_v35  ;;  %v15640_v37 = vpop.f32.mrb[27].mxu0  ;;  %18218 = vtanh.f32 %v1051_v32 }
 0x133   : >> { %v17844_v37 = vld [vmem:[%s19037_s27 + $0x130] sm:$0xff]  }
 0x134   : >> { %18220 = vtanh.f32 %v1054_v36  ;;  %15746 = vmatmul.mubr.msk.bf16.gmra.mrb[132].mxu0 %vm820_vm1, %v17838_v34  ;;  %v19243_v38 = vpop.eup %18214 }
 0x135   : >> { %15749 = vmatprep.mubr.msk.bf16.mxu0 %vm18885_vm0, %v18884_v1 }
 0x136   : >> { %v19247_v39 = vpop.eup %18216 }
 0x137   : >> { %v1058_v40 = vpop.f32.mrb[28].mxu0  ;;  %v1496_v41 = vpack.c.bf16 %v19247_v39, %v19243_v38 }
 0x138   : >> { %v1059_v42 = vadd.f32 %v19155_v31, %v1058_v40  ;;  %v15643_v43 = vpop.f32.mrb[29].mxu0 }
 0x139   : >> { %v1061_v45 = vpop.f32.mrb[30].mxu0 }
 0x13a   : >> { %v1062_v46 = vadd.f32 %v19155_v31, %v1061_v45  ;;  %v15644_v47 = vpop.f32.mrb[31].mxu0  ;;  %18222 = vtanh.f32 %v1059_v42 }
 0x13b   : >> { %v17845_v47 = vld [vmem:[%s19037_s27 + $0x138] sm:$0xff]  }
 0x13c   : >> { %18224 = vtanh.f32 %v1062_v46  ;;  %15750 = vmatmul.mubr.msk.bf16.gmra.mrb[136].mxu0 %vm820_vm1, %v17839_v44  ;;  %v19255_v50 = vpop.eup %18218 }
 0x13d   : >> { %15753 = vmatprep.mubr.msk.bf16.mxu0 %vm18885_vm0, %v18884_v1 }
 0x13e   : >> { %v19259_v52 = vpop.eup %18220 }
 0x13f   : >> { %v1066_v53 = vpop.f32.mrb[32].mxu0  ;;  %v1497_v54 = vpack.c.bf16 %v19259_v52, %v19255_v50  ;;  %v17854_v50 = vld [vmem:[%s23785_s3] ss:$28 sps:$4 sm:$0xff]  }
 0x140   : >> { %v1067_v55 = vadd.f32 %v19155_v31, %v1066_v53  ;;  %v15647_v56 = vpop.f32.mrb[33].mxu0 }
 0x141   : >> { %v1069_v58 = vpop.f32.mrb[34].mxu0 }
 0x142   : >> { %v1070_v61 = vadd.f32 %v19155_v31, %v1069_v58  ;;  %v15648_v63 = vpop.f32.mrb[35].mxu0  ;;  %18226 = vtanh.f32 %v1067_v55 }
 0x143   : >> { %v17846_v63 = vld [vmem:[%s19037_s27 + $0x140] sm:$0xff]  }
 0x144   : >> { %18228 = vtanh.f32 %v1070_v61  ;;  %15754 = vmatmul.mubr.msk.bf16.gmra.mrb[140].mxu0 %vm820_vm1, %v17840_v57  ;;  %v19267_v0 = vpop.eup %18222 }
 0x145   : >> { %15757 = vmatprep.mubr.msk.bf16.mxu0 %vm18885_vm0, %v18884_v1 }
 0x146   : >> { %v19271_v2 = vpop.eup %18224 }
 0x147   : >> { %v1074_v3 = vpop.f32.mrb[36].mxu0  ;;  %v1498_v4 = vpack.c.bf16 %v19271_v2, %v19267_v0 }
 0x148   : >> { %v1075_v5 = vadd.f32 %v19155_v31, %v1074_v3  ;;  %v15651_v6 = vpop.f32.mrb[37].mxu0 }
 0x149   : >> { %v1077_v11 = vpop.f32.mrb[38].mxu0 }
 0x14a   : >> { %v1078_v12 = vadd.f32 %v19155_v31, %v1077_v11  ;;  %v15652_v13 = vpop.f32.mrb[39].mxu0  ;;  %18230 = vtanh.f32 %v1075_v5 }
 0x14b   : >> { %v17847_v13 = vld [vmem:[%s19037_s27 + $0x148] sm:$0xff]  }
 0x14c   : >> { %18232 = vtanh.f32 %v1078_v12  ;;  %15758 = vmatmul.mubr.msk.bf16.gmra.mrb[144].mxu0 %vm820_vm1, %v17841_v9  ;;  %v18227_v14 = vpop.eup %18226 }
 0x14d   : >> { %15761 = vmatprep.mubr.msk.bf16.mxu0 %vm18885_vm0, %v18884_v1 }
 0x14e   : >> { %v18229_v15 = vpop.eup %18228 }
 0x14f   : >> { %v1082_v16 = vpop.f32.mrb[40].mxu0  ;;  %v1499_v19 = vpack.c.bf16 %v18229_v15, %v18227_v14 }
 0x150   : >> { %v1083_v21 = vadd.f32 %v19155_v31, %v1082_v16  ;;  %v15655_v22 = vpop.f32.mrb[41].mxu0 }
 0x151   : >> { %v1085_v24 = vpop.f32.mrb[42].mxu0  ;;  %14229 = vmatprep.subr.bf16.mxu1 %v1499_v19 }
 0x152   : >> { %v1086_v25 = vadd.f32 %v19155_v31, %v1085_v24  ;;  %v15656_v26 = vpop.f32.mrb[43].mxu0  ;;  %14230 = vmatpush3.bf16.msra.mxu1 %v1491_v51  ;;  %18234 = vtanh.f32 %v1083_v21 }
 0x154   : >> { %18236 = vtanh.f32 %v1086_v25  ;;  %15762 = vmatmul.mubr.msk.bf16.gmra.mrb[148].mxu0 %vm820_vm1, %v17843_v23  ;;  %v18231_v29 = vpop.eup %18230  ;;  %v17848_v23 = vld [vmem:[%s19037_s27 + $0x150] sm:$0xff]  }
 0x155   : >> { %15765 = vmatprep.mubr.msk.bf16.mxu0 %vm18885_vm0, %v18884_v1 }
 0x156   : >> { %v18233_v32 = vpop.eup %18232 }
 0x157   : >> { %v1090_v33 = vpop.f32.mrb[44].mxu0  ;;  %v1500_v34 = vpack.c.bf16 %v18233_v32, %v18231_v29 }
 0x158   : >> { %v1091_v35 = vadd.f32 %v19155_v31, %v1090_v33  ;;  %v15659_v36 = vpop.f32.mrb[45].mxu0 }
 0x159   : >> { %v1093_v40 = vpop.f32.mrb[46].mxu0  ;;  %14231 = vmatprep.subr.bf16.mxu1 %v1500_v34  ;;  %v17849_v34 = vld [vmem:[%s19037_s27 + $0x158] sm:$0xff]  }
 0x15a   : >> { %v1094_v48 = vadd.f32 %v19155_v31, %v1093_v40  ;;  %v15660_v49 = vpop.f32.mrb[47].mxu0  ;;  %14232 = vmatpush3.bf16.msra.mxu1 %v1492_v62  ;;  %18238 = vtanh.f32 %v1091_v35 }
 0x15c   : >> { %18240 = vtanh.f32 %v1094_v48  ;;  %15766 = vmatmul.mubr.msk.bf16.gmra.mrb[152].mxu0 %vm820_vm1, %v17844_v37  ;;  %v18235_v51 = vpop.eup %18234 }
 0x15d   : >> { %15769 = vmatprep.mubr.msk.bf16.mxu0 %vm18885_vm0, %v18884_v1 }
 0x15e   : >> { %v18237_v42 = vpop.eup %18236 }
 0x15f   : >> { %v1098_v43 = vpop.f32.mrb[48].mxu0  ;;  %v1501_v44 = vpack.c.bf16 %v18237_v42, %v18235_v51  ;;  %v17851_v51 = vld [vmem:[%s19037_s27 + $0x160] sm:$0xff]   ;;  %s18816_s27 = sshll.u32 (%p447_p11), %s18888_s15, 4  ;;  %s18817_s27 = int_to_ptr.vmem [resolvable:$false] %s18816_s27 }
 0x160   : >> { %v1099_v45 = vadd.f32 %v19155_v31, %v1098_v43  ;;  %v15663_v46 = vpop.f32.mrb[49].mxu0  ;;  %v17857_v43 = vld [vmem:[%s23785_s3 + $0x3c] ss:$28 sps:$4 sm:$0xff]   ;;  %s18818_s23 = scalar_lea.vmem (%p447_p11), %s18817_s27, 256  ;;  %p18819_p1 = scmp.lt.s32.totalorder (%p447_p11), %s23738_s0, %s18817_s27 }
 0x161   : >> { %v1101_v53 = vpop.f32.mrb[50].mxu0  ;;  %14233 = vmatprep.subr.bf16.mxu1 %v1501_v44  ;;  %p18820_p2 = scmp.lt.s32.totalorder (%p447_p11), %s18818_s23, %s18812_s17 }
 0x162   : >> { %v1102_v59 = vadd.f32 %v19155_v31, %v1101_v53  ;;  %v15664_v60 = vpop.f32.mrb[51].mxu0  ;;  %14234 = vmatpush3.bf16.msra.mxu1 %v1493_v10  ;;  %18242 = vtanh.f32 %v1099_v45  ;;  %v17859_v53 = vld [vmem:[%s23785_s3 + $0x38] ss:$28 sps:$4 sm:$0xff]  }
 0x163   : > { %p18821_p3 = por (%p447_p11), %p18820_p2, %p18819_p1 }
 0x164   : >> { %18244 = vtanh.f32 %v1102_v59  ;;  %15770 = vmatmul.mubr.msk.bf16.gmra.mrb[156].mxu0 %vm820_vm1, %v17845_v47  ;;  %v18239_v62 = vpop.eup %18238 }
 0x165   : >> { %15773 = vmatprep.mubr.msk.bf16.mxu0 %vm18885_vm0, %v18884_v1  ;;  %p18822_p4 = pnand (%p447_p11), %p18821_p3, %p18815_p0 }
 0x166   : >> { %v18241_v55 = vpop.eup %18240 }
 0x167   : >> { %v1106_v56 = vpop.f32.mrb[52].mxu0  ;;  %v1502_v57 = vpack.c.bf16 %v18241_v55, %v18239_v62  ;;  %v17860_v62 = vld [vmem:[%s23785_s3 + $0x74] ss:$28 sps:$4 sm:$0xff]  }
 0x168   : >> { %v1107_v58 = vadd.f32 %v19155_v31, %v1106_v56  ;;  %v15667_v61 = vpop.f32.mrb[53].mxu0 }
 0x169   : >> { %v1109_v3 = vpop.f32.mrb[54].mxu0  ;;  %14235 = vmatprep.subr.bf16.mxu1 %v1502_v57 }
 0x16a   : >> { %v1110_v7 = vadd.f32 %v19155_v31, %v1109_v3  ;;  %v15668_v8 = vpop.f32.mrb[55].mxu0  ;;  %14236 = vmatpush3.bf16.msra.mxu1 %v1494_v20  ;;  %18246 = vtanh.f32 %v1107_v58 }
 0x16c   : >> { %18248 = vtanh.f32 %v1110_v7  ;;  %15774 = vmatmul.mubr.msk.bf16.gmra.mrb[160].mxu0 %vm820_vm1, %v17846_v63  ;;  %v18243_v10 = vpop.eup %18242  ;;  %v17862_v7 = vld [vmem:[%s23785_s3 + $0x70] ss:$28 sps:$4 sm:$0xff]  }
 0x16d   : >> { %15777 = vmatprep.mubr.msk.bf16.mxu0 %vm18885_vm0, %v18884_v1 }
 0x16e   : >> { %v18245_v5 = vpop.eup %18244 }
 0x16f   : >> { %v1114_v6 = vpop.f32.mrb[56].mxu0  ;;  %v1503_v9 = vpack.c.bf16 %v18245_v5, %v18243_v10  ;;  %v17863_v5 = vld [vmem:[%s23785_s3 + $0xac] ss:$28 sps:$4 sm:$0xff]  }
 0x170   : >> { %v1115_v11 = vadd.f32 %v19155_v31, %v1114_v6  ;;  %v15671_v12 = vpop.f32.mrb[57].mxu0 }
 0x171   : >> { %v1117_v14 = vpop.f32.mrb[58].mxu0  ;;  %14237 = vmatprep.subr.bf16.mxu1 %v1503_v9 }
 0x172   : >> { %v1118_v17 = vadd.f32 %v19155_v31, %v1117_v14  ;;  %v15672_v18 = vpop.f32.mrb[59].mxu0  ;;  %14238 = vmatpush3.bf16.msra.mxu1 %v1495_v30  ;;  %18250 = vtanh.f32 %v1115_v11 }
 0x173   : >> { %v17865_v18 = vld [vmem:[%s23785_s3 + $0xa8] ss:$28 sps:$4 sm:$0xff]  }
 0x174   : >> { %18252 = vtanh.f32 %v1118_v17  ;;  %15778 = vmatmul.mubr.msk.bf16.gmra.mrb[164].mxu0 %vm820_vm1, %v17847_v13  ;;  %v18247_v20 = vpop.eup %18246 }
 0x175   : >> { %15781 = vmatprep.mubr.msk.bf16.mxu0 %vm18885_vm0, %v18884_v1 }
 0x176   : >> { %v18249_v15 = vpop.eup %18248 }
 0x177   : >> { %v1122_v16 = vpop.f32.mrb[60].mxu0  ;;  %v1504_v19 = vpack.c.bf16 %v18249_v15, %v18247_v20 }
 0x178   : >> { %v1123_v21 = vadd.f32 %v19155_v31, %v1122_v16  ;;  %v15675_v22 = vpop.f32.mrb[61].mxu0  ;;  %v17866_v16 = vld [vmem:[%s23785_s3 + $0xe4] ss:$28 sps:$4 sm:$0xff]  }
 0x179   : >> { %v1125_v24 = vpop.f32.mrb[62].mxu0  ;;  %14239 = vmatprep.subr.bf16.mxu1 %v1504_v19 }
 0x17a   : >> { %v1126_v27 = vadd.f32 %v19155_v31, %v1125_v24  ;;  %v15676_v28 = vpop.f32.mrb[63].mxu0  ;;  %14240 = vmatpush3.bf16.msra.mxu1 %v1496_v41  ;;  %18254 = vtanh.f32 %v1123_v21 }
 0x17c   : >> { %18256 = vtanh.f32 %v1126_v27  ;;  %15782 = vmatmul.mubr.msk.bf16.gmra.mrb[168].mxu0 %vm820_vm1, %v17848_v23  ;;  %v18251_v30 = vpop.eup %18250 }
 0x17d   : >> { %15785 = vmatprep.mubr.msk.bf16.mxu0 %vm18885_vm0, %v18884_v1 }
 0x17e   : >> { %v18253_v25 = vpop.eup %18252 }
 0x17f   : >> { %v1130_v26 = vpop.f32.mrb[64].mxu0  ;;  %v1505_v29 = vpack.c.bf16 %v18253_v25, %v18251_v30  ;;  %v17868_v30 = vld [vmem:[%s23785_s3 + $0xe0] ss:$28 sps:$4 sm:$0xff]  }
 0x180   : >> { %v1131_v32 = vadd.f32 %v19155_v31, %v1130_v26  ;;  %v15679_v33 = vpop.f32.mrb[65].mxu0 }
 0x181   : >> { %v1133_v35 = vpop.f32.mrb[66].mxu0  ;;  %14241 = vmatprep.subr.bf16.mxu1 %v1505_v29  ;;  %v17869_v29 = vld [vmem:[%s23785_s3 + $0x11c] ss:$28 sps:$4 sm:$0xff]  }
 0x182   : >> { %v1134_v38 = vadd.f32 %v19155_v31, %v1133_v35  ;;  %v15680_v39 = vpop.f32.mrb[67].mxu0  ;;  %14242 = vmatpush3.bf16.msra.mxu1 %v1497_v54  ;;  %18258 = vtanh.f32 %v1131_v32 }
 0x184   : >> { %18260 = vtanh.f32 %v1134_v38  ;;  %15786 = vmatmul.mubr.msk.bf16.gmra.mrb[172].mxu0 %vm820_vm1, %v17849_v34  ;;  %v18255_v41 = vpop.eup %18254 }
 0x185   : >> { %15789 = vmatprep.mubr.msk.bf16.mxu0 %vm18885_vm0, %v18884_v1 }
 0x186   : >> { %v18257_v36 = vpop.eup %18256 }
 0x187   : >> { %v1138_v37 = vpop.f32.mrb[68].mxu0  ;;  %v1506_v40 = vpack.c.bf16 %v18257_v36, %v18255_v41  ;;  %v17871_v36 = vld [vmem:[%s23785_s3 + $0x118] ss:$28 sps:$4 sm:$0xff]  }
 0x188   : >> { %v1139_v48 = vadd.f32 %v19155_v31, %v1138_v37  ;;  %v15683_v49 = vpop.f32.mrb[69].mxu0 }
 0x189   : >> { %v1141_v42 = vpop.f32.mrb[70].mxu0  ;;  %14243 = vmatprep.subr.bf16.mxu1 %v1506_v40 }
 0x18a   : >> { %v1142_v52 = vadd.f32 %v19155_v31, %v1141_v42  ;;  %v15684_v54 = vpop.f32.mrb[71].mxu0  ;;  %14244 = vmatpush3.bf16.msra.mxu1 %v1498_v4  ;;  %18262 = vtanh.f32 %v1139_v48  ;;  %v17872_v48 = vld [vmem:[%s23785_s3 + $0x154] ss:$28 sps:$4 sm:$0xff]  }
 0x18c   : >> { %18264 = vtanh.f32 %v1142_v52  ;;  %15790 = vmatmul.mubr.msk.bf16.gmra.mrb[176].mxu0 %vm820_vm1, %v17851_v51  ;;  %v19357_v44 = vpop.eup %18258 }
 0x18d   : >> { %2218 = vmatmul.mubr.bf16.vlgmr.msra.gmra.mrb[16].mxu1 %v17854_v50  ;;  %15855 = vmatprep.mubr.msk.bf16.mxu0 %vm18885_vm0, %v18884_v1 }
 0x18e   : >> { %v19361_v45 = vpop.eup %18260  ;;  %2225 = vmatprep.mubr.bf16.mxu1 %v17857_v43 }
 0x18f   : >> { %v1146_v46 = vpop.f32.mrb[72].mxu0  ;;  %v1507_v0 = vpack.c.bf16 %v19361_v45, %v19357_v44 }
 0x190   : >> { %v1147_v2 = vadd.f32 %v19155_v31, %v1146_v46  ;;  %v15687_v4 = vpop.f32.mrb[73].mxu0  ;;  %v17874_v46 = vld [vmem:[%s23785_s3 + $0x150] ss:$28 sps:$4 sm:$0xff]  }
 0x191   : >> { %v1149_v47 = vpop.f32.mrb[74].mxu0 }
 0x192   : >> { %v1150_v59 = vadd.f32 %v19155_v31, %v1149_v47  ;;  %v15688_v60 = vpop.f32.mrb[75].mxu0  ;;  %18266 = vtanh.f32 %v1147_v2  ;;  %v17875_v47 = vld [vmem:[%s23785_s3 + $0x18c] ss:$28 sps:$4 sm:$0xff]  }
 0x194   : >> { %18268 = vtanh.f32 %v1150_v59  ;;  %v19373_v55 = vpop.eup %18262 }
 0x195   : >> { %2226 = vmatmul.mubr.bf16.gmra.mrb[20].mxu1 %v17859_v53 }
 0x196   : >> { %v19375_v56 = vpop.eup %18264  ;;  %2233 = vmatprep.mubr.bf16.mxu1 %v17860_v62 }
 0x197   : >> { %v1154_v57 = vpop.f32.mrb[76].mxu0  ;;  %v1508_v58 = vpack.c.bf16 %v19375_v56, %v19373_v55 }
 0x198   : >> { %v1155_v61 = vadd.f32 %v19155_v31, %v1154_v57  ;;  %v15691_v63 = vpop.f32.mrb[77].mxu0 }
 0x199   : >> { %v1157_v3 = vpop.f32.mrb[78].mxu0 }
 0x19a   : >> { %v1158_v8 = vadd.f32 %v19155_v31, %v1157_v3  ;;  %v15692_v10 = vpop.f32.mrb[79].mxu0  ;;  %18270 = vtanh.f32 %v1155_v61  ;;  %v17877_v3 = vld [vmem:[%s23785_s3 + $0x188] ss:$28 sps:$4 sm:$0xff]  }
 0x19b   : >> { %v17878_v10 = vld [vmem:[%s23785_s3 + $0x1c4] ss:$28 sps:$4 sm:$0xff]  }
 0x19c   : >> { %18272 = vtanh.f32 %v1158_v8  ;;  %v19387_v6 = vpop.eup %18266 }
 0x19d   : >> { %2234 = vmatmul.mubr.bf16.gmra.mrb[24].mxu1 %v17862_v7 }
 0x19e   : >> { %v19389_v9 = vpop.eup %18268  ;;  %2241 = vmatprep.mubr.bf16.mxu1 %v17863_v5 }
 0x19f   : >> { %v1162_v11 = vpop.f32.mrb[80].mxu0  ;;  %v1509_v12 = vpack.c.bf16 %v19389_v9, %v19387_v6 }
 0x1a0   : >> { %v1163_v13 = vadd.f32 %v19155_v31, %v1162_v11  ;;  %v15695_v14 = vpop.f32.mrb[81].mxu0 }
 0x1a1   : >> { %v1165_v17 = vpop.f32.mrb[82].mxu0 }
 0x1a2   : >> { %v1166_v20 = vadd.f32 %v19155_v31, %v1165_v17  ;;  %v15696_v15 = vpop.f32.mrb[83].mxu0  ;;  %18274 = vtanh.f32 %v1163_v13 }
 0x1a3   : >> { %v17880_v15 = vld [vmem:[%s23785_s3 + $0x1c0] ss:$28 sps:$4 sm:$0xff]  }
 0x1a4   : >> { %18276 = vtanh.f32 %v1166_v20  ;;  %v19401_v19 = vpop.eup %18270 }
 0x1a5   : >> { %2242 = vmatmul.mubr.bf16.gmra.mrb[28].mxu1 %v17865_v18 }
 0x1a6   : >> { %v19403_v21 = vpop.eup %18272  ;;  %2249 = vmatprep.mubr.bf16.mxu1 %v17866_v16 }
 0x1a7   : >> { %v1170_v22 = vpop.f32.mrb[84].mxu0  ;;  %v1510_v23 = vpack.c.bf16 %v19403_v21, %v19401_v19 }
 0x1a8   : >> { %v1171_v24 = vadd.f32 %v19155_v31, %v1170_v22  ;;  %v15699_v27 = vpop.f32.mrb[85].mxu0 }
 0x1a9   : >> { %v1173_v28 = vpop.f32.mrb[86].mxu0 }
 0x1aa   : >> { %v1174_v25 = vadd.f32 %v19155_v31, %v1173_v28  ;;  %v15700_v26 = vpop.f32.mrb[87].mxu0  ;;  %18278 = vtanh.f32 %v1171_v24  ;;  %v17881_v24 = vld [vmem:[%s23785_s3 + $0x1fc] ss:$28 sps:$4 sm:$0xff]  }
 0x1ac   : >> { %18280 = vtanh.f32 %v1174_v25  ;;  %v19415_v32 = vpop.eup %18274 }
 0x1ad   : >> { %2250 = vmatmul.mubr.bf16.gmra.mrb[32].mxu1 %v17868_v30 }
 0x1ae   : >> { %v19417_v33 = vpop.eup %18276  ;;  %2257 = vmatprep.mubr.bf16.mxu1 %v17869_v29 }
 0x1af   : >> { %v1178_v34 = vpop.f32.mrb[88].mxu0  ;;  %v1511_v35 = vpack.c.bf16 %v19417_v33, %v19415_v32 }
 0x1b0   : >> { %v1179_v38 = vadd.f32 %v19155_v31, %v1178_v34  ;;  %v15703_v39 = vpop.f32.mrb[89].mxu0 }
 0x1b1   : >> { %v1181_v41 = vpop.f32.mrb[90].mxu0  ;;  %v1362_v39 = vpop.f32.mrb[0].mxu1 }
 0x1b2   : >> { %v1182_v37 = vadd.f32 %v19155_v31, %v1181_v41  ;;  %v15704_v40 = vpop.f32.mrb[91].mxu0  ;;  %18282 = vtanh.f32 %v1179_v38  ;;  %v17883_v38 = vld [vmem:[%s23785_s3 + $0x1f8] ss:$28 sps:$4 sm:$0xff]  }
 0x1b3   : >> { %v15795_v40 = vpop.f32.mrb[1].mxu1 }
 0x1b4   : >> { %18284 = vtanh.f32 %v1182_v37  ;;  %v19429_v49 = vpop.eup %18278  ;;  %v17884_v37 = vld [vmem:[%s23785_s3 + $0x234] ss:$28 sps:$4 sm:$0xff]  }
 0x1b5   : >> { %2258 = vmatmul.mubr.bf16.gmra.mrb[36].mxu1 %v17871_v36 }
 0x1b6   : >> { %v19431_v51 = vpop.eup %18280  ;;  %2265 = vmatprep.mubr.bf16.mxu1 %v17872_v48  ;;  %v1365_v48 = vpop.f32.mrb[2].mxu1 }
 0x1b7   : >> { %v1186_v42 = vpop.f32.mrb[92].mxu0  ;;  %v1512_v50 = vpack.c.bf16 %v19431_v51, %v19429_v49 }
 0x1b8   : >> { %v1187_v52 = vadd.f32 %v19155_v31, %v1186_v42  ;;  %v15707_v54 = vpop.f32.mrb[93].mxu0  ;;  %v15796_v42 = vpop.f32.mrb[3].mxu1 }
 0x1b9   : >> { %v1189_v43 = vpop.f32.mrb[94].mxu0  ;;  %v1363_v54 = vadd.f32 %v19155_v31, %v1362_v39 }
 0x1ba   : >> { %v1190_v2 = vadd.f32 %v19155_v31, %v1189_v43  ;;  %v15708_v4 = vpop.f32.mrb[95].mxu0  ;;  %18286 = vtanh.f32 %v1187_v52  ;;  %v1366_v43 = vadd.f32 %v19155_v31, %v1365_v48 }
 0x1bc   : >> { %18288 = vtanh.f32 %v1190_v2  ;;  %v19443_v53 = vpop.eup %18282 }
 0x1bd   : >> { %2266 = vmatmul.mubr.bf16.gmra.mrb[40].mxu1 %v17874_v46 }
 0x1be   : >> { %v19445_v59 = vpop.eup %18284  ;;  %2273 = vmatprep.mubr.bf16.mxu1 %v17875_v47  ;;  %v17886_v47 = vld [vmem:[%s23785_s3 + $0x230] ss:$28 sps:$4 sm:$0xff]  }
 0x1bf   : >> { %v1194_v60 = vpop.f32.mrb[96].mxu0  ;;  %v1513_v62 = vpack.c.bf16 %v19445_v59, %v19443_v53  ;;  %v17899_v53 = vld [vmem:[%s23785_s3 + $0x44] ss:$28 sps:$4 sm:$0xff]  }
 0x1c0   : >> { %v1195_v57 = vadd.f32 %v19155_v31, %v1194_v60  ;;  %v15711_v61 = vpop.f32.mrb[97].mxu0  ;;  %v1370_v60 = vpop.f32.mrb[4].mxu1 }
 0x1c1   : >> { %v1197_v63 = vpop.f32.mrb[98].mxu0 }
 0x1c2   : >> { %v1198_v7 = vadd.f32 %v19155_v31, %v1197_v63  ;;  %v15712_v8 = vpop.f32.mrb[99].mxu0  ;;  %18290 = vtanh.f32 %v1195_v57  ;;  %v17887_v63 = vld [vmem:[%s23785_s3 + $0x26c] ss:$28 sps:$4 sm:$0xff]  }
 0x1c4   : >> { %18292 = vtanh.f32 %v1198_v7  ;;  %v19457_v5 = vpop.eup %18286 }
 0x1c5   : >> { %2274 = vmatmul.mubr.bf16.gmra.mrb[44].mxu1 %v17877_v3  ;;  %v15799_v3 = vpop.f32.mrb[5].mxu1 }
 0x1c6   : >> { %v19459_v11 = vpop.eup %18288  ;;  %2281 = vmatprep.mubr.bf16.mxu1 %v17878_v10  ;;  %v1373_v7 = vpop.f32.mrb[6].mxu1 }
 0x1c7   : >> { %v1202_v13 = vpop.f32.mrb[100].mxu0  ;;  %v1514_v14 = vpack.c.bf16 %v19459_v11, %v19457_v5  ;;  %v15800_v8 = vpop.f32.mrb[7].mxu1 }
 0x1c8   : >> { %v1203_v17 = vadd.f32 %v19155_v31, %v1202_v13  ;;  %v15715_v18 = vpop.f32.mrb[101].mxu0  ;;  %v1371_v13 = vadd.f32 %v19155_v31, %v1370_v60 }
 0x1c9   : >> { %v1205_v20 = vpop.f32.mrb[102].mxu0 }
 0x1ca   : >> { %v1206_v16 = vadd.f32 %v19155_v31, %v1205_v20  ;;  %v15716_v22 = vpop.f32.mrb[103].mxu0  ;;  %18294 = vtanh.f32 %v1203_v17  ;;  %v1374_v17 = vadd.f32 %v19155_v31, %v1373_v7 }
 0x1cb   : >> { %v17889_v22 = vld [vmem:[%s23785_s3 + $0x268] ss:$28 sps:$4 sm:$0xff]  }
 0x1cc   : >> { %18296 = vtanh.f32 %v1206_v16  ;;  %v18291_v27 = vpop.eup %18290 }
 0x1cd   : >> { %2282 = vmatmul.mubr.bf16.gmra.mrb[48].mxu1 %v17880_v15 }
 0x1ce   : >> { %v18293_v28 = vpop.eup %18292  ;;  %2289 = vmatprep.mubr.bf16.mxu1 %v17881_v24  ;;  %v1378_v24 = vpop.f32.mrb[8].mxu1 }
 0x1cf   : >> { %v1210_v30 = vpop.f32.mrb[104].mxu0  ;;  %v1515_v25 = vpack.c.bf16 %v18293_v28, %v18291_v27 }
 0x1d0   : >> { %v1211_v26 = vadd.f32 %v19155_v31, %v1210_v30  ;;  %v15719_v29 = vpop.f32.mrb[105].mxu0 }
 0x1d1   : >> { %v1213_v34 = vpop.f32.mrb[106].mxu0  ;;  %14329 = vmatprep.subr.bf16.mxu1 %v1515_v25  ;;  %v17890_v25 = vld [vmem:[%s23785_s3 + $0x2a4] ss:$28 sps:$4 sm:$0xff]  }
 0x1d2   : >> { %v1214_v41 = vadd.f32 %v19155_v31, %v1213_v34  ;;  %v15720_v36 = vpop.f32.mrb[107].mxu0  ;;  %14330 = vmatpush3.bf16.msra.mxu1 %v1507_v0  ;;  %18298 = vtanh.f32 %v1211_v26  ;;  %v15803_v26 = vpop.f32.mrb[9].mxu1 }
 0x1d3   : >> { %v1381_v29 = vpop.f32.mrb[10].mxu1 }
 0x1d4   : >> { %18300 = vtanh.f32 %v1214_v41  ;;  %v18295_v52 = vpop.eup %18294  ;;  %v1379_v41 = vadd.f32 %v19155_v31, %v1378_v24  ;;  %v1382_v36 = vadd.f32 %v19155_v31, %v1381_v29 }
 0x1d5   : >> { %2290 = vmatmul.mubr.bf16.gmra.mrb[52].mxu1 %v17883_v38  ;;  %18302 = vtanh.f32 %v1363_v54  ;;  %v15804_v38 = vpop.f32.mrb[11].mxu1 }
 0x1d6   : >> { %v18297_v46 = vpop.eup %18296  ;;  %2297 = vmatprep.mubr.bf16.mxu1 %v17884_v37  ;;  %18304 = vtanh.f32 %v1366_v43  ;;  %v1386_v54 = vpop.f32.mrb[12].mxu1 }
 0x1d7   : >> { %v1218_v2 = vpop.f32.mrb[108].mxu0  ;;  %v1516_v44 = vpack.c.bf16 %v18297_v46, %v18295_v52  ;;  %v17892_v52 = vld [vmem:[%s23785_s3 + $0x2a0] ss:$28 sps:$4 sm:$0xff]  }
 0x1d8   : >> { %v1219_v45 = vadd.f32 %v19155_v31, %v1218_v2  ;;  %v15723_v0 = vpop.f32.mrb[109].mxu0 }
 0x1d9   : >> { %v1221_v4 = vpop.f32.mrb[110].mxu0  ;;  %14331 = vmatprep.subr.bf16.mxu1 %v1516_v44  ;;  %v17893_v44 = vld [vmem:[%s23785_s3 + $0x2dc] ss:$28 sps:$4 sm:$0xff]  }
 0x1da   : >> { %v1222_v57 = vadd.f32 %v19155_v31, %v1221_v4  ;;  %v15724_v61 = vpop.f32.mrb[111].mxu0  ;;  %14332 = vmatpush3.bf16.msra.mxu1 %v1508_v58  ;;  %18306 = vtanh.f32 %v1219_v45  ;;  %v15807_v45 = vpop.f32.mrb[13].mxu1 }
 0x1db   : >> { %v1389_v4 = vpop.f32.mrb[14].mxu1 }
 0x1dc   : >> { %18308 = vtanh.f32 %v1222_v57  ;;  %v18299_v10 = vpop.eup %18298 }
 0x1dd   : >> { %2298 = vmatmul.mubr.bf16.gmra.mrb[56].mxu1 %v17886_v47  ;;  %18310 = vtanh.f32 %v1371_v13  ;;  %v15808_v47 = vpop.f32.mrb[15].mxu1 }
 0x1de   : >> { %v18301_v18 = vpop.eup %18300  ;;  %2305 = vmatprep.mubr.bf16.mxu1 %v17887_v63  ;;  %18312 = vtanh.f32 %v1374_v17 }
 0x1df   : >> { %v1226_v20 = vpop.f32.mrb[112].mxu0  ;;  %v1517_v55 = vpack.c.bf16 %v18301_v18, %v18299_v10  ;;  %v19498_v15 = vpop.eup %18302  ;;  %v17895_v10 = vld [vmem:[%s23785_s3 + $0x2d8] ss:$28 sps:$4 sm:$0xff]  }
 0x1e0   : >> { %v1227_v56 = vadd.f32 %v19155_v31, %v1226_v20  ;;  %v15727_v58 = vpop.f32.mrb[113].mxu0  ;;  %v19503_v27 = vpop.eup %18304  ;;  %v17898_v20 = vld [vmem:[%s23785_s3 + $0xc] ss:$28 sps:$4 sm:$0xff]  }
 0x1e1   : >> { %v1229_v16 = vpop.f32.mrb[114].mxu0  ;;  %14333 = vmatprep.subr.bf16.mxu1 %v1517_v55  ;;  %v1536_v34 = vpack.c.bf16 %v19503_v27, %v19498_v15 }
 0x1e2   : >> { %v1230_v28 = vadd.f32 %v19155_v31, %v1229_v16  ;;  %v15728_v30 = vpop.f32.mrb[115].mxu0  ;;  %14334 = vmatpush3.bf16.msra.mxu1 %v1509_v12  ;;  %18314 = vtanh.f32 %v1227_v56 }
 0x1e4   : >> { %18316 = vtanh.f32 %v1230_v28  ;;  %v18307_v39 = vpop.eup %18306 }
 0x1e5   : >> { %2306 = vmatmul.mubr.bf16.gmra.mrb[60].mxu1 %v17889_v22  ;;  %18318 = vtanh.f32 %v1379_v41 }
 0x1e6   : >> { %v18309_v6 = vpop.eup %18308  ;;  %2313 = vmatprep.mubr.bf16.mxu1 %v17890_v25  ;;  %18320 = vtanh.f32 %v1382_v36 }
 0x1e7   : >> { %v1234_v9 = vpop.f32.mrb[116].mxu0  ;;  %v1518_v12 = vpack.c.bf16 %v18309_v6, %v18307_v39  ;;  %v19517_v48 = vpop.eup %18310 }
 0x1e8   : >> { %v1235_v37 = vadd.f32 %v19155_v31, %v1234_v9  ;;  %v15731_v40 = vpop.f32.mrb[117].mxu0  ;;  %v19522_v43 = vpop.eup %18312 }
 0x1e9   : >> { %v1237_v42 = vpop.f32.mrb[118].mxu0  ;;  %14335 = vmatprep.subr.bf16.mxu1 %v1518_v12  ;;  %v1537_v0 = vpack.c.bf16 %v19522_v43, %v19517_v48  ;;  %v17938_v48 = vld [vmem:[%s23785_s3 + $0x10] ss:$28 sps:$4 sm:$0xff]  }
 0x1ea   : >> { %v1238_v46 = vadd.f32 %v19155_v31, %v1237_v42  ;;  %v15732_v2 = vpop.f32.mrb[119].mxu0  ;;  %14336 = vmatpush3.bf16.msra.mxu1 %v1510_v23  ;;  %18322 = vtanh.f32 %v1235_v37  ;;  %v19536_v31 = vld [vmem:[%s23807_s2] ss:$0 sm:$0xff]  ;;  %v17941_v43 = vld [vmem:[%s23785_s3 + $0x4c] ss:$28 sps:$4 sm:$0xff]   ;;  %s23736_s2 = scalar_lea.hbm (%p447_p11), %s23795_s13, %s14173_s24 }
 0x1eb   : >> { %v1387_v19 = vadd.f32 %v19536_v31, %v1386_v54  ;;  %v1390_v21 = vadd.f32 %v19536_v31, %v1389_v4 }
 0x1ec   : >> { %18324 = vtanh.f32 %v1238_v46  ;;  %v18315_v60 = vpop.eup %18314  ;;  %v17896_v46 = vld [vmem:[%s23785_s3 + $0x8] ss:$28 sps:$4 sm:$0xff]  }
 0x1ed   : >> { %2314 = vmatmul.mubr.bf16.gmra.mrb[64].mxu1 %v17892_v52  ;;  %18326 = vtanh.f32 %v1387_v19 }
 0x1ee   : >> { %v18317_v23 = vpop.eup %18316  ;;  %2321 = vmatprep.mubr.bf16.mxu1 %v17893_v44  ;;  %18328 = vtanh.f32 %v1390_v21  ;;  %v17902_v21 = vld [vmem:[%s23785_s3 + $0x7c] ss:$28 sps:$4 sm:$0xff]  }
 0x1ef   : >> { %v1242_v57 = vpop.f32.mrb[120].mxu0  ;;  %v1519_v61 = vpack.c.bf16 %v18317_v23, %v18315_v60  ;;  %v19541_v7 = vpop.eup %18318 }
 0x1f0   : >> { %v1243_v63 = vadd.f32 %v19536_v31, %v1242_v57  ;;  %v15735_v3 = vpop.f32.mrb[121].mxu0  ;;  %v19546_v13 = vpop.eup %18320 }
 0x1f1   : >> { %v1245_v8 = vpop.f32.mrb[122].mxu0  ;;  %14337 = vmatprep.subr.bf16.mxu1 %v1519_v61  ;;  %v1538_v55 = vpack.c.bf16 %v19546_v13, %v19541_v7 }
 0x1f2   : >> { %v1246_v17 = vadd.f32 %v19536_v31, %v1245_v8  ;;  %v15736_v18 = vpop.f32.mrb[123].mxu0  ;;  %14338 = vmatpush3.bf16.msra.mxu1 %v1511_v35  ;;  %18330 = vtanh.f32 %v1243_v63 }
 0x1f4   : >> { %18332 = vtanh.f32 %v1246_v17  ;;  %v18323_v56 = vpop.eup %18322  ;;  %v17904_v17 = vld [vmem:[%s23785_s3 + $0x78] ss:$28 sps:$4 sm:$0xff]  }
 0x1f5   : >> { %2322 = vmatmul.mubr.bf16.gmra.mrb[68].mxu1 %v17895_v10 }
 0x1f6   : >> { %v18325_v58 = vpop.eup %18324  ;;  %2362 = vmatprep.mubr.bf16.mxu1 %v17898_v20 }
 0x1f7   : >> { %v1250_v16 = vpop.f32.mrb[124].mxu0  ;;  %v1520_v22 = vpack.c.bf16 %v18325_v58, %v18323_v56  ;;  %v18327_v32 = vpop.eup %18326  ;;  %v17905_v56 = vld [vmem:[%s23785_s3 + $0xb4] ss:$28 sps:$4 sm:$0xff]  }
 0x1f8   : >> { %v1251_v24 = vadd.f32 %v19536_v31, %v1250_v16  ;;  %v15739_v28 = vpop.f32.mrb[125].mxu0  ;;  %v18329_v35 = vpop.eup %18328 }
 0x1f9   : >> { %v1253_v33 = vpop.f32.mrb[126].mxu0  ;;  %14339 = vmatprep.subr.bf16.mxu1 %v1520_v22  ;;  %v19562_v26 = vpack.c.bf16 %v18329_v35, %v18327_v32  ;;  %v17907_v35 = vld [vmem:[%s23785_s3 + $0xb0] ss:$28 sps:$4 sm:$0xff]  }
 0x1fa   : >> { %v1254_v30 = vadd.f32 %v19536_v31, %v1253_v33  ;;  %v15740_v25 = vpop.f32.mrb[127].mxu0  ;;  %14340 = vmatpush3.bf16.msra.mxu1 %v1512_v50  ;;  %18334 = vtanh.f32 %v1251_v24 }
 0x1fc   : >> { %18336 = vtanh.f32 %v1254_v30  ;;  %v18331_v29 = vpop.eup %18330 }
 0x1fe   : >> { %v18333_v38 = vpop.eup %18332 }
 0x1ff   : >> { %v1258_v39 = vpop.f32.mrb[128].mxu0  ;;  %v1521_v41 = vpack.c.bf16 %v18333_v38, %v18331_v29  ;;  %v17908_v29 = vld [vmem:[%s23785_s3 + $0xec] ss:$28 sps:$4 sm:$0xff]  }
 0x200   : >> { %v1259_v36 = vadd.f32 %v19536_v31, %v1258_v39  ;;  %v15743_v6 = vpop.f32.mrb[129].mxu0 }
 0x201   : >> { %v1261_v9 = vpop.f32.mrb[130].mxu0  ;;  %14341 = vmatprep.subr.bf16.mxu1 %v1521_v41 }
 0x202   : >> { %v1262_v12 = vadd.f32 %v19536_v31, %v1261_v9  ;;  %v15744_v37 = vpop.f32.mrb[131].mxu0  ;;  %14342 = vmatpush3.bf16.msra.mxu1 %v1513_v62  ;;  %18338 = vtanh.f32 %v1259_v36 }
 0x203   : >> { %v17910_v37 = vld [vmem:[%s23785_s3 + $0xe8] ss:$28 sps:$4 sm:$0xff]  }
 0x204   : >> { %18340 = vtanh.f32 %v1262_v12  ;;  %v18335_v49 = vpop.eup %18334 }
 0x206   : >> { %v18337_v51 = vpop.eup %18336 }
 0x207   : >> { %v1266_v50 = vpop.f32.mrb[132].mxu0  ;;  %v1522_v40 = vpack.c.bf16 %v18337_v51, %v18335_v49  ;;  %v17956_v49 = vld [vmem:[%s23786_s4 + $0x40] sm:$0xff]  }
 0x208   : >> { %v1267_v42 = vadd.f32 %v19536_v31, %v1266_v50  ;;  %v15747_v52 = vpop.f32.mrb[133].mxu0  ;;  %15840 = vmatpush3.bf16.msra.mxu0 %v17956_v49 }
 0x209   : >> { %v1269_v54 = vpop.f32.mrb[134].mxu0  ;;  %14343 = vmatprep.subr.bf16.mxu1 %v1522_v40  ;;  %v17911_v40 = vld [vmem:[%s23785_s3 + $0x124] ss:$28 sps:$4 sm:$0xff]   ;;  %15841 = vmatprep.subr.bf16.mxu0 %v18884_v1 }
 0x20a   : >> { %v1270_v2 = vadd.f32 %v19536_v31, %v1269_v54  ;;  %v15748_v44 = vpop.f32.mrb[135].mxu0  ;;  %14344 = vmatpush3.bf16.msra.mxu1 %v1514_v14  ;;  %18342 = vtanh.f32 %v1267_v42  ;;  %v17901_v14 = vld [vmem:[%s23785_s3 + $0x40] ss:$28 sps:$4 sm:$0xff]  }
 0x20c   : >> { %18344 = vtanh.f32 %v1270_v2  ;;  %v19580_v59 = vpop.eup %18338 }
 0x20d   : >> { %2363 = vmatmul.mubr.bf16.vlgmr.msra.gmra.mrb[72].mxu1 %v17896_v46 }
 0x20e   : >> { %v19582_v62 = vpop.eup %18340  ;;  %2370 = vmatprep.mubr.bf16.mxu1 %v17899_v53 }
 0x20f   : >> { %v1274_v45 = vpop.f32.mrb[136].mxu0  ;;  %v1523_v4 = vpack.c.bf16 %v19582_v62, %v19580_v59  ;;  %v17928_v59 = vld [vmem:[%s23785_s3 + $0x238] ss:$28 sps:$4 sm:$0xff]   ;;  %v17975_v62 = vld [vmem:[%s23786_s4 + $0x48] sm:$0xff]  }
 0x210   : >> { %v1275_v47 = vadd.f32 %v19536_v31, %v1274_v45  ;;  %v15751_v5 = vpop.f32.mrb[137].mxu0  ;;  %v17913_v45 = vld [vmem:[%s23785_s3 + $0x120] ss:$28 sps:$4 sm:$0xff]   ;;  %15842 = vmatpush3.bf16.msra.mxu0 %v17975_v62 }
 0x211   : >> { %v1277_v11 = vpop.f32.mrb[138].mxu0  ;;  %15843 = vmatprep.subr.bf16.mxu0 %v18884_v1 }
 0x212   : >> { %v1278_v60 = vadd.f32 %v19536_v31, %v1277_v11  ;;  %v15752_v19 = vpop.f32.mrb[139].mxu0  ;;  %18346 = vtanh.f32 %v1275_v47  ;;  %v17914_v11 = vld [vmem:[%s23785_s3 + $0x15c] ss:$28 sps:$4 sm:$0xff]  }
 0x214   : >> { %18348 = vtanh.f32 %v1278_v60  ;;  %v19594_v23 = vpop.eup %18342 }
 0x215   : >> { %2371 = vmatmul.mubr.bf16.gmra.mrb[76].mxu1 %v17901_v14 }
 0x216   : >> { %v19596_v57 = vpop.eup %18344  ;;  %2378 = vmatprep.mubr.bf16.mxu1 %v17902_v21 }
 0x217   : >> { %v1282_v61 = vpop.f32.mrb[140].mxu0  ;;  %v1524_v63 = vpack.c.bf16 %v19596_v57, %v19594_v23 }
 0x218   : >> { %v1283_v3 = vadd.f32 %v19536_v31, %v1282_v61  ;;  %v15755_v8 = vpop.f32.mrb[141].mxu0 }
 0x219   : >> { %v1285_v10 = vpop.f32.mrb[142].mxu0 }
 0x21a   : >> { %v1286_v18 = vadd.f32 %v19536_v31, %v1285_v10  ;;  %v15756_v20 = vpop.f32.mrb[143].mxu0  ;;  %18350 = vtanh.f32 %v1283_v3  ;;  %v17916_v10 = vld [vmem:[%s23785_s3 + $0x158] ss:$28 sps:$4 sm:$0xff]  }
 0x21b   : >> { %v17917_v20 = vld [vmem:[%s23785_s3 + $0x194] ss:$28 sps:$4 sm:$0xff]  }
 0x21c   : >> { %18352 = vtanh.f32 %v1286_v18  ;;  %v19608_v58 = vpop.eup %18346 }
 0x21d   : >> { %2379 = vmatmul.mubr.bf16.gmra.mrb[80].mxu1 %v17904_v17 }
 0x21e   : >> { %v19610_v16 = vpop.eup %18348  ;;  %2386 = vmatprep.mubr.bf16.mxu1 %v17905_v56 }
 0x21f   : >> { %v1290_v22 = vpop.f32.mrb[144].mxu0  ;;  %v1525_v24 = vpack.c.bf16 %v19610_v16, %v19608_v58  ;;  %v17934_v16 = vld [vmem:[%s23785_s3 + $0x2a8] ss:$28 sps:$4 sm:$0xff]  }
 0x220   : >> { %v1291_v28 = vadd.f32 %v19536_v31, %v1290_v22  ;;  %v15759_v32 = vpop.f32.mrb[145].mxu0 }
 0x221   : >> { %v1293_v33 = vpop.f32.mrb[146].mxu0 }
 0x222   : >> { %v1294_v30 = vadd.f32 %v19536_v31, %v1293_v33  ;;  %v15760_v25 = vpop.f32.mrb[147].mxu0  ;;  %18354 = vtanh.f32 %v1291_v28 }
 0x223   : >> { %v17919_v25 = vld [vmem:[%s23785_s3 + $0x190] ss:$28 sps:$4 sm:$0xff]  }
 0x224   : >> { %18356 = vtanh.f32 %v1294_v30  ;;  %v19622_v38 = vpop.eup %18350 }
 0x225   : >> { %2387 = vmatmul.mubr.bf16.gmra.mrb[84].mxu1 %v17907_v35 }
 0x226   : >> { %v19624_v39 = vpop.eup %18352  ;;  %2394 = vmatprep.mubr.bf16.mxu1 %v17908_v29 }
 0x227   : >> { %v1298_v41 = vpop.f32.mrb[148].mxu0  ;;  %v1526_v36 = vpack.c.bf16 %v19624_v39, %v19622_v38  ;;  %v17937_v38 = vld [vmem:[%s23785_s3 + $0x2e0] ss:$28 sps:$4 sm:$0xff]  }
 0x228   : >> { %v1299_v6 = vadd.f32 %v19536_v31, %v1298_v41  ;;  %v15763_v9 = vpop.f32.mrb[149].mxu0 }
 0x229   : >> { %v1301_v12 = vpop.f32.mrb[150].mxu0 }
 0x22a   : >> { %v1302_v51 = vadd.f32 %v19536_v31, %v1301_v12  ;;  %v15764_v50 = vpop.f32.mrb[151].mxu0  ;;  %18358 = vtanh.f32 %v1299_v6  ;;  %v17920_v6 = vld [vmem:[%s23785_s3 + $0x1cc] ss:$28 sps:$4 sm:$0xff]  }
 0x22c   : >> { %18360 = vtanh.f32 %v1302_v51  ;;  %v19640_v42 = vpop.eup %18354 }
 0x22d   : >> { %2395 = vmatmul.mubr.bf16.gmra.mrb[88].mxu1 %v17910_v37 }
 0x22e   : >> { %v19642_v52 = vpop.eup %18356  ;;  %2402 = vmatprep.mubr.bf16.mxu1 %v17911_v40 }
 0x22f   : >> { %v1306_v54 = vpop.f32.mrb[152].mxu0  ;;  %v1527_v46 = vpack.c.bf16 %v19642_v52, %v19640_v42 }
 0x230   : >> { %v1307_v2 = vadd.f32 %v19536_v31, %v1306_v54  ;;  %v15767_v44 = vpop.f32.mrb[153].mxu0  ;;  %v17922_v54 = vld [vmem:[%s23785_s3 + $0x1c8] ss:$28 sps:$4 sm:$0xff]  }
 0x231   : >> { %v1309_v53 = vpop.f32.mrb[154].mxu0 }
 0x232   : >> { %v1310_v47 = vadd.f32 %v19536_v31, %v1309_v53  ;;  %v15768_v5 = vpop.f32.mrb[155].mxu0  ;;  %18362 = vtanh.f32 %v1307_v2  ;;  %v17923_v53 = vld [vmem:[%s23785_s3 + $0x204] ss:$28 sps:$4 sm:$0xff]  }
 0x234   : >> { %18364 = vtanh.f32 %v1310_v47  ;;  %v19654_v14 = vpop.eup %18358 }
 0x235   : >> { %2403 = vmatmul.mubr.bf16.gmra.mrb[92].mxu1 %v17913_v45 }
 0x236   : >> { %v19656_v60 = vpop.eup %18360  ;;  %2410 = vmatprep.mubr.bf16.mxu1 %v17914_v11 }
 0x237   : >> { %v1314_v19 = vpop.f32.mrb[156].mxu0  ;;  %v1528_v21 = vpack.c.bf16 %v19656_v60, %v19654_v14 }
 0x238   : >> { %v1315_v61 = vadd.f32 %v19536_v31, %v1314_v19  ;;  %v15771_v3 = vpop.f32.mrb[157].mxu0 }
 0x239   : >> { %v1317_v8 = vpop.f32.mrb[158].mxu0 }
 0x23a   : >> { %v1318_v17 = vadd.f32 %v19536_v31, %v1317_v8  ;;  %v15772_v18 = vpop.f32.mrb[159].mxu0  ;;  %18366 = vtanh.f32 %v1315_v61  ;;  %v17925_v8 = vld [vmem:[%s23785_s3 + $0x200] ss:$28 sps:$4 sm:$0xff]  }
 0x23b   : >> { %v17926_v18 = vld [vmem:[%s23785_s3 + $0x23c] ss:$28 sps:$4 sm:$0xff]  }
 0x23c   : >> { %18368 = vtanh.f32 %v1318_v17  ;;  %v19668_v56 = vpop.eup %18362 }
 0x23d   : >> { %2411 = vmatmul.mubr.bf16.gmra.mrb[96].mxu1 %v17916_v10 }
 0x23e   : >> { %v19670_v22 = vpop.eup %18364  ;;  %2418 = vmatprep.mubr.bf16.mxu1 %v17917_v20 }
 0x23f   : >> { %v1322_v28 = vpop.f32.mrb[160].mxu0  ;;  %v1529_v32 = vpack.c.bf16 %v19670_v22, %v19668_v56  ;;  %v17944_v56 = vld [vmem:[%s23785_s3 + $0x84] ss:$28 sps:$4 sm:$0xff]   ;;  %v17988_v22 = vld [vmem:[%s23786_s4 + $0x50] sm:$0xff]  }
 0x240   : >> { %v1323_v33 = vadd.f32 %v19536_v31, %v1322_v28  ;;  %v15775_v35 = vpop.f32.mrb[161].mxu0  ;;  %15844 = vmatpush3.bf16.msra.mxu0 %v17988_v22 }
 0x241   : >> { %v1325_v30 = vpop.f32.mrb[162].mxu0  ;;  %15845 = vmatprep.subr.bf16.mxu0 %v18884_v1 }
 0x242   : >> { %v1326_v29 = vadd.f32 %v19536_v31, %v1325_v30  ;;  %v15776_v41 = vpop.f32.mrb[163].mxu0  ;;  %18370 = vtanh.f32 %v1323_v33 }
 0x244   : >> { %18372 = vtanh.f32 %v1326_v29  ;;  %v19682_v9 = vpop.eup %18366 }
 0x245   : >> { %2419 = vmatmul.mubr.bf16.gmra.mrb[100].mxu1 %v17919_v25 }
 0x246   : >> { %v19684_v12 = vpop.eup %18368  ;;  %2426 = vmatprep.mubr.bf16.mxu1 %v17920_v6  ;;  %v17929_v6 = vld [vmem:[%s23785_s3 + $0x274] ss:$28 sps:$4 sm:$0xff]  }
 0x247   : >> { %v1330_v37 = vpop.f32.mrb[164].mxu0  ;;  %v1530_v49 = vpack.c.bf16 %v19684_v12, %v19682_v9 }
 0x248   : >> { %v1331_v51 = vadd.f32 %v19536_v31, %v1330_v37  ;;  %v15779_v50 = vpop.f32.mrb[165].mxu0 }
 0x249   : >> { %v1333_v40 = vpop.f32.mrb[166].mxu0 }
 0x24a   : >> { %v1334_v2 = vadd.f32 %v19536_v31, %v1333_v40  ;;  %v15780_v44 = vpop.f32.mrb[167].mxu0  ;;  %18374 = vtanh.f32 %v1331_v51 }
 0x24c   : >> { %18376 = vtanh.f32 %v1334_v2  ;;  %v18371_v45 = vpop.eup %18370  ;;  %v17931_v2 = vld [vmem:[%s23785_s3 + $0x270] ss:$28 sps:$4 sm:$0xff]  }
 0x24d   : >> { %2427 = vmatmul.mubr.bf16.gmra.mrb[104].mxu1 %v17922_v54 }
 0x24e   : >> { %v18373_v47 = vpop.eup %18372  ;;  %2434 = vmatprep.mubr.bf16.mxu1 %v17923_v53 }
 0x24f   : >> { %v1338_v5 = vpop.f32.mrb[168].mxu0  ;;  %v1531_v11 = vpack.c.bf16 %v18373_v47, %v18371_v45  ;;  %v17932_v45 = vld [vmem:[%s23785_s3 + $0x2ac] ss:$28 sps:$4 sm:$0xff]  }
 0x250   : >> { %v1339_v19 = vadd.f32 %v19536_v31, %v1338_v5  ;;  %v15783_v61 = vpop.f32.mrb[169].mxu0 }
 0x251   : >> { %v1341_v3 = vpop.f32.mrb[170].mxu0  ;;  %14429 = vmatprep.subr.bf16.mxu1 %v1531_v11 }
 0x252   : >> { %v1342_v10 = vadd.f32 %v19536_v31, %v1341_v3  ;;  %14430 = vmatpush3.bf16.msra.mxu1 %v1523_v4  ;;  %v15784_v17 = vpop.f32.mrb[171].mxu0  ;;  %18378 = vtanh.f32 %v1339_v19 }
 0x254   : >> { %18380 = vtanh.f32 %v1342_v10  ;;  %v18375_v20 = vpop.eup %18374  ;;  %v17935_v10 = vld [vmem:[%s23785_s3 + $0x2e4] ss:$28 sps:$4 sm:$0xff]  }
 0x255   : >> { %2435 = vmatmul.mubr.bf16.gmra.mrb[108].mxu1 %v17925_v8 }
 0x256   : >> { %v18377_v28 = vpop.eup %18376  ;;  %2442 = vmatprep.mubr.bf16.mxu1 %v17926_v18 }
 0x257   : >> { %v1346_v33 = vpop.f32.mrb[172].mxu0  ;;  %v1532_v35 = vpack.c.bf16 %v18377_v28, %v18375_v20 }
 0x258   : >> { %v1347_v30 = vadd.f32 %v19536_v31, %v1346_v33  ;;  %v15787_v25 = vpop.f32.mrb[173].mxu0 }
 0x259   : >> { %v1349_v29 = vpop.f32.mrb[174].mxu0  ;;  %14431 = vmatprep.subr.bf16.mxu1 %v1532_v35 }
 0x25a   : >> { %v1350_v4 = vadd.f32 %v19536_v31, %v1349_v29  ;;  %14432 = vmatpush3.bf16.msra.mxu1 %v1524_v63  ;;  %v15788_v41 = vpop.f32.mrb[175].mxu0  ;;  %18382 = vtanh.f32 %v1347_v30 }
 0x25c   : >> { %18384 = vtanh.f32 %v1350_v4  ;;  %v18379_v37 = vpop.eup %18378 }
 0x25d   : >> { %2443 = vmatmul.mubr.bf16.gmra.mrb[112].mxu1 %v17928_v59 }
 0x25e   : >> { %v18381_v51 = vpop.eup %18380  ;;  %2450 = vmatprep.mubr.bf16.mxu1 %v17929_v6  ;;  %v17946_v6 = vld [vmem:[%s23785_s3 + $0x80] ss:$28 sps:$4 sm:$0xff]  }
 0x25f   : >> { %v1354_v50 = vpop.f32.mrb[176].mxu0  ;;  %v1533_v40 = vpack.c.bf16 %v18381_v51, %v18379_v37  ;;  %v17947_v37 = vld [vmem:[%s23785_s3 + $0xbc] ss:$28 sps:$4 sm:$0xff]  }
 0x260   : >> { %v1355_v54 = vadd.f32 %v19536_v31, %v1354_v50  ;;  %v15791_v23 = vpop.f32.mrb[177].mxu0  ;;  %v14245_v57 = vpop.f32.mrb[16].mxu1 }
 0x261   : >> { %v1357_v63 = vpop.f32.mrb[178].mxu0  ;;  %14433 = vmatprep.subr.bf16.mxu1 %v1533_v40  ;;  %v14246_v44 = vpop.f32.mrb[17].mxu1 }
 0x262   : >> { %v1358_v53 = vadd.f32 %v19536_v31, %v1357_v63  ;;  %14434 = vmatpush3.bf16.msra.mxu1 %v1525_v24  ;;  %v15792_v47 = vpop.f32.mrb[179].mxu0  ;;  %v19733_v5 = vadd.f32 %v14246_v44, %v14245_v57  ;;  %v14248_v11 = vpop.f32.mrb[18].mxu1  ;;  %18386 = vtanh.f32 %v1355_v54  ;;  %v17949_v63 = vld [vmem:[%s23785_s3 + $0xb8] ss:$28 sps:$4 sm:$0xff]  }
 0x263   : >> { %v14249_v19 = vpop.f32.mrb[19].mxu1 }
 0x264   : >> { %18388 = vtanh.f32 %v1358_v53  ;;  %v19735_v61 = vadd.f32 %v14249_v19, %v14248_v11  ;;  %v18383_v3 = vpop.eup %18382 }
 0x265   : >> { %2451 = vmatmul.mubr.bf16.gmra.mrb[116].mxu1 %v17931_v2  ;;  %v17950_v2 = vld [vmem:[%s23785_s3 + $0xf4] ss:$28 sps:$4 sm:$0xff]  }
 0x266   : >> { %v18385_v31 = vpop.eup %18384  ;;  %2458 = vmatprep.mubr.bf16.mxu1 %v17932_v45 }
 0x267   : >> { %v1534_v8 = vpack.c.bf16 %v18385_v31, %v18383_v3  ;;  %v17952_v3 = vld [vmem:[%s23785_s3 + $0xf0] ss:$28 sps:$4 sm:$0xff]  }
 0x268   : >> { %v14251_v58 = vpop.f32.mrb[20].mxu1  ;;  %v17953_v31 = vld [vmem:[%s23785_s3 + $0x12c] ss:$28 sps:$4 sm:$0xff]  }
 0x269   : >> { %14435 = vmatprep.subr.bf16.mxu1 %v1534_v8  ;;  %v14252_v24 = vpop.f32.mrb[21].mxu1 }
 0x26a   : >> { %14436 = vmatpush3.bf16.msra.mxu1 %v1526_v36  ;;  %v19746_v17 = vadd.f32 %v14252_v24, %v14251_v58  ;;  %v14254_v18 = vpop.f32.mrb[22].mxu1  ;;  %v17940_v36 = vld [vmem:[%s23785_s3 + $0x14] ss:$28 sps:$4 sm:$0xff]  }
 0x26b   : >> { %v14255_v20 = vpop.f32.mrb[23].mxu1 }
 0x26c   : >> { %v19748_v28 = vadd.f32 %v14255_v20, %v14254_v18  ;;  %v18387_v33 = vpop.eup %18386  ;;  %v17955_v20 = vld [vmem:[%s23785_s3 + $0x128] ss:$28 sps:$4 sm:$0xff]  }
 0x26d   : >> { %2459 = vmatmul.mubr.bf16.gmra.mrb[120].mxu1 %v17934_v16 }
 0x26e   : >> { %v18389_v35 = vpop.eup %18388  ;;  %2466 = vmatprep.mubr.bf16.mxu1 %v17935_v10 }
 0x26f   : >> { %v1535_v30 = vpack.c.bf16 %v18389_v35, %v18387_v33  ;;  %v17957_v33 = vld [vmem:[%s23785_s3 + $0x164] ss:$28 sps:$4 sm:$0xff]  }
 0x270   : >> { %v14257_v25 = vpop.f32.mrb[24].mxu1 }
 0x271   : >> { %14437 = vmatprep.subr.bf16.mxu1 %v1535_v30  ;;  %v14258_v39 = vpop.f32.mrb[25].mxu1 }
 0x272   : >> { %14438 = vmatpush3.bf16.msra.mxu1 %v1527_v46  ;;  %v19759_v29 = vadd.f32 %v14258_v39, %v14257_v25  ;;  %v14260_v59 = vpop.f32.mrb[26].mxu1 }
 0x273   : >> { %14439 = vmatprep.subr.bf16.mxu1 %v1536_v34  ;;  %v14261_v62 = vpop.f32.mrb[27].mxu1 }
 0x274   : >> { %v19764_v4 = vadd.f32 %v14261_v62, %v14260_v59  ;;  %v17959_v59 = vld [vmem:[%s23785_s3 + $0x160] ss:$28 sps:$4 sm:$0xff]  }
 0x275   : >> { %2467 = vmatmul.mubr.bf16.gmra.mrb[124].mxu1 %v17937_v38  ;;  %v17960_v62 = vld [vmem:[%s23785_s3 + $0x19c] ss:$28 sps:$4 sm:$0xff]  }
 0x276   : >> { %14440 = vmatpush3.bf16.msra.mxu1 %v1528_v21  ;;  %2507 = vmatprep.mubr.bf16.mxu1 %v17940_v36  ;;  %v17943_v21 = vld [vmem:[%s23785_s3 + $0x48] ss:$28 sps:$4 sm:$0xff]  }
 0x277   : >> { %14441 = vmatprep.subr.bf16.mxu1 %v1537_v0 }
 0x278   : >> { %v14263_v42 = vpop.f32.mrb[28].mxu1 }
 0x279   : >> { %v14264_v52 = vpop.f32.mrb[29].mxu1 }
 0x27a   : >> { %14442 = vmatpush3.bf16.msra.mxu1 %v1529_v32  ;;  %v19775_v15 = vadd.f32 %v14264_v52, %v14263_v42  ;;  %v14266_v27 = vpop.f32.mrb[30].mxu1 }
 0x27b   : >> { %14443 = vmatprep.subr.bf16.mxu1 %v1538_v55  ;;  %v14267_v34 = vpop.f32.mrb[31].mxu1 }
 0x27c   : >> { %v19780_v46 = vadd.f32 %v14267_v34, %v14266_v27 }
 0x27e   : >> { %14444 = vmatpush3.bf16.msra.mxu1 %v1530_v49 }
 0x27f   : >> { %15809 = vmatprep.subr.bf16.mxu1 %v19562_v26 }
 0x280   : >> { %v14269_v0 = vpop.f32.mrb[32].mxu1 }
 0x281   : >> { %2508 = vmatmul.mubr.bf16.vlgmr.msra.gmra.mrb[128].mxu1 %v17938_v48  ;;  %v14270_v7 = vpop.f32.mrb[33].mxu1 }
 0x282   : >> { %2515 = vmatprep.mubr.bf16.mxu1 %v17941_v43  ;;  %v19792_v13 = vadd.f32 %v14270_v7, %v14269_v0  ;;  %v14272_v55 = vpop.f32.mrb[34].mxu1  ;;  %15810 = vmatpush3.bf16.msra.mxu1 %v19562_v26  ;;  %v17962_v0 = vld [vmem:[%s23785_s3 + $0x198] ss:$28 sps:$4 sm:$0xff]  }
 0x283   : >> { %v14273_v14 = vpop.f32.mrb[35].mxu1  ;;  %15891 = vmatprep.subr.bf16.mxu1 %v18884_v1  ;;  %v17963_v7 = vld [vmem:[%s23785_s3 + $0x1d4] ss:$28 sps:$4 sm:$0xff]  }
 0x284   : >> { %v19796_v60 = vadd.f32 %v14273_v14, %v14272_v55  ;;  %v17997_v55 = vld [vmem:[%s23786_s4 + $0x58] sm:$0xff]  }
 0x285   : >> { %15846 = vmatpush3.bf16.msra.mxu0 %v17997_v55 }
 0x286   : >> { %15847 = vmatprep.subr.bf16.mxu0 %v18884_v1 }
 0x288   : >> { %v14275_v32 = vpop.f32.mrb[36].mxu1 }
 0x289   : >> { %2516 = vmatmul.mubr.bf16.gmra.mrb[132].mxu1 %v17943_v21  ;;  %v14276_v26 = vpop.f32.mrb[37].mxu1 }
 0x28a   : >> { %2523 = vmatprep.mubr.bf16.mxu1 %v17944_v56  ;;  %v19808_v9 = vadd.f32 %v14276_v26, %v14275_v32  ;;  %v14278_v12 = vpop.f32.mrb[38].mxu1 }
 0x28b   : >> { %v14279_v49 = vpop.f32.mrb[39].mxu1 }
 0x28c   : >> { %v19810_v41 = vadd.f32 %v14279_v49, %v14278_v12  ;;  %v17965_v12 = vld [vmem:[%s23785_s3 + $0x1d0] ss:$28 sps:$4 sm:$0xff]  }
 0x28d   : >> { %v17966_v49 = vld [vmem:[%s23785_s3 + $0x20c] ss:$28 sps:$4 sm:$0xff]  }
 0x290   : >> { %v14281_v51 = vpop.f32.mrb[40].mxu1 }
 0x291   : >> { %2524 = vmatmul.mubr.bf16.gmra.mrb[136].mxu1 %v17946_v6  ;;  %v14282_v50 = vpop.f32.mrb[41].mxu1 }
 0x292   : >> { %2531 = vmatprep.mubr.bf16.mxu1 %v17947_v37  ;;  %v19818_v40 = vadd.f32 %v14282_v50, %v14281_v51  ;;  %v14284_v54 = vpop.f32.mrb[42].mxu1 }
 0x293   : >> { %v14285_v23 = vpop.f32.mrb[43].mxu1 }
 0x294   : >> { %v19820_v57 = vadd.f32 %v14285_v23, %v14284_v54 }
 0x298   : >> { %v14287_v44 = vpop.f32.mrb[44].mxu1 }
 0x299   : >> { %2532 = vmatmul.mubr.bf16.gmra.mrb[140].mxu1 %v17949_v63  ;;  %v14288_v53 = vpop.f32.mrb[45].mxu1  ;;  %v17968_v63 = vld [vmem:[%s23785_s3 + $0x208] ss:$28 sps:$4 sm:$0xff]  }
 0x29a   : >> { %2539 = vmatprep.mubr.bf16.mxu1 %v17950_v2  ;;  %v19828_v45 = vadd.f32 %v14288_v53, %v14287_v44  ;;  %v14290_v47 = vpop.f32.mrb[46].mxu1  ;;  %v17969_v2 = vld [vmem:[%s23785_s3 + $0x244] ss:$28 sps:$4 sm:$0xff]  }
 0x29b   : >> { %v14291_v11 = vpop.f32.mrb[47].mxu1 }
 0x29c   : >> { %v19830_v19 = vadd.f32 %v14291_v11, %v14290_v47 }
 0x2a0   : >> { %v14293_v8 = vpop.f32.mrb[48].mxu1 }
 0x2a1   : >> { %2540 = vmatmul.mubr.bf16.gmra.mrb[144].mxu1 %v17952_v3  ;;  %v14294_v58 = vpop.f32.mrb[49].mxu1  ;;  %v17971_v3 = vld [vmem:[%s23785_s3 + $0x240] ss:$28 sps:$4 sm:$0xff]  }
 0x2a2   : >> { %2547 = vmatprep.mubr.bf16.mxu1 %v17953_v31  ;;  %v19838_v16 = vadd.f32 %v14294_v58, %v14293_v8  ;;  %v14296_v24 = vpop.f32.mrb[50].mxu1  ;;  %v17972_v31 = vld [vmem:[%s23785_s3 + $0x27c] ss:$28 sps:$4 sm:$0xff]   ;;  %v17976_v58 = vld [vmem:[%s23785_s3 + $0x2b4] ss:$28 sps:$4 sm:$0xff]  }
 0x2a3   : >> { %v14297_v10 = vpop.f32.mrb[51].mxu1  ;;  %v17974_v8 = vld [vmem:[%s23785_s3 + $0x278] ss:$28 sps:$4 sm:$0xff]  }
 0x2a4   : >> { %v19840_v18 = vadd.f32 %v14297_v10, %v14296_v24  ;;  %v17978_v24 = vld [vmem:[%s23785_s3 + $0x2b0] ss:$28 sps:$4 sm:$0xff]  }
 0x2a5   : >> { %v17979_v10 = vld [vmem:[%s23785_s3 + $0x2ec] ss:$28 sps:$4 sm:$0xff]  }
 0x2a8   : >> { %v14299_v35 = vpop.f32.mrb[52].mxu1 }
 0x2a9   : >> { %2548 = vmatmul.mubr.bf16.gmra.mrb[148].mxu1 %v17955_v20  ;;  %v14300_v30 = vpop.f32.mrb[53].mxu1 }
 0x2aa   : >> { %2555 = vmatprep.mubr.bf16.mxu1 %v17957_v33  ;;  %v19848_v25 = vadd.f32 %v14300_v30, %v14299_v35  ;;  %v14302_v38 = vpop.f32.mrb[54].mxu1  ;;  %v17998_v33 = vld [vmem:[%s23786_s4 + $0x60] sm:$0xff]  }
 0x2ab   : >> { %v14303_v39 = vpop.f32.mrb[55].mxu1  ;;  %15848 = vmatpush3.bf16.msra.mxu0 %v17998_v33 }
 0x2ac   : >> { %v19850_v36 = vadd.f32 %v14303_v39, %v14302_v38  ;;  %15849 = vmatprep.subr.bf16.mxu0 %v18884_v1 }
 0x2b0   : >> { %v14305_v42 = vpop.f32.mrb[56].mxu1 }
 0x2b1   : >> { %2556 = vmatmul.mubr.bf16.gmra.mrb[152].mxu1 %v17959_v59  ;;  %v14306_v52 = vpop.f32.mrb[57].mxu1 }
 0x2b2   : >> { %2563 = vmatprep.mubr.bf16.mxu1 %v17960_v62  ;;  %v19858_v27 = vadd.f32 %v14306_v52, %v14305_v42  ;;  %v14308_v34 = vpop.f32.mrb[58].mxu1  ;;  %v17981_v42 = vld [vmem:[%s23785_s3 + $0x2e8] ss:$28 sps:$4 sm:$0xff]  }
 0x2b3   : >> { %v14309_v48 = vpop.f32.mrb[59].mxu1 }
 0x2b4   : >> { %v19860_v43 = vadd.f32 %v14309_v48, %v14308_v34  ;;  %v17982_v34 = vld [vmem:[%s23785_s3 + $0x18] ss:$28 sps:$4 sm:$0xff]  }
 0x2b8   : >> { %v14311_v14 = vpop.f32.mrb[60].mxu1 }
 0x2b9   : >> { %2564 = vmatmul.mubr.bf16.gmra.mrb[156].mxu1 %v17962_v0  ;;  %v14312_v21 = vpop.f32.mrb[61].mxu1 }
 0x2ba   : >> { %2571 = vmatprep.mubr.bf16.mxu1 %v17963_v7  ;;  %v19872_v56 = vadd.f32 %v14312_v21, %v14311_v14  ;;  %v14314_v22 = vpop.f32.mrb[62].mxu1 }
 0x2bb   : >> { %v14315_v32 = vpop.f32.mrb[63].mxu1 }
 0x2bc   : >> { %v19874_v26 = vadd.f32 %v14315_v32, %v14314_v22  ;;  %v17984_v32 = vld [vmem:[%s23785_s3 + $0x88] ss:$28 sps:$4 sm:$0xff]  }
 0x2c0   : >> { %v14317_v6 = vpop.f32.mrb[64].mxu1 }
 0x2c1   : >> { %2572 = vmatmul.mubr.bf16.gmra.mrb[160].mxu1 %v17965_v12  ;;  %v14318_v37 = vpop.f32.mrb[65].mxu1 }
 0x2c2   : >> { %2579 = vmatprep.mubr.bf16.mxu1 %v17966_v49  ;;  %v19882_v51 = vadd.f32 %v14318_v37, %v14317_v6  ;;  %v14320_v50 = vpop.f32.mrb[66].mxu1 }
 0x2c3   : >> { %v14321_v54 = vpop.f32.mrb[67].mxu1 }
 0x2c4   : >> { %v19884_v23 = vadd.f32 %v14321_v54, %v14320_v50 }
 0x2c8   : >> { %v14323_v44 = vpop.f32.mrb[68].mxu1 }
 0x2c9   : >> { %2580 = vmatmul.mubr.bf16.gmra.mrb[164].mxu1 %v17968_v63  ;;  %v14324_v53 = vpop.f32.mrb[69].mxu1 }
 0x2ca   : >> { %2587 = vmatprep.mubr.bf16.mxu1 %v17969_v2  ;;  %v14326_v47 = vpop.f32.mrb[70].mxu1  ;;  %v17986_v2 = vld [vmem:[%s23785_s3 + $0xf8] ss:$28 sps:$4 sm:$0xff]  }
 0x2cb   : >> { %v14327_v11 = vpop.f32.mrb[71].mxu1 }
 0x2d1   : >> { %2588 = vmatmul.mubr.bf16.gmra.mrb[168].mxu1 %v17971_v3 }
 0x2d2   : >> { %2595 = vmatprep.mubr.bf16.mxu1 %v17972_v31 }
 0x2d9   : >> { %2596 = vmatmul.mubr.bf16.gmra.mrb[172].mxu1 %v17974_v8 }
 0x2da   : >> { %2603 = vmatprep.mubr.bf16.mxu1 %v17976_v58  ;;  %v17989_v58 = vld [vmem:[%s23785_s3 + $0x168] ss:$28 sps:$4 sm:$0xff]  }
 0x2e0   : >> { %v14345_v20 = vpop.f32.mrb[72].mxu1 }
 0x2e1   : >> { %v14346_v35 = vpop.f32.mrb[73].mxu1  ;;  %2604 = vmatmul.mubr.bf16.gmra.mrb[176].mxu1 %v17978_v24 }
 0x2e2   : >> { %v14347_v30 = vadd.f32 %v14346_v35, %v14345_v20  ;;  %v14348_v38 = vpop.f32.mrb[74].mxu1  ;;  %2611 = vmatprep.mubr.bf16.mxu1 %v17979_v10 }
 0x2e3   : >> { %v14349_v39 = vpop.f32.mrb[75].mxu1 }
 0x2e4   : >> { %v19915_v59 = vadd.f32 %v14347_v30, %v19733_v5  ;;  %v14350_v62 = vadd.f32 %v14349_v39, %v14348_v38  ;;  %v17991_v39 = vld [vmem:[%s23785_s3 + $0x1d8] ss:$28 sps:$4 sm:$0xff]  }
 0x2e6   : >> { %v19921_v52 = vadd.f32 %v14350_v62, %v19735_v61  ;;  %v17983_v61 = vld [vmem:[%s23785_s3 + $0x50] ss:$28 sps:$4 sm:$0xff]  }
 0x2e8   : >> { %v14351_v48 = vpop.f32.mrb[76].mxu1 }
 0x2e9   : >> { %v14352_v0 = vpop.f32.mrb[77].mxu1  ;;  %2612 = vmatmul.mubr.bf16.gmra.mrb[180].mxu1 %v17981_v42 }
 0x2ea   : >> { %v14353_v7 = vadd.f32 %v14352_v0, %v14351_v48  ;;  %v14354_v55 = vpop.f32.mrb[78].mxu1  ;;  %15811 = vmatprep.mubr.msk.bf16.mxu1 %vm2142_vm2, %v17982_v34 }
 0x2eb   : >> { %v14355_v5 = vpop.f32.mrb[79].mxu1 }
 0x2ec   : >> { %v19928_v14 = vadd.f32 %v14353_v7, %v19746_v17  ;;  %v14356_v21 = vadd.f32 %v14355_v5, %v14354_v55  ;;  %v17993_v5 = vld [vmem:[%s23785_s3 + $0x248] ss:$28 sps:$4 sm:$0xff]  }
 0x2ee   : >> { %v19934_v22 = vadd.f32 %v14356_v21, %v19748_v28  ;;  %v17985_v28 = vld [vmem:[%s23785_s3 + $0xc0] ss:$28 sps:$4 sm:$0xff]   ;;  %v17999_v21 = vld [vmem:[%s23786_s4 + $0x68] sm:$0xff]  }
 0x2ef   : >> { %15850 = vmatpush3.bf16.msra.mxu0 %v17999_v21 }
 0x2f0   : >> { %v14357_v12 = vpop.f32.mrb[80].mxu1  ;;  %15851 = vmatprep.subr.bf16.mxu0 %v18884_v1 }
 0x2f1   : >> { %v14358_v49 = vpop.f32.mrb[81].mxu1  ;;  %15812 = vmatmul.mubr.msk.bf16.vlgmr.msra.gmra.mrb[184].mxu1 %vm2142_vm2, %v17983_v61 }
 0x2f2   : >> { %v14359_v6 = vadd.f32 %v14358_v49, %v14357_v12  ;;  %v14360_v37 = vpop.f32.mrb[82].mxu1  ;;  %15815 = vmatprep.mubr.msk.bf16.mxu1 %vm2142_vm2, %v17984_v32 }
 0x2f3   : >> { %v14361_v17 = vpop.f32.mrb[83].mxu1 }
 0x2f4   : >> { %v19942_v50 = vadd.f32 %v14359_v6, %v19759_v29  ;;  %v14362_v54 = vadd.f32 %v14361_v17, %v14360_v37  ;;  %v17994_v37 = vld [vmem:[%s23785_s3 + $0x280] ss:$28 sps:$4 sm:$0xff]  }
 0x2f6   : >> { %v19948_v63 = vadd.f32 %v14362_v54, %v19764_v4  ;;  %v17987_v4 = vld [vmem:[%s23785_s3 + $0x130] ss:$28 sps:$4 sm:$0xff]   ;;  %v17995_v54 = vld [vmem:[%s23785_s3 + $0x2b8] ss:$28 sps:$4 sm:$0xff]  }
 0x2f8   : >> { %v14363_v44 = vpop.f32.mrb[84].mxu1 }
 0x2f9   : >> { %v14364_v53 = vpop.f32.mrb[85].mxu1  ;;  %15816 = vmatmul.mubr.msk.bf16.gmra.mrb[188].mxu1 %vm2142_vm2, %v17985_v28 }
 0x2fa   : >> { %v14365_v47 = vadd.f32 %v14364_v53, %v14363_v44  ;;  %v14366_v11 = vpop.f32.mrb[86].mxu1  ;;  %15819 = vmatprep.mubr.msk.bf16.mxu1 %vm2142_vm2, %v17986_v2 }
 0x2fb   : >> { %v14367_v29 = vpop.f32.mrb[87].mxu1 }
 0x2fc   : >> { %v19956_v3 = vadd.f32 %v14365_v47, %v19775_v15  ;;  %v14368_v31 = vadd.f32 %v14367_v29, %v14366_v11 }
 0x2fe   : >> { %v19962_v8 = vadd.f32 %v14368_v31, %v19780_v46  ;;  %v17990_v46 = vld [vmem:[%s23785_s3 + $0x1a0] ss:$28 sps:$4 sm:$0xff]  }
 0x300   : >> { %v14369_v24 = vpop.f32.mrb[88].mxu1 }
 0x301   : >> { %v14370_v10 = vpop.f32.mrb[89].mxu1  ;;  %15820 = vmatmul.mubr.msk.bf16.gmra.mrb[192].mxu1 %vm2142_vm2, %v17987_v4 }
 0x302   : >> { %v14371_v20 = vadd.f32 %v14370_v10, %v14369_v24  ;;  %v14372_v33 = vpop.f32.mrb[90].mxu1  ;;  %15823 = vmatprep.mubr.msk.bf16.mxu1 %vm2142_vm2, %v17989_v58 }
 0x303   : >> { %v14373_v15 = vpop.f32.mrb[91].mxu1 }
 0x304   : >> { %v19970_v35 = vadd.f32 %v14371_v20, %v19792_v13  ;;  %v14374_v30 = vadd.f32 %v14373_v15, %v14372_v33 }
 0x306   : >> { %v19976_v38 = vadd.f32 %v14374_v30, %v19796_v60  ;;  %v17992_v60 = vld [vmem:[%s23785_s3 + $0x210] ss:$28 sps:$4 sm:$0xff]  }
 0x308   : >> { %v14375_v62 = vpop.f32.mrb[92].mxu1 }
 0x309   : >> { %v14376_v42 = vpop.f32.mrb[93].mxu1  ;;  %15824 = vmatmul.mubr.msk.bf16.gmra.mrb[196].mxu1 %vm2142_vm2, %v17990_v46 }
 0x30a   : >> { %v14377_v34 = vadd.f32 %v14376_v42, %v14375_v62  ;;  %v14378_v48 = vpop.f32.mrb[94].mxu1  ;;  %15827 = vmatprep.mubr.msk.bf16.mxu1 %vm2142_vm2, %v17991_v39  ;;  %v18000_v62 = vld [vmem:[%s23786_s4] sm:$0xff]  }
 0x30b   : >> { %v14379_v13 = vpop.f32.mrb[95].mxu1  ;;  %15892 = vmatpush3.bf16.msra.mxu1 %v18000_v62 }
 0x30c   : >> { %v19984_v0 = vadd.f32 %v14377_v34, %v19808_v9  ;;  %v14380_v7 = vadd.f32 %v14379_v13, %v14378_v48  ;;  %15893 = vmatprep.subr.bf16.mxu1 %v18884_v1 }
 0x30e   : >> { %v19990_v55 = vadd.f32 %v14380_v7, %v19810_v41 }
 0x310   : >> { %v14381_v61 = vpop.f32.mrb[96].mxu1 }
 0x311   : >> { %v14382_v9 = vpop.f32.mrb[97].mxu1  ;;  %15828 = vmatmul.mubr.msk.bf16.gmra.mrb[200].mxu1 %vm2142_vm2, %v17992_v60 }
 0x312   : >> { %v14383_v32 = vadd.f32 %v14382_v9, %v14381_v61  ;;  %v14384_v12 = vpop.f32.mrb[98].mxu1  ;;  %15831 = vmatprep.mubr.msk.bf16.mxu1 %vm2142_vm2, %v17993_v5  ;;  %v18003_v5 = vld [vmem:[%s23786_s4 + $0x10] sm:$0xff]   ;;  %v18004_v9 = vld [vmem:[%s23786_s4 + $0x18] sm:$0xff]  }
 0x313   : >> { %v14385_v41 = vpop.f32.mrb[99].mxu1 }
 0x314   : >> { %v20002_v49 = vadd.f32 %v14383_v32, %v19818_v40  ;;  %v14386_v6 = vadd.f32 %v14385_v41, %v14384_v12  ;;  %v18002_v12 = vld [vmem:[%s23786_s4 + $0x70] sm:$0xff]  }
 0x315   : >> { %15852 = vmatpush3.bf16.msra.mxu0 %v18002_v12 }
 0x316   : >> { %v20008_v17 = vadd.f32 %v14386_v6, %v19820_v57  ;;  %v17996_v57 = vld [vmem:[%s23785_s3 + $0x2f0] ss:$28 sps:$4 sm:$0xff]   ;;  %15853 = vmatprep.subr.bf16.mxu0 %v18884_v1 }
 0x318   : >> { %v14387_v28 = vpop.f32.mrb[100].mxu1 }
 0x319   : >> { %v14388_v2 = vpop.f32.mrb[101].mxu1  ;;  %15832 = vmatmul.mubr.msk.bf16.gmra.mrb[204].mxu1 %vm2142_vm2, %v17994_v37  ;;  %v18005_v37 = vld [vmem:[%s23786_s4 + $0x20] sm:$0xff]  }
 0x31a   : >> { %v14389_v44 = vadd.f32 %v14388_v2, %v14387_v28  ;;  %v14390_v53 = vpop.f32.mrb[102].mxu1  ;;  %15835 = vmatprep.mubr.msk.bf16.mxu1 %vm2142_vm2, %v17995_v54 }
 0x31b   : >> { %v14391_v40 = vpop.f32.mrb[103].mxu1 }
 0x31c   : >> { %v20016_v47 = vadd.f32 %v14389_v44, %v19828_v45  ;;  %v14392_v11 = vadd.f32 %v14391_v40, %v14390_v53  ;;  %v18006_v53 = vld [vmem:[%s23786_s4 + $0x28] sm:$0xff]  }
 0x31e   : >> { %v20022_v29 = vadd.f32 %v14392_v11, %v19830_v19 }
 0x320   : >> { %v14393_v31 = vpop.f32.mrb[104].mxu1 }
 0x321   : >> { %v14394_v4 = vpop.f32.mrb[105].mxu1  ;;  %15836 = vmatmul.mubr.msk.bf16.gmra.mrb[208].mxu1 %vm2142_vm2, %v17996_v57 }
 0x322   : >> { %v14395_v58 = vadd.f32 %v14394_v4, %v14393_v31  ;;  %v14396_v24 = vpop.f32.mrb[106].mxu1  ;;  %15907 = vmatprep.mubr.msk.bf16.mxu1 %vm18885_vm0, %v18884_v1 }
 0x323   : >> { %v14397_v10 = vpop.f32.mrb[107].mxu1 }
 0x324   : >> { %v20028_v45 = vadd.f32 %v14395_v58, %v19838_v16  ;;  %v14398_v20 = vadd.f32 %v14397_v10, %v14396_v24  ;;  %v18009_v10 = vld [vmem:[%s23786_s4 + $0x38] sm:$0xff]  }
 0x326   : >> { %v20031_v33 = vadd.f32 %v14398_v20, %v19840_v18  ;;  %v18001_v18 = vld [vmem:[%s23786_s4 + $0x8] sm:$0xff]  }
 0x327   : >> { %15894 = vmatpush3.bf16.msra.mxu1 %v18001_v18 }
 0x328   : >> { %v14399_v15 = vpop.f32.mrb[108].mxu1  ;;  %15895 = vmatprep.subr.bf16.mxu1 %v18884_v1 }
 0x329   : >> { %v14400_v19 = vpop.f32.mrb[109].mxu1 }
 0x32a   : >> { %v14401_v30 = vadd.f32 %v14400_v19, %v14399_v15  ;;  %v14402_v46 = vpop.f32.mrb[110].mxu1  ;;  %v18008_v19 = vld [vmem:[%s23786_s4 + $0x78] sm:$0xff]  }
 0x32b   : >> { %v14403_v39 = vpop.f32.mrb[111].mxu1  ;;  %15896 = vmatpush3.bf16.msra.mxu1 %v18003_v5  ;;  %15854 = vmatpush3.bf16.msra.mxu0 %v18008_v19 }
 0x32c   : >> { %v20037_v42 = vadd.f32 %v14401_v30, %v19848_v25  ;;  %v14404_v34 = vadd.f32 %v14403_v39, %v14402_v46  ;;  %15897 = vmatprep.subr.bf16.mxu1 %v18884_v1  ;;  %15943 = vmatprep.subr.bf16.mxu0 %v18884_v1 }
 0x32e   : >> { %v20040_v16 = vadd.f32 %v14404_v34, %v19850_v36 }
 0x32f   : >> { %15898 = vmatpush3.bf16.msra.mxu1 %v18004_v9 }
 0x330   : >> { %v14405_v48 = vpop.f32.mrb[112].mxu1  ;;  %15899 = vmatprep.subr.bf16.mxu1 %v18884_v1 }
 0x331   : >> { %v14406_v13 = vpop.f32.mrb[113].mxu1 }
 0x332   : >> { %v14407_v7 = vadd.f32 %v14406_v13, %v14405_v48  ;;  %v14408_v60 = vpop.f32.mrb[114].mxu1 }
 0x333   : >> { %v14409_v25 = vpop.f32.mrb[115].mxu1  ;;  %15900 = vmatpush3.bf16.msra.mxu1 %v18005_v37 }
 0x334   : >> { %v20051_v36 = vadd.f32 %v14407_v7, %v19858_v27  ;;  %v14410_v21 = vadd.f32 %v14409_v25, %v14408_v60  ;;  %15901 = vmatprep.subr.bf16.mxu1 %v18884_v1 }
 0x336   : >> { %v20054_v61 = vadd.f32 %v14410_v21, %v19860_v43 }
 0x337   : >> { %15902 = vmatpush3.bf16.msra.mxu1 %v18006_v53 }
 0x338   : >> { %v14411_v32 = vpop.f32.mrb[116].mxu1  ;;  %15903 = vmatprep.subr.bf16.mxu1 %v18884_v1 }
 0x339   : >> { %v14412_v41 = vpop.f32.mrb[117].mxu1 }
 0x33a   : >> { %v14413_v27 = vadd.f32 %v14412_v41, %v14411_v32  ;;  %v14414_v6 = vpop.f32.mrb[118].mxu1 }
 0x33b   : >> { %v14415_v43 = vpop.f32.mrb[119].mxu1 }
 0x33c   : >> { %v20069_v54 = vadd.f32 %v14413_v27, %v19872_v56  ;;  %v14416_v28 = vadd.f32 %v14415_v43, %v14414_v6 }
 0x33e   : >> { %v20072_v2 = vadd.f32 %v14416_v28, %v19874_v26  ;;  %v18007_v26 = vld [vmem:[%s23786_s4 + $0x30] sm:$0xff]  }
 0x33f   : >> { %15904 = vmatpush3.bf16.msra.mxu1 %v18007_v26 }
 0x340   : >> { %v14417_v44 = vpop.f32.mrb[120].mxu1  ;;  %15905 = vmatprep.subr.bf16.mxu1 %v18884_v1 }
 0x341   : >> { %v14418_v40 = vpop.f32.mrb[121].mxu1 }
 0x342   : >> { %v14419_v11 = vadd.f32 %v14418_v40, %v14417_v44  ;;  %v14420_v57 = vpop.f32.mrb[122].mxu1 }
 0x343   : >> { %v14421_v31 = vpop.f32.mrb[123].mxu1  ;;  %15906 = vmatpush3.bf16.msra.mxu1 %v18009_v10 }
 0x344   : >> { %v20080_v56 = vadd.f32 %v14419_v11, %v19882_v51  ;;  %v14422_v4 = vadd.f32 %v14421_v31, %v14420_v57  ;;  %15995 = vmatprep.subr.bf16.mxu1 %v18884_v1 }
 0x346   : >> { %v20086_v58 = vadd.f32 %v14422_v4, %v19884_v23 }
 0x348   : >> { %v14423_v24 = vpop.f32.mrb[124].mxu1 }
 0x349   : >> { %v14424_v20 = vpop.f32.mrb[125].mxu1 }
 0x34a   : >> { %v14426_v15 = vpop.f32.mrb[126].mxu1 }
 0x34b   : >> { %v14427_v51 = vpop.f32.mrb[127].mxu1 }
 0x354   : >> { %v14445_v23 = vpop.f32.mrb[128].mxu1 }
 0x355   : >> { %v14446_v30 = vpop.f32.mrb[129].mxu1 }
 0x356   : >> { %v14447_v46 = vadd.f32 %v14446_v30, %v14445_v23  ;;  %v14448_v39 = vpop.f32.mrb[130].mxu1 }
 0x357   : >> { %v14449_v62 = vpop.f32.mrb[131].mxu1 }
 0x358   : >> { %v14450_v34 = vadd.f32 %v14449_v62, %v14448_v39  ;;  %v20098_v18 = vadd.f32 %v14447_v46, %v19915_v59 }
 0x35a   : >> { %v20101_v48 = vadd.f32 %v14450_v34, %v19921_v52 }
 0x35c   : >> { %v14451_v13 = vpop.f32.mrb[132].mxu1 }
 0x35d   : >> { %v14452_v7 = vpop.f32.mrb[133].mxu1 }
 0x35e   : >> { %v14453_v60 = vadd.f32 %v14452_v7, %v14451_v13  ;;  %v14454_v25 = vpop.f32.mrb[134].mxu1 }
 0x35f   : >> { %v14455_v5 = vpop.f32.mrb[135].mxu1 }
 0x360   : >> { %v14456_v21 = vadd.f32 %v14455_v5, %v14454_v25  ;;  %v20104_v9 = vadd.f32 %v14453_v60, %v19928_v14 }
 0x362   : >> { %v20107_v32 = vadd.f32 %v14456_v21, %v19934_v22 }
 0x364   : >> { %v14457_v12 = vpop.f32.mrb[136].mxu1 }
 0x365   : >> { %v14458_v41 = vpop.f32.mrb[137].mxu1 }
 0x366   : >> { %v14459_v27 = vadd.f32 %v14458_v41, %v14457_v12  ;;  %v14460_v59 = vpop.f32.mrb[138].mxu1 }
 0x367   : >> { %v14461_v6 = vpop.f32.mrb[139].mxu1 }
 0x368   : >> { %v14462_v43 = vadd.f32 %v14461_v6, %v14460_v59  ;;  %v20110_v52 = vadd.f32 %v14459_v27, %v19942_v50 }
 0x36a   : >> { %v20113_v37 = vadd.f32 %v14462_v43, %v19948_v63 }
 0x36c   : >> { %v14463_v28 = vpop.f32.mrb[140].mxu1 }
 0x36d   : >> { %v14464_v44 = vpop.f32.mrb[141].mxu1 }
 0x36e   : >> { %v14465_v53 = vadd.f32 %v14464_v44, %v14463_v28  ;;  %v14466_v14 = vpop.f32.mrb[142].mxu1 }
 0x36f   : >> { %v14467_v40 = vpop.f32.mrb[143].mxu1 }
 0x370   : >> { %v14468_v11 = vadd.f32 %v14467_v40, %v14466_v14  ;;  %v20116_v22 = vadd.f32 %v14465_v53, %v19956_v3 }
 0x372   : >> { %v20119_v57 = vadd.f32 %v14468_v11, %v19962_v8 }
 0x374   : >> { %v14469_v31 = vpop.f32.mrb[144].mxu1 }
 0x375   : >> { %v14470_v4 = vpop.f32.mrb[145].mxu1 }
 0x376   : >> { %v14471_v26 = vadd.f32 %v14470_v4, %v14469_v31  ;;  %v14472_v50 = vpop.f32.mrb[146].mxu1 }
 0x377   : >> { %v14473_v24 = vpop.f32.mrb[147].mxu1 }
 0x378   : >> { %v14474_v10 = vadd.f32 %v14473_v24, %v14472_v50  ;;  %v20122_v63 = vadd.f32 %v14471_v26, %v19970_v35 }
 0x37a   : >> { %v20125_v20 = vadd.f32 %v14474_v10, %v19976_v38 }
 0x37c   : >> { %v14475_v15 = vpop.f32.mrb[148].mxu1 }
 0x37d   : >> { %v14476_v51 = vpop.f32.mrb[149].mxu1 }
 0x37e   : >> { %v14477_v19 = vadd.f32 %v14476_v51, %v14475_v15  ;;  %v14478_v3 = vpop.f32.mrb[150].mxu1 }
 0x37f   : >> { %v14479_v23 = vpop.f32.mrb[151].mxu1 }
 0x380   : >> { %v14480_v30 = vadd.f32 %v14479_v23, %v14478_v3  ;;  %v20128_v8 = vadd.f32 %v14477_v19, %v19984_v0 }
 0x382   : >> { %v20131_v46 = vadd.f32 %v14480_v30, %v19990_v55 }
 0x384   : >> { %v14481_v39 = vpop.f32.mrb[152].mxu1 }
 0x385   : >> { %v14482_v62 = vpop.f32.mrb[153].mxu1 }
 0x386   : >> { %v14483_v34 = vadd.f32 %v14482_v62, %v14481_v39  ;;  %v14484_v35 = vpop.f32.mrb[154].mxu1 }
 0x387   : >> { %v14485_v13 = vpop.f32.mrb[155].mxu1 }
 0x388   : >> { %v14486_v7 = vadd.f32 %v14485_v13, %v14484_v35  ;;  %v20134_v38 = vadd.f32 %v14483_v34, %v20002_v49 }
 0x38a   : >> { %v20137_v60 = vadd.f32 %v14486_v7, %v20008_v17 }
 0x38c   : >> { %v14487_v25 = vpop.f32.mrb[156].mxu1 }
 0x38d   : >> { %v14488_v5 = vpop.f32.mrb[157].mxu1 }
 0x38e   : >> { %v14489_v21 = vadd.f32 %v14488_v5, %v14487_v25  ;;  %v14490_v0 = vpop.f32.mrb[158].mxu1 }
 0x38f   : >> { %v14491_v12 = vpop.f32.mrb[159].mxu1 }
 0x390   : >> { %v14492_v41 = vadd.f32 %v14491_v12, %v14490_v0  ;;  %v20140_v55 = vadd.f32 %v14489_v21, %v20016_v47 }
 0x392   : >> { %v20143_v27 = vadd.f32 %v14492_v41, %v20022_v29 }
 0x394   : >> { %v14493_v59 = vpop.f32.mrb[160].mxu1 }
 0x395   : >> { %v14494_v6 = vpop.f32.mrb[161].mxu1 }
 0x396   : >> { %v14495_v43 = vadd.f32 %v14494_v6, %v14493_v59  ;;  %v14496_v49 = vpop.f32.mrb[162].mxu1 }
 0x397   : >> { %v14497_v28 = vpop.f32.mrb[163].mxu1 }
 0x398   : >> { %v14498_v44 = vadd.f32 %v14497_v28, %v14496_v49  ;;  %v20146_v17 = vadd.f32 %v14495_v43, %v20028_v45 }
 0x39a   : >> { %v20149_v53 = vadd.f32 %v14498_v44, %v20031_v33 }
 0x39c   : >> { %v14499_v14 = vpop.f32.mrb[164].mxu1 }
 0x39d   : >> { %v14500_v40 = vpop.f32.mrb[165].mxu1 }
 0x39e   : >> { %v14501_v11 = vadd.f32 %v14500_v40, %v14499_v14  ;;  %v14502_v47 = vpop.f32.mrb[166].mxu1  ;;  %v18011_v14 = vld [vmem:[%s23786_s4 + $0xc0] sm:$0xff]  }
 0x39f   : >> { %v14503_v31 = vpop.f32.mrb[167].mxu1 }
 0x3a0   : >> { %v14504_v4 = vadd.f32 %v14503_v31, %v14502_v47  ;;  %v20152_v29 = vadd.f32 %v14501_v11, %v20037_v42 }
 0x3a2   : >> { %v20155_v26 = vadd.f32 %v14504_v4, %v20040_v16 }
 0x3a4   : >> { %v14505_v50 = vpop.f32.mrb[168].mxu1 }
 0x3a5   : >> { %v14506_v24 = vpop.f32.mrb[169].mxu1 }
 0x3a6   : >> { %v14507_v10 = vadd.f32 %v14506_v24, %v14505_v50  ;;  %v14508_v45 = vpop.f32.mrb[170].mxu1 }
 0x3a7   : >> { %v14509_v15 = vpop.f32.mrb[171].mxu1 }
 0x3a8   : >> { %v14510_v51 = vadd.f32 %v14509_v15, %v14508_v45  ;;  %v20158_v33 = vadd.f32 %v14507_v10, %v20051_v36 }
 0x3aa   : >> { %v20161_v19 = vadd.f32 %v14510_v51, %v20054_v61 }
 0x3ac   : >> { %v14511_v3 = vpop.f32.mrb[172].mxu1 }
 0x3ad   : >> { %v14512_v23 = vpop.f32.mrb[173].mxu1 }
 0x3ae   : >> { %v14513_v30 = vadd.f32 %v14512_v23, %v14511_v3  ;;  %v14514_v42 = vpop.f32.mrb[174].mxu1 }
 0x3af   : >> { %v14515_v39 = vpop.f32.mrb[175].mxu1 }
 0x3b0   : >> { %v14516_v62 = vadd.f32 %v14515_v39, %v14514_v42  ;;  %v20164_v16 = vadd.f32 %v14513_v30, %v20069_v54  ;;  %v18012_v42 = vld [vmem:[%s23786_s4 + $0x88] sm:$0xff]  }
 0x3b2   : >> { %v20167_v34 = vadd.f32 %v14516_v62, %v20072_v2 }
 0x3b4   : >> { %v14517_v35 = vpop.f32.mrb[176].mxu1 }
 0x3b5   : >> { %v14518_v13 = vpop.f32.mrb[177].mxu1 }
 0x3b6   : >> { %v14519_v7 = vadd.f32 %v14518_v13, %v14517_v35  ;;  %v14520_v36 = vpop.f32.mrb[178].mxu1 }
 0x3b7   : >> { %v14521_v25 = vpop.f32.mrb[179].mxu1 }
 0x3b8   : >> { %v14522_v5 = vadd.f32 %v14521_v25, %v14520_v36  ;;  %v20170_v61 = vadd.f32 %v14519_v7, %v20080_v56 }
 0x3ba   : >> { %v20173_v21 = vadd.f32 %v14522_v5, %v20086_v58  ;;  %v18014_v5 = vld [vmem:[%s23786_s4 + $0x90] sm:$0xff]  }
 0x3bc   : >> { %v14523_v0 = vpop.f32.mrb[180].mxu1 }
 0x3bd   : >> { %v14524_v12 = vpop.f32.mrb[181].mxu1 }
 0x3be   : >> { %v14526_v41 = vpop.f32.mrb[182].mxu1  ;;  %v18019_v12 = vld [vmem:[%s23786_s4 + $0xe0] sm:$0xff]  }
 0x3bf   : >> { %v14527_v54 = vpop.f32.mrb[183].mxu1 }
 0x3c4   : >> { %v15813_v59 = vpop.f32.mrb[184].mxu1 }
 0x3c5   : >> { %v2663_v2 = vadd.f32 %v15813_v59, %v20104_v9  ;;  %v2654_v6 = vpop.f32.mrb[185].mxu1 }
 0x3c6   : >> { %v2655_v43 = vadd.f32 %v2654_v6, %v20098_v18  ;;  %v15814_v49 = vpop.f32.mrb[186].mxu1 }
 0x3c7   : >> { %2767 = vst [vmem:[#allocation2 + $0x10] sm:$0xff] %v2663_v2  ;;  %v2666_v28 = vadd.f32 %v15814_v49, %v20107_v32  ;;  %v2657_v44 = vpop.f32.mrb[187].mxu1 }
 0x3c8   : >> { %2765 = vst [vmem:[#allocation2] sm:$0xff] %v2655_v43  ;;  %v2658_v56 = vadd.f32 %v2657_v44, %v20101_v48  ;;  %v18013_v48 = vld [vmem:[%s23786_s4 + $0xc8] sm:$0xff]  }
 0x3c9   : >> { %2768 = vst [vmem:[#allocation2 + $0x18] sm:$0xff] %v2666_v28  ;;  %v20179_v58 = vpack.c.bf16 %v2666_v28, %v2663_v2 }
 0x3ca   : >> { %2766 = vst [vmem:[#allocation2 + $0x8] sm:$0xff] %v2658_v56  ;;  %v2811_v9 = vpack.c.bf16 %v2658_v56, %v2655_v43  ;;  %v18016_v43 = vld [vmem:[%s23786_s4 + $0x98] sm:$0xff]  }
 0x3cc   : >> { %v15817_v40 = vpop.f32.mrb[188].mxu1  ;;  %15908 = vmatmul.mubr.bf16.vlgmr.msra.gmra.mrb[212].mxu1 %v2811_v9 }
 0x3cd   : >> { %v20185_v18 = vadd.f32 %v15817_v40, %v20116_v22  ;;  %v2670_v11 = vpop.f32.mrb[189].mxu1  ;;  %15911 = vmatprep.mubr.msk.bf16.mxu1 %vm18885_vm0, %v18884_v1  ;;  %15996 = vmatpush3.bf16.msra.mxu1 %v18011_v14  ;;  %v18023_v40 = vld [vmem:[%s23786_s4 + $0xf0] sm:$0xff]  }
 0x3ce   : >> { %v2671_v32 = vadd.f32 %v2670_v11, %v20110_v52  ;;  %v15818_v47 = vpop.f32.mrb[190].mxu1  ;;  %15997 = vmatprep.subr.bf16.mxu1 %v18884_v1 }
 0x3cf   : >> { %2771 = vst [vmem:[#allocation2 + $0x30] sm:$0xff] %v20185_v18  ;;  %v20196_v31 = vadd.f32 %v15818_v47, %v20119_v57  ;;  %v2673_v22 = vpop.f32.mrb[191].mxu1  ;;  %v18010_v57 = vld [vmem:[%s23786_s4 + $0x80] sm:$0xff]  }
 0x3d0   : >> { %2769 = vst [vmem:[#allocation2 + $0x20] sm:$0xff] %v2671_v32  ;;  %v2674_v4 = vadd.f32 %v2673_v22, %v20113_v37  ;;  %v18015_v37 = vld [vmem:[%s23786_s4 + $0xd0] sm:$0xff]  }
 0x3d1   : >> { %2772 = vst [vmem:[#allocation2 + $0x38] sm:$0xff] %v20196_v31  ;;  %v2814_v50 = vpack.c.bf16 %v20196_v31, %v20185_v18  ;;  %15998 = vmatpush3.bf16.msra.mxu1 %v18013_v48  ;;  %v2836_v24 = vld [vmem:[#allocation2 + $0x1] sm:$0xff]  ;;  %v2837_v10 = vld [vmem:[#allocation2 + $0x9] sm:$0xff]  ;;  %v4476_v36 = vld [vmem:[#allocation2 + $0x11] sm:$0xff] }
 0x3d2   : >> { %2770 = vst [vmem:[#allocation2 + $0x28] sm:$0xff] %v2674_v4  ;;  %v20202_v52 = vpack.c.bf16 %v2674_v4, %v2671_v32  ;;  %15999 = vmatprep.subr.bf16.mxu1 %v18884_v1  ;;  %v2854_v45 = vpack.c.bf16 %v2837_v10, %v2836_v24  ;;  %v18020_v18 = vld [vmem:[%s23786_s4 + $0xa8] sm:$0xff]   ;;  %v18022_v10 = vld [vmem:[%s23786_s4 + $0xb0] sm:$0xff]  }
 0x3d4   : >> { %v15821_v15 = vpop.f32.mrb[192].mxu1  ;;  %15912 = vmatmul.mubr.bf16.gmra.mrb[216].mxu1 %v20179_v58  ;;  %15856 = vmatmul.mubr.bf16.vlgmr.msra.gmra.mrb[180].mxu0 %v2854_v45 }
 0x3d5   : >> { %v20213_v51 = vadd.f32 %v15821_v15, %v20128_v8  ;;  %v2686_v3 = vpop.f32.mrb[193].mxu1  ;;  %15915 = vmatprep.mubr.msk.bf16.mxu1 %vm18885_vm0, %v18884_v1  ;;  %15859 = vmatprep.mubr.msk.bf16.mxu0 %vm18885_vm0, %v18884_v1 }
 0x3d6   : >> { %v20218_v23 = vadd.f32 %v2686_v3, %v20122_v63  ;;  %v15822_v30 = vpop.f32.mrb[194].mxu1  ;;  %15944 = vmatpush3.bf16.msra.mxu0 %v18010_v57  ;;  %16000 = vmatpush3.bf16.msra.mxu1 %v18015_v37  ;;  %v18017_v63 = vld [vmem:[%s23786_s4 + $0xd8] sm:$0xff]  }
 0x3d7   : >> { %2775 = vst [vmem:[#allocation2 + $0x50] sm:$0xff] %v20213_v51  ;;  %v20227_v8 = vadd.f32 %v15822_v30, %v20131_v46  ;;  %v2689_v39 = vpop.f32.mrb[195].mxu1  ;;  %15945 = vmatprep.subr.bf16.mxu0 %v18884_v1  ;;  %v4477_v62 = vld [vmem:[#allocation2 + $0x19] sm:$0xff]  ;;  %16001 = vmatprep.subr.bf16.mxu1 %v18884_v1 }
 0x3d8   : >> { %2773 = vst [vmem:[#allocation2 + $0x40] sm:$0xff] %v20218_v23  ;;  %v20235_v35 = vadd.f32 %v2689_v39, %v20125_v20  ;;  %v20238_v13 = vld [vmem:[#allocation2 + $0x1c] sm:$0xff]  ;;  %v20253_v0 = vpack.c.bf16 %v4477_v62, %v4476_v36 }
 0x3d9   : >> { %v20240_v46 = vld [vmem:[#allocation2 + $0x24] sm:$0xff]  ;;  %2776 = vst [vmem:[#allocation2 + $0x58] sm:$0xff] %v20227_v8  ;;  %v2816_v7 = vpack.c.bf16 %v20227_v8, %v20213_v51 }
 0x3da   : >> { %v4924_v25 = vpack.c.bf16 %v20240_v46, %v20238_v13  ;;  %2774 = vst [vmem:[#allocation2 + $0x48] sm:$0xff] %v20235_v35  ;;  %v2815_v20 = vpack.c.bf16 %v20235_v35, %v20218_v23  ;;  %15946 = vmatpush3.bf16.msra.mxu0 %v18012_v42  ;;  %16002 = vmatpush3.bf16.msra.mxu1 %v18017_v63  ;;  %v2840_v44 = vld [vmem:[#allocation2 + $0x21] sm:$0xff]  ;;  %v2841_v56 = vld [vmem:[#allocation2 + $0x29] sm:$0xff]  ;;  %v18024_v23 = vld [vmem:[%s23786_s4 + $0xb8] sm:$0xff]  }
 0x3db   : >> { %15947 = vmatprep.subr.bf16.mxu0 %v18884_v1  ;;  %16003 = vmatprep.subr.bf16.mxu1 %v18884_v1  ;;  %v2856_v9 = vpack.c.bf16 %v2841_v56, %v2840_v44  ;;  %v3404_v44 = vld [vmem:[#allocation2 + $0x1b] sm:$0xff] }
 0x3dc   : >> { %v15825_v41 = vpop.f32.mrb[196].mxu1  ;;  %15916 = vmatmul.mubr.bf16.gmra.mrb[220].mxu1 %v20202_v52  ;;  %15860 = vmatmul.mubr.bf16.gmra.mrb[184].mxu0 %v20253_v0  ;;  %v3186_v56 = vld [vmem:[#allocation2 + $0x2] sm:$0xff] }
 0x3dd   : >> { %v20262_v54 = vadd.f32 %v15825_v41, %v20140_v55  ;;  %v2702_v59 = vpop.f32.mrb[197].mxu1  ;;  %15919 = vmatprep.mubr.msk.bf16.mxu1 %vm18885_vm0, %v18884_v1  ;;  %15863 = vmatprep.mubr.msk.bf16.mxu0 %vm18885_vm0, %v18884_v1 }
 0x3de   : >> { %v20268_v2 = vadd.f32 %v2702_v59, %v20134_v38  ;;  %v15826_v6 = vpop.f32.mrb[198].mxu1  ;;  %15948 = vmatpush3.bf16.msra.mxu0 %v18014_v5  ;;  %16004 = vmatpush3.bf16.msra.mxu1 %v18019_v12  ;;  %v18021_v38 = vld [vmem:[%s23786_s4 + $0xe8] sm:$0xff]  }
 0x3df   : >> { %2779 = vst [vmem:[#allocation2 + $0x70] sm:$0xff] %v20262_v54  ;;  %v20277_v55 = vadd.f32 %v15826_v6, %v20143_v27  ;;  %v2705_v49 = vpop.f32.mrb[199].mxu1  ;;  %15949 = vmatprep.subr.bf16.mxu0 %v18884_v1  ;;  %16005 = vmatprep.subr.bf16.mxu1 %v18884_v1 }
 0x3e0   : >> { %2777 = vst [vmem:[#allocation2 + $0x60] sm:$0xff] %v20268_v2  ;;  %v20285_v28 = vadd.f32 %v2705_v49, %v20137_v60  ;;  %v18018_v60 = vld [vmem:[%s23786_s4 + $0xa0] sm:$0xff]   ;;  %v2846_v12 = vld [vmem:[#allocation2 + $0x51] sm:$0xff] }
 0x3e1   : >> { %2780 = vst [vmem:[#allocation2 + $0x78] sm:$0xff] %v20277_v55  ;;  %v2818_v27 = vpack.c.bf16 %v20277_v55, %v20262_v54  ;;  %v2844_v39 = vld [vmem:[#allocation2 + $0x41] sm:$0xff] }
 0x3e2   : >> { %2778 = vst [vmem:[#allocation2 + $0x68] sm:$0xff] %v20285_v28  ;;  %v2817_v14 = vpack.c.bf16 %v20285_v28, %v20268_v2  ;;  %15950 = vmatpush3.bf16.msra.mxu0 %v18016_v43  ;;  %16006 = vmatpush3.bf16.msra.mxu1 %v18021_v38  ;;  %v3401_v54 = vld [vmem:[#allocation2 + $0x3] sm:$0xff]  ;;  %v3402_v2 = vld [vmem:[#allocation2 + $0xb] sm:$0xff] }
 0x3e3   : >> { %15951 = vmatprep.subr.bf16.mxu0 %v18884_v1  ;;  %16007 = vmatprep.subr.bf16.mxu1 %v18884_v1  ;;  %v3419_v55 = vpack.c.bf16 %v3402_v2, %v3401_v54  ;;  %v18027_v49 = vld [vmem:[%s23786_s4 + $0x140] sm:$0xff]   ;;  %v18029_v28 = vld [vmem:[%s23786_s4 + $0x148] sm:$0xff]  }
 0x3e4   : >> { %v15829_v11 = vpop.f32.mrb[200].mxu1  ;;  %15920 = vmatmul.mubr.bf16.gmra.mrb[224].mxu1 %v2814_v50  ;;  %15864 = vmatmul.mubr.bf16.gmra.mrb[188].mxu0 %v2856_v9  ;;  %v2843_v50 = vld [vmem:[#allocation2 + $0x39] sm:$0xff] }
 0x3e5   : >> { %v2727_v48 = vadd.f32 %v15829_v11, %v20152_v29  ;;  %v2718_v32 = vpop.f32.mrb[201].mxu1  ;;  %15923 = vmatprep.mubr.msk.bf16.mxu1 %vm18885_vm0, %v18884_v1  ;;  %15867 = vmatprep.mubr.msk.bf16.mxu0 %vm18885_vm0, %v18884_v1  ;;  %v18026_v9 = vld [vmem:[%s23786_s4 + $0x100] sm:$0xff]   ;;  %v18031_v11 = vld [vmem:[%s23786_s4 + $0x150] sm:$0xff]  }
 0x3e6   : >> { %v20309_v47 = vadd.f32 %v2718_v32, %v20146_v17  ;;  %v15830_v22 = vpop.f32.mrb[202].mxu1  ;;  %15952 = vmatpush3.bf16.msra.mxu0 %v18018_v60  ;;  %16008 = vmatpush3.bf16.msra.mxu1 %v18023_v40  ;;  %v18025_v17 = vld [vmem:[%s23786_s4 + $0xf8] sm:$0xff]   ;;  %v3405_v32 = vld [vmem:[#allocation2 + $0x23] sm:$0xff] }
 0x3e7   : >> { %2783 = vst [vmem:[#allocation2 + $0x90] sm:$0xff] %v2727_v48  ;;  %v2730_v29 = vadd.f32 %v15830_v22, %v20155_v26  ;;  %v2721_v31 = vpop.f32.mrb[203].mxu1  ;;  %15953 = vmatprep.subr.bf16.mxu0 %v18884_v1  ;;  %16009 = vmatprep.subr.bf16.mxu1 %v18884_v1  ;;  %v2842_v26 = vld [vmem:[#allocation2 + $0x31] sm:$0xff]  ;;  %v2847_v5 = vld [vmem:[#allocation2 + $0x59] sm:$0xff]  ;;  %v18028_v48 = vld [vmem:[%s23786_s4 + $0x108] sm:$0xff]  }
 0x3e8   : >> { %2781 = vst [vmem:[#allocation2 + $0x80] sm:$0xff] %v20309_v47  ;;  %v20323_v4 = vadd.f32 %v2721_v31, %v20149_v53  ;;  %v2857_v57 = vpack.c.bf16 %v2843_v50, %v2842_v26  ;;  %v2859_v51 = vpack.c.bf16 %v2847_v5, %v2846_v12  ;;  %v2850_v41 = vld [vmem:[#allocation2 + $0x71] sm:$0xff]  ;;  %v18035_v50 = vld [vmem:[%s23786_s4 + $0x160] sm:$0xff]  }
 0x3e9   : >> { %2784 = vst [vmem:[#allocation2 + $0x98] sm:$0xff] %v2730_v29  ;;  %v2849_v8 = vld [vmem:[#allocation2 + $0x69] sm:$0xff]  ;;  %v18033_v22 = vld [vmem:[%s23786_s4 + $0x158] sm:$0xff]  }
 0x3ea   : >> { %2782 = vst [vmem:[#allocation2 + $0x88] sm:$0xff] %v20323_v4  ;;  %15954 = vmatpush3.bf16.msra.mxu0 %v18020_v18  ;;  %v2819_v24 = vpack.c.bf16 %v20323_v4, %v20309_v47  ;;  %16010 = vmatpush3.bf16.msra.mxu1 %v18025_v17  ;;  %v3406_v47 = vld [vmem:[#allocation2 + $0x2b] sm:$0xff]  ;;  %v4692_v18 = vld [vmem:[#allocation2 + $0x1a] sm:$0xff] }
 0x3eb   : >> { %15955 = vmatprep.subr.bf16.mxu0 %v18884_v1  ;;  %16099 = vmatprep.subr.bf16.mxu1 %v18884_v1  ;;  %v4691_v29 = vld [vmem:[#allocation2 + $0x12] sm:$0xff]  ;;  %v3421_v31 = vpack.c.bf16 %v3406_v47, %v3405_v32  ;;  %v3195_v5 = vld [vmem:[#allocation2 + $0x4a] sm:$0xff]  ;;  %v18043_v47 = vld [vmem:[%s23786_s4 + $0x1c0] sm:$0xff]  }
 0x3ec   : >> { %v15833_v53 = vpop.f32.mrb[204].mxu1  ;;  %15924 = vmatmul.mubr.bf16.gmra.mrb[228].mxu1 %v2815_v20  ;;  %15868 = vmatmul.mubr.bf16.gmra.mrb[192].mxu0 %v2857_v57  ;;  %v18030_v17 = vld [vmem:[%s23786_s4 + $0x110] sm:$0xff]   ;;  %v20410_v4 = vpack.c.bf16 %v4692_v18, %v4691_v29  ;;  %v18032_v26 = vld [vmem:[%s23786_s4 + $0x118] sm:$0xff]   ;;  %v3190_v57 = vld [vmem:[#allocation2 + $0x22] sm:$0xff] }
 0x3ed   : >> { %v2743_v45 = vadd.f32 %v15833_v53, %v20164_v16  ;;  %v2734_v37 = vpop.f32.mrb[205].mxu1  ;;  %15927 = vmatprep.mubr.msk.bf16.mxu1 %vm18885_vm0, %v18884_v1  ;;  %15871 = vmatprep.mubr.msk.bf16.mxu0 %vm18885_vm0, %v18884_v1  ;;  %v3191_v53 = vld [vmem:[#allocation2 + $0x2a] sm:$0xff]  ;;  %v3411_v12 = vld [vmem:[#allocation2 + $0x53] sm:$0xff] }
 0x3ee   : >> { %v2735_v15 = vadd.f32 %v2734_v37, %v20158_v33  ;;  %v15834_v3 = vpop.f32.mrb[206].mxu1  ;;  %15956 = vmatpush3.bf16.msra.mxu0 %v18022_v10  ;;  %v2845_v33 = vld [vmem:[#allocation2 + $0x49] sm:$0xff] }
 0x3ef   : >> { %2787 = vst [vmem:[#allocation2 + $0xb0] sm:$0xff] %v2743_v45  ;;  %v2746_v30 = vadd.f32 %v15834_v3, %v20167_v34  ;;  %v2737_v16 = vpop.f32.mrb[207].mxu1  ;;  %15957 = vmatprep.subr.bf16.mxu0 %v18884_v1  ;;  %v2858_v63 = vpack.c.bf16 %v2845_v33, %v2844_v39  ;;  %v18037_v10 = vld [vmem:[%s23786_s4 + $0x168] sm:$0xff]   ;;  %v3407_v45 = vld [vmem:[#allocation2 + $0x33] sm:$0xff]  ;;  %v3206_v3 = vpack.c.bf16 %v3191_v53, %v3190_v57  ;;  %v3416_v2 = vld [vmem:[#allocation2 + $0x7b] sm:$0xff] }
 0x3f0   : >> { %2785 = vst [vmem:[#allocation2 + $0xa0] sm:$0xff] %v2735_v15  ;;  %v2738_v42 = vadd.f32 %v2737_v16, %v20161_v19  ;;  %v18034_v15 = vld [vmem:[%s23786_s4 + $0x120] sm:$0xff]   ;;  %v18041_v39 = vld [vmem:[%s23786_s4 + $0x178] sm:$0xff]   ;;  %v18045_v18 = vld [vmem:[%s23786_s4 + $0x1c8] sm:$0xff]  }
 0x3f1   : >> { %2788 = vst [vmem:[#allocation2 + $0xb8] sm:$0xff] %v2746_v30  ;;  %v2852_v6 = vld [vmem:[#allocation2 + $0x81] sm:$0xff]  ;;  %v2853_v43 = vld [vmem:[#allocation2 + $0x89] sm:$0xff] }
 0x3f2   : >> { %2786 = vst [vmem:[#allocation2 + $0xa8] sm:$0xff] %v2738_v42  ;;  %15958 = vmatpush3.bf16.msra.mxu0 %v18024_v23  ;;  %v2862_v38 = vpack.c.bf16 %v2853_v43, %v2852_v6  ;;  %v18039_v23 = vld [vmem:[%s23786_s4 + $0x170] sm:$0xff]   ;;  %v18036_v30 = vld [vmem:[%s23786_s4 + $0x128] sm:$0xff]   ;;  %v3193_v33 = vld [vmem:[#allocation2 + $0x3a] sm:$0xff] }
 0x3f3   : >> { %16047 = vmatprep.subr.bf16.mxu0 %v18884_v1  ;;  %v3409_v16 = vld [vmem:[#allocation2 + $0x43] sm:$0xff]  ;;  %v3410_v42 = vld [vmem:[#allocation2 + $0x4b] sm:$0xff] }
 0x3f4   : >> { %v15837_v62 = vpop.f32.mrb[208].mxu1  ;;  %15928 = vmatmul.mubr.bf16.gmra.mrb[232].mxu1 %v2816_v7  ;;  %15872 = vmatmul.mubr.bf16.gmra.mrb[196].mxu0 %v2858_v63  ;;  %v3192_v63 = vld [vmem:[#allocation2 + $0x32] sm:$0xff]  ;;  %v3198_v6 = vld [vmem:[#allocation2 + $0x62] sm:$0xff]  ;;  %v3199_v43 = vld [vmem:[#allocation2 + $0x6a] sm:$0xff] }
 0x3f5   : >> { %v2750_v34 = vpop.f32.mrb[209].mxu1  ;;  %15931 = vmatprep.mubr.msk.bf16.mxu1 %vm18885_vm0, %v18884_v1  ;;  %15875 = vmatprep.mubr.msk.bf16.mxu0 %vm18885_vm0, %v18884_v1  ;;  %v3423_v62 = vpack.c.bf16 %v3410_v42, %v3409_v16  ;;  %v5337_v29 = vld [vmem:[#allocation2 + $0x26] sm:$0xff]  ;;  %v18047_v57 = vld [vmem:[%s23786_s4 + $0x1d0] sm:$0xff]  }
 0x3f6   : >> { %v2751_v19 = vadd.f32 %v2750_v34, %v20170_v61  ;;  %v15838_v35 = vpop.f32.mrb[210].mxu1  ;;  %v2848_v61 = vld [vmem:[#allocation2 + $0x61] sm:$0xff]  ;;  %v18038_v34 = vld [vmem:[%s23786_s4 + $0x130] sm:$0xff]  }
 0x3f7   : >> { %v2753_v36 = vpop.f32.mrb[211].mxu1  ;;  %v2860_v7 = vpack.c.bf16 %v2849_v8, %v2848_v61  ;;  %v18040_v35 = vld [vmem:[%s23786_s4 + $0x138] sm:$0xff]   ;;  %v3413_v8 = vld [vmem:[#allocation2 + $0x63] sm:$0xff] }
 0x3f8   : >> { %2789 = vst [vmem:[#allocation2 + $0xc0] sm:$0xff] %v2751_v19  ;;  %v2754_v20 = vadd.f32 %v2753_v36, %v20173_v21  ;;  %v2851_v21 = vld [vmem:[#allocation2 + $0x79] sm:$0xff]  ;;  %v3207_v19 = vpack.c.bf16 %v3193_v33, %v3192_v63  ;;  %v18044_v53 = vld [vmem:[%s23786_s4 + $0x188] sm:$0xff]  }
 0x3f9   : >> { %v2861_v59 = vpack.c.bf16 %v2851_v21, %v2850_v41  ;;  %v3412_v36 = vld [vmem:[#allocation2 + $0x5b] sm:$0xff]  ;;  %v3196_v41 = vld [vmem:[#allocation2 + $0x52] sm:$0xff]  ;;  %v3838_v33 = vld [vmem:[#allocation2 + $0x46] sm:$0xff] }
 0x3fa   : >> { %2790 = vst [vmem:[#allocation2 + $0xc8] sm:$0xff] %v2754_v20  ;;  %v3194_v20 = vld [vmem:[#allocation2 + $0x42] sm:$0xff]  ;;  %v3197_v21 = vld [vmem:[#allocation2 + $0x5a] sm:$0xff] }
 0x3fb   : >> { %v3208_v61 = vpack.c.bf16 %v3195_v5, %v3194_v20  ;;  %v3209_v54 = vpack.c.bf16 %v3197_v21, %v3196_v41  ;;  %v18051_v42 = vld [vmem:[%s23786_s4 + $0x1e0] sm:$0xff]   ;;  %v18053_v63 = vld [vmem:[%s23786_s4 + $0x1e8] sm:$0xff]   ;;  %v18055_v20 = vld [vmem:[%s23786_s4 + $0x1f0] sm:$0xff]  }
 0x3fc   : >> { %15932 = vmatmul.mubr.bf16.gmra.mrb[236].mxu1 %v2817_v14  ;;  %15876 = vmatmul.mubr.bf16.gmra.mrb[200].mxu0 %v2859_v51  ;;  %v3403_v14 = vld [vmem:[#allocation2 + $0x13] sm:$0xff]  ;;  %v3424_v51 = vpack.c.bf16 %v3412_v36, %v3411_v12  ;;  %v18052_v5 = vld [vmem:[%s23786_s4 + $0x1a8] sm:$0xff]  }
 0x3fd   : >> { %15935 = vmatprep.mubr.msk.bf16.mxu1 %vm18885_vm0, %v18884_v1  ;;  %15879 = vmatprep.mubr.msk.bf16.mxu0 %vm18885_vm0, %v18884_v1  ;;  %v3420_v60 = vpack.c.bf16 %v3404_v44, %v3403_v14  ;;  %v3418_v44 = vld [vmem:[#allocation2 + $0x8b] sm:$0xff] }
 0x3fe   : >> { %v3839_v12 = vld [vmem:[#allocation2 + $0x4e] sm:$0xff] }
 0x3ff   : >> { %v18054_v41 = vld [vmem:[%s23786_s4 + $0x1b0] sm:$0xff]  }
 0x404   : >> { %15936 = vmatmul.mubr.bf16.gmra.mrb[240].mxu1 %v2818_v27  ;;  %15880 = vmatmul.mubr.bf16.gmra.mrb[204].mxu0 %v2860_v7  ;;  %v3187_v27 = vld [vmem:[#allocation2 + $0xa] sm:$0xff] }
 0x405   : >> { %15939 = vmatprep.mubr.msk.bf16.mxu1 %vm18885_vm0, %v18884_v1  ;;  %15883 = vmatprep.mubr.msk.bf16.mxu0 %vm18885_vm0, %v18884_v1  ;;  %v3204_v40 = vpack.c.bf16 %v3187_v27, %v3186_v56  ;;  %v3414_v7 = vld [vmem:[#allocation2 + $0x6b] sm:$0xff]  ;;  %v3201_v56 = vld [vmem:[#allocation2 + $0x7a] sm:$0xff] }
 0x406   : >> { %v3200_v27 = vld [vmem:[#allocation2 + $0x72] sm:$0xff] }
 0x40c   : >> { %15940 = vmatmul.mubr.bf16.gmra.mrb[244].mxu1 %v2819_v24  ;;  %15884 = vmatmul.mubr.bf16.gmra.mrb[208].mxu0 %v2861_v59  ;;  %v3408_v24 = vld [vmem:[#allocation2 + $0x3b] sm:$0xff]  ;;  %v3425_v59 = vpack.c.bf16 %v3414_v7, %v3413_v8 }
 0x40d   : >> { %16011 = vmatprep.mubr.msk.bf16.mxu1 %vm18885_vm0, %v18884_v1  ;;  %15887 = vmatprep.mubr.msk.bf16.mxu0 %vm18885_vm0, %v18884_v1  ;;  %v3422_v37 = vpack.c.bf16 %v3408_v24, %v3407_v45  ;;  %v18042_v24 = vld [vmem:[%s23786_s4 + $0x180] sm:$0xff]   ;;  %v3835_v45 = vld [vmem:[#allocation2 + $0x2e] sm:$0xff] }
 0x40e   : >> { %v3623_v8 = vld [vmem:[#allocation2 + $0x3c] sm:$0xff]  ;;  %v3622_v7 = vld [vmem:[#allocation2 + $0x34] sm:$0xff] }
 0x414   : >> { %16012 = vmatmul.mubr.bf16.vlgmr.msra.gmra.mrb[248].mxu1 %v3419_v55  ;;  %15888 = vmatmul.mubr.bf16.gmra.mrb[212].mxu0 %v2862_v38  ;;  %v3415_v55 = vld [vmem:[#allocation2 + $0x73] sm:$0xff]  ;;  %v3210_v38 = vpack.c.bf16 %v3199_v43, %v3198_v6  ;;  %v3624_v6 = vld [vmem:[#allocation2 + $0x44] sm:$0xff] }
 0x415   : >> { %16015 = vmatprep.mubr.msk.bf16.mxu1 %vm18885_vm0, %v18884_v1  ;;  %15959 = vmatprep.mubr.msk.bf16.mxu0 %vm18885_vm0, %v18884_v1  ;;  %v3625_v43 = vld [vmem:[#allocation2 + $0x4c] sm:$0xff] }
 0x416   : >> { %16100 = vmatpush3.bf16.msra.mxu1 %v18027_v49  ;;  %v3426_v49 = vpack.c.bf16 %v3416_v2, %v3415_v55  ;;  %v3842_v2 = vld [vmem:[#allocation2 + $0x66] sm:$0xff]  ;;  %v3841_v55 = vld [vmem:[#allocation2 + $0x5e] sm:$0xff] }
 0x417   : >> { %16101 = vmatprep.subr.bf16.mxu1 %v18884_v1 }
 0x41a   : >> { %16102 = vmatpush3.bf16.msra.mxu1 %v18029_v28  ;;  %v3417_v28 = vld [vmem:[#allocation2 + $0x83] sm:$0xff] }
 0x41b   : >> { %16103 = vmatprep.subr.bf16.mxu1 %v18884_v1  ;;  %v3427_v14 = vpack.c.bf16 %v3418_v44, %v3417_v28  ;;  %v3843_v28 = vld [vmem:[#allocation2 + $0x6e] sm:$0xff]  ;;  %v3844_v44 = vld [vmem:[#allocation2 + $0x76] sm:$0xff] }
 0x41c   : >> { %16016 = vmatmul.mubr.bf16.gmra.mrb[252].mxu1 %v3420_v60  ;;  %15960 = vmatmul.mubr.bf16.vlgmr.msra.gmra.mrb[216].mxu0 %v3204_v40  ;;  %v3211_v60 = vpack.c.bf16 %v3201_v56, %v3200_v27  ;;  %v3831_v40 = vld [vmem:[#allocation2 + $0xe] sm:$0xff]  ;;  %v3627_v56 = vld [vmem:[#allocation2 + $0x5c] sm:$0xff] }
 0x41d   : >> { %16019 = vmatprep.mubr.msk.bf16.mxu1 %vm18885_vm0, %v18884_v1  ;;  %15963 = vmatprep.mubr.msk.bf16.mxu0 %vm18885_vm0, %v18884_v1  ;;  %v3626_v27 = vld [vmem:[#allocation2 + $0x54] sm:$0xff] }
 0x41e   : >> { %16048 = vmatpush3.bf16.msra.mxu0 %v18026_v9  ;;  %16104 = vmatpush3.bf16.msra.mxu1 %v18031_v11  ;;  %v3832_v9 = vld [vmem:[#allocation2 + $0x16] sm:$0xff]  ;;  %v3202_v11 = vld [vmem:[#allocation2 + $0x82] sm:$0xff] }
 0x41f   : >> { %16049 = vmatprep.subr.bf16.mxu0 %v18884_v1  ;;  %16105 = vmatprep.subr.bf16.mxu1 %v18884_v1  ;;  %v3849_v32 = vpack.c.bf16 %v3832_v9, %v3831_v40  ;;  %v3846_v9 = vld [vmem:[#allocation2 + $0x86] sm:$0xff] }
 0x420   : >> { %v3628_v40 = vld [vmem:[#allocation2 + $0x64] sm:$0xff] }
 0x422   : >> { %16050 = vmatpush3.bf16.msra.mxu0 %v18028_v48  ;;  %16106 = vmatpush3.bf16.msra.mxu1 %v18033_v22  ;;  %v3203_v48 = vld [vmem:[#allocation2 + $0x8a] sm:$0xff] }
 0x423   : >> { %16051 = vmatprep.subr.bf16.mxu0 %v18884_v1  ;;  %16107 = vmatprep.subr.bf16.mxu1 %v18884_v1  ;;  %v3212_v22 = vpack.c.bf16 %v3203_v48, %v3202_v11  ;;  %v3629_v11 = vld [vmem:[#allocation2 + $0x6c] sm:$0xff]  ;;  %v3845_v48 = vld [vmem:[#allocation2 + $0x7e] sm:$0xff] }
 0x424   : >> { %16020 = vmatmul.mubr.bf16.gmra.mrb[0].mxu1 %v3421_v31  ;;  %15964 = vmatmul.mubr.bf16.gmra.mrb[220].mxu0 %v20410_v4  ;;  %v3616_v31 = vld [vmem:[#allocation2 + $0x4] sm:$0xff] }
 0x425   : >> { %16023 = vmatprep.mubr.msk.bf16.mxu1 %vm18885_vm0, %v18884_v1  ;;  %15967 = vmatprep.mubr.msk.bf16.mxu0 %vm18885_vm0, %v18884_v1 }
 0x426   : >> { %16052 = vmatpush3.bf16.msra.mxu0 %v18030_v17  ;;  %16108 = vmatpush3.bf16.msra.mxu1 %v18035_v50  ;;  %v3617_v17 = vld [vmem:[#allocation2 + $0xc] sm:$0xff]  ;;  %v5336_v50 = vld [vmem:[#allocation2 + $0x1e] sm:$0xff] }
 0x427   : >> { %16053 = vmatprep.subr.bf16.mxu0 %v18884_v1  ;;  %16109 = vmatprep.subr.bf16.mxu1 %v18884_v1 }
 0x42a   : >> { %16054 = vmatpush3.bf16.msra.mxu0 %v18032_v26  ;;  %16110 = vmatpush3.bf16.msra.mxu1 %v18037_v10  ;;  %v20491_v26 = vpack.c.bf16 %v5337_v29, %v5336_v50  ;;  %v3634_v10 = vpack.c.bf16 %v3617_v17, %v3616_v31  ;;  %v3631_v29 = vld [vmem:[#allocation2 + $0x7c] sm:$0xff]  ;;  %v3630_v31 = vld [vmem:[#allocation2 + $0x74] sm:$0xff] }
 0x42b   : >> { %16055 = vmatprep.subr.bf16.mxu0 %v18884_v1  ;;  %16111 = vmatprep.subr.bf16.mxu1 %v18884_v1  ;;  %v3641_v50 = vpack.c.bf16 %v3631_v29, %v3630_v31  ;;  %v4050_v29 = vld [vmem:[#allocation2 + $0x2f] sm:$0xff]  ;;  %v4051_v31 = vld [vmem:[#allocation2 + $0x37] sm:$0xff] }
 0x42c   : >> { %16024 = vmatmul.mubr.bf16.gmra.mrb[4].mxu1 %v3422_v37  ;;  %15968 = vmatmul.mubr.bf16.gmra.mrb[224].mxu0 %v3206_v3  ;;  %v3836_v37 = vld [vmem:[#allocation2 + $0x36] sm:$0xff] }
 0x42d   : >> { %16027 = vmatprep.mubr.msk.bf16.mxu1 %vm18885_vm0, %v18884_v1  ;;  %15971 = vmatprep.mubr.msk.bf16.mxu0 %vm18885_vm0, %v18884_v1  ;;  %v3618_v3 = vld [vmem:[#allocation2 + $0x14] sm:$0xff] }
 0x42e   : >> { %16056 = vmatpush3.bf16.msra.mxu0 %v18034_v15  ;;  %16112 = vmatpush3.bf16.msra.mxu1 %v18039_v23  ;;  %v18049_v15 = vld [vmem:[%s23786_s4 + $0x1d8] sm:$0xff]   ;;  %v3851_v23 = vpack.c.bf16 %v3836_v37, %v3835_v45  ;;  %v3635_v16 = vpack.c.bf16 %v20238_v13, %v3618_v3 }
 0x42f   : >> { %16057 = vmatprep.subr.bf16.mxu0 %v18884_v1  ;;  %16113 = vmatprep.subr.bf16.mxu1 %v18884_v1  ;;  %v18097_v13 = vld [vmem:[%s23786_s4 + $0x358] sm:$0xff]  }
 0x432   : >> { %16058 = vmatpush3.bf16.msra.mxu0 %v18036_v30  ;;  %16114 = vmatpush3.bf16.msra.mxu1 %v18041_v39  ;;  %v18046_v30 = vld [vmem:[%s23786_s4 + $0x190] sm:$0xff]   ;;  %v18048_v39 = vld [vmem:[%s23786_s4 + $0x198] sm:$0xff]  }
 0x433   : >> { %16059 = vmatprep.subr.bf16.mxu0 %v18884_v1  ;;  %16203 = vmatprep.subr.bf16.mxu1 %v18884_v1 }
 0x434   : >> { %16028 = vmatmul.mubr.bf16.gmra.mrb[8].mxu1 %v3423_v62  ;;  %15972 = vmatmul.mubr.bf16.gmra.mrb[228].mxu0 %v3207_v19  ;;  %v3621_v62 = vld [vmem:[#allocation2 + $0x2c] sm:$0xff] }
 0x435   : >> { %16031 = vmatprep.mubr.msk.bf16.mxu1 %vm18885_vm0, %v18884_v1  ;;  %15975 = vmatprep.mubr.msk.bf16.mxu0 %vm18885_vm0, %v18884_v1  ;;  %v3636_v36 = vpack.c.bf16 %v3621_v62, %v20240_v46 }
 0x436   : >> { %16060 = vmatpush3.bf16.msra.mxu0 %v18038_v34  ;;  %v3837_v34 = vld [vmem:[#allocation2 + $0x3e] sm:$0xff] }
 0x437   : >> { %16061 = vmatprep.subr.bf16.mxu0 %v18884_v1  ;;  %v3852_v19 = vpack.c.bf16 %v3838_v33, %v3837_v34 }
 0x43a   : >> { %16062 = vmatpush3.bf16.msra.mxu0 %v18040_v35  ;;  %v18050_v35 = vld [vmem:[%s23786_s4 + $0x1a0] sm:$0xff]  }
 0x43b   : >> { %16151 = vmatprep.subr.bf16.mxu0 %v18884_v1 }
 0x43c   : >> { %16032 = vmatmul.mubr.bf16.gmra.mrb[12].mxu1 %v3424_v51  ;;  %15976 = vmatmul.mubr.bf16.gmra.mrb[232].mxu0 %v3208_v61  ;;  %v3840_v51 = vld [vmem:[#allocation2 + $0x56] sm:$0xff] }
 0x43d   : >> { %16035 = vmatprep.mubr.msk.bf16.mxu1 %vm18885_vm0, %v18884_v1  ;;  %15979 = vmatprep.mubr.msk.bf16.mxu0 %vm18885_vm0, %v18884_v1  ;;  %v18057_v61 = vld [vmem:[%s23786_s4 + $0x1f8] sm:$0xff]   ;;  %v3853_v21 = vpack.c.bf16 %v3840_v51, %v3839_v12 }
 0x444   : >> { %16036 = vmatmul.mubr.bf16.gmra.mrb[16].mxu1 %v3425_v59  ;;  %15980 = vmatmul.mubr.bf16.gmra.mrb[236].mxu0 %v3209_v54  ;;  %v3637_v59 = vpack.c.bf16 %v3623_v8, %v3622_v7  ;;  %v18056_v54 = vld [vmem:[%s23786_s4 + $0x1b8] sm:$0xff]   ;;  %v18063_v8 = vld [vmem:[%s23786_s4 + $0x250] sm:$0xff]   ;;  %v18060_v7 = vld [vmem:[%s23786_s4 + $0x208] sm:$0xff]  }
 0x445   : >> { %16039 = vmatprep.mubr.msk.bf16.mxu1 %vm18885_vm0, %v18884_v1  ;;  %15983 = vmatprep.mubr.msk.bf16.mxu0 %vm18885_vm0, %v18884_v1 }
 0x44c   : >> { %16040 = vmatmul.mubr.bf16.gmra.mrb[20].mxu1 %v3426_v49  ;;  %15984 = vmatmul.mubr.bf16.gmra.mrb[240].mxu0 %v3210_v38  ;;  %v3854_v49 = vpack.c.bf16 %v3842_v2, %v3841_v55  ;;  %v3638_v38 = vpack.c.bf16 %v3625_v43, %v3624_v6  ;;  %v4049_v2 = vld [vmem:[#allocation2 + $0x27] sm:$0xff] }
 0x44d   : >> { %16043 = vmatprep.mubr.msk.bf16.mxu1 %vm18885_vm0, %v18884_v1  ;;  %15987 = vmatprep.mubr.msk.bf16.mxu0 %vm18885_vm0, %v18884_v1 }
 0x454   : >> { %16044 = vmatmul.mubr.bf16.gmra.mrb[24].mxu1 %v3427_v14  ;;  %15988 = vmatmul.mubr.bf16.gmra.mrb[244].mxu0 %v3211_v60  ;;  %v3855_v14 = vpack.c.bf16 %v3844_v44, %v3843_v28  ;;  %v3639_v60 = vpack.c.bf16 %v3627_v56, %v3626_v27  ;;  %v4048_v44 = vld [vmem:[#allocation2 + $0x1f] sm:$0xff] }
 0x455   : >> { %16115 = vmatprep.mubr.msk.bf16.mxu1 %vm18885_vm0, %v18884_v1  ;;  %15991 = vmatprep.mubr.msk.bf16.mxu0 %vm18885_vm0, %v18884_v1 }
 0x45c   : >> { %16116 = vmatmul.mubr.bf16.vlgmr.msra.gmra.mrb[28].mxu1 %v3849_v32  ;;  %15992 = vmatmul.mubr.bf16.gmra.mrb[248].mxu0 %v3212_v22  ;;  %v3856_v32 = vpack.c.bf16 %v3846_v9, %v3845_v48  ;;  %v3847_v22 = vld [vmem:[#allocation2 + $0x8e] sm:$0xff]  ;;  %v18064_v48 = vld [vmem:[%s23786_s4 + $0x218] sm:$0xff]  }
 0x45d   : >> { %16119 = vmatprep.mubr.msk.bf16.mxu1 %vm18885_vm0, %v18884_v1  ;;  %16063 = vmatprep.mubr.msk.bf16.mxu0 %vm18885_vm0, %v18884_v1 }
 0x45e   : >> { %16204 = vmatpush3.bf16.msra.mxu1 %v18043_v47  ;;  %v3640_v47 = vpack.c.bf16 %v3629_v11, %v3628_v40  ;;  %v4065_v40 = vpack.c.bf16 %v4049_v2, %v4048_v44  ;;  %v18067_v11 = vld [vmem:[%s23786_s4 + $0x260] sm:$0xff]   ;;  %v18072_v2 = vld [vmem:[%s23786_s4 + $0x238] sm:$0xff]  }
 0x45f   : >> { %16205 = vmatprep.subr.bf16.mxu1 %v18884_v1 }
 0x462   : >> { %16206 = vmatpush3.bf16.msra.mxu1 %v18045_v18  ;;  %v3848_v18 = vld [vmem:[#allocation2 + $0x96] sm:$0xff] }
 0x463   : >> { %16207 = vmatprep.subr.bf16.mxu1 %v18884_v1  ;;  %v3857_v17 = vpack.c.bf16 %v3848_v18, %v3847_v22  ;;  %v18069_v22 = vld [vmem:[%s23786_s4 + $0x268] sm:$0xff]  }
 0x464   : >> { %16120 = vmatmul.mubr.bf16.gmra.mrb[32].mxu1 %v20491_v26  ;;  %16064 = vmatmul.mubr.bf16.vlgmr.msra.gmra.mrb[252].mxu0 %v3634_v10  ;;  %v3632_v10 = vld [vmem:[#allocation2 + $0x84] sm:$0xff] }
 0x465   : >> { %16123 = vmatprep.mubr.msk.bf16.mxu1 %vm18885_vm0, %v18884_v1  ;;  %16067 = vmatprep.mubr.msk.bf16.mxu0 %vm18885_vm0, %v18884_v1 }
 0x466   : >> { %16152 = vmatpush3.bf16.msra.mxu0 %v18042_v24  ;;  %16208 = vmatpush3.bf16.msra.mxu1 %v18047_v57  ;;  %v3633_v57 = vld [vmem:[#allocation2 + $0x8c] sm:$0xff] }
 0x467   : >> { %16153 = vmatprep.subr.bf16.mxu0 %v18884_v1  ;;  %16209 = vmatprep.subr.bf16.mxu1 %v18884_v1  ;;  %v3642_v3 = vpack.c.bf16 %v3633_v57, %v3632_v10  ;;  %v4267_v57 = vld [vmem:[#allocation2 + $0x40] sm:$0xff] }
 0x46a   : >> { %16154 = vmatpush3.bf16.msra.mxu0 %v18044_v53  ;;  %16210 = vmatpush3.bf16.msra.mxu1 %v18049_v15  ;;  %v18059_v15 = vld [vmem:[%s23786_s4 + $0x240] sm:$0xff]  }
 0x46b   : >> { %16155 = vmatprep.subr.bf16.mxu0 %v18884_v1  ;;  %16211 = vmatprep.subr.bf16.mxu1 %v18884_v1 }
 0x46c   : >> { %16124 = vmatmul.mubr.bf16.gmra.mrb[36].mxu1 %v3851_v23  ;;  %16068 = vmatmul.mubr.bf16.gmra.mrb[0].mxu0 %v3635_v16  ;;  %v18061_v23 = vld [vmem:[%s23786_s4 + $0x248] sm:$0xff]  }
 0x46d   : >> { %16127 = vmatprep.mubr.msk.bf16.mxu1 %vm18885_vm0, %v18884_v1  ;;  %16071 = vmatprep.mubr.msk.bf16.mxu0 %vm18885_vm0, %v18884_v1  ;;  %v4264_v16 = vld [vmem:[#allocation2 + $0x28] sm:$0xff] }
 0x46e   : >> { %16156 = vmatpush3.bf16.msra.mxu0 %v18046_v30  ;;  %16212 = vmatpush3.bf16.msra.mxu1 %v18051_v42  ;;  %v4047_v42 = vld [vmem:[#allocation2 + $0x17] sm:$0xff] }
 0x46f   : >> { %16157 = vmatprep.subr.bf16.mxu0 %v18884_v1  ;;  %16213 = vmatprep.subr.bf16.mxu1 %v18884_v1 }
 0x472   : >> { %16158 = vmatpush3.bf16.msra.mxu0 %v18048_v39  ;;  %16214 = vmatpush3.bf16.msra.mxu1 %v18053_v63  ;;  %v4046_v39 = vld [vmem:[#allocation2 + $0xf] sm:$0xff] }
 0x473   : >> { %16159 = vmatprep.subr.bf16.mxu0 %v18884_v1  ;;  %16215 = vmatprep.subr.bf16.mxu1 %v18884_v1  ;;  %v4064_v12 = vpack.c.bf16 %v4047_v42, %v4046_v39  ;;  %v18068_v42 = vld [vmem:[%s23786_s4 + $0x228] sm:$0xff]  }
 0x474   : >> { %16128 = vmatmul.mubr.bf16.gmra.mrb[40].mxu1 %v3852_v19  ;;  %16072 = vmatmul.mubr.bf16.gmra.mrb[4].mxu0 %v3636_v36  ;;  %v4263_v19 = vld [vmem:[#allocation2 + $0x20] sm:$0xff] }
 0x475   : >> { %16131 = vmatprep.mubr.msk.bf16.mxu1 %vm18885_vm0, %v18884_v1  ;;  %16075 = vmatprep.mubr.msk.bf16.mxu0 %vm18885_vm0, %v18884_v1 }
 0x476   : >> { %16160 = vmatpush3.bf16.msra.mxu0 %v18050_v35  ;;  %16216 = vmatpush3.bf16.msra.mxu1 %v18055_v20  ;;  %v4280_v20 = vpack.c.bf16 %v4264_v16, %v4263_v19  ;;  %v18071_v16 = vld [vmem:[%s23786_s4 + $0x270] sm:$0xff]  }
 0x477   : >> { %16161 = vmatprep.subr.bf16.mxu0 %v18884_v1  ;;  %16217 = vmatprep.subr.bf16.mxu1 %v18884_v1 }
 0x47a   : >> { %16162 = vmatpush3.bf16.msra.mxu0 %v18052_v5  ;;  %16218 = vmatpush3.bf16.msra.mxu1 %v18057_v61  ;;  %v18058_v5 = vld [vmem:[%s23786_s4 + $0x200] sm:$0xff]  }
 0x47b   : >> { %16163 = vmatprep.subr.bf16.mxu0 %v18884_v1  ;;  %16307 = vmatprep.subr.bf16.mxu1 %v18884_v1 }
 0x47c   : >> { %16132 = vmatmul.mubr.bf16.gmra.mrb[44].mxu1 %v3853_v21  ;;  %16076 = vmatmul.mubr.bf16.gmra.mrb[8].mxu0 %v3637_v59  ;;  %v18065_v59 = vld [vmem:[%s23786_s4 + $0x258] sm:$0xff]  }
 0x47d   : >> { %16135 = vmatprep.mubr.msk.bf16.mxu1 %vm18885_vm0, %v18884_v1  ;;  %16079 = vmatprep.mubr.msk.bf16.mxu0 %vm18885_vm0, %v18884_v1 }
 0x47e   : >> { %16164 = vmatpush3.bf16.msra.mxu0 %v18054_v41  ;;  %v4266_v41 = vld [vmem:[#allocation2 + $0x38] sm:$0xff] }
 0x47f   : >> { %16165 = vmatprep.subr.bf16.mxu0 %v18884_v1 }
 0x482   : >> { %16166 = vmatpush3.bf16.msra.mxu0 %v18056_v54 }
 0x483   : >> { %16255 = vmatprep.subr.bf16.mxu0 %v18884_v1 }
 0x484   : >> { %16136 = vmatmul.mubr.bf16.gmra.mrb[48].mxu1 %v3854_v49  ;;  %16080 = vmatmul.mubr.bf16.gmra.mrb[12].mxu0 %v3638_v38  ;;  %v4265_v38 = vld [vmem:[#allocation2 + $0x30] sm:$0xff] }
 0x485   : >> { %16139 = vmatprep.mubr.msk.bf16.mxu1 %vm18885_vm0, %v18884_v1  ;;  %16083 = vmatprep.mubr.msk.bf16.mxu0 %vm18885_vm0, %v18884_v1  ;;  %v4281_v27 = vpack.c.bf16 %v4266_v41, %v4265_v38  ;;  %v4054_v38 = vld [vmem:[#allocation2 + $0x4f] sm:$0xff] }
 0x48c   : >> { %16140 = vmatmul.mubr.bf16.gmra.mrb[52].mxu1 %v3855_v14  ;;  %16084 = vmatmul.mubr.bf16.gmra.mrb[16].mxu0 %v3639_v60  ;;  %v18062_v14 = vld [vmem:[%s23786_s4 + $0x210] sm:$0xff]  }
 0x48d   : >> { %16143 = vmatprep.mubr.msk.bf16.mxu1 %vm18885_vm0, %v18884_v1  ;;  %16087 = vmatprep.mubr.msk.bf16.mxu0 %vm18885_vm0, %v18884_v1 }
 0x494   : >> { %16144 = vmatmul.mubr.bf16.gmra.mrb[56].mxu1 %v3856_v32  ;;  %16088 = vmatmul.mubr.bf16.gmra.mrb[20].mxu0 %v3640_v47  ;;  %v4268_v47 = vld [vmem:[#allocation2 + $0x48] sm:$0xff] }
 0x495   : >> { %16147 = vmatprep.mubr.msk.bf16.mxu1 %vm18885_vm0, %v18884_v1  ;;  %16091 = vmatprep.mubr.msk.bf16.mxu0 %vm18885_vm0, %v18884_v1 }
 0x49c   : >> { %16148 = vmatmul.mubr.bf16.gmra.mrb[60].mxu1 %v3857_v17  ;;  %16092 = vmatmul.mubr.bf16.gmra.mrb[24].mxu0 %v3641_v50 }
 0x49d   : >> { %16219 = vmatprep.mubr.msk.bf16.mxu1 %vm18885_vm0, %v18884_v1  ;;  %16095 = vmatprep.mubr.msk.bf16.mxu0 %vm18885_vm0, %v18884_v1 }
 0x49f   : >> { %v3115_v24 = vpop.f32.mrb[212].mxu1 }
 0x4a0   : >> { %v15909_v53 = vpop.f32.mrb[213].mxu1 }
 0x4a1   : >> { %v3118_v45 = vpop.f32.mrb[214].mxu1 }
 0x4a2   : >> { %v15910_v37 = vpop.f32.mrb[215].mxu1 }
 0x4a3   : >> { %v4282_v37 = vpack.c.bf16 %v4268_v47, %v4267_v57 }
 0x4a4   : >> { %16220 = vmatmul.mubr.bf16.vlgmr.msra.gmra.mrb[64].mxu1 %v20179_v58  ;;  %16096 = vmatmul.mubr.bf16.gmra.mrb[28].mxu0 %v3642_v3 }
 0x4a5   : >> { %16223 = vmatprep.mubr.msk.bf16.mxu1 %vm18885_vm0, %v18884_v1  ;;  %16167 = vmatprep.mubr.msk.bf16.mxu0 %vm18885_vm0, %v18884_v1 }
 0x4a6   : >> { %16308 = vmatpush3.bf16.msra.mxu1 %v18059_v15  ;;  %v18066_v15 = vld [vmem:[%s23786_s4 + $0x220] sm:$0xff]  }
 0x4a7   : >> { %v3123_v30 = vpop.f32.mrb[216].mxu1  ;;  %16309 = vmatprep.subr.bf16.mxu1 %v18884_v1  ;;  %v2962_v33 = vpop.f32.mrb[180].mxu0 }
 0x4a8   : >> { %v15913_v58 = vpop.f32.mrb[217].mxu1  ;;  %v20597_v63 = vadd.f32 %v3115_v24, %v2962_v33  ;;  %v15857_v62 = vpop.f32.mrb[181].mxu0  ;;  %v4270_v33 = vld [vmem:[#allocation2 + $0x58] sm:$0xff] }
 0x4a9   : >> { %v3126_v34 = vpop.f32.mrb[218].mxu1  ;;  %v2965_v35 = vpop.f32.mrb[182].mxu0  ;;  %v18073_v58 = vld [vmem:[%s23786_s4 + $0x278] sm:$0xff]  }
 0x4aa   : >> { %v15914_v36 = vpop.f32.mrb[219].mxu1  ;;  %16310 = vmatpush3.bf16.msra.mxu1 %v18061_v23  ;;  %v20602_v51 = vadd.f32 %v3118_v45, %v2965_v35  ;;  %v15858_v61 = vpop.f32.mrb[183].mxu0 }
 0x4ab   : >> { %16311 = vmatprep.subr.bf16.mxu1 %v18884_v1  ;;  %v4052_v61 = vld [vmem:[#allocation2 + $0x3f] sm:$0xff] }
 0x4ac   : >> { %16224 = vmatmul.mubr.bf16.gmra.mrb[68].mxu1 %v4280_v20  ;;  %16168 = vmatmul.mubr.bf16.vlgmr.msra.gmra.mrb[32].mxu0 %v4064_v12 }
 0x4ad   : >> { %16227 = vmatprep.mubr.msk.bf16.mxu1 %vm18885_vm0, %v18884_v1  ;;  %16171 = vmatprep.mubr.msk.bf16.mxu0 %vm18885_vm0, %v18884_v1 }
 0x4ae   : >> { %16256 = vmatpush3.bf16.msra.mxu0 %v18058_v5  ;;  %16312 = vmatpush3.bf16.msra.mxu1 %v18063_v8  ;;  %v4269_v5 = vld [vmem:[#allocation2 + $0x50] sm:$0xff] }
 0x4af   : >> { %v3131_v21 = vpop.f32.mrb[220].mxu1  ;;  %16257 = vmatprep.subr.bf16.mxu0 %v18884_v1  ;;  %v2970_v54 = vpop.f32.mrb[184].mxu0  ;;  %16313 = vmatprep.subr.bf16.mxu1 %v18884_v1 }
 0x4b0   : >> { %v15917_v6 = vpop.f32.mrb[221].mxu1  ;;  %v20620_v43 = vadd.f32 %v3123_v30, %v2970_v54  ;;  %v15861_v55 = vpop.f32.mrb[185].mxu0  ;;  %v4066_v30 = vpack.c.bf16 %v4051_v31, %v4050_v29  ;;  %v4274_v29 = vld [vmem:[#allocation2 + $0x78] sm:$0xff] }
 0x4b1   : >> { %v3134_v49 = vpop.f32.mrb[222].mxu1  ;;  %v2973_v28 = vpop.f32.mrb[186].mxu0  ;;  %v4272_v55 = vld [vmem:[#allocation2 + $0x68] sm:$0xff] }
 0x4b2   : >> { %v15918_v56 = vpop.f32.mrb[223].mxu1  ;;  %16258 = vmatpush3.bf16.msra.mxu0 %v18060_v7  ;;  %v20625_v60 = vadd.f32 %v3126_v34, %v2973_v28  ;;  %v15862_v9 = vpop.f32.mrb[187].mxu0  ;;  %16314 = vmatpush3.bf16.msra.mxu1 %v18065_v59  ;;  %v4053_v34 = vld [vmem:[#allocation2 + $0x47] sm:$0xff]  ;;  %v4283_v7 = vpack.c.bf16 %v4270_v33, %v4269_v5  ;;  %v4055_v28 = vld [vmem:[#allocation2 + $0x57] sm:$0xff] }
 0x4b3   : >> { %16259 = vmatprep.subr.bf16.mxu0 %v18884_v1  ;;  %16315 = vmatprep.subr.bf16.mxu1 %v18884_v1  ;;  %v4067_v54 = vpack.c.bf16 %v4053_v34, %v4052_v61  ;;  %v4271_v9 = vld [vmem:[#allocation2 + $0x60] sm:$0xff]  ;;  %v4058_v34 = vld [vmem:[#allocation2 + $0x6f] sm:$0xff] }
 0x4b4   : >> { %16228 = vmatmul.mubr.bf16.gmra.mrb[72].mxu1 %v4281_v27  ;;  %16172 = vmatmul.mubr.bf16.gmra.mrb[36].mxu0 %v4065_v40  ;;  %v4275_v61 = vld [vmem:[#allocation2 + $0x80] sm:$0xff] }
 0x4b5   : >> { %16231 = vmatprep.mubr.msk.bf16.mxu1 %vm18885_vm0, %v18884_v1  ;;  %16175 = vmatprep.mubr.msk.bf16.mxu0 %vm18885_vm0, %v18884_v1 }
 0x4b6   : >> { %16260 = vmatpush3.bf16.msra.mxu0 %v18062_v14  ;;  %16316 = vmatpush3.bf16.msra.mxu1 %v18067_v11 }
 0x4b7   : >> { %v3139_v32 = vpop.f32.mrb[224].mxu1  ;;  %16261 = vmatprep.subr.bf16.mxu0 %v18884_v1  ;;  %v2978_v18 = vpop.f32.mrb[188].mxu0  ;;  %16317 = vmatprep.subr.bf16.mxu1 %v18884_v1 }
 0x4b8   : >> { %v15921_v17 = vpop.f32.mrb[225].mxu1  ;;  %v20644_v50 = vadd.f32 %v3131_v21, %v2978_v18  ;;  %v15865_v24 = vpop.f32.mrb[189].mxu0  ;;  %v18070_v21 = vld [vmem:[%s23786_s4 + $0x230] sm:$0xff]  }
 0x4b9   : >> { %v3142_v10 = vpop.f32.mrb[226].mxu1  ;;  %v2981_v53 = vpop.f32.mrb[190].mxu0  ;;  %v4057_v17 = vld [vmem:[#allocation2 + $0x67] sm:$0xff] }
 0x4ba   : >> { %v15922_v45 = vpop.f32.mrb[227].mxu1  ;;  %16262 = vmatpush3.bf16.msra.mxu0 %v18064_v48  ;;  %v20649_v3 = vadd.f32 %v3134_v49, %v2981_v53  ;;  %v15866_v23 = vpop.f32.mrb[191].mxu0  ;;  %16318 = vmatpush3.bf16.msra.mxu1 %v18069_v22  ;;  %v4284_v48 = vpack.c.bf16 %v4272_v55, %v4271_v9  ;;  %v4068_v22 = vpack.c.bf16 %v4055_v28, %v4054_v38  ;;  %v4278_v55 = vld [vmem:[#allocation2 + $0x98] sm:$0xff]  ;;  %v4061_v38 = vld [vmem:[#allocation2 + $0x87] sm:$0xff]  ;;  %v4277_v9 = vld [vmem:[#allocation2 + $0x90] sm:$0xff] }
 0x4bb   : >> { %16263 = vmatprep.subr.bf16.mxu0 %v18884_v1  ;;  %16319 = vmatprep.subr.bf16.mxu1 %v18884_v1  ;;  %v4273_v45 = vld [vmem:[#allocation2 + $0x70] sm:$0xff] }
 0x4bc   : >> { %16232 = vmatmul.mubr.bf16.gmra.mrb[76].mxu1 %v4282_v37  ;;  %16176 = vmatmul.mubr.bf16.gmra.mrb[40].mxu0 %v4066_v30  ;;  %v4285_v30 = vpack.c.bf16 %v4274_v29, %v4273_v45 }
 0x4bd   : >> { %16235 = vmatprep.mubr.msk.bf16.mxu1 %vm18885_vm0, %v18884_v1  ;;  %16179 = vmatprep.mubr.msk.bf16.mxu0 %vm18885_vm0, %v18884_v1 }
 0x4be   : >> { %16264 = vmatpush3.bf16.msra.mxu0 %v18066_v15  ;;  %16320 = vmatpush3.bf16.msra.mxu1 %v18071_v16  ;;  %v4056_v15 = vld [vmem:[#allocation2 + $0x5f] sm:$0xff] }
 0x4bf   : >> { %v3147_v39 = vpop.f32.mrb[228].mxu1  ;;  %16265 = vmatprep.subr.bf16.mxu0 %v18884_v1  ;;  %v2986_v62 = vpop.f32.mrb[192].mxu0  ;;  %16321 = vmatprep.subr.bf16.mxu1 %v18884_v1 }
 0x4c0   : >> { %v15925_v19 = vpop.f32.mrb[229].mxu1  ;;  %v20668_v35 = vadd.f32 %v3139_v32, %v2986_v62  ;;  %v15869_v36 = vpop.f32.mrb[193].mxu0 }
 0x4c1   : >> { %v3150_v20 = vpop.f32.mrb[230].mxu1  ;;  %v2989_v12 = vpop.f32.mrb[194].mxu0  ;;  %v4059_v19 = vld [vmem:[#allocation2 + $0x77] sm:$0xff] }
 0x4c2   : >> { %v15926_v8 = vpop.f32.mrb[231].mxu1  ;;  %16266 = vmatpush3.bf16.msra.mxu0 %v18068_v42  ;;  %v20673_v41 = vadd.f32 %v3142_v10, %v2989_v12  ;;  %v15870_v59 = vpop.f32.mrb[195].mxu0  ;;  %16322 = vmatpush3.bf16.msra.mxu1 %v18073_v58  ;;  %v4276_v58 = vld [vmem:[#allocation2 + $0x88] sm:$0xff] }
 0x4c3   : >> { %16267 = vmatprep.subr.bf16.mxu0 %v18884_v1  ;;  %16411 = vmatprep.subr.bf16.mxu1 %v18884_v1 }
 0x4c4   : >> { %16236 = vmatmul.mubr.bf16.gmra.mrb[80].mxu1 %v4283_v7  ;;  %16180 = vmatmul.mubr.bf16.gmra.mrb[44].mxu0 %v4067_v54 }
 0x4c5   : >> { %16239 = vmatprep.mubr.msk.bf16.mxu1 %vm18885_vm0, %v18884_v1  ;;  %16183 = vmatprep.mubr.msk.bf16.mxu0 %vm18885_vm0, %v18884_v1 }
 0x4c6   : >> { %16268 = vmatpush3.bf16.msra.mxu0 %v18070_v21  ;;  %v4286_v21 = vpack.c.bf16 %v4276_v58, %v4275_v61 }
 0x4c7   : >> { %v3155_v6 = vpop.f32.mrb[232].mxu1  ;;  %16269 = vmatprep.subr.bf16.mxu0 %v18884_v1  ;;  %v2994_v49 = vpop.f32.mrb[196].mxu0 }
 0x4c8   : >> { %v15929_v44 = vpop.f32.mrb[233].mxu1  ;;  %v20685_v56 = vadd.f32 %v3147_v39, %v2994_v49  ;;  %v15873_v27 = vpop.f32.mrb[197].mxu0  ;;  %v4069_v39 = vpack.c.bf16 %v4057_v17, %v4056_v15 }
 0x4c9   : >> { %v3158_v14 = vpop.f32.mrb[234].mxu1  ;;  %v2997_v40 = vpop.f32.mrb[198].mxu0 }
 0x4ca   : >> { %v15930_v11 = vpop.f32.mrb[235].mxu1  ;;  %16270 = vmatpush3.bf16.msra.mxu0 %v18072_v2  ;;  %v20687_v32 = vadd.f32 %v3150_v20, %v2997_v40  ;;  %v15874_v47 = vpop.f32.mrb[199].mxu0  ;;  %v4070_v2 = vpack.c.bf16 %v4059_v19, %v4058_v34  ;;  %v4693_v19 = vld [vmem:[#allocation2 + $0x22] sm:$0xff] }
 0x4cb   : >> { %16359 = vmatprep.subr.bf16.mxu0 %v18884_v1  ;;  %v4060_v11 = vld [vmem:[#allocation2 + $0x7f] sm:$0xff]  ;;  %v4287_v47 = vpack.c.bf16 %v4278_v55, %v4277_v9 }
 0x4cc   : >> { %16240 = vmatmul.mubr.bf16.gmra.mrb[84].mxu1 %v4284_v48  ;;  %16184 = vmatmul.mubr.bf16.gmra.mrb[48].mxu0 %v4068_v22  ;;  %v4071_v29 = vpack.c.bf16 %v4061_v38, %v4060_v11  ;;  %v4478_v9 = vld [vmem:[#allocation2 + $0x21] sm:$0xff] }
 0x4cd   : >> { %16243 = vmatprep.mubr.msk.bf16.mxu1 %vm18885_vm0, %v18884_v1  ;;  %16187 = vmatprep.mubr.msk.bf16.mxu0 %vm18885_vm0, %v18884_v1 }
 0x4cf   : >> { %v3163_v18 = vpop.f32.mrb[236].mxu1  ;;  %v3002_v31 = vpop.f32.mrb[200].mxu0 }
 0x4d0   : >> { %v15933_v24 = vpop.f32.mrb[237].mxu1  ;;  %v20694_v10 = vadd.f32 %v3155_v6, %v3002_v31  ;;  %v15877_v57 = vpop.f32.mrb[201].mxu0 }
 0x4d1   : >> { %v3166_v53 = vpop.f32.mrb[238].mxu1  ;;  %v3005_v37 = vpop.f32.mrb[202].mxu0  ;;  %v4062_v24 = vld [vmem:[#allocation2 + $0x8f] sm:$0xff]  ;;  %v4063_v57 = vld [vmem:[#allocation2 + $0x97] sm:$0xff] }
 0x4d2   : >> { %v15934_v23 = vpop.f32.mrb[239].mxu1  ;;  %v20696_v16 = vadd.f32 %v3158_v14, %v3005_v37  ;;  %v15878_v42 = vpop.f32.mrb[203].mxu0  ;;  %v4072_v58 = vpack.c.bf16 %v4063_v57, %v4062_v24  ;;  %v18078_v57 = vld [vmem:[%s23786_s4 + $0x290] sm:$0xff]  }
 0x4d3   : >> { %v18075_v42 = vld [vmem:[%s23786_s4 + $0x2c0] sm:$0xff]  }
 0x4d4   : >> { %16244 = vmatmul.mubr.bf16.gmra.mrb[88].mxu1 %v4285_v30  ;;  %16188 = vmatmul.mubr.bf16.gmra.mrb[52].mxu0 %v4069_v39 }
 0x4d5   : >> { %16247 = vmatprep.mubr.msk.bf16.mxu1 %vm18885_vm0, %v18884_v1  ;;  %16191 = vmatprep.mubr.msk.bf16.mxu0 %vm18885_vm0, %v18884_v1 }
 0x4d7   : >> { %v3171_v33 = vpop.f32.mrb[240].mxu1  ;;  %v3010_v62 = vpop.f32.mrb[204].mxu0 }
 0x4d8   : >> { %v15937_v36 = vpop.f32.mrb[241].mxu1  ;;  %v20702_v20 = vadd.f32 %v3163_v18, %v3010_v62  ;;  %v15881_v5 = vpop.f32.mrb[205].mxu0  ;;  %v18077_v62 = vld [vmem:[%s23786_s4 + $0x2c8] sm:$0xff]  }
 0x4d9   : >> { %v3174_v12 = vpop.f32.mrb[242].mxu1  ;;  %v3013_v8 = vpop.f32.mrb[206].mxu0  ;;  %v4694_v36 = vld [vmem:[#allocation2 + $0x2a] sm:$0xff] }
 0x4da   : >> { %v15938_v7 = vpop.f32.mrb[243].mxu1  ;;  %v20704_v59 = vadd.f32 %v3166_v53, %v3013_v8  ;;  %v15882_v54 = vpop.f32.mrb[207].mxu0 }
 0x4db   : >> { %v4710_v54 = vpack.c.bf16 %v4694_v36, %v4693_v19  ;;  %v4481_v19 = vld [vmem:[#allocation2 + $0x39] sm:$0xff] }
 0x4dc   : >> { %16248 = vmatmul.mubr.bf16.gmra.mrb[92].mxu1 %v4286_v21  ;;  %16192 = vmatmul.mubr.bf16.gmra.mrb[56].mxu0 %v4070_v2  ;;  %v18074_v2 = vld [vmem:[%s23786_s4 + $0x280] sm:$0xff]  }
 0x4dd   : >> { %16251 = vmatprep.mubr.msk.bf16.mxu1 %vm18885_vm0, %v18884_v1  ;;  %16195 = vmatprep.mubr.msk.bf16.mxu0 %vm18885_vm0, %v18884_v1 }
 0x4df   : >> { %v3179_v6 = vpop.f32.mrb[244].mxu1  ;;  %v3018_v49 = vpop.f32.mrb[208].mxu0 }
 0x4e0   : >> { %v15941_v28 = vpop.f32.mrb[245].mxu1  ;;  %v20710_v44 = vadd.f32 %v3171_v33, %v3018_v49  ;;  %v15885_v27 = vpop.f32.mrb[209].mxu0 }
 0x4e1   : >> { %v3182_v14 = vpop.f32.mrb[246].mxu1  ;;  %v3021_v40 = vpop.f32.mrb[210].mxu0  ;;  %v4696_v27 = vld [vmem:[#allocation2 + $0x3a] sm:$0xff] }
 0x4e2   : >> { %v15942_v48 = vpop.f32.mrb[247].mxu1  ;;  %v20712_v22 = vadd.f32 %v3174_v12, %v3021_v40  ;;  %v15886_v18 = vpop.f32.mrb[211].mxu0  ;;  %v4479_v40 = vld [vmem:[#allocation2 + $0x29] sm:$0xff] }
 0x4e4   : >> { %16252 = vmatmul.mubr.bf16.gmra.mrb[96].mxu1 %v4287_v47  ;;  %16196 = vmatmul.mubr.bf16.gmra.mrb[60].mxu0 %v4071_v29  ;;  %v4695_v29 = vld [vmem:[#allocation2 + $0x32] sm:$0xff] }
 0x4e5   : >> { %16323 = vmatprep.mubr.msk.bf16.mxu1 %vm18885_vm0, %v18884_v1  ;;  %16199 = vmatprep.mubr.msk.bf16.mxu0 %vm18885_vm0, %v18884_v1  ;;  %v4711_v24 = vpack.c.bf16 %v4696_v27, %v4695_v29  ;;  %v4700_v27 = vld [vmem:[#allocation2 + $0x5a] sm:$0xff]  ;;  %v4699_v29 = vld [vmem:[#allocation2 + $0x52] sm:$0xff] }
 0x4e7   : >> { %v3527_v31 = vpop.f32.mrb[248].mxu1  ;;  %v3026_v17 = vpop.f32.mrb[212].mxu0 }
 0x4e8   : >> { %v16013_v53 = vpop.f32.mrb[249].mxu1  ;;  %v20718_v45 = vadd.f32 %v3179_v6, %v3026_v17  ;;  %v15889_v37 = vpop.f32.mrb[213].mxu0 }
 0x4e9   : >> { %v3530_v15 = vpop.f32.mrb[250].mxu1  ;;  %v3029_v23 = vpop.f32.mrb[214].mxu0 }
 0x4ea   : >> { %v16014_v30 = vpop.f32.mrb[251].mxu1  ;;  %v20723_v39 = vadd.f32 %v3182_v14, %v3029_v23  ;;  %v15890_v33 = vpop.f32.mrb[215].mxu0  ;;  %v4495_v23 = vpack.c.bf16 %v4479_v40, %v4478_v9  ;;  %v4482_v9 = vld [vmem:[#allocation2 + $0x41] sm:$0xff]  ;;  %v4483_v40 = vld [vmem:[#allocation2 + $0x49] sm:$0xff] }
 0x4eb   : >> { %v4697_v33 = vld [vmem:[#allocation2 + $0x42] sm:$0xff] }
 0x4ec   : >> { %16324 = vmatmul.mubr.bf16.vlgmr.msra.gmra.mrb[100].mxu1 %v20410_v4  ;;  %16200 = vmatmul.mubr.bf16.gmra.mrb[64].mxu0 %v4072_v58  ;;  %v4698_v58 = vld [vmem:[#allocation2 + $0x4a] sm:$0xff] }
 0x4ed   : >> { %16327 = vmatprep.mubr.msk.bf16.mxu1 %vm18885_vm0, %v18884_v1  ;;  %16271 = vmatprep.mubr.msk.bf16.mxu0 %vm18885_vm0, %v18884_v1 }
 0x4ee   : >> { %16412 = vmatpush3.bf16.msra.mxu1 %v18075_v42 }
 0x4ef   : >> { %v3535_v34 = vpop.f32.mrb[252].mxu1  ;;  %16413 = vmatprep.subr.bf16.mxu1 %v18884_v1  ;;  %v3312_v5 = vpop.f32.mrb[216].mxu0 }
 0x4f0   : >> { %v16017_v12 = vpop.f32.mrb[253].mxu1  ;;  %v3383_v4 = vadd.f32 %v3312_v5, %v20597_v63  ;;  %v15961_v61 = vpop.f32.mrb[217].mxu0  ;;  %v18079_v63 = vld [vmem:[%s23786_s4 + $0x2d0] sm:$0xff]  }
 0x4f1   : >> { %v3538_v8 = vpop.f32.mrb[254].mxu1  ;;  %v3315_v7 = vpop.f32.mrb[218].mxu0 }
 0x4f2   : >> { %v16018_v21 = vpop.f32.mrb[255].mxu1  ;;  %16414 = vmatpush3.bf16.msra.mxu1 %v18077_v62  ;;  %v20738_v6 = vadd.f32 %v3527_v31, %v3383_v4  ;;  %v3384_v55 = vadd.f32 %v3315_v7, %v20602_v51  ;;  %v15962_v49 = vpop.f32.mrb[219].mxu0  ;;  %v18076_v51 = vld [vmem:[%s23786_s4 + $0x288] sm:$0xff]  }
 0x4f3   : >> { %16415 = vmatprep.subr.bf16.mxu1 %v18884_v1  ;;  %v18085_v62 = vld [vmem:[%s23786_s4 + $0x2e8] sm:$0xff]   ;;  %v4712_v21 = vpack.c.bf16 %v4698_v58, %v4697_v33 }
 0x4f4   : >> { %16328 = vmatmul.mubr.bf16.gmra.mrb[104].mxu1 %v4710_v54  ;;  %v20745_v38 = vadd.f32 %v3530_v15, %v3384_v55  ;;  %16272 = vmatmul.mubr.bf16.vlgmr.msra.gmra.mrb[68].mxu0 %v20253_v0  ;;  %v18081_v0 = vld [vmem:[%s23786_s4 + $0x2d8] sm:$0xff]   ;;  %v18082_v54 = vld [vmem:[%s23786_s4 + $0x2a0] sm:$0xff]   ;;  %v4702_v33 = vld [vmem:[#allocation2 + $0x6a] sm:$0xff] }
 0x4f5   : >> { %16331 = vmatprep.mubr.msk.bf16.mxu1 %vm18885_vm0, %v18884_v1  ;;  %16275 = vmatprep.mubr.msk.bf16.mxu0 %vm18885_vm0, %v18884_v1 }
 0x4f6   : >> { %16360 = vmatpush3.bf16.msra.mxu0 %v18074_v2  ;;  %16416 = vmatpush3.bf16.msra.mxu1 %v18079_v63 }
 0x4f7   : >> { %v3543_v28 = vpop.f32.mrb[0].mxu1  ;;  %16361 = vmatprep.subr.bf16.mxu0 %v18884_v1  ;;  %v3320_v14 = vpop.f32.mrb[220].mxu0  ;;  %16417 = vmatprep.subr.bf16.mxu1 %v18884_v1 }
 0x4f8   : >> { %v16021_v11 = vpop.f32.mrb[1].mxu1  ;;  %v3385_v48 = vadd.f32 %v3320_v14, %v20620_v43  ;;  %v15965_v47 = vpop.f32.mrb[221].mxu0  ;;  %v18083_v43 = vld [vmem:[%s23786_s4 + $0x2e0] sm:$0xff]  }
 0x4f9   : >> { %v3546_v18 = vpop.f32.mrb[2].mxu1  ;;  %v3323_v31 = vpop.f32.mrb[222].mxu0 }
 0x4fa   : >> { %v16022_v17 = vpop.f32.mrb[3].mxu1  ;;  %16362 = vmatpush3.bf16.msra.mxu0 %v18076_v51  ;;  %v20764_v53 = vadd.f32 %v3535_v34, %v3385_v48  ;;  %v3386_v37 = vadd.f32 %v3323_v31, %v20625_v60  ;;  %v15966_v15 = vpop.f32.mrb[223].mxu0  ;;  %16418 = vmatpush3.bf16.msra.mxu1 %v18081_v0  ;;  %v18080_v60 = vld [vmem:[%s23786_s4 + $0x298] sm:$0xff]  }
 0x4fb   : >> { %16363 = vmatprep.subr.bf16.mxu0 %v18884_v1  ;;  %16419 = vmatprep.subr.bf16.mxu1 %v18884_v1  ;;  %v18089_v0 = vld [vmem:[%s23786_s4 + $0x2f8] sm:$0xff]  }
 0x4fc   : >> { %16332 = vmatmul.mubr.bf16.gmra.mrb[108].mxu1 %v4711_v24  ;;  %v20772_v30 = vadd.f32 %v3538_v8, %v3386_v37  ;;  %16276 = vmatmul.mubr.bf16.gmra.mrb[72].mxu0 %v4495_v23  ;;  %v4480_v8 = vld [vmem:[#allocation2 + $0x31] sm:$0xff]  ;;  %v4713_v24 = vpack.c.bf16 %v4700_v27, %v4699_v29 }
 0x4fd   : >> { %16335 = vmatprep.mubr.msk.bf16.mxu1 %vm18885_vm0, %v18884_v1  ;;  %16279 = vmatprep.mubr.msk.bf16.mxu0 %vm18885_vm0, %v18884_v1  ;;  %v4496_v63 = vpack.c.bf16 %v4481_v19, %v4480_v8 }
 0x4fe   : >> { %16364 = vmatpush3.bf16.msra.mxu0 %v18078_v57  ;;  %16420 = vmatpush3.bf16.msra.mxu1 %v18083_v43  ;;  %v18086_v57 = vld [vmem:[%s23786_s4 + $0x2b0] sm:$0xff]   ;;  %v4497_v43 = vpack.c.bf16 %v4483_v40, %v4482_v9 }
 0x4ff   : >> { %v3551_v42 = vpop.f32.mrb[4].mxu1  ;;  %16365 = vmatprep.subr.bf16.mxu0 %v18884_v1  ;;  %v3328_v34 = vpop.f32.mrb[224].mxu0  ;;  %16421 = vmatprep.subr.bf16.mxu1 %v18884_v1  ;;  %v4703_v9 = vld [vmem:[#allocation2 + $0x72] sm:$0xff] }
 0x500   : >> { %v16025_v36 = vpop.f32.mrb[5].mxu1  ;;  %v3387_v5 = vadd.f32 %v3328_v34, %v20644_v50  ;;  %v15969_v12 = vpop.f32.mrb[225].mxu0  ;;  %v18087_v50 = vld [vmem:[%s23786_s4 + $0x2f0] sm:$0xff]  }
 0x501   : >> { %v3554_v4 = vpop.f32.mrb[6].mxu1  ;;  %v3331_v61 = vpop.f32.mrb[226].mxu0 }
 0x502   : >> { %v16026_v7 = vpop.f32.mrb[7].mxu1  ;;  %16366 = vmatpush3.bf16.msra.mxu0 %v18080_v60  ;;  %v20790_v2 = vadd.f32 %v3543_v28, %v3387_v5  ;;  %v3388_v55 = vadd.f32 %v3331_v61, %v20649_v3  ;;  %v15970_v49 = vpop.f32.mrb[227].mxu0  ;;  %16422 = vmatpush3.bf16.msra.mxu1 %v18085_v62  ;;  %v18084_v3 = vld [vmem:[%s23786_s4 + $0x2a8] sm:$0xff]   ;;  %v4485_v62 = vld [vmem:[#allocation2 + $0x59] sm:$0xff] }
 0x503   : >> { %16367 = vmatprep.subr.bf16.mxu0 %v18884_v1  ;;  %16423 = vmatprep.subr.bf16.mxu1 %v18884_v1 }
 0x504   : >> { %16336 = vmatmul.mubr.bf16.gmra.mrb[112].mxu1 %v4712_v21  ;;  %v20798_v51 = vadd.f32 %v3546_v18, %v3388_v55  ;;  %16280 = vmatmul.mubr.bf16.gmra.mrb[76].mxu0 %v4496_v63  ;;  %v4704_v63 = vld [vmem:[#allocation2 + $0x7a] sm:$0xff] }
 0x505   : >> { %16339 = vmatprep.mubr.msk.bf16.mxu1 %vm18885_vm0, %v18884_v1  ;;  %16283 = vmatprep.mubr.msk.bf16.mxu0 %vm18885_vm0, %v18884_v1 }
 0x506   : >> { %16368 = vmatpush3.bf16.msra.mxu0 %v18082_v54  ;;  %16424 = vmatpush3.bf16.msra.mxu1 %v18087_v50 }
 0x507   : >> { %v3559_v28 = vpop.f32.mrb[8].mxu1  ;;  %16369 = vmatprep.subr.bf16.mxu0 %v18884_v1  ;;  %v3336_v14 = vpop.f32.mrb[228].mxu0  ;;  %16425 = vmatprep.subr.bf16.mxu1 %v18884_v1 }
 0x508   : >> { %v16029_v11 = vpop.f32.mrb[9].mxu1  ;;  %v3389_v48 = vadd.f32 %v3336_v14, %v20668_v35  ;;  %v15973_v47 = vpop.f32.mrb[229].mxu0 }
 0x509   : >> { %v3562_v18 = vpop.f32.mrb[10].mxu1  ;;  %v3339_v31 = vpop.f32.mrb[230].mxu0 }
 0x50a   : >> { %v16030_v17 = vpop.f32.mrb[11].mxu1  ;;  %16370 = vmatpush3.bf16.msra.mxu0 %v18084_v3  ;;  %v20816_v37 = vadd.f32 %v3551_v42, %v3389_v48  ;;  %v3390_v15 = vadd.f32 %v3339_v31, %v20673_v41  ;;  %v15974_v23 = vpop.f32.mrb[231].mxu0  ;;  %16426 = vmatpush3.bf16.msra.mxu1 %v18089_v0  ;;  %v18088_v41 = vld [vmem:[%s23786_s4 + $0x2b8] sm:$0xff]   ;;  %v4701_v42 = vld [vmem:[#allocation2 + $0x62] sm:$0xff]  ;;  %v4715_v48 = vpack.c.bf16 %v4704_v63, %v4703_v9 }
 0x50b   : >> { %16371 = vmatprep.subr.bf16.mxu0 %v18884_v1  ;;  %16515 = vmatprep.subr.bf16.mxu1 %v18884_v1  ;;  %v4714_v8 = vpack.c.bf16 %v4702_v33, %v4701_v42  ;;  %v4486_v3 = vld [vmem:[#allocation2 + $0x61] sm:$0xff]  ;;  %v4489_v23 = vld [vmem:[#allocation2 + $0x79] sm:$0xff]  ;;  %v4488_v33 = vld [vmem:[#allocation2 + $0x71] sm:$0xff] }
 0x50c   : >> { %16340 = vmatmul.mubr.bf16.gmra.mrb[116].mxu1 %v4713_v24  ;;  %v20821_v35 = vadd.f32 %v3554_v4, %v3390_v15  ;;  %16284 = vmatmul.mubr.bf16.gmra.mrb[80].mxu0 %v4497_v43  ;;  %v4484_v4 = vld [vmem:[#allocation2 + $0x51] sm:$0xff]  ;;  %v4705_v24 = vld [vmem:[#allocation2 + $0x82] sm:$0xff] }
 0x50d   : >> { %16343 = vmatprep.mubr.msk.bf16.mxu1 %vm18885_vm0, %v18884_v1  ;;  %16287 = vmatprep.mubr.msk.bf16.mxu0 %vm18885_vm0, %v18884_v1  ;;  %v4498_v55 = vpack.c.bf16 %v4485_v62, %v4484_v4  ;;  %v4708_v4 = vld [vmem:[#allocation2 + $0x9a] sm:$0xff]  ;;  %v4707_v63 = vld [vmem:[#allocation2 + $0x92] sm:$0xff] }
 0x50e   : >> { %16372 = vmatpush3.bf16.msra.mxu0 %v18086_v57  ;;  %v4706_v57 = vld [vmem:[#allocation2 + $0x8a] sm:$0xff] }
 0x50f   : >> { %v3567_v60 = vpop.f32.mrb[12].mxu1  ;;  %16373 = vmatprep.subr.bf16.mxu0 %v18884_v1  ;;  %v3344_v58 = vpop.f32.mrb[232].mxu0  ;;  %v4716_v62 = vpack.c.bf16 %v4706_v57, %v4705_v24 }
 0x510   : >> { %v16033_v34 = vpop.f32.mrb[13].mxu1  ;;  %v3391_v19 = vadd.f32 %v3344_v58, %v20685_v56  ;;  %v15977_v36 = vpop.f32.mrb[233].mxu0 }
 0x511   : >> { %v3570_v5 = vpop.f32.mrb[14].mxu1  ;;  %v3347_v12 = vpop.f32.mrb[234].mxu0 }
 0x512   : >> { %v16034_v61 = vpop.f32.mrb[15].mxu1  ;;  %16374 = vmatpush3.bf16.msra.mxu0 %v18088_v41  ;;  %v20832_v7 = vadd.f32 %v3559_v28, %v3391_v19  ;;  %v3392_v21 = vadd.f32 %v3347_v12, %v20687_v32  ;;  %v15978_v54 = vpop.f32.mrb[235].mxu0  ;;  %v4487_v28 = vld [vmem:[#allocation2 + $0x69] sm:$0xff] }
 0x513   : >> { %16463 = vmatprep.subr.bf16.mxu0 %v18884_v1  ;;  %v4499_v31 = vpack.c.bf16 %v4487_v28, %v4486_v3  ;;  %v4717_v28 = vpack.c.bf16 %v4708_v4, %v4707_v63 }
 0x514   : >> { %16344 = vmatmul.mubr.bf16.gmra.mrb[120].mxu1 %v4714_v8  ;;  %v20836_v49 = vadd.f32 %v3562_v18, %v3392_v21  ;;  %16288 = vmatmul.mubr.bf16.gmra.mrb[84].mxu0 %v4498_v55  ;;  %v4490_v8 = vld [vmem:[#allocation2 + $0x81] sm:$0xff]  ;;  %v4491_v21 = vld [vmem:[#allocation2 + $0x89] sm:$0xff] }
 0x515   : >> { %16347 = vmatprep.mubr.msk.bf16.mxu1 %vm18885_vm0, %v18884_v1  ;;  %16291 = vmatprep.mubr.msk.bf16.mxu0 %vm18885_vm0, %v18884_v1 }
 0x517   : >> { %v3575_v56 = vpop.f32.mrb[16].mxu1  ;;  %v3352_v50 = vpop.f32.mrb[236].mxu0 }
 0x518   : >> { %v16037_v32 = vpop.f32.mrb[17].mxu1  ;;  %v3393_v27 = vadd.f32 %v3352_v50, %v20694_v10  ;;  %v15981_v0 = vpop.f32.mrb[237].mxu0 }
 0x519   : >> { %v3578_v14 = vpop.f32.mrb[18].mxu1  ;;  %v3355_v40 = vpop.f32.mrb[238].mxu0 }
 0x51a   : >> { %v16038_v11 = vpop.f32.mrb[19].mxu1  ;;  %v20843_v47 = vadd.f32 %v3567_v60, %v3393_v27  ;;  %v3394_v18 = vadd.f32 %v3355_v40, %v20696_v16  ;;  %v15982_v29 = vpop.f32.mrb[239].mxu0 }
 0x51b   : >> { %v5121_v29 = vld [vmem:[#allocation2 + $0x1d] sm:$0xff] }
 0x51c   : >> { %16348 = vmatmul.mubr.bf16.gmra.mrb[124].mxu1 %v4715_v48  ;;  %v20846_v17 = vadd.f32 %v3570_v5, %v3394_v18  ;;  %16292 = vmatmul.mubr.bf16.gmra.mrb[88].mxu0 %v4499_v31  ;;  %v4500_v5 = vpack.c.bf16 %v4489_v23, %v4488_v33  ;;  %v4493_v48 = vld [vmem:[#allocation2 + $0x99] sm:$0xff] }
 0x51d   : >> { %16351 = vmatprep.mubr.msk.bf16.mxu1 %vm18885_vm0, %v18884_v1  ;;  %16295 = vmatprep.mubr.msk.bf16.mxu0 %vm18885_vm0, %v18884_v1 }
 0x51f   : >> { %v3583_v10 = vpop.f32.mrb[20].mxu1  ;;  %v3360_v15 = vpop.f32.mrb[240].mxu0 }
 0x520   : >> { %v16041_v43 = vpop.f32.mrb[21].mxu1  ;;  %v3395_v16 = vadd.f32 %v3360_v15, %v20702_v20  ;;  %v15985_v41 = vpop.f32.mrb[241].mxu0  ;;  %v4492_v15 = vld [vmem:[#allocation2 + $0x91] sm:$0xff] }
 0x521   : >> { %v3586_v60 = vpop.f32.mrb[22].mxu1  ;;  %v3363_v42 = vpop.f32.mrb[242].mxu0  ;;  %v18091_v43 = vld [vmem:[%s23786_s4 + $0x340] sm:$0xff]  }
 0x522   : >> { %v16042_v58 = vpop.f32.mrb[23].mxu1  ;;  %v20853_v34 = vadd.f32 %v3575_v56, %v3395_v16  ;;  %v3396_v19 = vadd.f32 %v3363_v42, %v20704_v59  ;;  %v15986_v36 = vpop.f32.mrb[243].mxu0  ;;  %v4502_v42 = vpack.c.bf16 %v4493_v48, %v4492_v15 }
 0x524   : >> { %16352 = vmatmul.mubr.bf16.gmra.mrb[128].mxu1 %v4716_v62  ;;  %v20856_v12 = vadd.f32 %v3578_v14, %v3396_v19  ;;  %16296 = vmatmul.mubr.bf16.gmra.mrb[92].mxu0 %v4500_v5  ;;  %v4501_v14 = vpack.c.bf16 %v4491_v21, %v4490_v8  ;;  %v5123_v62 = vld [vmem:[#allocation2 + $0x2d] sm:$0xff] }
 0x525   : >> { %16355 = vmatprep.mubr.msk.bf16.mxu1 %vm18885_vm0, %v18884_v1  ;;  %16299 = vmatprep.mubr.msk.bf16.mxu0 %vm18885_vm0, %v18884_v1 }
 0x527   : >> { %v3591_v20 = vpop.f32.mrb[24].mxu1  ;;  %v3368_v61 = vpop.f32.mrb[244].mxu0 }
 0x528   : >> { %v16045_v54 = vpop.f32.mrb[25].mxu1  ;;  %v3397_v59 = vadd.f32 %v3368_v61, %v20710_v44  ;;  %v15989_v55 = vpop.f32.mrb[245].mxu0  ;;  %v5122_v44 = vld [vmem:[#allocation2 + $0x25] sm:$0xff] }
 0x529   : >> { %v3594_v56 = vpop.f32.mrb[26].mxu1  ;;  %v3371_v50 = vpop.f32.mrb[246].mxu0  ;;  %v5139_v24 = vpack.c.bf16 %v5122_v44, %v5121_v29  ;;  %v18090_v54 = vld [vmem:[%s23786_s4 + $0x300] sm:$0xff]   ;;  %v18094_v29 = vld [vmem:[%s23786_s4 + $0x310] sm:$0xff]  }
 0x52a   : >> { %v16046_v3 = vpop.f32.mrb[27].mxu1  ;;  %v20863_v32 = vadd.f32 %v3583_v10, %v3397_v59  ;;  %v3398_v27 = vadd.f32 %v3371_v50, %v20712_v22  ;;  %v15990_v0 = vpop.f32.mrb[247].mxu0 }
 0x52b   : >> { %v5126_v3 = vld [vmem:[#allocation2 + $0x45] sm:$0xff] }
 0x52c   : >> { %16356 = vmatmul.mubr.bf16.gmra.mrb[132].mxu1 %v4717_v28  ;;  %v20866_v9 = vadd.f32 %v3586_v60, %v3398_v27  ;;  %16300 = vmatmul.mubr.bf16.gmra.mrb[96].mxu0 %v4501_v14  ;;  %v4909_v28 = vld [vmem:[#allocation2 + $0x34] sm:$0xff] }
 0x52d   : >> { %16427 = vmatprep.mubr.msk.bf16.mxu1 %vm18885_vm0, %v18884_v1  ;;  %16303 = vmatprep.mubr.msk.bf16.mxu0 %vm18885_vm0, %v18884_v1 }
 0x52f   : >> { %v3957_v40 = vpop.f32.mrb[28].mxu1  ;;  %v3376_v11 = vpop.f32.mrb[248].mxu0 }
 0x530   : >> { %v16117_v18 = vpop.f32.mrb[29].mxu1  ;;  %v3399_v22 = vadd.f32 %v3376_v11, %v20718_v45  ;;  %v15993_v31 = vpop.f32.mrb[249].mxu0  ;;  %v18093_v45 = vld [vmem:[%s23786_s4 + $0x348] sm:$0xff]  }
 0x531   : >> { %v3960_v10 = vpop.f32.mrb[30].mxu1  ;;  %v3379_v57 = vpop.f32.mrb[250].mxu0 }
 0x532   : >> { %v16118_v23 = vpop.f32.mrb[31].mxu1  ;;  %v20876_v16 = vadd.f32 %v3591_v20, %v3399_v22  ;;  %v3400_v41 = vadd.f32 %v3379_v57, %v20723_v39  ;;  %v15994_v60 = vpop.f32.mrb[251].mxu0  ;;  %v5124_v39 = vld [vmem:[#allocation2 + $0x35] sm:$0xff] }
 0x533   : >> { %v5140_v21 = vpack.c.bf16 %v5124_v39, %v5123_v62  ;;  %v5127_v23 = vld [vmem:[#allocation2 + $0x4d] sm:$0xff] }
 0x534   : >> { %16428 = vmatmul.mubr.bf16.vlgmr.msra.gmra.mrb[136].mxu1 %v5139_v24  ;;  %v20879_v33 = vadd.f32 %v3594_v56, %v3400_v41  ;;  %16304 = vmatmul.mubr.bf16.gmra.mrb[100].mxu0 %v4502_v42  ;;  %v18101_v41 = vld [vmem:[%s23786_s4 + $0x368] sm:$0xff]  }
 0x535   : >> { %16431 = vmatprep.mubr.msk.bf16.mxu1 %vm18885_vm0, %v18884_v1  ;;  %16375 = vmatprep.mubr.msk.bf16.mxu0 %vm18885_vm0, %v18884_v1  ;;  %v4911_v42 = vld [vmem:[#allocation2 + $0x44] sm:$0xff] }
 0x536   : >> { %16516 = vmatpush3.bf16.msra.mxu1 %v18091_v43  ;;  %v5128_v43 = vld [vmem:[#allocation2 + $0x55] sm:$0xff] }
 0x537   : >> { %v3965_v58 = vpop.f32.mrb[32].mxu1  ;;  %16517 = vmatprep.subr.bf16.mxu1 %v18884_v1  ;;  %v3742_v19 = vpop.f32.mrb[252].mxu0 }
 0x538   : >> { %v16121_v36 = vpop.f32.mrb[33].mxu1  ;;  %v3813_v5 = vadd.f32 %v3742_v19, %v20738_v6  ;;  %v16065_v20 = vpop.f32.mrb[253].mxu0  ;;  %v18095_v6 = vld [vmem:[%s23786_s4 + $0x350] sm:$0xff]  }
 0x539   : >> { %v3968_v4 = vpop.f32.mrb[34].mxu1  ;;  %v3745_v61 = vpop.f32.mrb[254].mxu0  ;;  %v4910_v36 = vld [vmem:[#allocation2 + $0x3c] sm:$0xff]  ;;  %v5142_v20 = vpack.c.bf16 %v5128_v43, %v5127_v23 }
 0x53a   : >> { %v16122_v8 = vpop.f32.mrb[35].mxu1  ;;  %16518 = vmatpush3.bf16.msra.mxu1 %v18093_v45  ;;  %v20893_v59 = vadd.f32 %v3957_v40, %v3813_v5  ;;  %v3814_v55 = vadd.f32 %v3745_v61, %v20745_v38  ;;  %v16066_v56 = vpop.f32.mrb[255].mxu0  ;;  %v18092_v38 = vld [vmem:[%s23786_s4 + $0x308] sm:$0xff]   ;;  %v5125_v40 = vld [vmem:[#allocation2 + $0x3d] sm:$0xff] }
 0x53b   : >> { %16519 = vmatprep.subr.bf16.mxu1 %v18884_v1  ;;  %v5141_v18 = vpack.c.bf16 %v5126_v3, %v5125_v40  ;;  %v4912_v3 = vld [vmem:[#allocation2 + $0x4c] sm:$0xff] }
 0x53c   : >> { %16432 = vmatmul.mubr.bf16.gmra.mrb[140].mxu1 %v5140_v21  ;;  %v20900_v63 = vadd.f32 %v3960_v10, %v3814_v55  ;;  %16376 = vmatmul.mubr.bf16.vlgmr.msra.gmra.mrb[104].mxu0 %v4924_v25  ;;  %v4908_v25 = vld [vmem:[#allocation2 + $0x2c] sm:$0xff] }
 0x53d   : >> { %16435 = vmatprep.mubr.msk.bf16.mxu1 %vm18885_vm0, %v18884_v1  ;;  %16379 = vmatprep.mubr.msk.bf16.mxu0 %vm18885_vm0, %v18884_v1  ;;  %v4925_v24 = vpack.c.bf16 %v4909_v28, %v4908_v25 }
 0x53e   : >> { %16464 = vmatpush3.bf16.msra.mxu0 %v18090_v54  ;;  %16520 = vmatpush3.bf16.msra.mxu1 %v18095_v6  ;;  %v4926_v54 = vpack.c.bf16 %v4911_v42, %v4910_v36  ;;  %v5130_v6 = vld [vmem:[#allocation2 + $0x65] sm:$0xff] }
 0x53f   : >> { %v3973_v50 = vpop.f32.mrb[36].mxu1  ;;  %16465 = vmatprep.subr.bf16.mxu0 %v18884_v1  ;;  %v3750_v46 = vpop.f32.mrb[0].mxu0  ;;  %16521 = vmatprep.subr.bf16.mxu1 %v18884_v1 }
 0x540   : >> { %v16125_v27 = vpop.f32.mrb[37].mxu1  ;;  %v3815_v0 = vadd.f32 %v3750_v46, %v20764_v53  ;;  %v16069_v14 = vpop.f32.mrb[1].mxu0  ;;  %v18099_v53 = vld [vmem:[%s23786_s4 + $0x360] sm:$0xff]  }
 0x541   : >> { %v3976_v44 = vpop.f32.mrb[38].mxu1  ;;  %v3753_v11 = vpop.f32.mrb[2].mxu0 }
 0x542   : >> { %v16126_v48 = vpop.f32.mrb[39].mxu1  ;;  %16466 = vmatpush3.bf16.msra.mxu0 %v18092_v38  ;;  %v20921_v22 = vadd.f32 %v3965_v58, %v3815_v0  ;;  %v3816_v31 = vadd.f32 %v3753_v11, %v20772_v30  ;;  %v16070_v10 = vpop.f32.mrb[3].mxu0  ;;  %16522 = vmatpush3.bf16.msra.mxu1 %v18097_v13  ;;  %v18096_v30 = vld [vmem:[%s23786_s4 + $0x318] sm:$0xff]   ;;  %v18102_v11 = vld [vmem:[%s23786_s4 + $0x330] sm:$0xff]  }
 0x543   : >> { %16467 = vmatprep.subr.bf16.mxu0 %v18884_v1  ;;  %16523 = vmatprep.subr.bf16.mxu1 %v18884_v1  ;;  %v18105_v38 = vld [vmem:[%s23786_s4 + $0x378] sm:$0xff]  }
 0x544   : >> { %16436 = vmatmul.mubr.bf16.gmra.mrb[144].mxu1 %v5141_v18  ;;  %v20929_v57 = vadd.f32 %v3968_v4, %v3816_v31  ;;  %16380 = vmatmul.mubr.bf16.gmra.mrb[108].mxu0 %v4925_v24  ;;  %v18098_v4 = vld [vmem:[%s23786_s4 + $0x320] sm:$0xff]   ;;  %v4913_v13 = vld [vmem:[#allocation2 + $0x54] sm:$0xff] }
 0x545   : >> { %16439 = vmatprep.mubr.msk.bf16.mxu1 %vm18885_vm0, %v18884_v1  ;;  %16383 = vmatprep.mubr.msk.bf16.mxu0 %vm18885_vm0, %v18884_v1  ;;  %v5129_v0 = vld [vmem:[#allocation2 + $0x5d] sm:$0xff]  ;;  %v4927_v31 = vpack.c.bf16 %v4913_v13, %v4912_v3  ;;  %v5131_v24 = vld [vmem:[#allocation2 + $0x6d] sm:$0xff] }
 0x546   : >> { %16468 = vmatpush3.bf16.msra.mxu0 %v18094_v29  ;;  %16524 = vmatpush3.bf16.msra.mxu1 %v18099_v53  ;;  %v5143_v40 = vpack.c.bf16 %v5130_v6, %v5129_v0  ;;  %v5132_v53 = vld [vmem:[#allocation2 + $0x75] sm:$0xff]  ;;  %v5133_v6 = vld [vmem:[#allocation2 + $0x7d] sm:$0xff]  ;;  %v5135_v0 = vld [vmem:[#allocation2 + $0x8d] sm:$0xff] }
 0x547   : >> { %v3981_v15 = vpop.f32.mrb[40].mxu1  ;;  %16469 = vmatprep.subr.bf16.mxu0 %v18884_v1  ;;  %v3758_v60 = vpop.f32.mrb[4].mxu0  ;;  %16525 = vmatprep.subr.bf16.mxu1 %v18884_v1 }
 0x548   : >> { %v16129_v45 = vpop.f32.mrb[41].mxu1  ;;  %v3817_v58 = vadd.f32 %v3758_v60, %v20790_v2  ;;  %v16073_v62 = vpop.f32.mrb[5].mxu0  ;;  %v18103_v2 = vld [vmem:[%s23786_s4 + $0x370] sm:$0xff]  }
 0x549   : >> { %v3984_v39 = vpop.f32.mrb[42].mxu1  ;;  %v3761_v19 = vpop.f32.mrb[6].mxu0  ;;  %v4914_v45 = vld [vmem:[#allocation2 + $0x5c] sm:$0xff]  ;;  %v5144_v62 = vpack.c.bf16 %v5132_v53, %v5131_v24 }
 0x54a   : >> { %v16130_v5 = vpop.f32.mrb[43].mxu1  ;;  %16470 = vmatpush3.bf16.msra.mxu0 %v18096_v30  ;;  %v20947_v61 = vadd.f32 %v3973_v50, %v3817_v58  ;;  %v3818_v8 = vadd.f32 %v3761_v19, %v20798_v51  ;;  %v16074_v21 = vpop.f32.mrb[7].mxu0  ;;  %16526 = vmatpush3.bf16.msra.mxu1 %v18101_v41  ;;  %v18100_v51 = vld [vmem:[%s23786_s4 + $0x328] sm:$0xff]  }
 0x54b   : >> { %16471 = vmatprep.subr.bf16.mxu0 %v18884_v1  ;;  %16527 = vmatprep.subr.bf16.mxu1 %v18884_v1  ;;  %v4916_v21 = vld [vmem:[#allocation2 + $0x6c] sm:$0xff] }
 0x54c   : >> { %16440 = vmatmul.mubr.bf16.gmra.mrb[148].mxu1 %v5142_v20  ;;  %v20955_v55 = vadd.f32 %v3976_v44, %v3818_v8  ;;  %16384 = vmatmul.mubr.bf16.gmra.mrb[112].mxu0 %v4926_v54  ;;  %v4917_v54 = vld [vmem:[#allocation2 + $0x74] sm:$0xff] }
 0x54d   : >> { %16443 = vmatprep.mubr.msk.bf16.mxu1 %vm18885_vm0, %v18884_v1  ;;  %16387 = vmatprep.mubr.msk.bf16.mxu0 %vm18885_vm0, %v18884_v1 }
 0x54e   : >> { %16472 = vmatpush3.bf16.msra.mxu0 %v18098_v4  ;;  %16528 = vmatpush3.bf16.msra.mxu1 %v18103_v2  ;;  %v5134_v4 = vld [vmem:[#allocation2 + $0x85] sm:$0xff] }
 0x54f   : >> { %v3989_v56 = vpop.f32.mrb[44].mxu1  ;;  %16473 = vmatprep.subr.bf16.mxu0 %v18884_v1  ;;  %v3766_v50 = vpop.f32.mrb[8].mxu0  ;;  %16529 = vmatprep.subr.bf16.mxu1 %v18884_v1  ;;  %v5145_v3 = vpack.c.bf16 %v5134_v4, %v5133_v6  ;;  %v4923_v6 = vld [vmem:[#allocation2 + $0xa4] sm:$0xff] }
 0x550   : >> { %v16133_v46 = vpop.f32.mrb[45].mxu1  ;;  %v3819_v25 = vadd.f32 %v3766_v50, %v20816_v37  ;;  %v16077_v28 = vpop.f32.mrb[9].mxu0 }
 0x551   : >> { %v3992_v27 = vpop.f32.mrb[46].mxu1  ;;  %v3769_v14 = vpop.f32.mrb[10].mxu0  ;;  %v4929_v28 = vpack.c.bf16 %v4917_v54, %v4916_v21 }
 0x552   : >> { %v16134_v44 = vpop.f32.mrb[47].mxu1  ;;  %16474 = vmatpush3.bf16.msra.mxu0 %v18100_v51  ;;  %v20973_v48 = vadd.f32 %v3981_v15, %v3819_v25  ;;  %v3820_v18 = vadd.f32 %v3769_v14, %v20821_v35  ;;  %v16078_v29 = vpop.f32.mrb[11].mxu0  ;;  %16530 = vmatpush3.bf16.msra.mxu1 %v18105_v38  ;;  %v18104_v35 = vld [vmem:[%s23786_s4 + $0x338] sm:$0xff]   ;;  %v4915_v15 = vld [vmem:[#allocation2 + $0x64] sm:$0xff] }
 0x553   : >> { %16475 = vmatprep.subr.bf16.mxu0 %v18884_v1  ;;  %16619 = vmatprep.subr.bf16.mxu1 %v18884_v1  ;;  %v4928_v5 = vpack.c.bf16 %v4915_v15, %v4914_v45  ;;  %v5136_v14 = vld [vmem:[#allocation2 + $0x95] sm:$0xff] }
 0x554   : >> { %16444 = vmatmul.mubr.bf16.gmra.mrb[152].mxu1 %v5143_v40  ;;  %v20978_v37 = vadd.f32 %v3984_v39, %v3820_v18  ;;  %16388 = vmatmul.mubr.bf16.gmra.mrb[116].mxu0 %v4927_v31  ;;  %v4919_v40 = vld [vmem:[#allocation2 + $0x84] sm:$0xff]  ;;  %v5146_v24 = vpack.c.bf16 %v5136_v14, %v5135_v0  ;;  %v4921_v45 = vld [vmem:[#allocation2 + $0x94] sm:$0xff] }
 0x555   : >> { %16447 = vmatprep.mubr.msk.bf16.mxu1 %vm18885_vm0, %v18884_v1  ;;  %16391 = vmatprep.mubr.msk.bf16.mxu0 %vm18885_vm0, %v18884_v1  ;;  %v18107_v14 = vld [vmem:[%s23786_s4 + $0x3c0] sm:$0xff]  }
 0x556   : >> { %16476 = vmatpush3.bf16.msra.mxu0 %v18102_v11 }
 0x557   : >> { %v3997_v10 = vpop.f32.mrb[48].mxu1  ;;  %16477 = vmatprep.subr.bf16.mxu0 %v18884_v1  ;;  %v3774_v30 = vpop.f32.mrb[12].mxu0 }
 0x558   : >> { %v16137_v23 = vpop.f32.mrb[49].mxu1  ;;  %v3821_v43 = vadd.f32 %v3774_v30, %v20832_v7  ;;  %v16081_v41 = vpop.f32.mrb[13].mxu0 }
 0x559   : >> { %v4000_v60 = vpop.f32.mrb[50].mxu1  ;;  %v3777_v42 = vpop.f32.mrb[14].mxu0  ;;  %v5138_v41 = vld [vmem:[#allocation2 + $0xa5] sm:$0xff] }
 0x55a   : >> { %v16138_v58 = vpop.f32.mrb[51].mxu1  ;;  %16478 = vmatpush3.bf16.msra.mxu0 %v18104_v35  ;;  %v20989_v39 = vadd.f32 %v3989_v56, %v3821_v43  ;;  %v3822_v19 = vadd.f32 %v3777_v42, %v20836_v49  ;;  %v16082_v36 = vpop.f32.mrb[15].mxu0  ;;  %v4918_v35 = vld [vmem:[#allocation2 + $0x7c] sm:$0xff]  ;;  %v4920_v42 = vld [vmem:[#allocation2 + $0x8c] sm:$0xff] }
 0x55b   : >> { %16567 = vmatprep.subr.bf16.mxu0 %v18884_v1  ;;  %v4930_v23 = vpack.c.bf16 %v4919_v40, %v4918_v35  ;;  %v5137_v36 = vld [vmem:[#allocation2 + $0x9d] sm:$0xff] }
 0x55c   : >> { %16448 = vmatmul.mubr.bf16.gmra.mrb[156].mxu1 %v5144_v62  ;;  %v20993_v20 = vadd.f32 %v3992_v27, %v3822_v19  ;;  %16392 = vmatmul.mubr.bf16.gmra.mrb[120].mxu0 %v4928_v5  ;;  %v5147_v4 = vpack.c.bf16 %v5138_v41, %v5137_v36 }
 0x55d   : >> { %16451 = vmatprep.mubr.msk.bf16.mxu1 %vm18885_vm0, %v18884_v1  ;;  %16395 = vmatprep.mubr.msk.bf16.mxu0 %vm18885_vm0, %v18884_v1 }
 0x55f   : >> { %v4005_v7 = vpop.f32.mrb[52].mxu1  ;;  %v3782_v8 = vpop.f32.mrb[16].mxu0 }
 0x560   : >> { %v16141_v49 = vpop.f32.mrb[53].mxu1  ;;  %v3823_v2 = vadd.f32 %v3782_v8, %v20843_v47  ;;  %v16085_v51 = vpop.f32.mrb[17].mxu0 }
 0x561   : >> { %v4008_v56 = vpop.f32.mrb[54].mxu1  ;;  %v3785_v38 = vpop.f32.mrb[18].mxu0  ;;  %v4931_v49 = vpack.c.bf16 %v4921_v45, %v4920_v42 }
 0x562   : >> { %v16142_v50 = vpop.f32.mrb[55].mxu1  ;;  %v21000_v13 = vadd.f32 %v3997_v10, %v3823_v2  ;;  %v3824_v46 = vadd.f32 %v3785_v38, %v20846_v17  ;;  %v16086_v25 = vpop.f32.mrb[19].mxu0 }
 0x563   : >> { %v5551_v50 = vld [vmem:[#allocation2 + $0x1f] sm:$0xff] }
 0x564   : >> { %16452 = vmatmul.mubr.bf16.gmra.mrb[160].mxu1 %v5145_v3  ;;  %v21003_v27 = vadd.f32 %v4000_v60, %v3824_v46  ;;  %16396 = vmatmul.mubr.bf16.gmra.mrb[124].mxu0 %v4929_v28 }
 0x565   : >> { %16455 = vmatprep.mubr.msk.bf16.mxu1 %vm18885_vm0, %v18884_v1  ;;  %16399 = vmatprep.mubr.msk.bf16.mxu0 %vm18885_vm0, %v18884_v1 }
 0x567   : >> { %v4013_v47 = vpop.f32.mrb[56].mxu1  ;;  %v3790_v44 = vpop.f32.mrb[20].mxu0 }
 0x568   : >> { %v16145_v11 = vpop.f32.mrb[57].mxu1  ;;  %v3825_v17 = vadd.f32 %v3790_v44, %v20853_v34  ;;  %v16089_v18 = vpop.f32.mrb[21].mxu0 }
 0x569   : >> { %v4016_v29 = vpop.f32.mrb[58].mxu1  ;;  %v3793_v31 = vpop.f32.mrb[22].mxu0 }
 0x56a   : >> { %v16146_v10 = vpop.f32.mrb[59].mxu1  ;;  %v21010_v53 = vadd.f32 %v4005_v7, %v3825_v17  ;;  %v3826_v30 = vadd.f32 %v3793_v31, %v20856_v12  ;;  %v16090_v15 = vpop.f32.mrb[23].mxu0  ;;  %v5553_v31 = vld [vmem:[#allocation2 + $0x2f] sm:$0xff] }
 0x56c   : >> { %16456 = vmatmul.mubr.bf16.gmra.mrb[164].mxu1 %v5146_v24  ;;  %v21013_v43 = vadd.f32 %v4008_v56, %v3826_v30  ;;  %16400 = vmatmul.mubr.bf16.gmra.mrb[128].mxu0 %v4930_v23 }
 0x56d   : >> { %16459 = vmatprep.mubr.msk.bf16.mxu1 %vm18885_vm0, %v18884_v1  ;;  %16403 = vmatprep.mubr.msk.bf16.mxu0 %vm18885_vm0, %v18884_v1 }
 0x56f   : >> { %v4021_v34 = vpop.f32.mrb[60].mxu1  ;;  %v3798_v60 = vpop.f32.mrb[24].mxu0 }
 0x570   : >> { %v16149_v58 = vpop.f32.mrb[61].mxu1  ;;  %v3827_v12 = vadd.f32 %v3798_v60, %v20863_v32  ;;  %v16093_v62 = vpop.f32.mrb[25].mxu0  ;;  %v5552_v32 = vld [vmem:[#allocation2 + $0x27] sm:$0xff] }
 0x571   : >> { %v4024_v19 = vpop.f32.mrb[62].mxu1  ;;  %v3801_v5 = vpop.f32.mrb[26].mxu0  ;;  %v5569_v25 = vpack.c.bf16 %v5552_v32, %v5551_v50  ;;  %v18106_v60 = vld [vmem:[%s23786_s4 + $0x380] sm:$0xff]  }
 0x572   : >> { %v16150_v7 = vpop.f32.mrb[63].mxu1  ;;  %v21020_v8 = vadd.f32 %v4013_v47, %v3827_v12  ;;  %v3828_v21 = vadd.f32 %v3801_v5, %v20866_v9  ;;  %v16094_v54 = vpop.f32.mrb[27].mxu0  ;;  %v4922_v47 = vld [vmem:[#allocation2 + $0x9c] sm:$0xff]  ;;  %v5338_v5 = vld [vmem:[#allocation2 + $0x2e] sm:$0xff] }
 0x573   : >> { %v4932_v17 = vpack.c.bf16 %v4923_v6, %v4922_v47  ;;  %v5339_v7 = vld [vmem:[#allocation2 + $0x36] sm:$0xff]  ;;  %v5555_v32 = vld [vmem:[#allocation2 + $0x3f] sm:$0xff] }
 0x574   : >> { %16460 = vmatmul.mubr.bf16.gmra.mrb[168].mxu1 %v5147_v4  ;;  %v21023_v2 = vadd.f32 %v4016_v29, %v3828_v21  ;;  %16404 = vmatmul.mubr.bf16.gmra.mrb[132].mxu0 %v4931_v49  ;;  %v5557_v47 = vld [vmem:[#allocation2 + $0x4f] sm:$0xff] }
 0x575   : >> { %16531 = vmatprep.mubr.msk.bf16.mxu1 %vm18885_vm0, %v18884_v1  ;;  %16407 = vmatprep.mubr.msk.bf16.mxu0 %vm18885_vm0, %v18884_v1 }
 0x577   : >> { %v4387_v51 = vpop.f32.mrb[64].mxu1  ;;  %v3806_v56 = vpop.f32.mrb[28].mxu0 }
 0x578   : >> { %v16221_v38 = vpop.f32.mrb[65].mxu1  ;;  %v3829_v9 = vadd.f32 %v3806_v56, %v20876_v16  ;;  %v16097_v3 = vpop.f32.mrb[29].mxu0  ;;  %v18109_v16 = vld [vmem:[%s23786_s4 + $0x3c8] sm:$0xff]  }
 0x579   : >> { %v4390_v46 = vpop.f32.mrb[66].mxu1  ;;  %v3809_v28 = vpop.f32.mrb[30].mxu0  ;;  %v18110_v38 = vld [vmem:[%s23786_s4 + $0x390] sm:$0xff]  }
 0x57a   : >> { %v16222_v0 = vpop.f32.mrb[67].mxu1  ;;  %v21033_v44 = vadd.f32 %v4021_v34, %v3829_v9  ;;  %v3830_v40 = vadd.f32 %v3809_v28, %v20879_v33  ;;  %v16098_v11 = vpop.f32.mrb[31].mxu0  ;;  %v5554_v33 = vld [vmem:[#allocation2 + $0x37] sm:$0xff] }
 0x57b   : >> { %v5570_v41 = vpack.c.bf16 %v5554_v33, %v5553_v31  ;;  %v5558_v0 = vld [vmem:[#allocation2 + $0x57] sm:$0xff]  ;;  %v5341_v11 = vld [vmem:[#allocation2 + $0x46] sm:$0xff] }
 0x57c   : >> { %16532 = vmatmul.mubr.bf16.vlgmr.msra.gmra.mrb[172].mxu1 %v5569_v25  ;;  %v21036_v18 = vadd.f32 %v4024_v19, %v3830_v40  ;;  %16408 = vmatmul.mubr.bf16.gmra.mrb[136].mxu0 %v4932_v17  ;;  %v5556_v19 = vld [vmem:[#allocation2 + $0x47] sm:$0xff] }
 0x57d   : >> { %16535 = vmatprep.mubr.msk.bf16.mxu1 %vm18885_vm0, %v18884_v1  ;;  %16479 = vmatprep.mubr.msk.bf16.mxu0 %vm18885_vm0, %v18884_v1  ;;  %v5571_v6 = vpack.c.bf16 %v5556_v19, %v5555_v32  ;;  %v5343_v19 = vld [vmem:[#allocation2 + $0x56] sm:$0xff] }
 0x57e   : >> { %16620 = vmatpush3.bf16.msra.mxu1 %v18107_v14  ;;  %v18117_v14 = vld [vmem:[%s23786_s4 + $0x3e8] sm:$0xff]   ;;  %v18118_v32 = vld [vmem:[%s23786_s4 + $0x3b0] sm:$0xff]  }
 0x57f   : >> { %v4395_v29 = vpop.f32.mrb[68].mxu1  ;;  %16621 = vmatprep.subr.bf16.mxu1 %v18884_v1  ;;  %v4172_v35 = vpop.f32.mrb[32].mxu0 }
 0x580   : >> { %v16225_v10 = vpop.f32.mrb[69].mxu1  ;;  %v4243_v24 = vadd.f32 %v4172_v35, %v20893_v59  ;;  %v16169_v30 = vpop.f32.mrb[33].mxu0  ;;  %v18111_v59 = vld [vmem:[%s23786_s4 + $0x3d0] sm:$0xff]   ;;  %v5340_v35 = vld [vmem:[#allocation2 + $0x3e] sm:$0xff] }
 0x581   : >> { %v4398_v15 = vpop.f32.mrb[70].mxu1  ;;  %v4175_v23 = vpop.f32.mrb[34].mxu0  ;;  %v18114_v30 = vld [vmem:[%s23786_s4 + $0x3a0] sm:$0xff]  }
 0x582   : >> { %v16226_v34 = vpop.f32.mrb[71].mxu1  ;;  %16622 = vmatpush3.bf16.msra.mxu1 %v18109_v16  ;;  %v21050_v42 = vadd.f32 %v4387_v51, %v4243_v24  ;;  %v4244_v45 = vadd.f32 %v4175_v23, %v20900_v63  ;;  %v16170_v58 = vpop.f32.mrb[35].mxu0  ;;  %v18108_v63 = vld [vmem:[%s23786_s4 + $0x388] sm:$0xff]   ;;  %v5572_v24 = vpack.c.bf16 %v5558_v0, %v5557_v47 }
 0x583   : >> { %16623 = vmatprep.subr.bf16.mxu1 %v18884_v1  ;;  %v5560_v58 = vld [vmem:[#allocation2 + $0x67] sm:$0xff] }
 0x584   : >> { %16536 = vmatmul.mubr.bf16.gmra.mrb[176].mxu1 %v5570_v41  ;;  %v21057_v12 = vadd.f32 %v4390_v46, %v4244_v45  ;;  %16480 = vmatmul.mubr.bf16.vlgmr.msra.gmra.mrb[140].mxu0 %v20491_v26  ;;  %v18113_v26 = vld [vmem:[%s23786_s4 + $0x3d8] sm:$0xff]   ;;  %v5355_v46 = vpack.c.bf16 %v5339_v7, %v5338_v5  ;;  %v5356_v41 = vpack.c.bf16 %v5341_v11, %v5340_v35 }
 0x585   : >> { %16539 = vmatprep.mubr.msk.bf16.mxu1 %vm18885_vm0, %v18884_v1  ;;  %16483 = vmatprep.mubr.msk.bf16.mxu0 %vm18885_vm0, %v18884_v1  ;;  %v5344_v11 = vld [vmem:[#allocation2 + $0x5e] sm:$0xff] }
 0x586   : >> { %16568 = vmatpush3.bf16.msra.mxu0 %v18106_v60  ;;  %16624 = vmatpush3.bf16.msra.mxu1 %v18111_v59  ;;  %v18121_v59 = vld [vmem:[%s23786_s4 + $0x3f8] sm:$0xff]  }
 0x587   : >> { %v4403_v62 = vpop.f32.mrb[72].mxu1  ;;  %16569 = vmatprep.subr.bf16.mxu0 %v18884_v1  ;;  %v4180_v36 = vpop.f32.mrb[36].mxu0  ;;  %16625 = vmatprep.subr.bf16.mxu1 %v18884_v1 }
 0x588   : >> { %v16229_v4 = vpop.f32.mrb[73].mxu1  ;;  %v4245_v21 = vadd.f32 %v4180_v36, %v20921_v22  ;;  %v16173_v54 = vpop.f32.mrb[37].mxu0  ;;  %v18115_v22 = vld [vmem:[%s23786_s4 + $0x3e0] sm:$0xff]  }
 0x589   : >> { %v4406_v49 = vpop.f32.mrb[74].mxu1  ;;  %v4183_v51 = vpop.f32.mrb[38].mxu0  ;;  %v5559_v4 = vld [vmem:[#allocation2 + $0x5f] sm:$0xff] }
 0x58a   : >> { %v16230_v56 = vpop.f32.mrb[75].mxu1  ;;  %16570 = vmatpush3.bf16.msra.mxu0 %v18108_v63  ;;  %v21076_v50 = vadd.f32 %v4395_v29, %v4245_v21  ;;  %v4246_v9 = vadd.f32 %v4183_v51, %v20929_v57  ;;  %v16174_v3 = vpop.f32.mrb[39].mxu0  ;;  %16626 = vmatpush3.bf16.msra.mxu1 %v18113_v26  ;;  %v18112_v57 = vld [vmem:[%s23786_s4 + $0x398] sm:$0xff]  }
 0x58b   : >> { %16571 = vmatprep.subr.bf16.mxu0 %v18884_v1  ;;  %16627 = vmatprep.subr.bf16.mxu1 %v18884_v1  ;;  %v5561_v3 = vld [vmem:[#allocation2 + $0x6f] sm:$0xff] }
 0x58c   : >> { %16540 = vmatmul.mubr.bf16.gmra.mrb[180].mxu1 %v5571_v6  ;;  %v21084_v25 = vadd.f32 %v4398_v15, %v4246_v9  ;;  %16484 = vmatmul.mubr.bf16.gmra.mrb[144].mxu0 %v5355_v46  ;;  %v5562_v46 = vld [vmem:[#allocation2 + $0x77] sm:$0xff] }
 0x58d   : >> { %16543 = vmatprep.mubr.msk.bf16.mxu1 %vm18885_vm0, %v18884_v1  ;;  %16487 = vmatprep.mubr.msk.bf16.mxu0 %vm18885_vm0, %v18884_v1 }
 0x58e   : >> { %16572 = vmatpush3.bf16.msra.mxu0 %v18110_v38  ;;  %16628 = vmatpush3.bf16.msra.mxu1 %v18115_v22 }
 0x58f   : >> { %v4411_v28 = vpop.f32.mrb[76].mxu1  ;;  %16573 = vmatprep.subr.bf16.mxu0 %v18884_v1  ;;  %v4188_v40 = vpop.f32.mrb[40].mxu0  ;;  %16629 = vmatprep.subr.bf16.mxu1 %v18884_v1 }
 0x590   : >> { %v16233_v17 = vpop.f32.mrb[77].mxu1  ;;  %v4247_v16 = vadd.f32 %v4188_v40, %v20947_v61  ;;  %v16177_v29 = vpop.f32.mrb[41].mxu0  ;;  %v18119_v61 = vld [vmem:[%s23786_s4 + $0x3f0] sm:$0xff]  }
 0x591   : >> { %v4414_v31 = vpop.f32.mrb[78].mxu1  ;;  %v4191_v33 = vpop.f32.mrb[42].mxu0 }
 0x592   : >> { %v16234_v10 = vpop.f32.mrb[79].mxu1  ;;  %16574 = vmatpush3.bf16.msra.mxu0 %v18112_v57  ;;  %v21102_v15 = vadd.f32 %v4403_v62, %v4247_v16  ;;  %v4248_v23 = vadd.f32 %v4191_v33, %v20955_v55  ;;  %v16178_v34 = vpop.f32.mrb[43].mxu0  ;;  %16630 = vmatpush3.bf16.msra.mxu1 %v18117_v14  ;;  %v18116_v55 = vld [vmem:[%s23786_s4 + $0x3a8] sm:$0xff]   ;;  %v5574_v16 = vpack.c.bf16 %v5562_v46, %v5561_v3 }
 0x593   : >> { %16575 = vmatprep.subr.bf16.mxu0 %v18884_v1  ;;  %16631 = vmatprep.subr.bf16.mxu1 %v18884_v1  ;;  %v5342_v62 = vld [vmem:[#allocation2 + $0x4e] sm:$0xff]  ;;  %v5345_v57 = vld [vmem:[#allocation2 + $0x66] sm:$0xff]  ;;  %v5347_v34 = vld [vmem:[#allocation2 + $0x76] sm:$0xff] }
 0x594   : >> { %16544 = vmatmul.mubr.bf16.gmra.mrb[184].mxu1 %v5572_v24  ;;  %v21110_v60 = vadd.f32 %v4406_v49, %v4248_v23  ;;  %16488 = vmatmul.mubr.bf16.gmra.mrb[148].mxu0 %v5356_v41  ;;  %v5573_v49 = vpack.c.bf16 %v5560_v58, %v5559_v4  ;;  %v5357_v38 = vpack.c.bf16 %v5343_v19, %v5342_v62  ;;  %v5564_v24 = vld [vmem:[#allocation2 + $0x87] sm:$0xff]  ;;  %v5566_v4 = vld [vmem:[#allocation2 + $0x97] sm:$0xff] }
 0x595   : >> { %16547 = vmatprep.mubr.msk.bf16.mxu1 %vm18885_vm0, %v18884_v1  ;;  %16491 = vmatprep.mubr.msk.bf16.mxu0 %vm18885_vm0, %v18884_v1  ;;  %v5358_v35 = vpack.c.bf16 %v5345_v57, %v5344_v11  ;;  %v5346_v23 = vld [vmem:[#allocation2 + $0x6e] sm:$0xff] }
 0x596   : >> { %16576 = vmatpush3.bf16.msra.mxu0 %v18114_v30  ;;  %16632 = vmatpush3.bf16.msra.mxu1 %v18119_v61 }
 0x597   : >> { %v4419_v45 = vpop.f32.mrb[80].mxu1  ;;  %16577 = vmatprep.subr.bf16.mxu0 %v18884_v1  ;;  %v4196_v63 = vpop.f32.mrb[44].mxu0  ;;  %16633 = vmatprep.subr.bf16.mxu1 %v18884_v1 }
 0x598   : >> { %v16237_v26 = vpop.f32.mrb[81].mxu1  ;;  %v4249_v36 = vadd.f32 %v4196_v63, %v20973_v48  ;;  %v16181_v5 = vpop.f32.mrb[45].mxu0 }
 0x599   : >> { %v4422_v7 = vpop.f32.mrb[82].mxu1  ;;  %v4199_v21 = vpop.f32.mrb[46].mxu0 }
 0x59a   : >> { %v16238_v54 = vpop.f32.mrb[83].mxu1  ;;  %16578 = vmatpush3.bf16.msra.mxu0 %v18116_v55  ;;  %v21128_v51 = vadd.f32 %v4411_v28, %v4249_v36  ;;  %v4250_v56 = vadd.f32 %v4199_v21, %v20978_v37  ;;  %v16182_v6 = vpop.f32.mrb[47].mxu0  ;;  %16634 = vmatpush3.bf16.msra.mxu1 %v18121_v59  ;;  %v18120_v37 = vld [vmem:[%s23786_s4 + $0x3b8] sm:$0xff]   ;;  %v5359_v36 = vpack.c.bf16 %v5347_v34, %v5346_v23 }
 0x59b   : >> { %16579 = vmatprep.subr.bf16.mxu0 %v18884_v1  ;;  %16723 = vmatprep.subr.bf16.mxu1 %v18884_v1  ;;  %v5349_v54 = vld [vmem:[#allocation2 + $0x86] sm:$0xff] }
 0x59c   : >> { %16548 = vmatmul.mubr.bf16.gmra.mrb[188].mxu1 %v5573_v49  ;;  %v21133_v48 = vadd.f32 %v4414_v31, %v4250_v56  ;;  %16492 = vmatmul.mubr.bf16.gmra.mrb[152].mxu0 %v5357_v38  ;;  %v5348_v38 = vld [vmem:[#allocation2 + $0x7e] sm:$0xff] }
 0x59d   : >> { %16551 = vmatprep.mubr.msk.bf16.mxu1 %vm18885_vm0, %v18884_v1  ;;  %16495 = vmatprep.mubr.msk.bf16.mxu0 %vm18885_vm0, %v18884_v1  ;;  %v5360_v57 = vpack.c.bf16 %v5349_v54, %v5348_v38 }
 0x59e   : >> { %16580 = vmatpush3.bf16.msra.mxu0 %v18118_v32 }
 0x59f   : >> { %v4427_v9 = vpop.f32.mrb[84].mxu1  ;;  %16581 = vmatprep.subr.bf16.mxu0 %v18884_v1  ;;  %v4204_v22 = vpop.f32.mrb[48].mxu0 }
 0x5a0   : >> { %v16241_v28 = vpop.f32.mrb[85].mxu1  ;;  %v4251_v47 = vadd.f32 %v4204_v22, %v20989_v39  ;;  %v16185_v0 = vpop.f32.mrb[49].mxu0 }
 0x5a1   : >> { %v4430_v14 = vpop.f32.mrb[86].mxu1  ;;  %v4207_v40 = vpop.f32.mrb[50].mxu0 }
 0x5a2   : >> { %v16242_v17 = vpop.f32.mrb[87].mxu1  ;;  %16582 = vmatpush3.bf16.msra.mxu0 %v18120_v37  ;;  %v21144_v29 = vadd.f32 %v4419_v45, %v4251_v47  ;;  %v4252_v31 = vadd.f32 %v4207_v40, %v20993_v20  ;;  %v16186_v33 = vpop.f32.mrb[51].mxu0  ;;  %v5563_v45 = vld [vmem:[#allocation2 + $0x7f] sm:$0xff]  ;;  %v5568_v47 = vld [vmem:[#allocation2 + $0xa7] sm:$0xff]  ;;  %v5351_v40 = vld [vmem:[#allocation2 + $0x96] sm:$0xff] }
 0x5a3   : >> { %16671 = vmatprep.subr.bf16.mxu0 %v18884_v1  ;;  %v5575_v63 = vpack.c.bf16 %v5564_v24, %v5563_v45  ;;  %v5353_v45 = vld [vmem:[#allocation2 + $0xa6] sm:$0xff] }
 0x5a4   : >> { %16552 = vmatmul.mubr.bf16.gmra.mrb[192].mxu1 %v5574_v16  ;;  %v21148_v10 = vadd.f32 %v4422_v7, %v4252_v31  ;;  %16496 = vmatmul.mubr.bf16.gmra.mrb[156].mxu0 %v5358_v35  ;;  %v5565_v7 = vld [vmem:[#allocation2 + $0x8f] sm:$0xff]  ;;  %v5567_v31 = vld [vmem:[#allocation2 + $0x9f] sm:$0xff] }
 0x5a5   : >> { %16555 = vmatprep.mubr.msk.bf16.mxu1 %vm18885_vm0, %v18884_v1  ;;  %16499 = vmatprep.mubr.msk.bf16.mxu0 %vm18885_vm0, %v18884_v1 }
 0x5a7   : >> { %v4435_v39 = vpop.f32.mrb[88].mxu1  ;;  %v4212_v30 = vpop.f32.mrb[52].mxu0 }
 0x5a8   : >> { %v16245_v20 = vpop.f32.mrb[89].mxu1  ;;  %v4253_v41 = vadd.f32 %v4212_v30, %v21000_v13  ;;  %v16189_v61 = vpop.f32.mrb[53].mxu0 }
 0x5a9   : >> { %v4438_v55 = vpop.f32.mrb[90].mxu1  ;;  %v4215_v58 = vpop.f32.mrb[54].mxu0  ;;  %v5982_v61 = vld [vmem:[#allocation2 + $0x32] sm:$0xff] }
 0x5aa   : >> { %v16246_v59 = vpop.f32.mrb[91].mxu1  ;;  %v21155_v62 = vadd.f32 %v4427_v9, %v4253_v41  ;;  %v4254_v19 = vadd.f32 %v4215_v58, %v21003_v27  ;;  %v16190_v26 = vpop.f32.mrb[55].mxu0  ;;  %v5576_v9 = vpack.c.bf16 %v5566_v4, %v5565_v7  ;;  %v5981_v41 = vld [vmem:[#allocation2 + $0x2a] sm:$0xff]  ;;  %v18123_v7 = vld [vmem:[%s23786_s4 + $0x440] sm:$0xff]  }
 0x5ab   : >> { %v5352_v26 = vld [vmem:[#allocation2 + $0x9e] sm:$0xff] }
 0x5ac   : >> { %16556 = vmatmul.mubr.bf16.gmra.mrb[196].mxu1 %v5575_v63  ;;  %v21158_v5 = vadd.f32 %v4430_v14, %v4254_v19  ;;  %16500 = vmatmul.mubr.bf16.gmra.mrb[160].mxu0 %v5359_v36  ;;  %v5350_v14 = vld [vmem:[#allocation2 + $0x8e] sm:$0xff] }
 0x5ad   : >> { %16559 = vmatprep.mubr.msk.bf16.mxu1 %vm18885_vm0, %v18884_v1  ;;  %16503 = vmatprep.mubr.msk.bf16.mxu0 %vm18885_vm0, %v18884_v1  ;;  %v5361_v34 = vpack.c.bf16 %v5351_v40, %v5350_v14 }
 0x5af   : >> { %v4443_v13 = vpop.f32.mrb[92].mxu1  ;;  %v4220_v21 = vpop.f32.mrb[56].mxu0 }
 0x5b0   : >> { %v16249_v49 = vpop.f32.mrb[93].mxu1  ;;  %v4255_v27 = vadd.f32 %v4220_v21, %v21010_v53  ;;  %v16193_v32 = vpop.f32.mrb[57].mxu0 }
 0x5b1   : >> { %v4446_v56 = vpop.f32.mrb[94].mxu1  ;;  %v4223_v6 = vpop.f32.mrb[58].mxu0  ;;  %v5362_v49 = vpack.c.bf16 %v5353_v45, %v5352_v26  ;;  %v5988_v26 = vld [vmem:[#allocation2 + $0x62] sm:$0xff] }
 0x5b2   : >> { %v16250_v37 = vpop.f32.mrb[95].mxu1  ;;  %v21165_v3 = vadd.f32 %v4435_v39, %v4255_v27  ;;  %v4256_v46 = vadd.f32 %v4223_v6, %v21013_v43  ;;  %v16194_v22 = vpop.f32.mrb[59].mxu0  ;;  %v5577_v39 = vpack.c.bf16 %v5568_v47, %v5567_v31  ;;  %v18122_v47 = vld [vmem:[%s23786_s4 + $0x400] sm:$0xff]  }
 0x5b4   : >> { %16560 = vmatmul.mubr.bf16.gmra.mrb[200].mxu1 %v5576_v9  ;;  %v21168_v28 = vadd.f32 %v4438_v55, %v4256_v46  ;;  %16504 = vmatmul.mubr.bf16.gmra.mrb[164].mxu0 %v5360_v57  ;;  %v5983_v46 = vld [vmem:[#allocation2 + $0x3a] sm:$0xff] }
 0x5b5   : >> { %16563 = vmatprep.mubr.msk.bf16.mxu1 %vm18885_vm0, %v18884_v1  ;;  %16507 = vmatprep.mubr.msk.bf16.mxu0 %vm18885_vm0, %v18884_v1 }
 0x5b7   : >> { %v4451_v53 = vpop.f32.mrb[96].mxu1  ;;  %v4228_v0 = vpop.f32.mrb[60].mxu0 }
 0x5b8   : >> { %v16253_v11 = vpop.f32.mrb[97].mxu1  ;;  %v4257_v43 = vadd.f32 %v4228_v0, %v21020_v8  ;;  %v16197_v17 = vpop.f32.mrb[61].mxu0 }
 0x5b9   : >> { %v4454_v16 = vpop.f32.mrb[98].mxu1  ;;  %v4231_v33 = vpop.f32.mrb[62].mxu0  ;;  %v5985_v17 = vld [vmem:[#allocation2 + $0x4a] sm:$0xff] }
 0x5ba   : >> { %v16254_v35 = vpop.f32.mrb[99].mxu1  ;;  %v21175_v24 = vadd.f32 %v4443_v13, %v4257_v43  ;;  %v4258_v30 = vadd.f32 %v4231_v33, %v21023_v2  ;;  %v16198_v23 = vpop.f32.mrb[63].mxu0  ;;  %v5999_v13 = vpack.c.bf16 %v5982_v61, %v5981_v41  ;;  %v5769_v33 = vld [vmem:[#allocation2 + $0x38] sm:$0xff] }
 0x5bc   : >> { %16564 = vmatmul.mubr.bf16.gmra.mrb[204].mxu1 %v5577_v39  ;;  %v21178_v20 = vadd.f32 %v4446_v56, %v4258_v30  ;;  %16508 = vmatmul.mubr.bf16.gmra.mrb[168].mxu0 %v5361_v34  ;;  %v5984_v56 = vld [vmem:[#allocation2 + $0x42] sm:$0xff] }
 0x5bd   : >> { %16635 = vmatprep.mubr.msk.bf16.mxu1 %vm18885_vm0, %v18884_v1  ;;  %16511 = vmatprep.mubr.msk.bf16.mxu0 %vm18885_vm0, %v18884_v1 }
 0x5bf   : >> { %v4817_v8 = vpop.f32.mrb[100].mxu1  ;;  %v4236_v55 = vpop.f32.mrb[64].mxu0 }
 0x5c0   : >> { %v16325_v58 = vpop.f32.mrb[101].mxu1  ;;  %v4259_v2 = vadd.f32 %v4236_v55, %v21033_v44  ;;  %v16201_v59 = vpop.f32.mrb[65].mxu0  ;;  %v18125_v44 = vld [vmem:[%s23786_s4 + $0x448] sm:$0xff]   ;;  %v18126_v55 = vld [vmem:[%s23786_s4 + $0x410] sm:$0xff]  }
 0x5c1   : >> { %v4820_v63 = vpop.f32.mrb[102].mxu1  ;;  %v4239_v19 = vpop.f32.mrb[66].mxu0 }
 0x5c2   : >> { %v16326_v36 = vpop.f32.mrb[103].mxu1  ;;  %v21188_v4 = vadd.f32 %v4451_v53, %v4259_v2  ;;  %v4260_v21 = vadd.f32 %v4239_v19, %v21036_v18  ;;  %v16202_v54 = vpop.f32.mrb[67].mxu0  ;;  %v6000_v53 = vpack.c.bf16 %v5984_v56, %v5983_v46 }
 0x5c3   : >> { %v18133_v36 = vld [vmem:[%s23786_s4 + $0x468] sm:$0xff]  }
 0x5c4   : >> { %16636 = vmatmul.mubr.bf16.vlgmr.msra.gmra.mrb[208].mxu1 %v5999_v13  ;;  %v21191_v27 = vadd.f32 %v4454_v16, %v4260_v21  ;;  %16512 = vmatmul.mubr.bf16.gmra.mrb[172].mxu0 %v5362_v49  ;;  %v5986_v16 = vld [vmem:[#allocation2 + $0x52] sm:$0xff] }
 0x5c5   : >> { %16639 = vmatprep.mubr.msk.bf16.mxu1 %vm18885_vm0, %v18884_v1  ;;  %16583 = vmatprep.mubr.msk.bf16.mxu0 %vm18885_vm0, %v18884_v1  ;;  %v6001_v61 = vpack.c.bf16 %v5986_v16, %v5985_v17 }
 0x5c6   : >> { %16724 = vmatpush3.bf16.msra.mxu1 %v18123_v7  ;;  %v5771_v7 = vld [vmem:[#allocation2 + $0x48] sm:$0xff] }
 0x5c7   : >> { %v4825_v32 = vpop.f32.mrb[104].mxu1  ;;  %16725 = vmatprep.subr.bf16.mxu1 %v18884_v1  ;;  %v4602_v18 = vpop.f32.mrb[68].mxu0 }
 0x5c8   : >> { %v16329_v6 = vpop.f32.mrb[105].mxu1  ;;  %v4673_v38 = vadd.f32 %v4602_v18, %v21050_v42  ;;  %v16273_v37 = vpop.f32.mrb[69].mxu0  ;;  %v18127_v42 = vld [vmem:[%s23786_s4 + $0x450] sm:$0xff]   ;;  %v5770_v18 = vld [vmem:[#allocation2 + $0x40] sm:$0xff] }
 0x5c9   : >> { %v4828_v9 = vpop.f32.mrb[106].mxu1  ;;  %v4605_v22 = vpop.f32.mrb[70].mxu0  ;;  %v18130_v37 = vld [vmem:[%s23786_s4 + $0x420] sm:$0xff]  }
 0x5ca   : >> { %v16330_v57 = vpop.f32.mrb[107].mxu1  ;;  %16726 = vmatpush3.bf16.msra.mxu1 %v18125_v44  ;;  %v21205_v0 = vadd.f32 %v4817_v8, %v4673_v38  ;;  %v4674_v14 = vadd.f32 %v4605_v22, %v21057_v12  ;;  %v16274_v40 = vpop.f32.mrb[71].mxu0  ;;  %v18124_v12 = vld [vmem:[%s23786_s4 + $0x408] sm:$0xff]   ;;  %v5768_v8 = vld [vmem:[#allocation2 + $0x30] sm:$0xff] }
 0x5cb   : >> { %16727 = vmatprep.subr.bf16.mxu1 %v18884_v1  ;;  %v5785_v59 = vpack.c.bf16 %v5769_v33, %v5768_v8  ;;  %v5786_v57 = vpack.c.bf16 %v5771_v7, %v5770_v18  ;;  %v5990_v40 = vld [vmem:[#allocation2 + $0x72] sm:$0xff]  ;;  %v5774_v7 = vld [vmem:[#allocation2 + $0x60] sm:$0xff] }
 0x5cc   : >> { %16640 = vmatmul.mubr.bf16.gmra.mrb[212].mxu1 %v6000_v53  ;;  %v21212_v11 = vadd.f32 %v4820_v63, %v4674_v14  ;;  %16584 = vmatmul.mubr.bf16.vlgmr.msra.gmra.mrb[176].mxu0 %v20202_v52  ;;  %v18129_v52 = vld [vmem:[%s23786_s4 + $0x458] sm:$0xff]   ;;  %v5989_v14 = vld [vmem:[#allocation2 + $0x6a] sm:$0xff] }
 0x5cd   : >> { %16643 = vmatprep.mubr.msk.bf16.mxu1 %vm18885_vm0, %v18884_v1  ;;  %16587 = vmatprep.mubr.msk.bf16.mxu0 %vm18885_vm0, %v18884_v1 }
 0x5ce   : >> { %16672 = vmatpush3.bf16.msra.mxu0 %v18122_v47  ;;  %16728 = vmatpush3.bf16.msra.mxu1 %v18127_v42  ;;  %v18137_v42 = vld [vmem:[%s23786_s4 + $0x478] sm:$0xff]  }
 0x5cf   : >> { %v4833_v43 = vpop.f32.mrb[108].mxu1  ;;  %16673 = vmatprep.subr.bf16.mxu0 %v18884_v1  ;;  %v4610_v31 = vpop.f32.mrb[72].mxu0  ;;  %16729 = vmatprep.subr.bf16.mxu1 %v18884_v1 }
 0x5d0   : >> { %v16333_v35 = vpop.f32.mrb[109].mxu1  ;;  %v4675_v39 = vadd.f32 %v4610_v31, %v21076_v50  ;;  %v16277_v30 = vpop.f32.mrb[73].mxu0  ;;  %v18131_v50 = vld [vmem:[%s23786_s4 + $0x460] sm:$0xff]  }
 0x5d1   : >> { %v4836_v23 = vpop.f32.mrb[110].mxu1  ;;  %v4613_v34 = vpop.f32.mrb[74].mxu0  ;;  %v5772_v35 = vld [vmem:[#allocation2 + $0x50] sm:$0xff]  ;;  %v6003_v30 = vpack.c.bf16 %v5990_v40, %v5989_v14 }
 0x5d2   : >> { %v16334_v41 = vpop.f32.mrb[111].mxu1  ;;  %16674 = vmatpush3.bf16.msra.mxu0 %v18124_v12  ;;  %v21231_v45 = vadd.f32 %v4825_v32, %v4675_v39  ;;  %v4676_v58 = vadd.f32 %v4613_v34, %v21084_v25  ;;  %v16278_v2 = vpop.f32.mrb[75].mxu0  ;;  %16730 = vmatpush3.bf16.msra.mxu1 %v18129_v52  ;;  %v18128_v25 = vld [vmem:[%s23786_s4 + $0x418] sm:$0xff]  }
 0x5d3   : >> { %16675 = vmatprep.subr.bf16.mxu0 %v18884_v1  ;;  %16731 = vmatprep.subr.bf16.mxu1 %v18884_v1  ;;  %v5987_v32 = vld [vmem:[#allocation2 + $0x5a] sm:$0xff] }
 0x5d4   : >> { %16644 = vmatmul.mubr.bf16.gmra.mrb[216].mxu1 %v6001_v61  ;;  %v21239_v63 = vadd.f32 %v4828_v9, %v4676_v58  ;;  %16588 = vmatmul.mubr.bf16.gmra.mrb[180].mxu0 %v5785_v59  ;;  %v6002_v38 = vpack.c.bf16 %v5988_v26, %v5987_v32  ;;  %v5992_v58 = vld [vmem:[#allocation2 + $0x82] sm:$0xff] }
 0x5d5   : >> { %16647 = vmatprep.mubr.msk.bf16.mxu1 %vm18885_vm0, %v18884_v1  ;;  %16591 = vmatprep.mubr.msk.bf16.mxu0 %vm18885_vm0, %v18884_v1  ;;  %v5775_v59 = vld [vmem:[#allocation2 + $0x68] sm:$0xff] }
 0x5d6   : >> { %16676 = vmatpush3.bf16.msra.mxu0 %v18126_v55  ;;  %16732 = vmatpush3.bf16.msra.mxu1 %v18131_v50 }
 0x5d7   : >> { %v4841_v19 = vpop.f32.mrb[112].mxu1  ;;  %16677 = vmatprep.subr.bf16.mxu0 %v18884_v1  ;;  %v4618_v13 = vpop.f32.mrb[76].mxu0  ;;  %16733 = vmatprep.subr.bf16.mxu1 %v18884_v1 }
 0x5d8   : >> { %v16337_v21 = vpop.f32.mrb[113].mxu1  ;;  %v4677_v54 = vadd.f32 %v4618_v13, %v21102_v15  ;;  %v16281_v49 = vpop.f32.mrb[77].mxu0  ;;  %v18135_v15 = vld [vmem:[%s23786_s4 + $0x470] sm:$0xff]  }
 0x5d9   : >> { %v4844_v44 = vpop.f32.mrb[114].mxu1  ;;  %v4621_v56 = vpop.f32.mrb[78].mxu0 }
 0x5da   : >> { %v16338_v6 = vpop.f32.mrb[115].mxu1  ;;  %16678 = vmatpush3.bf16.msra.mxu0 %v18128_v25  ;;  %v21257_v9 = vadd.f32 %v4833_v43, %v4677_v54  ;;  %v4678_v46 = vadd.f32 %v4621_v56, %v21110_v60  ;;  %v16282_v22 = vpop.f32.mrb[79].mxu0  ;;  %16734 = vmatpush3.bf16.msra.mxu1 %v18133_v36  ;;  %v18132_v60 = vld [vmem:[%s23786_s4 + $0x428] sm:$0xff]   ;;  %v5773_v43 = vld [vmem:[#allocation2 + $0x58] sm:$0xff]  ;;  %v5788_v56 = vpack.c.bf16 %v5775_v59, %v5774_v7 }
 0x5db   : >> { %16679 = vmatprep.subr.bf16.mxu0 %v18884_v1  ;;  %16735 = vmatprep.subr.bf16.mxu1 %v18884_v1  ;;  %v5787_v61 = vpack.c.bf16 %v5773_v43, %v5772_v35  ;;  %v5991_v36 = vld [vmem:[#allocation2 + $0x7a] sm:$0xff]  ;;  %v5993_v6 = vld [vmem:[#allocation2 + $0x8a] sm:$0xff] }
 0x5dc   : >> { %16648 = vmatmul.mubr.bf16.gmra.mrb[220].mxu1 %v6002_v38  ;;  %v21265_v53 = vadd.f32 %v4836_v23, %v4678_v46  ;;  %16592 = vmatmul.mubr.bf16.gmra.mrb[184].mxu0 %v5786_v57  ;;  %v18134_v23 = vld [vmem:[%s23786_s4 + $0x430] sm:$0xff]   ;;  %v6004_v54 = vpack.c.bf16 %v5992_v58, %v5991_v36  ;;  %v5777_v46 = vld [vmem:[#allocation2 + $0x78] sm:$0xff] }
 0x5dd   : >> { %16651 = vmatprep.mubr.msk.bf16.mxu1 %vm18885_vm0, %v18884_v1  ;;  %16595 = vmatprep.mubr.msk.bf16.mxu0 %vm18885_vm0, %v18884_v1  ;;  %v5994_v38 = vld [vmem:[#allocation2 + $0x92] sm:$0xff] }
 0x5de   : >> { %16680 = vmatpush3.bf16.msra.mxu0 %v18130_v37  ;;  %16736 = vmatpush3.bf16.msra.mxu1 %v18135_v15  ;;  %v6005_v40 = vpack.c.bf16 %v5994_v38, %v5993_v6  ;;  %v5781_v36 = vld [vmem:[#allocation2 + $0x98] sm:$0xff] }
 0x5df   : >> { %v4849_v47 = vpop.f32.mrb[116].mxu1  ;;  %16681 = vmatprep.subr.bf16.mxu0 %v18884_v1  ;;  %v4626_v12 = vpop.f32.mrb[80].mxu0  ;;  %16737 = vmatprep.subr.bf16.mxu1 %v18884_v1 }
 0x5e0   : >> { %v16341_v17 = vpop.f32.mrb[117].mxu1  ;;  %v4679_v16 = vadd.f32 %v4626_v12, %v21128_v51  ;;  %v16285_v52 = vpop.f32.mrb[81].mxu0 }
 0x5e1   : >> { %v4852_v31 = vpop.f32.mrb[118].mxu1  ;;  %v4629_v33 = vpop.f32.mrb[82].mxu0  ;;  %v5996_v52 = vld [vmem:[#allocation2 + $0xa2] sm:$0xff] }
 0x5e2   : >> { %v16342_v39 = vpop.f32.mrb[119].mxu1  ;;  %16682 = vmatpush3.bf16.msra.mxu0 %v18132_v60  ;;  %v21283_v34 = vadd.f32 %v4841_v19, %v4679_v16  ;;  %v4680_v8 = vadd.f32 %v4629_v33, %v21133_v48  ;;  %v16286_v41 = vpop.f32.mrb[83].mxu0  ;;  %16738 = vmatpush3.bf16.msra.mxu1 %v18137_v42  ;;  %v18136_v48 = vld [vmem:[%s23786_s4 + $0x438] sm:$0xff]   ;;  %v5779_v33 = vld [vmem:[#allocation2 + $0x88] sm:$0xff] }
 0x5e3   : >> { %16683 = vmatprep.subr.bf16.mxu0 %v18884_v1  ;;  %16827 = vmatprep.subr.bf16.mxu1 %v18884_v1  ;;  %v5778_v41 = vld [vmem:[#allocation2 + $0x80] sm:$0xff] }
 0x5e4   : >> { %16652 = vmatmul.mubr.bf16.gmra.mrb[224].mxu1 %v6003_v30  ;;  %v21288_v51 = vadd.f32 %v4844_v44, %v4680_v8  ;;  %16596 = vmatmul.mubr.bf16.gmra.mrb[188].mxu0 %v5787_v61  ;;  %v5790_v59 = vpack.c.bf16 %v5779_v33, %v5778_v41 }
 0x5e5   : >> { %16655 = vmatprep.mubr.msk.bf16.mxu1 %vm18885_vm0, %v18884_v1  ;;  %16599 = vmatprep.mubr.msk.bf16.mxu0 %vm18885_vm0, %v18884_v1 }
 0x5e6   : >> { %16684 = vmatpush3.bf16.msra.mxu0 %v18134_v23  ;;  %v5995_v23 = vld [vmem:[#allocation2 + $0x9a] sm:$0xff] }
 0x5e7   : >> { %v4857_v55 = vpop.f32.mrb[120].mxu1  ;;  %16685 = vmatprep.subr.bf16.mxu0 %v18884_v1  ;;  %v4634_v2 = vpop.f32.mrb[84].mxu0 }
 0x5e8   : >> { %v16345_v50 = vpop.f32.mrb[121].mxu1  ;;  %v4681_v25 = vadd.f32 %v4634_v2, %v21144_v29  ;;  %v16289_v19 = vpop.f32.mrb[85].mxu0 }
 0x5e9   : >> { %v4860_v26 = vpop.f32.mrb[122].mxu1  ;;  %v4637_v13 = vpop.f32.mrb[86].mxu0  ;;  %v5998_v19 = vld [vmem:[#allocation2 + $0xb2] sm:$0xff] }
 0x5ea   : >> { %v16346_v21 = vpop.f32.mrb[123].mxu1  ;;  %16686 = vmatpush3.bf16.msra.mxu0 %v18136_v48  ;;  %v21299_v49 = vadd.f32 %v4849_v47, %v4681_v25  ;;  %v4682_v44 = vadd.f32 %v4637_v13, %v21148_v10  ;;  %v16290_v32 = vpop.f32.mrb[87].mxu0  ;;  %v5776_v47 = vld [vmem:[#allocation2 + $0x70] sm:$0xff]  ;;  %v6006_v48 = vpack.c.bf16 %v5996_v52, %v5995_v23 }
 0x5eb   : >> { %16775 = vmatprep.subr.bf16.mxu0 %v18884_v1  ;;  %v5789_v17 = vpack.c.bf16 %v5777_v46, %v5776_v47  ;;  %v5997_v25 = vld [vmem:[#allocation2 + $0xaa] sm:$0xff] }
 0x5ec   : >> { %16656 = vmatmul.mubr.bf16.gmra.mrb[228].mxu1 %v6004_v54  ;;  %v21303_v18 = vadd.f32 %v4852_v31, %v4682_v44  ;;  %16600 = vmatmul.mubr.bf16.gmra.mrb[192].mxu0 %v5788_v56  ;;  %v5780_v44 = vld [vmem:[#allocation2 + $0x90] sm:$0xff]  ;;  %v6007_v56 = vpack.c.bf16 %v5998_v19, %v5997_v25  ;;  %v18138_v19 = vld [vmem:[%s23786_s4 + $0x480] sm:$0xff]  }
 0x5ed   : >> { %16659 = vmatprep.mubr.msk.bf16.mxu1 %vm18885_vm0, %v18884_v1  ;;  %16603 = vmatprep.mubr.msk.bf16.mxu0 %vm18885_vm0, %v18884_v1  ;;  %v6196_v23 = vld [vmem:[#allocation2 + $0x2b] sm:$0xff] }
 0x5ef   : >> { %v4865_v29 = vpop.f32.mrb[124].mxu1  ;;  %v4642_v37 = vpop.f32.mrb[88].mxu0 }
 0x5f0   : >> { %v16349_v10 = vpop.f32.mrb[125].mxu1  ;;  %v4683_v22 = vadd.f32 %v4642_v37, %v21155_v62  ;;  %v16293_v57 = vpop.f32.mrb[89].mxu0  ;;  %v5791_v37 = vpack.c.bf16 %v5781_v36, %v5780_v44  ;;  %v6416_v44 = vld [vmem:[#allocation2 + $0x54] sm:$0xff] }
 0x5f1   : >> { %v4868_v15 = vpop.f32.mrb[126].mxu1  ;;  %v4645_v60 = vpop.f32.mrb[90].mxu0  ;;  %v6411_v10 = vld [vmem:[#allocation2 + $0x2c] sm:$0xff] }
 0x5f2   : >> { %v16350_v14 = vpop.f32.mrb[127].mxu1  ;;  %v21310_v42 = vadd.f32 %v4857_v55, %v4683_v22  ;;  %v4684_v12 = vadd.f32 %v4645_v60, %v21158_v5  ;;  %v16294_v43 = vpop.f32.mrb[91].mxu0  ;;  %v6412_v22 = vld [vmem:[#allocation2 + $0x34] sm:$0xff] }
 0x5f4   : >> { %16660 = vmatmul.mubr.bf16.gmra.mrb[232].mxu1 %v6005_v40  ;;  %v21313_v16 = vadd.f32 %v4860_v26, %v4684_v12  ;;  %16604 = vmatmul.mubr.bf16.gmra.mrb[196].mxu0 %v5789_v17  ;;  %v5782_v12 = vld [vmem:[#allocation2 + $0xa0] sm:$0xff]  ;;  %v6429_v17 = vpack.c.bf16 %v6412_v22, %v6411_v10 }
 0x5f5   : >> { %16663 = vmatprep.mubr.msk.bf16.mxu1 %vm18885_vm0, %v18884_v1  ;;  %16607 = vmatprep.mubr.msk.bf16.mxu0 %vm18885_vm0, %v18884_v1 }
 0x5f7   : >> { %v4873_v62 = vpop.f32.mrb[128].mxu1  ;;  %v4650_v31 = vpop.f32.mrb[92].mxu0 }
 0x5f8   : >> { %v16353_v35 = vpop.f32.mrb[129].mxu1  ;;  %v4685_v39 = vadd.f32 %v4650_v31, %v21165_v3  ;;  %v16297_v5 = vpop.f32.mrb[93].mxu0 }
 0x5f9   : >> { %v4876_v30 = vpop.f32.mrb[130].mxu1  ;;  %v4653_v8 = vpop.f32.mrb[94].mxu0 }
 0x5fa   : >> { %v16354_v61 = vpop.f32.mrb[131].mxu1  ;;  %v21320_v55 = vadd.f32 %v4865_v29, %v4685_v39  ;;  %v4686_v58 = vadd.f32 %v4653_v8, %v21168_v28  ;;  %v16298_v2 = vpop.f32.mrb[95].mxu0  ;;  %v6197_v8 = vld [vmem:[#allocation2 + $0x33] sm:$0xff] }
 0x5fb   : >> { %v6413_v2 = vld [vmem:[#allocation2 + $0x3c] sm:$0xff] }
 0x5fc   : >> { %16664 = vmatmul.mubr.bf16.gmra.mrb[236].mxu1 %v6006_v48  ;;  %v21323_v50 = vadd.f32 %v4868_v15, %v4686_v58  ;;  %16608 = vmatmul.mubr.bf16.gmra.mrb[200].mxu0 %v5790_v59  ;;  %v5783_v15 = vld [vmem:[#allocation2 + $0xa8] sm:$0xff] }
 0x5fd   : >> { %16667 = vmatprep.mubr.msk.bf16.mxu1 %vm18885_vm0, %v18884_v1  ;;  %16611 = vmatprep.mubr.msk.bf16.mxu0 %vm18885_vm0, %v18884_v1  ;;  %v5792_v35 = vpack.c.bf16 %v5783_v15, %v5782_v12 }
 0x5ff   : >> { %v4881_v3 = vpop.f32.mrb[132].mxu1  ;;  %v4658_v26 = vpop.f32.mrb[96].mxu0 }
 0x600   : >> { %v16357_v13 = vpop.f32.mrb[133].mxu1  ;;  %v4687_v28 = vadd.f32 %v4658_v26, %v21175_v24  ;;  %v16301_v7 = vpop.f32.mrb[97].mxu0 }
 0x601   : >> { %v4884_v21 = vpop.f32.mrb[134].mxu1  ;;  %v4661_v54 = vpop.f32.mrb[98].mxu0 }
 0x602   : >> { %v16358_v32 = vpop.f32.mrb[135].mxu1  ;;  %v21330_v29 = vadd.f32 %v4873_v62, %v4687_v28  ;;  %v4688_v6 = vadd.f32 %v4661_v54, %v21178_v20  ;;  %v16302_v38 = vpop.f32.mrb[99].mxu0  ;;  %v18139_v62 = vld [vmem:[%s23786_s4 + $0x4c0] sm:$0xff]   ;;  %v6214_v28 = vpack.c.bf16 %v6197_v8, %v6196_v23  ;;  %v6415_v54 = vld [vmem:[#allocation2 + $0x4c] sm:$0xff] }
 0x603   : >> { %v18145_v32 = vld [vmem:[%s23786_s4 + $0x4d8] sm:$0xff]  }
 0x604   : >> { %16668 = vmatmul.mubr.bf16.gmra.mrb[240].mxu1 %v6007_v56  ;;  %v21333_v46 = vadd.f32 %v4876_v30, %v4688_v6  ;;  %16612 = vmatmul.mubr.bf16.gmra.mrb[204].mxu0 %v5791_v37  ;;  %v6414_v30 = vld [vmem:[#allocation2 + $0x44] sm:$0xff]  ;;  %v6417_v8 = vld [vmem:[#allocation2 + $0x5c] sm:$0xff] }
 0x605   : >> { %16739 = vmatprep.mubr.msk.bf16.mxu1 %vm18885_vm0, %v18884_v1  ;;  %16615 = vmatprep.mubr.msk.bf16.mxu0 %vm18885_vm0, %v18884_v1  ;;  %v6430_v25 = vpack.c.bf16 %v6414_v30, %v6413_v2  ;;  %v6199_v6 = vld [vmem:[#allocation2 + $0x43] sm:$0xff] }
 0x607   : >> { %v5247_v24 = vpop.f32.mrb[136].mxu1  ;;  %v4666_v57 = vpop.f32.mrb[100].mxu0 }
 0x608   : >> { %v16429_v60 = vpop.f32.mrb[137].mxu1  ;;  %v4689_v20 = vadd.f32 %v4666_v57, %v21188_v4  ;;  %v16305_v47 = vpop.f32.mrb[101].mxu0  ;;  %v18141_v4 = vld [vmem:[%s23786_s4 + $0x4c8] sm:$0xff]   ;;  %v6198_v57 = vld [vmem:[#allocation2 + $0x3b] sm:$0xff] }
 0x609   : >> { %v5250_v14 = vpop.f32.mrb[138].mxu1  ;;  %v4669_v40 = vpop.f32.mrb[102].mxu0  ;;  %v6431_v60 = vpack.c.bf16 %v6416_v44, %v6415_v54  ;;  %v6215_v12 = vpack.c.bf16 %v6199_v6, %v6198_v57 }
 0x60a   : >> { %v16430_v43 = vpop.f32.mrb[139].mxu1  ;;  %v21343_v52 = vadd.f32 %v4881_v3, %v4689_v20  ;;  %v4690_v31 = vadd.f32 %v4669_v40, %v21191_v27  ;;  %v16306_v33 = vpop.f32.mrb[103].mxu0  ;;  %v18142_v20 = vld [vmem:[%s23786_s4 + $0x490] sm:$0xff]  }
 0x60c   : >> { %16740 = vmatmul.mubr.bf16.vlgmr.msra.gmra.mrb[244].mxu1 %v6429_v17  ;;  %v21346_v39 = vadd.f32 %v4884_v21, %v4690_v31  ;;  %16616 = vmatmul.mubr.bf16.gmra.mrb[208].mxu0 %v5792_v35  ;;  %v18149_v31 = vld [vmem:[%s23786_s4 + $0x4e8] sm:$0xff]  }
 0x60d   : >> { %16743 = vmatprep.mubr.msk.bf16.mxu1 %vm18885_vm0, %v18884_v1  ;;  %16687 = vmatprep.mubr.msk.bf16.mxu0 %vm18885_vm0, %v18884_v1  ;;  %v6200_v35 = vld [vmem:[#allocation2 + $0x4b] sm:$0xff] }
 0x60e   : >> { %16828 = vmatpush3.bf16.msra.mxu1 %v18139_v62  ;;  %v6418_v62 = vld [vmem:[#allocation2 + $0x64] sm:$0xff] }
 0x60f   : >> { %v5255_v5 = vpop.f32.mrb[140].mxu1  ;;  %16829 = vmatprep.subr.bf16.mxu1 %v18884_v1  ;;  %v5032_v27 = vpop.f32.mrb[104].mxu0 }
 0x610   : >> { %v16433_v41 = vpop.f32.mrb[141].mxu1  ;;  %v5103_v61 = vadd.f32 %v5032_v27, %v21205_v0  ;;  %v16377_v48 = vpop.f32.mrb[105].mxu0  ;;  %v18143_v0 = vld [vmem:[%s23786_s4 + $0x4d0] sm:$0xff]  }
 0x611   : >> { %v5258_v58 = vpop.f32.mrb[142].mxu1  ;;  %v5035_v59 = vpop.f32.mrb[106].mxu0  ;;  %v6432_v48 = vpack.c.bf16 %v6418_v62, %v6417_v8 }
 0x612   : >> { %v16434_v3 = vpop.f32.mrb[143].mxu1  ;;  %16830 = vmatpush3.bf16.msra.mxu1 %v18141_v4  ;;  %v21360_v26 = vadd.f32 %v5247_v24, %v5103_v61  ;;  %v5104_v36 = vadd.f32 %v5035_v59, %v21212_v11  ;;  %v16378_v13 = vpop.f32.mrb[107].mxu0  ;;  %v18140_v11 = vld [vmem:[%s23786_s4 + $0x488] sm:$0xff]   ;;  %v6201_v4 = vld [vmem:[#allocation2 + $0x53] sm:$0xff] }
 0x613   : >> { %16831 = vmatprep.subr.bf16.mxu1 %v18884_v1  ;;  %v6419_v13 = vld [vmem:[#allocation2 + $0x6c] sm:$0xff] }
 0x614   : >> { %16744 = vmatmul.mubr.bf16.gmra.mrb[248].mxu1 %v6430_v25  ;;  %v21367_v7 = vadd.f32 %v5250_v14, %v5104_v36  ;;  %16688 = vmatmul.mubr.bf16.vlgmr.msra.gmra.mrb[212].mxu0 %v6214_v28  ;;  %v6216_v25 = vpack.c.bf16 %v6201_v4, %v6200_v35  ;;  %v6420_v28 = vld [vmem:[#allocation2 + $0x74] sm:$0xff] }
 0x615   : >> { %16747 = vmatprep.mubr.msk.bf16.mxu1 %vm18885_vm0, %v18884_v1  ;;  %16691 = vmatprep.mubr.msk.bf16.mxu0 %vm18885_vm0, %v18884_v1 }
 0x616   : >> { %16776 = vmatpush3.bf16.msra.mxu0 %v18138_v19  ;;  %16832 = vmatpush3.bf16.msra.mxu1 %v18143_v0  ;;  %v18153_v0 = vld [vmem:[%s23786_s4 + $0x4f8] sm:$0xff]  }
 0x617   : >> { %v5263_v21 = vpop.f32.mrb[144].mxu1  ;;  %16777 = vmatprep.subr.bf16.mxu0 %v18884_v1  ;;  %v5040_v56 = vpop.f32.mrb[108].mxu0  ;;  %16833 = vmatprep.subr.bf16.mxu1 %v18884_v1 }
 0x618   : >> { %v16437_v38 = vpop.f32.mrb[145].mxu1  ;;  %v5105_v37 = vadd.f32 %v5040_v56, %v21231_v45  ;;  %v16381_v24 = vpop.f32.mrb[109].mxu0  ;;  %v18147_v45 = vld [vmem:[%s23786_s4 + $0x4e0] sm:$0xff]  }
 0x619   : >> { %v5266_v10 = vpop.f32.mrb[146].mxu1  ;;  %v5043_v22 = vpop.f32.mrb[110].mxu0  ;;  %v6202_v38 = vld [vmem:[#allocation2 + $0x5b] sm:$0xff]  ;;  %v6433_v24 = vpack.c.bf16 %v6420_v28, %v6419_v13 }
 0x61a   : >> { %v16438_v15 = vpop.f32.mrb[147].mxu1  ;;  %16778 = vmatpush3.bf16.msra.mxu0 %v18140_v11  ;;  %v21385_v47 = vadd.f32 %v5255_v5, %v5105_v37  ;;  %v5106_v14 = vadd.f32 %v5043_v22, %v21239_v63  ;;  %v16382_v40 = vpop.f32.mrb[111].mxu0  ;;  %16834 = vmatpush3.bf16.msra.mxu1 %v18145_v32  ;;  %v18144_v63 = vld [vmem:[%s23786_s4 + $0x498] sm:$0xff]  }
 0x61b   : >> { %16779 = vmatprep.subr.bf16.mxu0 %v18884_v1  ;;  %16835 = vmatprep.subr.bf16.mxu1 %v18884_v1 }
 0x61c   : >> { %16748 = vmatmul.mubr.bf16.gmra.mrb[252].mxu1 %v6431_v60  ;;  %v21393_v43 = vadd.f32 %v5258_v58, %v5106_v14  ;;  %16692 = vmatmul.mubr.bf16.gmra.mrb[216].mxu0 %v6215_v12  ;;  %v18146_v58 = vld [vmem:[%s23786_s4 + $0x4a0] sm:$0xff]   ;;  %v6204_v12 = vld [vmem:[#allocation2 + $0x6b] sm:$0xff] }
 0x61d   : >> { %16751 = vmatprep.mubr.msk.bf16.mxu1 %vm18885_vm0, %v18884_v1  ;;  %16695 = vmatprep.mubr.msk.bf16.mxu0 %vm18885_vm0, %v18884_v1  ;;  %v6422_v14 = vld [vmem:[#allocation2 + $0x84] sm:$0xff] }
 0x61e   : >> { %16780 = vmatpush3.bf16.msra.mxu0 %v18142_v20  ;;  %16836 = vmatpush3.bf16.msra.mxu1 %v18147_v45  ;;  %v6205_v45 = vld [vmem:[#allocation2 + $0x73] sm:$0xff] }
 0x61f   : >> { %v5271_v17 = vpop.f32.mrb[148].mxu1  ;;  %16781 = vmatprep.subr.bf16.mxu0 %v18884_v1  ;;  %v5048_v33 = vpop.f32.mrb[112].mxu0  ;;  %16837 = vmatprep.subr.bf16.mxu1 %v18884_v1  ;;  %v6218_v8 = vpack.c.bf16 %v6205_v45, %v6204_v12 }
 0x620   : >> { %v16441_v5 = vpop.f32.mrb[149].mxu1  ;;  %v5107_v30 = vadd.f32 %v5048_v33, %v21257_v9  ;;  %v16385_v27 = vpop.f32.mrb[113].mxu0  ;;  %v18151_v9 = vld [vmem:[%s23786_s4 + $0x4f0] sm:$0xff]   ;;  %v6421_v33 = vld [vmem:[#allocation2 + $0x7c] sm:$0xff] }
 0x621   : >> { %v5274_v23 = vpop.f32.mrb[150].mxu1  ;;  %v5051_v41 = vpop.f32.mrb[114].mxu0  ;;  %v6434_v5 = vpack.c.bf16 %v6422_v14, %v6421_v33 }
 0x622   : >> { %v16442_v61 = vpop.f32.mrb[151].mxu1  ;;  %16782 = vmatpush3.bf16.msra.mxu0 %v18144_v63  ;;  %v21411_v2 = vadd.f32 %v5263_v21, %v5107_v30  ;;  %v5108_v59 = vadd.f32 %v5051_v41, %v21265_v53  ;;  %v16386_v3 = vpop.f32.mrb[115].mxu0  ;;  %16838 = vmatpush3.bf16.msra.mxu1 %v18149_v31  ;;  %v18148_v53 = vld [vmem:[%s23786_s4 + $0x4a8] sm:$0xff]  }
 0x623   : >> { %16783 = vmatprep.subr.bf16.mxu0 %v18884_v1  ;;  %16839 = vmatprep.subr.bf16.mxu1 %v18884_v1  ;;  %v6203_v21 = vld [vmem:[#allocation2 + $0x63] sm:$0xff]  ;;  %v6423_v61 = vld [vmem:[#allocation2 + $0x8c] sm:$0xff] }
 0x624   : >> { %16752 = vmatmul.mubr.bf16.gmra.mrb[0].mxu1 %v6432_v48  ;;  %v21419_v19 = vadd.f32 %v5266_v10, %v5108_v59  ;;  %16696 = vmatmul.mubr.bf16.gmra.mrb[220].mxu0 %v6216_v25  ;;  %v18150_v10 = vld [vmem:[%s23786_s4 + $0x4b0] sm:$0xff]   ;;  %v6217_v60 = vpack.c.bf16 %v6203_v21, %v6202_v38  ;;  %v6207_v59 = vld [vmem:[#allocation2 + $0x83] sm:$0xff] }
 0x625   : >> { %16755 = vmatprep.mubr.msk.bf16.mxu1 %vm18885_vm0, %v18884_v1  ;;  %16699 = vmatprep.mubr.msk.bf16.mxu0 %vm18885_vm0, %v18884_v1  ;;  %v6424_v48 = vld [vmem:[#allocation2 + $0x94] sm:$0xff] }
 0x626   : >> { %16784 = vmatpush3.bf16.msra.mxu0 %v18146_v58  ;;  %16840 = vmatpush3.bf16.msra.mxu1 %v18151_v9  ;;  %v6435_v28 = vpack.c.bf16 %v6424_v48, %v6423_v61  ;;  %v6209_v38 = vld [vmem:[#allocation2 + $0x93] sm:$0xff] }
 0x627   : >> { %v5279_v36 = vpop.f32.mrb[152].mxu1  ;;  %16785 = vmatprep.subr.bf16.mxu0 %v18884_v1  ;;  %v5056_v11 = vpop.f32.mrb[116].mxu0  ;;  %16841 = vmatprep.subr.bf16.mxu1 %v18884_v1 }
 0x628   : >> { %v16445_v54 = vpop.f32.mrb[153].mxu1  ;;  %v5109_v44 = vadd.f32 %v5056_v11, %v21283_v34  ;;  %v16389_v32 = vpop.f32.mrb[117].mxu0 }
 0x629   : >> { %v5282_v56 = vpop.f32.mrb[154].mxu1  ;;  %v5059_v6 = vpop.f32.mrb[118].mxu0  ;;  %v6426_v32 = vld [vmem:[#allocation2 + $0xa4] sm:$0xff] }
 0x62a   : >> { %v16446_v37 = vpop.f32.mrb[155].mxu1  ;;  %16786 = vmatpush3.bf16.msra.mxu0 %v18148_v53  ;;  %v21437_v22 = vadd.f32 %v5271_v17, %v5109_v44  ;;  %v5110_v57 = vadd.f32 %v5059_v6, %v21288_v51  ;;  %v16390_v15 = vpop.f32.mrb[119].mxu0  ;;  %16842 = vmatpush3.bf16.msra.mxu1 %v18153_v0  ;;  %v18152_v51 = vld [vmem:[%s23786_s4 + $0x4b8] sm:$0xff]   ;;  %v6208_v6 = vld [vmem:[#allocation2 + $0x8b] sm:$0xff] }
 0x62b   : >> { %16787 = vmatprep.subr.bf16.mxu0 %v18884_v1  ;;  %16931 = vmatprep.subr.bf16.mxu1 %v18884_v1  ;;  %v6220_v12 = vpack.c.bf16 %v6209_v38, %v6208_v6 }
 0x62c   : >> { %16756 = vmatmul.mubr.bf16.gmra.mrb[4].mxu1 %v6433_v24  ;;  %v21442_v34 = vadd.f32 %v5274_v23, %v5110_v57  ;;  %16700 = vmatmul.mubr.bf16.gmra.mrb[224].mxu0 %v6217_v60  ;;  %v6425_v57 = vld [vmem:[#allocation2 + $0x9c] sm:$0xff] }
 0x62d   : >> { %16759 = vmatprep.mubr.msk.bf16.mxu1 %vm18885_vm0, %v18884_v1  ;;  %16703 = vmatprep.mubr.msk.bf16.mxu0 %vm18885_vm0, %v18884_v1 }
 0x62e   : >> { %16788 = vmatpush3.bf16.msra.mxu0 %v18150_v10 }
 0x62f   : >> { %v5287_v20 = vpop.f32.mrb[156].mxu1  ;;  %16789 = vmatprep.subr.bf16.mxu0 %v18884_v1  ;;  %v5064_v40 = vpop.f32.mrb[120].mxu0 }
 0x630   : >> { %v16449_v63 = vpop.f32.mrb[157].mxu1  ;;  %v5111_v17 = vadd.f32 %v5064_v40, %v21299_v49  ;;  %v16393_v62 = vpop.f32.mrb[121].mxu0 }
 0x631   : >> { %v5290_v31 = vpop.f32.mrb[158].mxu1  ;;  %v5067_v35 = vpop.f32.mrb[122].mxu0  ;;  %v6427_v63 = vld [vmem:[#allocation2 + $0xac] sm:$0xff] }
 0x632   : >> { %v16450_v4 = vpop.f32.mrb[159].mxu1  ;;  %16790 = vmatpush3.bf16.msra.mxu0 %v18152_v51  ;;  %v21453_v30 = vadd.f32 %v5279_v36, %v5111_v17  ;;  %v5112_v27 = vadd.f32 %v5067_v35, %v21303_v18  ;;  %v16394_v23 = vpop.f32.mrb[123].mxu0  ;;  %v6206_v36 = vld [vmem:[#allocation2 + $0x7b] sm:$0xff]  ;;  %v6436_v51 = vpack.c.bf16 %v6426_v32, %v6425_v57 }
 0x633   : >> { %16879 = vmatprep.subr.bf16.mxu0 %v18884_v1  ;;  %v6219_v54 = vpack.c.bf16 %v6207_v59, %v6206_v36  ;;  %v6428_v17 = vld [vmem:[#allocation2 + $0xb4] sm:$0xff] }
 0x634   : >> { %16760 = vmatmul.mubr.bf16.gmra.mrb[8].mxu1 %v6434_v5  ;;  %v21457_v41 = vadd.f32 %v5282_v56, %v5112_v27  ;;  %16704 = vmatmul.mubr.bf16.gmra.mrb[228].mxu0 %v6218_v8  ;;  %v6210_v27 = vld [vmem:[#allocation2 + $0x9b] sm:$0xff]  ;;  %v6437_v8 = vpack.c.bf16 %v6428_v17, %v6427_v63 }
 0x635   : >> { %16763 = vmatprep.mubr.msk.bf16.mxu1 %vm18885_vm0, %v18884_v1  ;;  %16707 = vmatprep.mubr.msk.bf16.mxu0 %vm18885_vm0, %v18884_v1  ;;  %v6627_v57 = vld [vmem:[#allocation2 + $0x35] sm:$0xff]  ;;  %v18154_v17 = vld [vmem:[%s23786_s4 + $0x500] sm:$0xff]  }
 0x637   : >> { %v5295_v49 = vpop.f32.mrb[160].mxu1  ;;  %v5072_v58 = vpop.f32.mrb[124].mxu0 }
 0x638   : >> { %v16453_v18 = vpop.f32.mrb[161].mxu1  ;;  %v5113_v3 = vadd.f32 %v5072_v58, %v21310_v42  ;;  %v16397_v25 = vpop.f32.mrb[125].mxu0 }
 0x639   : >> { %v5298_v9 = vpop.f32.mrb[162].mxu1  ;;  %v5075_v53 = vpop.f32.mrb[126].mxu0  ;;  %v6841_v18 = vld [vmem:[#allocation2 + $0x2e] sm:$0xff] }
 0x63a   : >> { %v16454_v13 = vpop.f32.mrb[163].mxu1  ;;  %v21464_v0 = vadd.f32 %v5287_v20, %v5113_v3  ;;  %v5114_v11 = vadd.f32 %v5075_v53, %v21313_v16  ;;  %v16398_v21 = vpop.f32.mrb[127].mxu0  ;;  %v6842_v3 = vld [vmem:[#allocation2 + $0x36] sm:$0xff] }
 0x63b   : >> { %v6213_v53 = vld [vmem:[#allocation2 + $0xb3] sm:$0xff] }
 0x63c   : >> { %16764 = vmatmul.mubr.bf16.gmra.mrb[12].mxu1 %v6435_v28  ;;  %v21467_v44 = vadd.f32 %v5290_v31, %v5114_v11  ;;  %16708 = vmatmul.mubr.bf16.gmra.mrb[232].mxu0 %v6219_v54  ;;  %v6211_v31 = vld [vmem:[#allocation2 + $0xa3] sm:$0xff]  ;;  %v6859_v54 = vpack.c.bf16 %v6842_v3, %v6841_v18 }
 0x63d   : >> { %16767 = vmatprep.mubr.msk.bf16.mxu1 %vm18885_vm0, %v18884_v1  ;;  %16711 = vmatprep.mubr.msk.bf16.mxu0 %vm18885_vm0, %v18884_v1  ;;  %v6221_v58 = vpack.c.bf16 %v6211_v31, %v6210_v27  ;;  %v6846_v27 = vld [vmem:[#allocation2 + $0x56] sm:$0xff] }
 0x63f   : >> { %v5303_v42 = vpop.f32.mrb[164].mxu1  ;;  %v5080_v56 = vpop.f32.mrb[128].mxu0 }
 0x640   : >> { %v16457_v37 = vpop.f32.mrb[165].mxu1  ;;  %v5115_v16 = vadd.f32 %v5080_v56, %v21320_v55  ;;  %v16401_v24 = vpop.f32.mrb[129].mxu0 }
 0x641   : >> { %v5306_v10 = vpop.f32.mrb[166].mxu1  ;;  %v5083_v15 = vpop.f32.mrb[130].mxu0  ;;  %v6844_v24 = vld [vmem:[#allocation2 + $0x46] sm:$0xff] }
 0x642   : >> { %v16458_v60 = vpop.f32.mrb[167].mxu1  ;;  %v21474_v20 = vadd.f32 %v5295_v49, %v5115_v16  ;;  %v5116_v14 = vadd.f32 %v5083_v15, %v21323_v50  ;;  %v16402_v40 = vpop.f32.mrb[131].mxu0 }
 0x643   : >> { %v6843_v40 = vld [vmem:[#allocation2 + $0x3e] sm:$0xff] }
 0x644   : >> { %16768 = vmatmul.mubr.bf16.gmra.mrb[16].mxu1 %v6436_v51  ;;  %v21477_v45 = vadd.f32 %v5298_v9, %v5116_v14  ;;  %16712 = vmatmul.mubr.bf16.gmra.mrb[236].mxu0 %v6220_v12  ;;  %v6212_v9 = vld [vmem:[#allocation2 + $0xab] sm:$0xff]  ;;  %v6860_v63 = vpack.c.bf16 %v6844_v24, %v6843_v40 }
 0x645   : >> { %16771 = vmatprep.mubr.msk.bf16.mxu1 %vm18885_vm0, %v18884_v1  ;;  %16715 = vmatprep.mubr.msk.bf16.mxu0 %vm18885_vm0, %v18884_v1  ;;  %v6222_v38 = vpack.c.bf16 %v6213_v53, %v6212_v9 }
 0x647   : >> { %v5311_v55 = vpop.f32.mrb[168].mxu1  ;;  %v5088_v62 = vpop.f32.mrb[132].mxu0 }
 0x648   : >> { %v16461_v33 = vpop.f32.mrb[169].mxu1  ;;  %v5117_v50 = vadd.f32 %v5088_v62, %v21330_v29  ;;  %v16405_v35 = vpop.f32.mrb[133].mxu0 }
 0x649   : >> { %v5314_v4 = vpop.f32.mrb[170].mxu1  ;;  %v5091_v5 = vpop.f32.mrb[134].mxu0 }
 0x64a   : >> { %v16462_v23 = vpop.f32.mrb[171].mxu1  ;;  %v21484_v49 = vadd.f32 %v5303_v42, %v5117_v50  ;;  %v5118_v61 = vadd.f32 %v5091_v5, %v21333_v46  ;;  %v16406_v48 = vpop.f32.mrb[135].mxu0  ;;  %v18155_v42 = vld [vmem:[%s23786_s4 + $0x540] sm:$0xff]   ;;  %v6845_v5 = vld [vmem:[#allocation2 + $0x4e] sm:$0xff] }
 0x64b   : >> { %v18161_v23 = vld [vmem:[%s23786_s4 + $0x558] sm:$0xff]   ;;  %v6861_v53 = vpack.c.bf16 %v6846_v27, %v6845_v5 }
 0x64c   : >> { %16772 = vmatmul.mubr.bf16.gmra.mrb[20].mxu1 %v6437_v8  ;;  %v21487_v59 = vadd.f32 %v5306_v10, %v5118_v61  ;;  %16716 = vmatmul.mubr.bf16.gmra.mrb[240].mxu0 %v6221_v58  ;;  %v6626_v10 = vld [vmem:[#allocation2 + $0x2d] sm:$0xff]  ;;  %v6629_v61 = vld [vmem:[#allocation2 + $0x45] sm:$0xff] }
 0x64d   : >> { %16843 = vmatprep.mubr.msk.bf16.mxu1 %vm18885_vm0, %v18884_v1  ;;  %16719 = vmatprep.mubr.msk.bf16.mxu0 %vm18885_vm0, %v18884_v1  ;;  %v6644_v50 = vpack.c.bf16 %v6627_v57, %v6626_v10  ;;  %v6847_v57 = vld [vmem:[#allocation2 + $0x5e] sm:$0xff] }
 0x64f   : >> { %v5677_v29 = vpop.f32.mrb[172].mxu1  ;;  %v5096_v25 = vpop.f32.mrb[136].mxu0 }
 0x650   : >> { %v16533_v36 = vpop.f32.mrb[173].mxu1  ;;  %v5119_v46 = vadd.f32 %v5096_v25, %v21343_v52  ;;  %v16409_v13 = vpop.f32.mrb[137].mxu0  ;;  %v18157_v52 = vld [vmem:[%s23786_s4 + $0x548] sm:$0xff]   ;;  %v6628_v25 = vld [vmem:[#allocation2 + $0x3d] sm:$0xff] }
 0x651   : >> { %v5680_v28 = vpop.f32.mrb[174].mxu1  ;;  %v5099_v11 = vpop.f32.mrb[138].mxu0  ;;  %v18158_v36 = vld [vmem:[%s23786_s4 + $0x510] sm:$0xff]  }
 0x652   : >> { %v16534_v21 = vpop.f32.mrb[175].mxu1  ;;  %v21497_v32 = vadd.f32 %v5311_v55, %v5119_v46  ;;  %v5120_v56 = vadd.f32 %v5099_v11, %v21346_v39  ;;  %v16410_v6 = vpop.f32.mrb[139].mxu0  ;;  %v6645_v11 = vpack.c.bf16 %v6629_v61, %v6628_v25 }
 0x654   : >> { %16844 = vmatmul.mubr.bf16.vlgmr.msra.gmra.mrb[24].mxu1 %v6859_v54  ;;  %v21500_v37 = vadd.f32 %v5314_v4, %v5120_v56  ;;  %16720 = vmatmul.mubr.bf16.gmra.mrb[244].mxu0 %v6222_v38  ;;  %v18165_v56 = vld [vmem:[%s23786_s4 + $0x568] sm:$0xff]  }
 0x655   : >> { %16847 = vmatprep.mubr.msk.bf16.mxu1 %vm18885_vm0, %v18884_v1  ;;  %16791 = vmatprep.mubr.msk.bf16.mxu0 %vm18885_vm0, %v18884_v1  ;;  %v6630_v38 = vld [vmem:[#allocation2 + $0x4d] sm:$0xff] }
 0x656   : >> { %16932 = vmatpush3.bf16.msra.mxu1 %v18155_v42  ;;  %v6848_v42 = vld [vmem:[#allocation2 + $0x66] sm:$0xff] }
 0x657   : >> { %v5685_v16 = vpop.f32.mrb[176].mxu1  ;;  %16933 = vmatprep.subr.bf16.mxu1 %v18884_v1  ;;  %v5462_v39 = vpop.f32.mrb[140].mxu0 }
 0x658   : >> { %v16537_v15 = vpop.f32.mrb[177].mxu1  ;;  %v5533_v60 = vadd.f32 %v5462_v39, %v21360_v26  ;;  %v16481_v51 = vpop.f32.mrb[141].mxu0  ;;  %v18159_v26 = vld [vmem:[%s23786_s4 + $0x550] sm:$0xff]  }
 0x659   : >> { %v5688_v14 = vpop.f32.mrb[178].mxu1  ;;  %v5465_v12 = vpop.f32.mrb[142].mxu0  ;;  %v6862_v51 = vpack.c.bf16 %v6848_v42, %v6847_v57 }
 0x65a   : >> { %v16538_v55 = vpop.f32.mrb[179].mxu1  ;;  %16934 = vmatpush3.bf16.msra.mxu1 %v18157_v52  ;;  %v21514_v62 = vadd.f32 %v5677_v29, %v5533_v60  ;;  %v5534_v31 = vadd.f32 %v5465_v12, %v21367_v7  ;;  %v16482_v33 = vpop.f32.mrb[143].mxu0  ;;  %v18156_v7 = vld [vmem:[%s23786_s4 + $0x508] sm:$0xff]   ;;  %v6631_v52 = vld [vmem:[#allocation2 + $0x55] sm:$0xff] }
 0x65b   : >> { %16935 = vmatprep.subr.bf16.mxu1 %v18884_v1  ;;  %v6849_v33 = vld [vmem:[#allocation2 + $0x6e] sm:$0xff] }
 0x65c   : >> { %16848 = vmatmul.mubr.bf16.gmra.mrb[28].mxu1 %v6860_v63  ;;  %v21521_v35 = vadd.f32 %v5680_v28, %v5534_v31  ;;  %16792 = vmatmul.mubr.bf16.vlgmr.msra.gmra.mrb[248].mxu0 %v6644_v50  ;;  %v6646_v63 = vpack.c.bf16 %v6631_v52, %v6630_v38  ;;  %v6850_v50 = vld [vmem:[#allocation2 + $0x76] sm:$0xff] }
 0x65d   : >> { %16851 = vmatprep.mubr.msk.bf16.mxu1 %vm18885_vm0, %v18884_v1  ;;  %16795 = vmatprep.mubr.msk.bf16.mxu0 %vm18885_vm0, %v18884_v1 }
 0x65e   : >> { %16880 = vmatpush3.bf16.msra.mxu0 %v18154_v17  ;;  %16936 = vmatpush3.bf16.msra.mxu1 %v18159_v26  ;;  %v18169_v26 = vld [vmem:[%s23786_s4 + $0x578] sm:$0xff]  }
 0x65f   : >> { %v5693_v4 = vpop.f32.mrb[180].mxu1  ;;  %16881 = vmatprep.subr.bf16.mxu0 %v18884_v1  ;;  %v5470_v8 = vpop.f32.mrb[144].mxu0  ;;  %16937 = vmatprep.subr.bf16.mxu1 %v18884_v1 }
 0x660   : >> { %v16541_v48 = vpop.f32.mrb[181].mxu1  ;;  %v5535_v58 = vadd.f32 %v5470_v8, %v21385_v47  ;;  %v16485_v29 = vpop.f32.mrb[145].mxu0  ;;  %v18163_v47 = vld [vmem:[%s23786_s4 + $0x560] sm:$0xff]  }
 0x661   : >> { %v5696_v18 = vpop.f32.mrb[182].mxu1  ;;  %v5473_v3 = vpop.f32.mrb[146].mxu0  ;;  %v6632_v48 = vld [vmem:[#allocation2 + $0x5d] sm:$0xff]  ;;  %v6863_v29 = vpack.c.bf16 %v6850_v50, %v6849_v33 }
 0x662   : >> { %v16542_v9 = vpop.f32.mrb[183].mxu1  ;;  %16882 = vmatpush3.bf16.msra.mxu0 %v18156_v7  ;;  %v21539_v46 = vadd.f32 %v5685_v16, %v5535_v58  ;;  %v5536_v13 = vadd.f32 %v5473_v3, %v21393_v43  ;;  %v16486_v28 = vpop.f32.mrb[147].mxu0  ;;  %16938 = vmatpush3.bf16.msra.mxu1 %v18161_v23  ;;  %v18160_v43 = vld [vmem:[%s23786_s4 + $0x518] sm:$0xff]  }
 0x663   : >> { %16883 = vmatprep.subr.bf16.mxu0 %v18884_v1  ;;  %16939 = vmatprep.subr.bf16.mxu1 %v18884_v1 }
 0x664   : >> { %16852 = vmatmul.mubr.bf16.gmra.mrb[32].mxu1 %v6861_v53  ;;  %v21547_v21 = vadd.f32 %v5688_v14, %v5536_v13  ;;  %16796 = vmatmul.mubr.bf16.gmra.mrb[252].mxu0 %v6645_v11  ;;  %v18162_v14 = vld [vmem:[%s23786_s4 + $0x520] sm:$0xff]   ;;  %v6634_v11 = vld [vmem:[#allocation2 + $0x6d] sm:$0xff] }
 0x665   : >> { %16855 = vmatprep.mubr.msk.bf16.mxu1 %vm18885_vm0, %v18884_v1  ;;  %16799 = vmatprep.mubr.msk.bf16.mxu0 %vm18885_vm0, %v18884_v1  ;;  %v6852_v13 = vld [vmem:[#allocation2 + $0x86] sm:$0xff] }
 0x666   : >> { %16884 = vmatpush3.bf16.msra.mxu0 %v18158_v36  ;;  %16940 = vmatpush3.bf16.msra.mxu1 %v18163_v47  ;;  %v6635_v47 = vld [vmem:[#allocation2 + $0x75] sm:$0xff] }
 0x667   : >> { %v5701_v54 = vpop.f32.mrb[184].mxu1  ;;  %16885 = vmatprep.subr.bf16.mxu0 %v18884_v1  ;;  %v5478_v6 = vpop.f32.mrb[148].mxu0  ;;  %16941 = vmatprep.subr.bf16.mxu1 %v18884_v1  ;;  %v6648_v57 = vpack.c.bf16 %v6635_v47, %v6634_v11 }
 0x668   : >> { %v16545_v16 = vpop.f32.mrb[185].mxu1  ;;  %v5537_v24 = vadd.f32 %v5478_v6, %v21411_v2  ;;  %v16489_v39 = vpop.f32.mrb[149].mxu0  ;;  %v18167_v2 = vld [vmem:[%s23786_s4 + $0x570] sm:$0xff]   ;;  %v6851_v6 = vld [vmem:[#allocation2 + $0x7e] sm:$0xff] }
 0x669   : >> { %v5704_v10 = vpop.f32.mrb[186].mxu1  ;;  %v5481_v15 = vpop.f32.mrb[150].mxu0  ;;  %v6864_v16 = vpack.c.bf16 %v6852_v13, %v6851_v6 }
 0x66a   : >> { %v16546_v60 = vpop.f32.mrb[187].mxu1  ;;  %16886 = vmatpush3.bf16.msra.mxu0 %v18160_v43  ;;  %v21565_v40 = vadd.f32 %v5693_v4, %v5537_v24  ;;  %v5538_v12 = vadd.f32 %v5481_v15, %v21419_v19  ;;  %v16490_v55 = vpop.f32.mrb[151].mxu0  ;;  %16942 = vmatpush3.bf16.msra.mxu1 %v18165_v56  ;;  %v18164_v19 = vld [vmem:[%s23786_s4 + $0x528] sm:$0xff]  }
 0x66b   : >> { %16887 = vmatprep.subr.bf16.mxu0 %v18884_v1  ;;  %16943 = vmatprep.subr.bf16.mxu1 %v18884_v1  ;;  %v6633_v4 = vld [vmem:[#allocation2 + $0x65] sm:$0xff]  ;;  %v6853_v60 = vld [vmem:[#allocation2 + $0x8e] sm:$0xff] }
 0x66c   : >> { %16856 = vmatmul.mubr.bf16.gmra.mrb[36].mxu1 %v6862_v51  ;;  %v21573_v17 = vadd.f32 %v5696_v18, %v5538_v12  ;;  %16800 = vmatmul.mubr.bf16.gmra.mrb[0].mxu0 %v6646_v63  ;;  %v18166_v18 = vld [vmem:[%s23786_s4 + $0x530] sm:$0xff]   ;;  %v6647_v53 = vpack.c.bf16 %v6633_v4, %v6632_v48  ;;  %v6637_v12 = vld [vmem:[#allocation2 + $0x85] sm:$0xff] }
 0x66d   : >> { %16859 = vmatprep.mubr.msk.bf16.mxu1 %vm18885_vm0, %v18884_v1  ;;  %16803 = vmatprep.mubr.msk.bf16.mxu0 %vm18885_vm0, %v18884_v1  ;;  %v6854_v51 = vld [vmem:[#allocation2 + $0x96] sm:$0xff] }
 0x66e   : >> { %16888 = vmatpush3.bf16.msra.mxu0 %v18162_v14  ;;  %16944 = vmatpush3.bf16.msra.mxu1 %v18167_v2  ;;  %v6865_v50 = vpack.c.bf16 %v6854_v51, %v6853_v60  ;;  %v6639_v48 = vld [vmem:[#allocation2 + $0x95] sm:$0xff] }
 0x66f   : >> { %v5709_v31 = vpop.f32.mrb[188].mxu1  ;;  %16889 = vmatprep.subr.bf16.mxu0 %v18884_v1  ;;  %v5486_v7 = vpop.f32.mrb[152].mxu0  ;;  %16945 = vmatprep.subr.bf16.mxu1 %v18884_v1 }
 0x670   : >> { %v16549_v5 = vpop.f32.mrb[189].mxu1  ;;  %v5539_v27 = vadd.f32 %v5486_v7, %v21437_v22  ;;  %v16493_v23 = vpop.f32.mrb[153].mxu0 }
 0x671   : >> { %v5712_v8 = vpop.f32.mrb[190].mxu1  ;;  %v5489_v61 = vpop.f32.mrb[154].mxu0  ;;  %v6856_v23 = vld [vmem:[#allocation2 + $0xa6] sm:$0xff] }
 0x672   : >> { %v16550_v58 = vpop.f32.mrb[191].mxu1  ;;  %16890 = vmatpush3.bf16.msra.mxu0 %v18164_v19  ;;  %v21591_v3 = vadd.f32 %v5701_v54, %v5539_v27  ;;  %v5540_v25 = vadd.f32 %v5489_v61, %v21442_v34  ;;  %v16494_v9 = vpop.f32.mrb[155].mxu0  ;;  %16946 = vmatpush3.bf16.msra.mxu1 %v18169_v26  ;;  %v18168_v34 = vld [vmem:[%s23786_s4 + $0x538] sm:$0xff]   ;;  %v6638_v61 = vld [vmem:[#allocation2 + $0x8d] sm:$0xff] }
 0x673   : >> { %16891 = vmatprep.subr.bf16.mxu0 %v18884_v1  ;;  %17035 = vmatprep.subr.bf16.mxu1 %v18884_v1  ;;  %v6650_v11 = vpack.c.bf16 %v6639_v48, %v6638_v61 }
 0x674   : >> { %16860 = vmatmul.mubr.bf16.gmra.mrb[40].mxu1 %v6863_v29  ;;  %v21596_v22 = vadd.f32 %v5704_v10, %v5540_v25  ;;  %16804 = vmatmul.mubr.bf16.gmra.mrb[4].mxu0 %v6647_v53  ;;  %v6855_v25 = vld [vmem:[#allocation2 + $0x9e] sm:$0xff] }
 0x675   : >> { %16863 = vmatprep.mubr.msk.bf16.mxu1 %vm18885_vm0, %v18884_v1  ;;  %16807 = vmatprep.mubr.msk.bf16.mxu0 %vm18885_vm0, %v18884_v1 }
 0x676   : >> { %16892 = vmatpush3.bf16.msra.mxu0 %v18166_v18 }
 0x677   : >> { %v5717_v36 = vpop.f32.mrb[192].mxu1  ;;  %16893 = vmatprep.subr.bf16.mxu0 %v18884_v1  ;;  %v5494_v28 = vpop.f32.mrb[156].mxu0 }
 0x678   : >> { %v16553_v43 = vpop.f32.mrb[193].mxu1  ;;  %v5541_v54 = vadd.f32 %v5494_v28, %v21453_v30  ;;  %v16497_v42 = vpop.f32.mrb[157].mxu0 }
 0x679   : >> { %v5720_v56 = vpop.f32.mrb[194].mxu1  ;;  %v5497_v38 = vpop.f32.mrb[158].mxu0  ;;  %v6857_v43 = vld [vmem:[#allocation2 + $0xae] sm:$0xff] }
 0x67a   : >> { %v16554_v52 = vpop.f32.mrb[195].mxu1  ;;  %16894 = vmatpush3.bf16.msra.mxu0 %v18168_v34  ;;  %v21607_v24 = vadd.f32 %v5709_v31, %v5541_v54  ;;  %v5542_v39 = vadd.f32 %v5497_v38, %v21457_v41  ;;  %v16498_v10 = vpop.f32.mrb[159].mxu0  ;;  %v6636_v31 = vld [vmem:[#allocation2 + $0x7d] sm:$0xff]  ;;  %v6866_v34 = vpack.c.bf16 %v6856_v23, %v6855_v25 }
 0x67b   : >> { %16983 = vmatprep.subr.bf16.mxu0 %v18884_v1  ;;  %v6649_v5 = vpack.c.bf16 %v6637_v12, %v6636_v31  ;;  %v6858_v54 = vld [vmem:[#allocation2 + $0xb6] sm:$0xff]  ;;  %v7057_v25 = vld [vmem:[#allocation2 + $0x40] sm:$0xff] }
 0x67c   : >> { %16864 = vmatmul.mubr.bf16.gmra.mrb[44].mxu1 %v6864_v16  ;;  %v21611_v15 = vadd.f32 %v5712_v8, %v5542_v39  ;;  %16808 = vmatmul.mubr.bf16.gmra.mrb[8].mxu0 %v6648_v57  ;;  %v6640_v39 = vld [vmem:[#allocation2 + $0x9d] sm:$0xff]  ;;  %v6867_v57 = vpack.c.bf16 %v6858_v54, %v6857_v43 }
 0x67d   : >> { %16867 = vmatprep.mubr.msk.bf16.mxu1 %vm18885_vm0, %v18884_v1  ;;  %16811 = vmatprep.mubr.msk.bf16.mxu0 %vm18885_vm0, %v18884_v1  ;;  %v18170_v54 = vld [vmem:[%s23786_s4 + $0x580] sm:$0xff]  }
 0x67f   : >> { %v5725_v30 = vpop.f32.mrb[196].mxu1  ;;  %v5502_v14 = vpop.f32.mrb[160].mxu0 }
 0x680   : >> { %v16557_v41 = vpop.f32.mrb[197].mxu1  ;;  %v5543_v55 = vadd.f32 %v5502_v14, %v21464_v0  ;;  %v16501_v63 = vpop.f32.mrb[161].mxu0 }
 0x681   : >> { %v5728_v2 = vpop.f32.mrb[198].mxu1  ;;  %v5505_v19 = vpop.f32.mrb[162].mxu0  ;;  %v7272_v41 = vld [vmem:[#allocation2 + $0x41] sm:$0xff]  ;;  %v6642_v63 = vld [vmem:[#allocation2 + $0xad] sm:$0xff] }
 0x682   : >> { %v16558_v33 = vpop.f32.mrb[199].mxu1  ;;  %v21618_v26 = vadd.f32 %v5717_v36, %v5543_v55  ;;  %v5544_v7 = vadd.f32 %v5505_v19, %v21467_v44  ;;  %v16502_v4 = vpop.f32.mrb[163].mxu0 }
 0x684   : >> { %16868 = vmatmul.mubr.bf16.gmra.mrb[48].mxu1 %v6865_v50  ;;  %v21621_v27 = vadd.f32 %v5720_v56, %v5544_v7  ;;  %16812 = vmatmul.mubr.bf16.gmra.mrb[12].mxu0 %v6649_v5  ;;  %v6641_v56 = vld [vmem:[#allocation2 + $0xa5] sm:$0xff]  ;;  %v7271_v50 = vld [vmem:[#allocation2 + $0x39] sm:$0xff] }
 0x685   : >> { %16871 = vmatprep.mubr.msk.bf16.mxu1 %vm18885_vm0, %v18884_v1  ;;  %16815 = vmatprep.mubr.msk.bf16.mxu0 %vm18885_vm0, %v18884_v1  ;;  %v6651_v14 = vpack.c.bf16 %v6641_v56, %v6640_v39  ;;  %v7289_v5 = vpack.c.bf16 %v7272_v41, %v7271_v50  ;;  %v18177_v39 = vld [vmem:[%s23786_s4 + $0x5d8] sm:$0xff]  }
 0x686   : >> { %v7275_v41 = vld [vmem:[#allocation2 + $0x59] sm:$0xff] }
 0x687   : >> { %v5733_v0 = vpop.f32.mrb[200].mxu1  ;;  %v5510_v8 = vpop.f32.mrb[164].mxu0 }
 0x688   : >> { %v16561_v58 = vpop.f32.mrb[201].mxu1  ;;  %v5545_v44 = vadd.f32 %v5510_v8, %v21474_v20  ;;  %v16505_v29 = vpop.f32.mrb[165].mxu0 }
 0x689   : >> { %v5736_v18 = vpop.f32.mrb[202].mxu1  ;;  %v5513_v9 = vpop.f32.mrb[166].mxu0  ;;  %v7273_v29 = vld [vmem:[#allocation2 + $0x49] sm:$0xff] }
 0x68a   : >> { %v16562_v53 = vpop.f32.mrb[203].mxu1  ;;  %v21628_v36 = vadd.f32 %v5725_v30, %v5545_v44  ;;  %v5546_v13 = vadd.f32 %v5513_v9, %v21477_v45  ;;  %v16506_v28 = vpop.f32.mrb[167].mxu0 }
 0x68c   : >> { %16872 = vmatmul.mubr.bf16.gmra.mrb[52].mxu1 %v6866_v34  ;;  %v21631_v47 = vadd.f32 %v5728_v2, %v5546_v13  ;;  %16816 = vmatmul.mubr.bf16.gmra.mrb[16].mxu0 %v6650_v11  ;;  %v6643_v2 = vld [vmem:[#allocation2 + $0xb5] sm:$0xff] }
 0x68d   : >> { %16875 = vmatprep.mubr.msk.bf16.mxu1 %vm18885_vm0, %v18884_v1  ;;  %16819 = vmatprep.mubr.msk.bf16.mxu0 %vm18885_vm0, %v18884_v1  ;;  %v6652_v48 = vpack.c.bf16 %v6643_v2, %v6642_v63  ;;  %v7056_v11 = vld [vmem:[#allocation2 + $0x38] sm:$0xff]  ;;  %v7059_v63 = vld [vmem:[#allocation2 + $0x50] sm:$0xff] }
 0x68f   : >> { %v5741_v20 = vpop.f32.mrb[204].mxu1  ;;  %v5518_v42 = vpop.f32.mrb[168].mxu0 }
 0x690   : >> { %v16565_v6 = vpop.f32.mrb[205].mxu1  ;;  %v5547_v45 = vadd.f32 %v5518_v42, %v21484_v49  ;;  %v16509_v38 = vpop.f32.mrb[169].mxu0 }
 0x691   : >> { %v5744_v52 = vpop.f32.mrb[206].mxu1  ;;  %v5521_v16 = vpop.f32.mrb[170].mxu0 }
 0x692   : >> { %v16566_v10 = vpop.f32.mrb[207].mxu1  ;;  %v21638_v30 = vadd.f32 %v5733_v0, %v5547_v45  ;;  %v5548_v60 = vadd.f32 %v5521_v16, %v21487_v59  ;;  %v16510_v51 = vpop.f32.mrb[171].mxu0  ;;  %v18171_v0 = vld [vmem:[%s23786_s4 + $0x5c0] sm:$0xff]   ;;  %v7074_v45 = vpack.c.bf16 %v7057_v25, %v7056_v11 }
 0x693   : >> { %v7276_v16 = vld [vmem:[#allocation2 + $0x61] sm:$0xff] }
 0x694   : >> { %16876 = vmatmul.mubr.bf16.gmra.mrb[56].mxu1 %v6867_v57  ;;  %v21641_v12 = vadd.f32 %v5736_v18, %v5548_v60  ;;  %16820 = vmatmul.mubr.bf16.gmra.mrb[20].mxu0 %v6651_v14  ;;  %v7058_v57 = vld [vmem:[#allocation2 + $0x48] sm:$0xff] }
 0x695   : >> { %16947 = vmatprep.mubr.msk.bf16.mxu1 %vm18885_vm0, %v18884_v1  ;;  %16823 = vmatprep.mubr.msk.bf16.mxu0 %vm18885_vm0, %v18884_v1 }
 0x697   : >> { %v6107_v49 = vpop.f32.mrb[208].mxu1  ;;  %v5526_v55 = vpop.f32.mrb[172].mxu0 }
 0x698   : >> { %v16637_v19 = vpop.f32.mrb[209].mxu1  ;;  %v5549_v59 = vadd.f32 %v5526_v55, %v21497_v32  ;;  %v16513_v31 = vpop.f32.mrb[173].mxu0  ;;  %v18173_v32 = vld [vmem:[%s23786_s4 + $0x5c8] sm:$0xff]  }
 0x699   : >> { %v6110_v33 = vpop.f32.mrb[210].mxu1  ;;  %v5529_v7 = vpop.f32.mrb[174].mxu0  ;;  %v7291_v19 = vpack.c.bf16 %v7276_v16, %v7275_v41  ;;  %v18182_v41 = vld [vmem:[%s23786_s4 + $0x5b0] sm:$0xff]  }
 0x69a   : >> { %v16638_v4 = vpop.f32.mrb[211].mxu1  ;;  %v21651_v23 = vadd.f32 %v5741_v20, %v5549_v59  ;;  %v5550_v8 = vadd.f32 %v5529_v7, %v21500_v37  ;;  %v16514_v61 = vpop.f32.mrb[175].mxu0  ;;  %v7274_v37 = vld [vmem:[#allocation2 + $0x51] sm:$0xff]  ;;  %v7075_v7 = vpack.c.bf16 %v7059_v63, %v7058_v57  ;;  %v7279_v57 = vld [vmem:[#allocation2 + $0x79] sm:$0xff] }
 0x69b   : >> { %v7290_v43 = vpack.c.bf16 %v7274_v37, %v7273_v29  ;;  %v18174_v59 = vld [vmem:[%s23786_s4 + $0x590] sm:$0xff]   ;;  %v18181_v61 = vld [vmem:[%s23786_s4 + $0x5e8] sm:$0xff]  }
 0x69c   : >> { %16948 = vmatmul.mubr.bf16.vlgmr.msra.gmra.mrb[60].mxu1 %v7289_v5  ;;  %v21654_v58 = vadd.f32 %v5744_v52, %v5550_v8  ;;  %16824 = vmatmul.mubr.bf16.gmra.mrb[24].mxu0 %v6652_v48  ;;  %v7278_v8 = vld [vmem:[#allocation2 + $0x71] sm:$0xff] }
 0x69d   : >> { %16951 = vmatprep.mubr.msk.bf16.mxu1 %vm18885_vm0, %v18884_v1  ;;  %16895 = vmatprep.mubr.msk.bf16.mxu0 %vm18885_vm0, %v18884_v1 }
 0x69e   : >> { %17036 = vmatpush3.bf16.msra.mxu1 %v18171_v0  ;;  %v7277_v0 = vld [vmem:[#allocation2 + $0x69] sm:$0xff] }
 0x69f   : >> { %v6115_v44 = vpop.f32.mrb[212].mxu1  ;;  %17037 = vmatprep.subr.bf16.mxu1 %v18884_v1  ;;  %v5892_v18 = vpop.f32.mrb[176].mxu0 }
 0x6a0   : >> { %v16641_v9 = vpop.f32.mrb[213].mxu1  ;;  %v5963_v53 = vadd.f32 %v5892_v18, %v21514_v62  ;;  %v16585_v34 = vpop.f32.mrb[177].mxu0  ;;  %v18175_v62 = vld [vmem:[%s23786_s4 + $0x5d0] sm:$0xff]  }
 0x6a1   : >> { %v6118_v13 = vpop.f32.mrb[214].mxu1  ;;  %v5895_v28 = vpop.f32.mrb[178].mxu0  ;;  %v7060_v9 = vld [vmem:[#allocation2 + $0x58] sm:$0xff]  ;;  %v7292_v34 = vpack.c.bf16 %v7278_v8, %v7277_v0 }
 0x6a2   : >> { %v16642_v20 = vpop.f32.mrb[215].mxu1  ;;  %17038 = vmatpush3.bf16.msra.mxu1 %v18173_v32  ;;  %v21668_v42 = vadd.f32 %v6107_v49, %v5963_v53  ;;  %v5964_v56 = vadd.f32 %v5895_v28, %v21521_v35  ;;  %v16586_v6 = vpop.f32.mrb[179].mxu0  ;;  %v18172_v35 = vld [vmem:[%s23786_s4 + $0x588] sm:$0xff]   ;;  %v7061_v32 = vld [vmem:[#allocation2 + $0x60] sm:$0xff] }
 0x6a3   : >> { %17039 = vmatprep.subr.bf16.mxu1 %v18884_v1  ;;  %v7280_v6 = vld [vmem:[#allocation2 + $0x81] sm:$0xff] }
 0x6a4   : >> { %16952 = vmatmul.mubr.bf16.gmra.mrb[64].mxu1 %v7290_v43  ;;  %v21675_v38 = vadd.f32 %v6110_v33, %v5964_v56  ;;  %16896 = vmatmul.mubr.bf16.vlgmr.msra.gmra.mrb[28].mxu0 %v7074_v45  ;;  %v7076_v43 = vpack.c.bf16 %v7061_v32, %v7060_v9  ;;  %v18185_v45 = vld [vmem:[%s23786_s4 + $0x5f8] sm:$0xff]  }
 0x6a5   : >> { %16955 = vmatprep.mubr.msk.bf16.mxu1 %vm18885_vm0, %v18884_v1  ;;  %16899 = vmatprep.mubr.msk.bf16.mxu0 %vm18885_vm0, %v18884_v1 }
 0x6a6   : >> { %16984 = vmatpush3.bf16.msra.mxu0 %v18170_v54  ;;  %17040 = vmatpush3.bf16.msra.mxu1 %v18175_v62 }
 0x6a7   : >> { %v6123_v52 = vpop.f32.mrb[216].mxu1  ;;  %16985 = vmatprep.subr.bf16.mxu0 %v18884_v1  ;;  %v5900_v10 = vpop.f32.mrb[180].mxu0  ;;  %17041 = vmatprep.subr.bf16.mxu1 %v18884_v1 }
 0x6a8   : >> { %v16645_v60 = vpop.f32.mrb[217].mxu1  ;;  %v5965_v51 = vadd.f32 %v5900_v10, %v21539_v46  ;;  %v16589_v14 = vpop.f32.mrb[181].mxu0  ;;  %v18179_v46 = vld [vmem:[%s23786_s4 + $0x5e0] sm:$0xff]  }
 0x6a9   : >> { %v6126_v49 = vpop.f32.mrb[218].mxu1  ;;  %v5903_v55 = vpop.f32.mrb[182].mxu0 }
 0x6aa   : >> { %v16646_v2 = vpop.f32.mrb[219].mxu1  ;;  %16986 = vmatpush3.bf16.msra.mxu0 %v18172_v35  ;;  %v21693_v31 = vadd.f32 %v6115_v44, %v5965_v51  ;;  %v5966_v33 = vadd.f32 %v5903_v55, %v21547_v21  ;;  %v16590_v50 = vpop.f32.mrb[183].mxu0  ;;  %17042 = vmatpush3.bf16.msra.mxu1 %v18177_v39  ;;  %v18176_v21 = vld [vmem:[%s23786_s4 + $0x598] sm:$0xff]   ;;  %v7062_v35 = vld [vmem:[#allocation2 + $0x68] sm:$0xff]  ;;  %v7063_v51 = vld [vmem:[#allocation2 + $0x70] sm:$0xff] }
 0x6ab   : >> { %16987 = vmatprep.subr.bf16.mxu0 %v18884_v1  ;;  %17043 = vmatprep.subr.bf16.mxu1 %v18884_v1  ;;  %v7282_v50 = vld [vmem:[#allocation2 + $0x91] sm:$0xff] }
 0x6ac   : >> { %16956 = vmatmul.mubr.bf16.gmra.mrb[68].mxu1 %v7291_v19  ;;  %v21701_v4 = vadd.f32 %v6118_v13, %v5966_v33  ;;  %16900 = vmatmul.mubr.bf16.gmra.mrb[32].mxu0 %v7075_v7  ;;  %v18178_v13 = vld [vmem:[%s23786_s4 + $0x5a0] sm:$0xff]   ;;  %v7077_v19 = vpack.c.bf16 %v7063_v51, %v7062_v35  ;;  %v7281_v33 = vld [vmem:[#allocation2 + $0x89] sm:$0xff] }
 0x6ad   : >> { %16959 = vmatprep.mubr.msk.bf16.mxu1 %vm18885_vm0, %v18884_v1  ;;  %16903 = vmatprep.mubr.msk.bf16.mxu0 %vm18885_vm0, %v18884_v1  ;;  %v7069_v51 = vld [vmem:[#allocation2 + $0xa0] sm:$0xff] }
 0x6ae   : >> { %16988 = vmatpush3.bf16.msra.mxu0 %v18174_v59  ;;  %17044 = vmatpush3.bf16.msra.mxu1 %v18179_v46  ;;  %v7065_v46 = vld [vmem:[#allocation2 + $0x80] sm:$0xff] }
 0x6af   : >> { %v6131_v5 = vpop.f32.mrb[220].mxu1  ;;  %16989 = vmatprep.subr.bf16.mxu0 %v18884_v1  ;;  %v5908_v48 = vpop.f32.mrb[184].mxu0  ;;  %17045 = vmatprep.subr.bf16.mxu1 %v18884_v1 }
 0x6b0   : >> { %v16649_v44 = vpop.f32.mrb[221].mxu1  ;;  %v5967_v29 = vadd.f32 %v5908_v48, %v21565_v40  ;;  %v16593_v37 = vpop.f32.mrb[185].mxu0  ;;  %v18183_v40 = vld [vmem:[%s23786_s4 + $0x5f0] sm:$0xff]   ;;  %v7064_v48 = vld [vmem:[#allocation2 + $0x78] sm:$0xff] }
 0x6b1   : >> { %v6134_v18 = vpop.f32.mrb[222].mxu1  ;;  %v5911_v25 = vpop.f32.mrb[186].mxu0  ;;  %v7294_v44 = vpack.c.bf16 %v7282_v50, %v7281_v33 }
 0x6b2   : >> { %v16650_v53 = vpop.f32.mrb[223].mxu1  ;;  %16990 = vmatpush3.bf16.msra.mxu0 %v18176_v21  ;;  %v21719_v28 = vadd.f32 %v6123_v52, %v5967_v29  ;;  %v5968_v11 = vadd.f32 %v5911_v25, %v21573_v17  ;;  %v16594_v20 = vpop.f32.mrb[187].mxu0  ;;  %17046 = vmatpush3.bf16.msra.mxu1 %v18181_v61  ;;  %v18180_v17 = vld [vmem:[%s23786_s4 + $0x5a8] sm:$0xff]   ;;  %v7078_v25 = vpack.c.bf16 %v7065_v46, %v7064_v48 }
 0x6b3   : >> { %16991 = vmatprep.subr.bf16.mxu0 %v18884_v1  ;;  %17047 = vmatprep.subr.bf16.mxu1 %v18884_v1  ;;  %v7284_v53 = vld [vmem:[#allocation2 + $0xa1] sm:$0xff] }
 0x6b4   : >> { %16960 = vmatmul.mubr.bf16.gmra.mrb[72].mxu1 %v7292_v34  ;;  %v21727_v54 = vadd.f32 %v6126_v49, %v5968_v11  ;;  %16904 = vmatmul.mubr.bf16.gmra.mrb[36].mxu0 %v7076_v43  ;;  %v7293_v49 = vpack.c.bf16 %v7280_v6, %v7279_v57  ;;  %v7286_v57 = vld [vmem:[#allocation2 + $0xb1] sm:$0xff] }
 0x6b5   : >> { %16963 = vmatprep.mubr.msk.bf16.mxu1 %vm18885_vm0, %v18884_v1  ;;  %16907 = vmatprep.mubr.msk.bf16.mxu0 %vm18885_vm0, %v18884_v1 }
 0x6b6   : >> { %16992 = vmatpush3.bf16.msra.mxu0 %v18178_v13  ;;  %17048 = vmatpush3.bf16.msra.mxu1 %v18183_v40  ;;  %v7066_v13 = vld [vmem:[#allocation2 + $0x88] sm:$0xff]  ;;  %v7283_v40 = vld [vmem:[#allocation2 + $0x99] sm:$0xff] }
 0x6b7   : >> { %v6139_v56 = vpop.f32.mrb[224].mxu1  ;;  %16993 = vmatprep.subr.bf16.mxu0 %v18884_v1  ;;  %v5916_v62 = vpop.f32.mrb[188].mxu0  ;;  %17049 = vmatprep.subr.bf16.mxu1 %v18884_v1 }
 0x6b8   : >> { %v16653_v52 = vpop.f32.mrb[225].mxu1  ;;  %v5969_v16 = vadd.f32 %v5916_v62, %v21591_v3  ;;  %v16597_v39 = vpop.f32.mrb[189].mxu0 }
 0x6b9   : >> { %v6142_v10 = vpop.f32.mrb[226].mxu1  ;;  %v5919_v60 = vpop.f32.mrb[190].mxu0 }
 0x6ba   : >> { %v16654_v14 = vpop.f32.mrb[227].mxu1  ;;  %16994 = vmatpush3.bf16.msra.mxu0 %v18180_v17  ;;  %v21745_v55 = vadd.f32 %v6131_v5, %v5969_v16  ;;  %v5970_v63 = vadd.f32 %v5919_v60, %v21596_v22  ;;  %v16598_v2 = vpop.f32.mrb[191].mxu0  ;;  %17050 = vmatpush3.bf16.msra.mxu1 %v18185_v45  ;;  %v18184_v22 = vld [vmem:[%s23786_s4 + $0x5b8] sm:$0xff]   ;;  %v7295_v45 = vpack.c.bf16 %v7284_v53, %v7283_v40 }
 0x6bb   : >> { %16995 = vmatprep.subr.bf16.mxu0 %v18884_v1  ;;  %v7068_v2 = vld [vmem:[#allocation2 + $0x98] sm:$0xff] }
 0x6bc   : >> { %16964 = vmatmul.mubr.bf16.gmra.mrb[76].mxu1 %v7293_v49  ;;  %v21749_v3 = vadd.f32 %v6134_v18, %v5970_v63  ;;  %16908 = vmatmul.mubr.bf16.gmra.mrb[40].mxu0 %v7077_v19 }
 0x6bd   : >> { %16967 = vmatprep.mubr.msk.bf16.mxu1 %vm18885_vm0, %v18884_v1  ;;  %16911 = vmatprep.mubr.msk.bf16.mxu0 %vm18885_vm0, %v18884_v1 }
 0x6be   : >> { %16996 = vmatpush3.bf16.msra.mxu0 %v18182_v41 }
 0x6bf   : >> { %v6147_v59 = vpop.f32.mrb[228].mxu1  ;;  %16997 = vmatprep.subr.bf16.mxu0 %v18884_v1  ;;  %v5924_v7 = vpop.f32.mrb[192].mxu0 }
 0x6c0   : >> { %v16657_v21 = vpop.f32.mrb[229].mxu1  ;;  %v5971_v5 = vadd.f32 %v5924_v7, %v21607_v24  ;;  %v16601_v0 = vpop.f32.mrb[193].mxu0  ;;  %v7080_v7 = vpack.c.bf16 %v7069_v51, %v7068_v2 }
 0x6c1   : >> { %v6150_v8 = vpop.f32.mrb[230].mxu1  ;;  %v5927_v61 = vpop.f32.mrb[194].mxu0  ;;  %v7288_v21 = vld [vmem:[#allocation2 + $0xc1] sm:$0xff] }
 0x6c2   : >> { %v16658_v32 = vpop.f32.mrb[231].mxu1  ;;  %16998 = vmatpush3.bf16.msra.mxu0 %v18184_v22  ;;  %v21760_v29 = vadd.f32 %v6139_v56, %v5971_v5  ;;  %v5972_v37 = vadd.f32 %v5927_v61, %v21611_v15  ;;  %v16602_v18 = vpop.f32.mrb[195].mxu0  ;;  %v7067_v56 = vld [vmem:[#allocation2 + $0x90] sm:$0xff]  ;;  %v7070_v0 = vld [vmem:[#allocation2 + $0xa8] sm:$0xff] }
 0x6c3   : >> { %17087 = vmatprep.subr.bf16.mxu0 %v18884_v1  ;;  %v7079_v16 = vpack.c.bf16 %v7067_v56, %v7066_v13  ;;  %v7287_v32 = vld [vmem:[#allocation2 + $0xb9] sm:$0xff] }
 0x6c4   : >> { %16968 = vmatmul.mubr.bf16.gmra.mrb[80].mxu1 %v7294_v44  ;;  %v21764_v9 = vadd.f32 %v6142_v10, %v5972_v37  ;;  %16912 = vmatmul.mubr.bf16.gmra.mrb[44].mxu0 %v7078_v25  ;;  %v7285_v10 = vld [vmem:[#allocation2 + $0xa9] sm:$0xff]  ;;  %v7297_v25 = vpack.c.bf16 %v7288_v21, %v7287_v32 }
 0x6c5   : >> { %16971 = vmatprep.mubr.msk.bf16.mxu1 %vm18885_vm0, %v18884_v1  ;;  %16915 = vmatprep.mubr.msk.bf16.mxu0 %vm18885_vm0, %v18884_v1  ;;  %v7296_v22 = vpack.c.bf16 %v7286_v57, %v7285_v10  ;;  %v7071_v37 = vld [vmem:[#allocation2 + $0xb0] sm:$0xff] }
 0x6c6   : >> { %v7081_v13 = vpack.c.bf16 %v7071_v37, %v7070_v0  ;;  %v7488_v32 = vld [vmem:[#allocation2 + $0x4a] sm:$0xff] }
 0x6c7   : >> { %v6155_v24 = vpop.f32.mrb[232].mxu1  ;;  %v5932_v34 = vpop.f32.mrb[196].mxu0 }
 0x6c8   : >> { %v16661_v11 = vpop.f32.mrb[233].mxu1  ;;  %v5973_v15 = vadd.f32 %v5932_v34, %v21618_v26  ;;  %v16605_v20 = vpop.f32.mrb[197].mxu0 }
 0x6c9   : >> { %v6158_v43 = vpop.f32.mrb[234].mxu1  ;;  %v5935_v17 = vpop.f32.mrb[198].mxu0 }
 0x6ca   : >> { %v16662_v6 = vpop.f32.mrb[235].mxu1  ;;  %v21771_v62 = vadd.f32 %v6147_v59, %v5973_v15  ;;  %v5974_v35 = vadd.f32 %v5935_v17, %v21621_v27  ;;  %v16606_v52 = vpop.f32.mrb[199].mxu0  ;;  %v7702_v15 = vld [vmem:[#allocation2 + $0x43] sm:$0xff] }
 0x6cb   : >> { %v7701_v6 = vld [vmem:[#allocation2 + $0x3b] sm:$0xff] }
 0x6cc   : >> { %16972 = vmatmul.mubr.bf16.gmra.mrb[84].mxu1 %v7295_v45  ;;  %v21774_v39 = vadd.f32 %v6150_v8, %v5974_v35  ;;  %16916 = vmatmul.mubr.bf16.gmra.mrb[48].mxu0 %v7079_v16  ;;  %v7072_v35 = vld [vmem:[#allocation2 + $0xb8] sm:$0xff]  ;;  %v7719_v16 = vpack.c.bf16 %v7702_v15, %v7701_v6  ;;  %v7707_v6 = vld [vmem:[#allocation2 + $0x6b] sm:$0xff] }
 0x6cd   : >> { %16975 = vmatprep.mubr.msk.bf16.mxu1 %vm18885_vm0, %v18884_v1  ;;  %16919 = vmatprep.mubr.msk.bf16.mxu0 %vm18885_vm0, %v18884_v1 }
 0x6cf   : >> { %v6163_v26 = vpop.f32.mrb[236].mxu1  ;;  %v5940_v60 = vpop.f32.mrb[200].mxu0 }
 0x6d0   : >> { %v16665_v14 = vpop.f32.mrb[237].mxu1  ;;  %v5975_v27 = vadd.f32 %v5940_v60, %v21628_v36  ;;  %v16609_v49 = vpop.f32.mrb[201].mxu0 }
 0x6d1   : >> { %v6166_v41 = vpop.f32.mrb[238].mxu1  ;;  %v5943_v63 = vpop.f32.mrb[202].mxu0  ;;  %v7703_v14 = vld [vmem:[#allocation2 + $0x4b] sm:$0xff] }
 0x6d2   : >> { %v16666_v19 = vpop.f32.mrb[239].mxu1  ;;  %v21781_v59 = vadd.f32 %v6155_v24, %v5975_v27  ;;  %v5976_v33 = vadd.f32 %v5943_v63, %v21631_v47  ;;  %v16610_v50 = vpop.f32.mrb[203].mxu0  ;;  %v7704_v27 = vld [vmem:[#allocation2 + $0x53] sm:$0xff] }
 0x6d4   : >> { %16976 = vmatmul.mubr.bf16.gmra.mrb[88].mxu1 %v7296_v22  ;;  %v21784_v46 = vadd.f32 %v6158_v43, %v5976_v33  ;;  %16920 = vmatmul.mubr.bf16.gmra.mrb[52].mxu0 %v7080_v7  ;;  %v7073_v43 = vld [vmem:[#allocation2 + $0xc0] sm:$0xff]  ;;  %v7720_v7 = vpack.c.bf16 %v7704_v27, %v7703_v14 }
 0x6d5   : >> { %16979 = vmatprep.mubr.msk.bf16.mxu1 %vm18885_vm0, %v18884_v1  ;;  %16923 = vmatprep.mubr.msk.bf16.mxu0 %vm18885_vm0, %v18884_v1  ;;  %v7082_v60 = vpack.c.bf16 %v7073_v43, %v7072_v35  ;;  %v7486_v33 = vld [vmem:[#allocation2 + $0x3a] sm:$0xff] }
 0x6d6   : >> { %v7490_v14 = vld [vmem:[#allocation2 + $0x5a] sm:$0xff] }
 0x6d7   : >> { %v6171_v36 = vpop.f32.mrb[240].mxu1  ;;  %v5948_v5 = vpop.f32.mrb[204].mxu0 }
 0x6d8   : >> { %v16669_v8 = vpop.f32.mrb[241].mxu1  ;;  %v5977_v61 = vadd.f32 %v5948_v5, %v21638_v30  ;;  %v16613_v47 = vpop.f32.mrb[205].mxu0 }
 0x6d9   : >> { %v6174_v48 = vpop.f32.mrb[242].mxu1  ;;  %v5951_v44 = vpop.f32.mrb[206].mxu0 }
 0x6da   : >> { %v16670_v18 = vpop.f32.mrb[243].mxu1  ;;  %v21791_v24 = vadd.f32 %v6163_v26, %v5977_v61  ;;  %v5978_v53 = vadd.f32 %v5951_v44, %v21641_v12  ;;  %v16614_v34 = vpop.f32.mrb[207].mxu0  ;;  %v7489_v44 = vld [vmem:[#allocation2 + $0x52] sm:$0xff] }
 0x6db   : >> { %v7705_v34 = vld [vmem:[#allocation2 + $0x5b] sm:$0xff] }
 0x6dc   : >> { %16980 = vmatmul.mubr.bf16.gmra.mrb[92].mxu1 %v7297_v25  ;;  %v21794_v11 = vadd.f32 %v6166_v41, %v5978_v53  ;;  %16924 = vmatmul.mubr.bf16.gmra.mrb[56].mxu0 %v7081_v13  ;;  %v7487_v41 = vld [vmem:[#allocation2 + $0x42] sm:$0xff] }
 0x6dd   : >> { %17051 = vmatprep.mubr.msk.bf16.mxu1 %vm18885_vm0, %v18884_v1  ;;  %16927 = vmatprep.mubr.msk.bf16.mxu0 %vm18885_vm0, %v18884_v1  ;;  %v7504_v8 = vpack.c.bf16 %v7487_v41, %v7486_v33  ;;  %v18190_v41 = vld [vmem:[%s23786_s4 + $0x620] sm:$0xff]  }
 0x6de   : >> { %v7710_v33 = vld [vmem:[#allocation2 + $0x83] sm:$0xff] }
 0x6df   : >> { %v6537_v30 = vpop.f32.mrb[244].mxu1  ;;  %v5956_v20 = vpop.f32.mrb[208].mxu0 }
 0x6e0   : >> { %v16741_v40 = vpop.f32.mrb[245].mxu1  ;;  %v5979_v17 = vadd.f32 %v5956_v20, %v21651_v23  ;;  %v16617_v12 = vpop.f32.mrb[209].mxu0  ;;  %v18188_v20 = vld [vmem:[%s23786_s4 + $0x610] sm:$0xff]  }
 0x6e1   : >> { %v6540_v56 = vpop.f32.mrb[246].mxu1  ;;  %v5959_v45 = vpop.f32.mrb[210].mxu0  ;;  %v7505_v12 = vpack.c.bf16 %v7489_v44, %v7488_v32  ;;  %v18192_v44 = vld [vmem:[%s23786_s4 + $0x630] sm:$0xff]  }
 0x6e2   : >> { %v16742_v52 = vpop.f32.mrb[247].mxu1  ;;  %v21801_v26 = vadd.f32 %v6171_v36, %v5979_v17  ;;  %v5980_v10 = vadd.f32 %v5959_v45, %v21654_v58  ;;  %v16618_v57 = vpop.f32.mrb[211].mxu0  ;;  %v18186_v36 = vld [vmem:[%s23786_s4 + $0x600] sm:$0xff]   ;;  %v7708_v45 = vld [vmem:[#allocation2 + $0x73] sm:$0xff] }
 0x6e3   : >> { %v7491_v52 = vld [vmem:[#allocation2 + $0x62] sm:$0xff] }
 0x6e4   : >> { %17052 = vmatmul.mubr.bf16.vlgmr.msra.gmra.mrb[96].mxu1 %v7719_v16  ;;  %v21804_v51 = vadd.f32 %v6174_v48, %v5980_v10  ;;  %16928 = vmatmul.mubr.bf16.gmra.mrb[60].mxu0 %v7082_v60  ;;  %v7706_v48 = vld [vmem:[#allocation2 + $0x63] sm:$0xff] }
 0x6e5   : >> { %17055 = vmatprep.mubr.msk.bf16.mxu1 %vm18885_vm0, %v18884_v1  ;;  %16999 = vmatprep.mubr.msk.bf16.mxu0 %vm18885_vm0, %v18884_v1  ;;  %v7721_v15 = vpack.c.bf16 %v7706_v48, %v7705_v34  ;;  %v18193_v34 = vld [vmem:[%s23786_s4 + $0x638] sm:$0xff]  }
 0x6e7   : >> { %v6545_v23 = vpop.f32.mrb[248].mxu1  ;;  %v6322_v49 = vpop.f32.mrb[212].mxu0 }
 0x6e8   : >> { %v16745_v63 = vpop.f32.mrb[249].mxu1  ;;  %v6393_v58 = vadd.f32 %v6322_v49, %v21668_v42  ;;  %v16689_v2 = vpop.f32.mrb[213].mxu0  ;;  %v18187_v42 = vld [vmem:[%s23786_s4 + $0x608] sm:$0xff]   ;;  %v7722_v49 = vpack.c.bf16 %v7708_v45, %v7707_v6  ;;  %v7494_v6 = vld [vmem:[#allocation2 + $0x7a] sm:$0xff] }
 0x6e9   : >> { %v6548_v19 = vpop.f32.mrb[250].mxu1  ;;  %v6325_v22 = vpop.f32.mrb[214].mxu0 }
 0x6ea   : >> { %v16746_v50 = vpop.f32.mrb[251].mxu1  ;;  %v21814_v21 = vadd.f32 %v6537_v30, %v6393_v58  ;;  %v6394_v5 = vadd.f32 %v6325_v22, %v21675_v38  ;;  %v16690_v0 = vpop.f32.mrb[215].mxu0  ;;  %v18191_v22 = vld [vmem:[%s23786_s4 + $0x628] sm:$0xff]  }
 0x6ec   : >> { %17056 = vmatmul.mubr.bf16.gmra.mrb[100].mxu1 %v7720_v7  ;;  %v21817_v61 = vadd.f32 %v6540_v56, %v6394_v5  ;;  %17000 = vmatmul.mubr.bf16.vlgmr.msra.gmra.mrb[64].mxu0 %v7504_v8  ;;  %v18189_v56 = vld [vmem:[%s23786_s4 + $0x618] sm:$0xff]   ;;  %v7492_v7 = vld [vmem:[#allocation2 + $0x6a] sm:$0xff] }
 0x6ed   : >> { %17059 = vmatprep.mubr.msk.bf16.mxu1 %vm18885_vm0, %v18884_v1  ;;  %17003 = vmatprep.mubr.msk.bf16.mxu0 %vm18885_vm0, %v18884_v1 }
 0x6ee   : >> { %17088 = vmatpush3.bf16.msra.mxu0 %v18186_v36  ;;  %v7493_v36 = vld [vmem:[#allocation2 + $0x72] sm:$0xff] }
 0x6ef   : >> { %v6553_v47 = vpop.f32.mrb[252].mxu1  ;;  %17089 = vmatprep.subr.bf16.mxu0 %v18884_v1  ;;  %v6330_v38 = vpop.f32.mrb[216].mxu0 }
 0x6f0   : >> { %v16749_v37 = vpop.f32.mrb[253].mxu1  ;;  %v6395_v18 = vadd.f32 %v6330_v38, %v21693_v31  ;;  %v16693_v25 = vpop.f32.mrb[217].mxu0 }
 0x6f1   : >> { %v6556_v53 = vpop.f32.mrb[254].mxu1  ;;  %v6333_v13 = vpop.f32.mrb[218].mxu0 }
 0x6f2   : >> { %v16750_v30 = vpop.f32.mrb[255].mxu1  ;;  %17090 = vmatpush3.bf16.msra.mxu0 %v18187_v42  ;;  %v21831_v43 = vadd.f32 %v6545_v23, %v6395_v18  ;;  %v6396_v40 = vadd.f32 %v6333_v13, %v21701_v4  ;;  %v16694_v17 = vpop.f32.mrb[219].mxu0  ;;  %v7711_v13 = vld [vmem:[#allocation2 + $0x8b] sm:$0xff] }
 0x6f3   : >> { %17091 = vmatprep.subr.bf16.mxu0 %v18884_v1  ;;  %v7712_v30 = vld [vmem:[#allocation2 + $0x93] sm:$0xff] }
 0x6f4   : >> { %17060 = vmatmul.mubr.bf16.gmra.mrb[104].mxu1 %v7721_v15  ;;  %v21835_v31 = vadd.f32 %v6548_v19, %v6396_v40  ;;  %17004 = vmatmul.mubr.bf16.gmra.mrb[68].mxu0 %v7505_v12  ;;  %v7506_v19 = vpack.c.bf16 %v7491_v52, %v7490_v14 }
 0x6f5   : >> { %17063 = vmatprep.mubr.msk.bf16.mxu1 %vm18885_vm0, %v18884_v1  ;;  %17007 = vmatprep.mubr.msk.bf16.mxu0 %vm18885_vm0, %v18884_v1 }
 0x6f6   : >> { %17092 = vmatpush3.bf16.msra.mxu0 %v18188_v20  ;;  %v7495_v20 = vld [vmem:[#allocation2 + $0x82] sm:$0xff] }
 0x6f7   : >> { %v6561_v4 = vpop.f32.mrb[0].mxu1  ;;  %17093 = vmatprep.subr.bf16.mxu0 %v18884_v1  ;;  %v6338_v35 = vpop.f32.mrb[220].mxu0 }
 0x6f8   : >> { %v16753_v16 = vpop.f32.mrb[1].mxu1  ;;  %v6397_v10 = vadd.f32 %v6338_v35, %v21719_v28  ;;  %v16697_v57 = vpop.f32.mrb[221].mxu0  ;;  %v7724_v35 = vpack.c.bf16 %v7712_v30, %v7711_v13 }
 0x6f9   : >> { %v6564_v60 = vpop.f32.mrb[2].mxu1  ;;  %v6341_v23 = vpop.f32.mrb[222].mxu0  ;;  %v7508_v57 = vpack.c.bf16 %v7495_v20, %v7494_v6 }
 0x6fa   : >> { %v16754_v27 = vpop.f32.mrb[3].mxu1  ;;  %17094 = vmatpush3.bf16.msra.mxu0 %v18189_v56  ;;  %v21849_v63 = vadd.f32 %v6553_v47, %v6397_v10  ;;  %v6398_v58 = vadd.f32 %v6341_v23, %v21727_v54  ;;  %v16698_v2 = vpop.f32.mrb[223].mxu0  ;;  %v7709_v47 = vld [vmem:[#allocation2 + $0x7b] sm:$0xff]  ;;  %v7714_v23 = vld [vmem:[#allocation2 + $0xa3] sm:$0xff] }
 0x6fb   : >> { %17095 = vmatprep.subr.bf16.mxu0 %v18884_v1  ;;  %v7723_v32 = vpack.c.bf16 %v7710_v33, %v7709_v47  ;;  %v7496_v27 = vld [vmem:[#allocation2 + $0x8a] sm:$0xff] }
 0x6fc   : >> { %17064 = vmatmul.mubr.bf16.gmra.mrb[108].mxu1 %v7722_v49  ;;  %v21853_v28 = vadd.f32 %v6556_v53, %v6398_v58  ;;  %17008 = vmatmul.mubr.bf16.gmra.mrb[72].mxu0 %v7506_v19  ;;  %v7507_v53 = vpack.c.bf16 %v7493_v36, %v7492_v7  ;;  %v7497_v49 = vld [vmem:[#allocation2 + $0x92] sm:$0xff]  ;;  %v7713_v19 = vld [vmem:[#allocation2 + $0x9b] sm:$0xff] }
 0x6fd   : >> { %17067 = vmatprep.mubr.msk.bf16.mxu1 %vm18885_vm0, %v18884_v1  ;;  %17011 = vmatprep.mubr.msk.bf16.mxu0 %vm18885_vm0, %v18884_v1  ;;  %v7725_v33 = vpack.c.bf16 %v7714_v23, %v7713_v19 }
 0x6fe   : >> { %17096 = vmatpush3.bf16.msra.mxu0 %v18190_v41 }
 0x6ff   : >> { %v6569_v54 = vpop.f32.mrb[4].mxu1  ;;  %17097 = vmatprep.subr.bf16.mxu0 %v18884_v1  ;;  %v6346_v50 = vpop.f32.mrb[224].mxu0 }
 0x700   : >> { %v16757_v5 = vpop.f32.mrb[5].mxu1  ;;  %v6399_v0 = vadd.f32 %v6346_v50, %v21745_v55  ;;  %v16701_v8 = vpop.f32.mrb[225].mxu0 }
 0x701   : >> { %v6572_v42 = vpop.f32.mrb[6].mxu1  ;;  %v6349_v48 = vpop.f32.mrb[226].mxu0  ;;  %v7509_v5 = vpack.c.bf16 %v7497_v49, %v7496_v27  ;;  %v7715_v8 = vld [vmem:[#allocation2 + $0xab] sm:$0xff] }
 0x702   : >> { %v16758_v38 = vpop.f32.mrb[7].mxu1  ;;  %17098 = vmatpush3.bf16.msra.mxu0 %v18191_v22  ;;  %v21867_v37 = vadd.f32 %v6561_v4, %v6399_v0  ;;  %v6400_v18 = vadd.f32 %v6349_v48, %v21749_v3  ;;  %v16702_v25 = vpop.f32.mrb[227].mxu0  ;;  %v7499_v48 = vld [vmem:[#allocation2 + $0xa2] sm:$0xff] }
 0x703   : >> { %17099 = vmatprep.subr.bf16.mxu0 %v18884_v1  ;;  %v7498_v25 = vld [vmem:[#allocation2 + $0x9a] sm:$0xff] }
 0x704   : >> { %17068 = vmatmul.mubr.bf16.gmra.mrb[112].mxu1 %v7723_v32  ;;  %v21871_v55 = vadd.f32 %v6564_v60, %v6400_v18  ;;  %17012 = vmatmul.mubr.bf16.gmra.mrb[76].mxu0 %v7507_v53 }
 0x705   : >> { %17071 = vmatprep.mubr.msk.bf16.mxu1 %vm18885_vm0, %v18884_v1  ;;  %17015 = vmatprep.mubr.msk.bf16.mxu0 %vm18885_vm0, %v18884_v1 }
 0x706   : >> { %17100 = vmatpush3.bf16.msra.mxu0 %v18192_v44 }
 0x707   : >> { %v6577_v3 = vpop.f32.mrb[8].mxu1  ;;  %17101 = vmatprep.subr.bf16.mxu0 %v18884_v1  ;;  %v6354_v15 = vpop.f32.mrb[228].mxu0 }
 0x708   : >> { %v16761_v40 = vpop.f32.mrb[9].mxu1  ;;  %v6401_v17 = vadd.f32 %v6354_v15, %v21760_v29  ;;  %v16705_v12 = vpop.f32.mrb[229].mxu0  ;;  %v7510_v15 = vpack.c.bf16 %v7499_v48, %v7498_v25 }
 0x709   : >> { %v6580_v56 = vpop.f32.mrb[10].mxu1  ;;  %v6357_v4 = vpop.f32.mrb[230].mxu0  ;;  %v7718_v40 = vld [vmem:[#allocation2 + $0xc3] sm:$0xff] }
 0x70a   : >> { %v16762_v45 = vpop.f32.mrb[11].mxu1  ;;  %17102 = vmatpush3.bf16.msra.mxu0 %v18193_v34  ;;  %v21882_v52 = vadd.f32 %v6569_v54, %v6401_v17  ;;  %v6402_v16 = vadd.f32 %v6357_v4, %v21764_v9  ;;  %v16706_v10 = vpop.f32.mrb[231].mxu0  ;;  %v7500_v12 = vld [vmem:[#allocation2 + $0xaa] sm:$0xff] }
 0x70c   : >> { %17072 = vmatmul.mubr.bf16.gmra.mrb[116].mxu1 %v7724_v35  ;;  %v21885_v60 = vadd.f32 %v6572_v42, %v6402_v16  ;;  %17016 = vmatmul.mubr.bf16.gmra.mrb[80].mxu0 %v7508_v57  ;;  %v7716_v42 = vld [vmem:[#allocation2 + $0xb3] sm:$0xff]  ;;  %v7717_v35 = vld [vmem:[#allocation2 + $0xbb] sm:$0xff] }
 0x70d   : >> { %17075 = vmatprep.mubr.msk.bf16.mxu1 %vm18885_vm0, %v18884_v1  ;;  %17019 = vmatprep.mubr.msk.bf16.mxu0 %vm18885_vm0, %v18884_v1  ;;  %v7726_v34 = vpack.c.bf16 %v7716_v42, %v7715_v8  ;;  %v7727_v57 = vpack.c.bf16 %v7718_v40, %v7717_v35  ;;  %v7919_v40 = vld [vmem:[#allocation2 + $0x54] sm:$0xff] }
 0x70f   : >> { %v6585_v29 = vpop.f32.mrb[12].mxu1  ;;  %v6362_v14 = vpop.f32.mrb[232].mxu0 }
 0x710   : >> { %v16765_v41 = vpop.f32.mrb[13].mxu1  ;;  %v6403_v9 = vadd.f32 %v6362_v14, %v21771_v62  ;;  %v16709_v58 = vpop.f32.mrb[233].mxu0 }
 0x711   : >> { %v6588_v2 = vpop.f32.mrb[14].mxu1  ;;  %v6365_v22 = vpop.f32.mrb[234].mxu0 }
 0x712   : >> { %v16766_v54 = vpop.f32.mrb[15].mxu1  ;;  %v21892_v50 = vadd.f32 %v6577_v3, %v6403_v9  ;;  %v6404_v7 = vadd.f32 %v6365_v22, %v21774_v39  ;;  %v16710_v36 = vpop.f32.mrb[235].mxu0  ;;  %v7503_v9 = vld [vmem:[#allocation2 + $0xc2] sm:$0xff] }
 0x714   : >> { %17076 = vmatmul.mubr.bf16.gmra.mrb[120].mxu1 %v7725_v33  ;;  %v21895_v0 = vadd.f32 %v6580_v56, %v6404_v7  ;;  %17020 = vmatmul.mubr.bf16.gmra.mrb[84].mxu0 %v7509_v5  ;;  %v7501_v56 = vld [vmem:[#allocation2 + $0xb2] sm:$0xff]  ;;  %v7502_v33 = vld [vmem:[#allocation2 + $0xba] sm:$0xff] }
 0x715   : >> { %17079 = vmatprep.mubr.msk.bf16.mxu1 %vm18885_vm0, %v18884_v1  ;;  %17023 = vmatprep.mubr.msk.bf16.mxu0 %vm18885_vm0, %v18884_v1  ;;  %v7511_v27 = vpack.c.bf16 %v7501_v56, %v7500_v12 }
 0x717   : >> { %v6593_v62 = vpop.f32.mrb[16].mxu1  ;;  %v6370_v47 = vpop.f32.mrb[236].mxu0 }
 0x718   : >> { %v16769_v38 = vpop.f32.mrb[17].mxu1  ;;  %v6405_v39 = vadd.f32 %v6370_v47, %v21781_v59  ;;  %v16713_v32 = vpop.f32.mrb[237].mxu0 }
 0x719   : >> { %v6596_v44 = vpop.f32.mrb[18].mxu1  ;;  %v6373_v18 = vpop.f32.mrb[238].mxu0 }
 0x71a   : >> { %v16770_v53 = vpop.f32.mrb[19].mxu1  ;;  %v21902_v3 = vadd.f32 %v6585_v29, %v6405_v39  ;;  %v6406_v13 = vadd.f32 %v6373_v18, %v21784_v46  ;;  %v16714_v30 = vpop.f32.mrb[239].mxu0  ;;  %v7916_v18 = vld [vmem:[#allocation2 + $0x3c] sm:$0xff] }
 0x71c   : >> { %17080 = vmatmul.mubr.bf16.gmra.mrb[124].mxu1 %v7726_v34  ;;  %v21905_v20 = vadd.f32 %v6588_v2, %v6406_v13  ;;  %17024 = vmatmul.mubr.bf16.gmra.mrb[88].mxu0 %v7510_v15 }
 0x71d   : >> { %17083 = vmatprep.mubr.msk.bf16.mxu1 %vm18885_vm0, %v18884_v1  ;;  %17027 = vmatprep.mubr.msk.bf16.mxu0 %vm18885_vm0, %v18884_v1 }
 0x71f   : >> { %v6601_v59 = vpop.f32.mrb[20].mxu1  ;;  %v6378_v17 = vpop.f32.mrb[240].mxu0 }
 0x720   : >> { %v16773_v4 = vpop.f32.mrb[21].mxu1  ;;  %v6407_v46 = vadd.f32 %v6378_v17, %v21791_v24  ;;  %v16717_v6 = vpop.f32.mrb[241].mxu0 }
 0x721   : >> { %v6604_v45 = vpop.f32.mrb[22].mxu1  ;;  %v6381_v16 = vpop.f32.mrb[242].mxu0 }
 0x722   : >> { %v16774_v10 = vpop.f32.mrb[23].mxu1  ;;  %v21912_v29 = vadd.f32 %v6593_v62, %v6407_v46  ;;  %v6408_v23 = vadd.f32 %v6381_v16, %v21794_v11  ;;  %v16718_v14 = vpop.f32.mrb[243].mxu0  ;;  %v7512_v62 = vpack.c.bf16 %v7503_v9, %v7502_v33 }
 0x723   : >> { %v7921_v14 = vld [vmem:[#allocation2 + $0x64] sm:$0xff] }
 0x724   : >> { %17084 = vmatmul.mubr.bf16.gmra.mrb[128].mxu1 %v7727_v57  ;;  %v21915_v49 = vadd.f32 %v6596_v44, %v6408_v23  ;;  %17028 = vmatmul.mubr.bf16.gmra.mrb[92].mxu0 %v7511_v27 }
 0x725   : >> { %17031 = vmatprep.mubr.msk.bf16.mxu0 %vm18885_vm0, %v18884_v1 }
 0x727   : >> { %v6967_v24 = vpop.f32.mrb[24].mxu1  ;;  %v6386_v41 = vpop.f32.mrb[244].mxu0 }
 0x728   : >> { %v16845_v58 = vpop.f32.mrb[25].mxu1  ;;  %v6409_v2 = vadd.f32 %v6386_v41, %v21801_v26  ;;  %v16721_v19 = vpop.f32.mrb[245].mxu0  ;;  %v7917_v26 = vld [vmem:[#allocation2 + $0x44] sm:$0xff] }
 0x729   : >> { %v6970_v22 = vpop.f32.mrb[26].mxu1  ;;  %v6389_v54 = vpop.f32.mrb[246].mxu0  ;;  %v7934_v13 = vpack.c.bf16 %v7917_v26, %v7916_v18  ;;  %v7920_v58 = vld [vmem:[#allocation2 + $0x5c] sm:$0xff] }
 0x72a   : >> { %v16846_v11 = vpop.f32.mrb[27].mxu1  ;;  %v21920_v7 = vadd.f32 %v6601_v59, %v6409_v2  ;;  %v6410_v36 = vadd.f32 %v6389_v54, %v21804_v51  ;;  %v16722_v5 = vpop.f32.mrb[247].mxu0  ;;  %v7936_v54 = vpack.c.bf16 %v7921_v14, %v7920_v58 }
 0x72b   : >> { %v7923_v5 = vld [vmem:[#allocation2 + $0x74] sm:$0xff] }
 0x72c   : >> { %v21923_v8 = vadd.f32 %v6604_v45, %v6410_v36  ;;  %17032 = vmatmul.mubr.bf16.gmra.mrb[96].mxu0 %v7512_v62 }
 0x72d   : >> { %17103 = vmatprep.mubr.msk.bf16.mxu0 %vm18885_vm0, %v18884_v1 }
 0x72f   : >> { %v6975_v42 = vpop.f32.mrb[28].mxu1  ;;  %v6752_v47 = vpop.f32.mrb[248].mxu0 }
 0x730   : >> { %v16849_v48 = vpop.f32.mrb[29].mxu1  ;;  %v6823_v38 = vadd.f32 %v6752_v47, %v21814_v21  ;;  %v16793_v39 = vpop.f32.mrb[249].mxu0  ;;  %v7918_v21 = vld [vmem:[#allocation2 + $0x4c] sm:$0xff] }
 0x731   : >> { %v6978_v32 = vpop.f32.mrb[30].mxu1  ;;  %v6755_v44 = vpop.f32.mrb[250].mxu0  ;;  %v7935_v16 = vpack.c.bf16 %v7919_v40, %v7918_v21  ;;  %v7924_v40 = vld [vmem:[#allocation2 + $0x7c] sm:$0xff] }
 0x732   : >> { %v16850_v25 = vpop.f32.mrb[31].mxu1  ;;  %v21928_v51 = vadd.f32 %v6967_v24, %v6823_v38  ;;  %v6824_v53 = vadd.f32 %v6755_v44, %v21817_v61  ;;  %v16794_v34 = vpop.f32.mrb[251].mxu0 }
 0x733   : >> { %v7925_v34 = vld [vmem:[#allocation2 + $0x84] sm:$0xff] }
 0x734   : >> { %v21931_v30 = vadd.f32 %v6970_v22, %v6824_v53  ;;  %17104 = vmatmul.mubr.bf16.vlgmr.msra.gmra.mrb[100].mxu0 %v7934_v13 }
 0x735   : >> { %17107 = vmatprep.mubr.msk.bf16.mxu0 %vm18885_vm0, %v18884_v1 }
 0x737   : >> { %v6983_v15 = vpop.f32.mrb[32].mxu1  ;;  %v6760_v59 = vpop.f32.mrb[252].mxu0 }
 0x738   : >> { %v16853_v17 = vpop.f32.mrb[33].mxu1  ;;  %v6825_v12 = vadd.f32 %v6760_v59, %v21831_v43  ;;  %v16797_v56 = vpop.f32.mrb[253].mxu0 }
 0x739   : >> { %v6986_v4 = vpop.f32.mrb[34].mxu1  ;;  %v6763_v46 = vpop.f32.mrb[254].mxu0 }
 0x73a   : >> { %v16854_v6 = vpop.f32.mrb[35].mxu1  ;;  %v21936_v61 = vadd.f32 %v6975_v42, %v6825_v12  ;;  %v6826_v45 = vadd.f32 %v6763_v46, %v21835_v31  ;;  %v16798_v35 = vpop.f32.mrb[255].mxu0 }
 0x73b   : >> { %v7927_v35 = vld [vmem:[#allocation2 + $0x94] sm:$0xff] }
 0x73c   : >> { %v21939_v10 = vadd.f32 %v6978_v32, %v6826_v45  ;;  %17108 = vmatmul.mubr.bf16.gmra.mrb[104].mxu0 %v7935_v16 }
 0x73d   : >> { %17111 = vmatprep.mubr.msk.bf16.mxu0 %vm18885_vm0, %v18884_v1 }
 0x73f   : >> { %v6991_v57 = vpop.f32.mrb[36].mxu1  ;;  %v6768_v23 = vpop.f32.mrb[0].mxu0 }
 0x740   : >> { %v16857_v43 = vpop.f32.mrb[37].mxu1  ;;  %v6827_v27 = vadd.f32 %v6768_v23, %v21849_v63  ;;  %v16801_v24 = vpop.f32.mrb[1].mxu0  ;;  %v7922_v63 = vld [vmem:[#allocation2 + $0x6c] sm:$0xff] }
 0x741   : >> { %v6994_v41 = vpop.f32.mrb[38].mxu1  ;;  %v6771_v9 = vpop.f32.mrb[2].mxu0  ;;  %v7937_v44 = vpack.c.bf16 %v7923_v5, %v7922_v63  ;;  %v7928_v5 = vld [vmem:[#allocation2 + $0x9c] sm:$0xff] }
 0x742   : >> { %v16858_v2 = vpop.f32.mrb[39].mxu1  ;;  %v21944_v31 = vadd.f32 %v6983_v15, %v6827_v27  ;;  %v6828_v19 = vadd.f32 %v6771_v9, %v21853_v28  ;;  %v16802_v22 = vpop.f32.mrb[3].mxu0 }
 0x743   : >> { %v7929_v22 = vld [vmem:[#allocation2 + $0xa4] sm:$0xff] }
 0x744   : >> { %v21947_v33 = vadd.f32 %v6986_v4, %v6828_v19  ;;  %17112 = vmatmul.mubr.bf16.gmra.mrb[108].mxu0 %v7936_v54  ;;  %v7938_v4 = vpack.c.bf16 %v7925_v34, %v7924_v40 }
 0x745   : >> { %17115 = vmatprep.mubr.msk.bf16.mxu0 %vm18885_vm0, %v18884_v1 }
 0x747   : >> { %v6999_v11 = vpop.f32.mrb[40].mxu1  ;;  %v6776_v36 = vpop.f32.mrb[4].mxu0 }
 0x748   : >> { %v16861_v62 = vpop.f32.mrb[41].mxu1  ;;  %v6829_v42 = vadd.f32 %v6776_v36, %v21867_v37  ;;  %v16805_v47 = vpop.f32.mrb[5].mxu0 }
 0x749   : >> { %v7002_v26 = vpop.f32.mrb[42].mxu1  ;;  %v6779_v48 = vpop.f32.mrb[6].mxu0 }
 0x74a   : >> { %v16862_v38 = vpop.f32.mrb[43].mxu1  ;;  %v21952_v28 = vadd.f32 %v6991_v57, %v6829_v42  ;;  %v6830_v39 = vadd.f32 %v6779_v48, %v21871_v55  ;;  %v16806_v32 = vpop.f32.mrb[7].mxu0 }
 0x74b   : >> { %v7931_v32 = vld [vmem:[#allocation2 + $0xb4] sm:$0xff] }
 0x74c   : >> { %v21955_v18 = vadd.f32 %v6994_v41, %v6830_v39  ;;  %17116 = vmatmul.mubr.bf16.gmra.mrb[112].mxu0 %v7937_v44 }
 0x74d   : >> { %17119 = vmatprep.mubr.msk.bf16.mxu0 %vm18885_vm0, %v18884_v1 }
 0x74f   : >> { %v7007_v25 = vpop.f32.mrb[44].mxu1  ;;  %v6784_v53 = vpop.f32.mrb[8].mxu0 }
 0x750   : >> { %v16865_v37 = vpop.f32.mrb[45].mxu1  ;;  %v6831_v13 = vadd.f32 %v6784_v53, %v21882_v52  ;;  %v16809_v15 = vpop.f32.mrb[9].mxu0  ;;  %v7926_v52 = vld [vmem:[#allocation2 + $0x8c] sm:$0xff] }
 0x751   : >> { %v7010_v59 = vpop.f32.mrb[46].mxu1  ;;  %v6787_v21 = vpop.f32.mrb[10].mxu0  ;;  %v7939_v9 = vpack.c.bf16 %v7927_v35, %v7926_v52  ;;  %v7932_v35 = vld [vmem:[#allocation2 + $0xbc] sm:$0xff] }
 0x752   : >> { %v16866_v17 = vpop.f32.mrb[47].mxu1  ;;  %v21960_v55 = vadd.f32 %v6999_v11, %v6831_v13  ;;  %v6832_v12 = vadd.f32 %v6787_v21, %v21885_v60  ;;  %v16810_v56 = vpop.f32.mrb[11].mxu0 }
 0x753   : >> { %v7933_v56 = vld [vmem:[#allocation2 + $0xc4] sm:$0xff] }
 0x754   : >> { %v21963_v46 = vadd.f32 %v7002_v26, %v6832_v12  ;;  %17120 = vmatmul.mubr.bf16.gmra.mrb[116].mxu0 %v7938_v4  ;;  %v7940_v26 = vpack.c.bf16 %v7929_v22, %v7928_v5 }
 0x755   : >> { %17123 = vmatprep.mubr.msk.bf16.mxu0 %vm18885_vm0, %v18884_v1 }
 0x757   : >> { %v7015_v6 = vpop.f32.mrb[48].mxu1  ;;  %v6792_v45 = vpop.f32.mrb[12].mxu0 }
 0x758   : >> { %v16869_v16 = vpop.f32.mrb[49].mxu1  ;;  %v6833_v57 = vadd.f32 %v6792_v45, %v21892_v50  ;;  %v16813_v23 = vpop.f32.mrb[13].mxu0 }
 0x759   : >> { %v7018_v14 = vpop.f32.mrb[50].mxu1  ;;  %v6795_v43 = vpop.f32.mrb[14].mxu0 }
 0x75a   : >> { %v16870_v27 = vpop.f32.mrb[51].mxu1  ;;  %v21968_v60 = vadd.f32 %v7007_v25, %v6833_v57  ;;  %v6834_v24 = vadd.f32 %v6795_v43, %v21895_v0  ;;  %v16814_v41 = vpop.f32.mrb[15].mxu0 }
 0x75c   : >> { %v21971_v58 = vadd.f32 %v7010_v59, %v6834_v24  ;;  %17124 = vmatmul.mubr.bf16.gmra.mrb[120].mxu0 %v7939_v9 }
 0x75d   : >> { %17127 = vmatprep.mubr.msk.bf16.mxu0 %vm18885_vm0, %v18884_v1 }
 0x75f   : >> { %v7023_v2 = vpop.f32.mrb[52].mxu1  ;;  %v6800_v19 = vpop.f32.mrb[16].mxu0 }
 0x760   : >> { %v16873_v50 = vpop.f32.mrb[53].mxu1  ;;  %v6835_v54 = vadd.f32 %v6800_v19, %v21902_v3  ;;  %v16817_v11 = vpop.f32.mrb[17].mxu0  ;;  %v7930_v3 = vld [vmem:[#allocation2 + $0xac] sm:$0xff] }
 0x761   : >> { %v7026_v36 = vpop.f32.mrb[54].mxu1  ;;  %v6803_v63 = vpop.f32.mrb[18].mxu0  ;;  %v7941_v21 = vpack.c.bf16 %v7931_v32, %v7930_v3 }
 0x762   : >> { %v16874_v62 = vpop.f32.mrb[55].mxu1  ;;  %v21976_v0 = vadd.f32 %v7015_v6, %v6835_v54  ;;  %v6836_v42 = vadd.f32 %v6803_v63, %v21905_v20  ;;  %v16818_v47 = vpop.f32.mrb[19].mxu0 }
 0x764   : >> { %v21979_v48 = vadd.f32 %v7018_v14, %v6836_v42  ;;  %17128 = vmatmul.mubr.bf16.gmra.mrb[124].mxu0 %v7940_v26  ;;  %v7942_v14 = vpack.c.bf16 %v7933_v56, %v7932_v35 }
 0x765   : >> { %17131 = vmatprep.mubr.msk.bf16.mxu0 %vm18885_vm0, %v18884_v1 }
 0x767   : >> { %v7031_v38 = vpop.f32.mrb[56].mxu1  ;;  %v6808_v39 = vpop.f32.mrb[20].mxu0 }
 0x768   : >> { %v16877_v44 = vpop.f32.mrb[57].mxu1  ;;  %v6837_v25 = vadd.f32 %v6808_v39, %v21912_v29  ;;  %v16821_v53 = vpop.f32.mrb[21].mxu0 }
 0x769   : >> { %v7034_v34 = vpop.f32.mrb[58].mxu1  ;;  %v6811_v37 = vpop.f32.mrb[22].mxu0 }
 0x76a   : >> { %v16878_v13 = vpop.f32.mrb[59].mxu1  ;;  %v21984_v20 = vadd.f32 %v7023_v2, %v6837_v25  ;;  %v6838_v15 = vadd.f32 %v6811_v37, %v21915_v49  ;;  %v16822_v59 = vpop.f32.mrb[23].mxu0 }
 0x76c   : >> { %v21987_v40 = vadd.f32 %v7026_v36, %v6838_v15  ;;  %17132 = vmatmul.mubr.bf16.gmra.mrb[128].mxu0 %v7941_v21 }
 0x76d   : >> { %17135 = vmatprep.mubr.msk.bf16.mxu0 %vm18885_vm0, %v18884_v1 }
 0x76f   : >> { %v7397_v17 = vpop.f32.mrb[60].mxu1  ;;  %v6816_v12 = vpop.f32.mrb[24].mxu0 }
 0x770   : >> { %v16949_v29 = vpop.f32.mrb[61].mxu1  ;;  %v6839_v4 = vadd.f32 %v6816_v12, %v21920_v7  ;;  %v16825_v6 = vpop.f32.mrb[25].mxu0 }
 0x771   : >> { %v7400_v45 = vpop.f32.mrb[62].mxu1  ;;  %v6819_v52 = vpop.f32.mrb[26].mxu0 }
 0x772   : >> { %v16950_v16 = vpop.f32.mrb[63].mxu1  ;;  %v21992_v49 = vadd.f32 %v7031_v38, %v6839_v4  ;;  %v6840_v57 = vadd.f32 %v6819_v52, %v21923_v8  ;;  %v16826_v23 = vpop.f32.mrb[27].mxu0 }
 0x774   : >> { %v21995_v43 = vadd.f32 %v7034_v34, %v6840_v57  ;;  %17136 = vmatmul.mubr.bf16.gmra.mrb[132].mxu0 %v7942_v14 }
 0x777   : >> { %v7405_v1 = vpop.f32.mrb[64].mxu1  ;;  %v7182_v27 = vpop.f32.mrb[28].mxu0 }
 0x778   : >> { %v16953_v24 = vpop.f32.mrb[65].mxu1  ;;  %v7253_v41 = vadd.f32 %v7182_v27, %v21928_v51  ;;  %v16897_v7 = vpop.f32.mrb[29].mxu0 }
 0x779   : >> { %v7408_v9 = vpop.f32.mrb[66].mxu1  ;;  %v7185_v2 = vpop.f32.mrb[30].mxu0 }
 0x77a   : >> { %v16954_v19 = vpop.f32.mrb[67].mxu1  ;;  %v21998_v22 = vadd.f32 %v7397_v17, %v7253_v41  ;;  %v7254_v50 = vadd.f32 %v7185_v2, %v21931_v30  ;;  %v16898_v54 = vpop.f32.mrb[31].mxu0 }
 0x77c   : >> { %v22001_v8 = vadd.f32 %v7400_v45, %v7254_v50 }
 0x77f   : >> { %v7413_v11 = vpop.f32.mrb[68].mxu1  ;;  %v7190_v36 = vpop.f32.mrb[32].mxu0 }
 0x780   : >> { %v16957_v63 = vpop.f32.mrb[69].mxu1  ;;  %v7255_v5 = vadd.f32 %v7190_v36, %v21936_v61  ;;  %v16901_v62 = vpop.f32.mrb[33].mxu0 }
 0x781   : >> { %v7416_v42 = vpop.f32.mrb[70].mxu1  ;;  %v7193_v47 = vpop.f32.mrb[34].mxu0 }
 0x782   : >> { %v16958_v51 = vpop.f32.mrb[71].mxu1  ;;  %v22004_v26 = vadd.f32 %v7405_v1, %v7255_v5  ;;  %v7256_v38 = vadd.f32 %v7193_v47, %v21939_v10  ;;  %v16902_v39 = vpop.f32.mrb[35].mxu0 }
 0x784   : >> { %v22007_v3 = vadd.f32 %v7408_v9, %v7256_v38 }
 0x787   : >> { %v7421_v30 = vpop.f32.mrb[72].mxu1  ;;  %v7198_v32 = vpop.f32.mrb[36].mxu0 }
 0x788   : >> { %v16961_v44 = vpop.f32.mrb[73].mxu1  ;;  %v7257_v25 = vadd.f32 %v7198_v32, %v21944_v31  ;;  %v16905_v53 = vpop.f32.mrb[37].mxu0 }
 0x789   : >> { %v7424_v34 = vpop.f32.mrb[74].mxu1  ;;  %v7201_v37 = vpop.f32.mrb[38].mxu0 }
 0x78a   : >> { %v16962_v61 = vpop.f32.mrb[75].mxu1  ;;  %v22010_v13 = vadd.f32 %v7413_v11, %v7257_v25  ;;  %v7258_v15 = vadd.f32 %v7201_v37, %v21947_v33  ;;  %v16906_v59 = vpop.f32.mrb[39].mxu0 }
 0x78c   : >> { %v22013_v21 = vadd.f32 %v7416_v42, %v7258_v15 }
 0x78f   : >> { %v7429_v10 = vpop.f32.mrb[76].mxu1  ;;  %v7206_v17 = vpop.f32.mrb[40].mxu0 }
 0x790   : >> { %v16965_v12 = vpop.f32.mrb[77].mxu1  ;;  %v7259_v56 = vadd.f32 %v7206_v17, %v21952_v28  ;;  %v16909_v29 = vpop.f32.mrb[41].mxu0 }
 0x791   : >> { %v7432_v4 = vpop.f32.mrb[78].mxu1  ;;  %v7209_v6 = vpop.f32.mrb[42].mxu0 }
 0x792   : >> { %v16966_v31 = vpop.f32.mrb[79].mxu1  ;;  %v22016_v45 = vadd.f32 %v7421_v30, %v7259_v56  ;;  %v7260_v52 = vadd.f32 %v7209_v6, %v21955_v18  ;;  %v16910_v35 = vpop.f32.mrb[43].mxu0 }
 0x794   : >> { %v22019_v16 = vadd.f32 %v7424_v34, %v7260_v52 }
 0x797   : >> { %v7437_v33 = vpop.f32.mrb[80].mxu1  ;;  %v7214_v57 = vpop.f32.mrb[44].mxu0 }
 0x798   : >> { %v16969_v23 = vpop.f32.mrb[81].mxu1  ;;  %v7261_v14 = vadd.f32 %v7214_v57, %v21960_v55  ;;  %v16913_v1 = vpop.f32.mrb[45].mxu0 }
 0x799   : >> { %v7440_v27 = vpop.f32.mrb[82].mxu1  ;;  %v7217_v24 = vpop.f32.mrb[46].mxu0 }
 0x79a   : >> { %v16970_v28 = vpop.f32.mrb[83].mxu1  ;;  %v22022_v41 = vadd.f32 %v7429_v10, %v7261_v14  ;;  %v7262_v7 = vadd.f32 %v7217_v24, %v21963_v46  ;;  %v16914_v9 = vpop.f32.mrb[47].mxu0 }
 0x79c   : >> { %v22025_v2 = vadd.f32 %v7432_v4, %v7262_v7 }
 0x79f   : >> { %v7445_v18 = vpop.f32.mrb[84].mxu1  ;;  %v7222_v19 = vpop.f32.mrb[48].mxu0 }
 0x7a0   : >> { %v16973_v50 = vpop.f32.mrb[85].mxu1  ;;  %v7263_v54 = vadd.f32 %v7222_v19, %v21968_v60  ;;  %v16917_v11 = vpop.f32.mrb[49].mxu0 }
 0x7a1   : >> { %v7448_v36 = vpop.f32.mrb[86].mxu1  ;;  %v7225_v63 = vpop.f32.mrb[50].mxu0 }
 0x7a2   : >> { %v16974_v55 = vpop.f32.mrb[87].mxu1  ;;  %v22028_v5 = vadd.f32 %v7437_v33, %v7263_v54  ;;  %v7264_v62 = vadd.f32 %v7225_v63, %v21971_v58  ;;  %v16918_v42 = vpop.f32.mrb[51].mxu0 }
 0x7a4   : >> { %v22031_v47 = vadd.f32 %v7440_v27, %v7264_v62 }
 0x7a7   : >> { %v7453_v46 = vpop.f32.mrb[88].mxu1  ;;  %v7230_v51 = vpop.f32.mrb[52].mxu0 }
 0x7a8   : >> { %v16977_v38 = vpop.f32.mrb[89].mxu1  ;;  %v7265_v39 = vadd.f32 %v7230_v51, %v21976_v0  ;;  %v16921_v30 = vpop.f32.mrb[53].mxu0 }
 0x7a9   : >> { %v7456_v32 = vpop.f32.mrb[90].mxu1  ;;  %v7233_v44 = vpop.f32.mrb[54].mxu0 }
 0x7aa   : >> { %v16978_v60 = vpop.f32.mrb[91].mxu1  ;;  %v22034_v25 = vadd.f32 %v7445_v18, %v7265_v39  ;;  %v7266_v53 = vadd.f32 %v7233_v44, %v21979_v48  ;;  %v16922_v34 = vpop.f32.mrb[55].mxu0 }
 0x7ac   : >> { %v22037_v37 = vadd.f32 %v7448_v36, %v7266_v53 }
 0x7af   : >> { %v7461_v58 = vpop.f32.mrb[92].mxu1  ;;  %v7238_v61 = vpop.f32.mrb[56].mxu0 }
 0x7b0   : >> { %v16981_v15 = vpop.f32.mrb[93].mxu1  ;;  %v7267_v59 = vadd.f32 %v7238_v61, %v21984_v20  ;;  %v16925_v10 = vpop.f32.mrb[57].mxu0 }
 0x7b1   : >> { %v7464_v17 = vpop.f32.mrb[94].mxu1  ;;  %v7241_v12 = vpop.f32.mrb[58].mxu0 }
 0x7b2   : >> { %v16982_v0 = vpop.f32.mrb[95].mxu1  ;;  %v22040_v56 = vadd.f32 %v7453_v46, %v7267_v59  ;;  %v7268_v29 = vadd.f32 %v7241_v12, %v21987_v40  ;;  %v16926_v4 = vpop.f32.mrb[59].mxu0 }
 0x7b4   : >> { %v22043_v6 = vadd.f32 %v7456_v32, %v7268_v29 }
 0x7b7   : >> { %v7827_v48 = vpop.f32.mrb[96].mxu1  ;;  %v7246_v31 = vpop.f32.mrb[60].mxu0 }
 0x7b8   : >> { %v17053_v52 = vpop.f32.mrb[97].mxu1  ;;  %v7269_v35 = vadd.f32 %v7246_v31, %v21992_v49  ;;  %v16929_v33 = vpop.f32.mrb[61].mxu0 }
 0x7b9   : >> { %v7830_v57 = vpop.f32.mrb[98].mxu1  ;;  %v7249_v23 = vpop.f32.mrb[62].mxu0 }
 0x7ba   : >> { %v17054_v20 = vpop.f32.mrb[99].mxu1  ;;  %v22046_v14 = vadd.f32 %v7461_v58, %v7269_v35  ;;  %v7270_v1 = vadd.f32 %v7249_v23, %v21995_v43  ;;  %v16930_v27 = vpop.f32.mrb[63].mxu0 }
 0x7bc   : >> { %v22049_v24 = vadd.f32 %v7464_v17, %v7270_v1 }
 0x7bf   : >> { %v7835_v40 = vpop.f32.mrb[100].mxu1  ;;  %v7612_v28 = vpop.f32.mrb[64].mxu0 }
 0x7c0   : >> { %v17057_v7 = vpop.f32.mrb[101].mxu1  ;;  %v7683_v9 = vadd.f32 %v7612_v28, %v21998_v22  ;;  %v17001_v18 = vpop.f32.mrb[65].mxu0 }
 0x7c1   : >> { %v7838_v19 = vpop.f32.mrb[102].mxu1  ;;  %v7615_v50 = vpop.f32.mrb[66].mxu0 }
 0x7c2   : >> { %v17058_v49 = vpop.f32.mrb[103].mxu1  ;;  %v22052_v54 = vadd.f32 %v7827_v48, %v7683_v9  ;;  %v7684_v11 = vadd.f32 %v7615_v50, %v22001_v8  ;;  %v17002_v36 = vpop.f32.mrb[67].mxu0 }
 0x7c4   : >> { %v22055_v63 = vadd.f32 %v7830_v57, %v7684_v11 }
 0x7c7   : >> { %v7843_v43 = vpop.f32.mrb[104].mxu1  ;;  %v7620_v55 = vpop.f32.mrb[68].mxu0 }
 0x7c8   : >> { %v17061_v62 = vpop.f32.mrb[105].mxu1  ;;  %v7685_v42 = vadd.f32 %v7620_v55, %v22004_v26  ;;  %v17005_v46 = vpop.f32.mrb[69].mxu0 }
 0x7c9   : >> { %v7846_v51 = vpop.f32.mrb[106].mxu1  ;;  %v7623_v38 = vpop.f32.mrb[70].mxu0 }
 0x7ca   : >> { %v17062_v22 = vpop.f32.mrb[107].mxu1  ;;  %v22058_v39 = vadd.f32 %v7835_v40, %v7685_v42  ;;  %v7686_v30 = vadd.f32 %v7623_v38, %v22007_v3  ;;  %v17006_v32 = vpop.f32.mrb[71].mxu0 }
 0x7cc   : >> { %v22061_v44 = vadd.f32 %v7838_v19, %v7686_v30 }
 0x7cf   : >> { %v7851_v8 = vpop.f32.mrb[108].mxu1  ;;  %v7628_v60 = vpop.f32.mrb[72].mxu0 }
 0x7d0   : >> { %v17065_v53 = vpop.f32.mrb[109].mxu1  ;;  %v7687_v34 = vadd.f32 %v7628_v60, %v22010_v13  ;;  %v17009_v58 = vpop.f32.mrb[73].mxu0 }
 0x7d1   : >> { %v7854_v61 = vpop.f32.mrb[110].mxu1  ;;  %v7631_v15 = vpop.f32.mrb[74].mxu0 }
 0x7d2   : >> { %v17066_v26 = vpop.f32.mrb[111].mxu1  ;;  %v22064_v59 = vadd.f32 %v7843_v43, %v7687_v34  ;;  %v7688_v10 = vadd.f32 %v7631_v15, %v22013_v21  ;;  %v17010_v17 = vpop.f32.mrb[75].mxu0 }
 0x7d4   : >> { %v22067_v12 = vadd.f32 %v7846_v51, %v7688_v10 }
 0x7d7   : >> { %v7859_v3 = vpop.f32.mrb[112].mxu1  ;;  %v7636_v0 = vpop.f32.mrb[76].mxu0 }
 0x7d8   : >> { %v17069_v29 = vpop.f32.mrb[113].mxu1  ;;  %v7689_v4 = vadd.f32 %v7636_v0, %v22016_v45  ;;  %v17013_v48 = vpop.f32.mrb[77].mxu0 }
 0x7d9   : >> { %v7862_v31 = vpop.f32.mrb[114].mxu1  ;;  %v7639_v52 = vpop.f32.mrb[78].mxu0 }
 0x7da   : >> { %v17070_v13 = vpop.f32.mrb[115].mxu1  ;;  %v22070_v35 = vadd.f32 %v7851_v8, %v7689_v4  ;;  %v7690_v33 = vadd.f32 %v7639_v52, %v22019_v16  ;;  %v17014_v57 = vpop.f32.mrb[79].mxu0 }
 0x7dc   : >> { %v22073_v23 = vadd.f32 %v7854_v61, %v7690_v33 }
 0x7df   : >> { %v7867_v21 = vpop.f32.mrb[116].mxu1  ;;  %v7644_v20 = vpop.f32.mrb[80].mxu0 }
 0x7e0   : >> { %v17073_v1 = vpop.f32.mrb[117].mxu1  ;;  %v7691_v27 = vadd.f32 %v7644_v20, %v22022_v41  ;;  %v17017_v40 = vpop.f32.mrb[81].mxu0 }
 0x7e1   : >> { %v7870_v28 = vpop.f32.mrb[118].mxu1  ;;  %v7647_v7 = vpop.f32.mrb[82].mxu0 }
 0x7e2   : >> { %v17074_v45 = vpop.f32.mrb[119].mxu1  ;;  %v22076_v9 = vadd.f32 %v7859_v3, %v7691_v27  ;;  %v7692_v18 = vadd.f32 %v7647_v7, %v22025_v2  ;;  %v17018_v19 = vpop.f32.mrb[83].mxu0 }
 0x7e4   : >> { %v22079_v50 = vadd.f32 %v7862_v31, %v7692_v18 }
 0x7e7   : >> { %v7875_v16 = vpop.f32.mrb[120].mxu1  ;;  %v7652_v49 = vpop.f32.mrb[84].mxu0 }
 0x7e8   : >> { %v17077_v11 = vpop.f32.mrb[121].mxu1  ;;  %v7693_v36 = vadd.f32 %v7652_v49, %v22028_v5  ;;  %v17021_v43 = vpop.f32.mrb[85].mxu0 }
 0x7e9   : >> { %v7878_v55 = vpop.f32.mrb[122].mxu1  ;;  %v7655_v62 = vpop.f32.mrb[86].mxu0 }
 0x7ea   : >> { %v17078_v41 = vpop.f32.mrb[123].mxu1  ;;  %v22082_v42 = vadd.f32 %v7867_v21, %v7693_v36  ;;  %v7694_v46 = vadd.f32 %v7655_v62, %v22031_v47  ;;  %v17022_v51 = vpop.f32.mrb[87].mxu0 }
 0x7ec   : >> { %v22085_v38 = vadd.f32 %v7870_v28, %v7694_v46 }
 0x7ef   : >> { %v7883_v2 = vpop.f32.mrb[124].mxu1  ;;  %v7660_v22 = vpop.f32.mrb[88].mxu0 }
 0x7f0   : >> { %v17081_v30 = vpop.f32.mrb[125].mxu1  ;;  %v7695_v32 = vadd.f32 %v7660_v22, %v22034_v25  ;;  %v17025_v8 = vpop.f32.mrb[89].mxu0 }
 0x7f1   : >> { %v7886_v60 = vpop.f32.mrb[126].mxu1  ;;  %v7663_v53 = vpop.f32.mrb[90].mxu0 }
 0x7f2   : >> { %v17082_v5 = vpop.f32.mrb[127].mxu1  ;;  %v22088_v34 = vadd.f32 %v7875_v16, %v7695_v32  ;;  %v7696_v58 = vadd.f32 %v7663_v53, %v22037_v37  ;;  %v17026_v61 = vpop.f32.mrb[91].mxu0 }
 0x7f4   : >> { %v22091_v15 = vadd.f32 %v7878_v55, %v7696_v58 }
 0x7f7   : >> { %v7891_v47 = vpop.f32.mrb[128].mxu1  ;;  %v7668_v26 = vpop.f32.mrb[92].mxu0 }
 0x7f8   : >> { %v17085_v10 = vpop.f32.mrb[129].mxu1  ;;  %v7697_v17 = vadd.f32 %v7668_v26, %v22040_v56  ;;  %v17029_v3 = vpop.f32.mrb[93].mxu0 }
 0x7f9   : >> { %v7894_v0 = vpop.f32.mrb[130].mxu1  ;;  %v7671_v29 = vpop.f32.mrb[94].mxu0 }
 0x7fa   : >> { %v17086_v25 = vpop.f32.mrb[131].mxu1  ;;  %v22094_v4 = vadd.f32 %v7883_v2, %v7697_v17  ;;  %v7698_v48 = vadd.f32 %v7671_v29, %v22043_v6  ;;  %v17030_v31 = vpop.f32.mrb[95].mxu0  ;;  %v22108_v6 = vld [vmem:[%s23787_s5] ss:$0 sm:$0xff] }
 0x7fc   : >> { %v22097_v52 = vadd.f32 %v7886_v60, %v7698_v48 }
 0x7ff   : >> { %v7676_v37 = vpop.f32.mrb[96].mxu0 }
 0x800   : >> { %v7699_v13 = vadd.f32 %v7676_v37, %v22046_v14  ;;  %v17033_v33 = vpop.f32.mrb[97].mxu0 }
 0x801   : >> { %v7679_v57 = vpop.f32.mrb[98].mxu0 }
 0x802   : >> { %v22100_v21 = vadd.f32 %v7891_v47, %v7699_v13  ;;  %v7700_v56 = vadd.f32 %v7679_v57, %v22049_v24  ;;  %v17034_v20 = vpop.f32.mrb[99].mxu0 }
 0x804   : >> { %v22103_v1 = vadd.f32 %v7894_v0, %v7700_v56 }
 0x807   : >> { %v8042_v27 = vpop.f32.mrb[100].mxu0 }
 0x808   : >> { %v8113_v40 = vadd.f32 %v8042_v27, %v22052_v54  ;;  %v17105_v28 = vpop.f32.mrb[101].mxu0 }
 0x809   : >> { %v8045_v14 = vpop.f32.mrb[102].mxu0 }
 0x80a   : >> { %v8138_v7 = vadd.f32 %v22108_v6, %v8113_v40  ;;  %v8114_v45 = vadd.f32 %v8045_v14, %v22055_v63  ;;  %v17106_v18 = vpop.f32.mrb[103].mxu0 }
 0x80c   : >> { %v8139_v24 = vadd.f32 %v22108_v6, %v8114_v45  ;;  %18390 = vtanh.f32 %v8138_v7 }
 0x80e   : >> { %18392 = vtanh.f32 %v8139_v24 }
 0x80f   : >> { %v8050_v19 = vpop.f32.mrb[104].mxu0 }
 0x810   : >> { %v8115_v16 = vadd.f32 %v8050_v19, %v22058_v39  ;;  %v17109_v49 = vpop.f32.mrb[105].mxu0 }
 0x811   : >> { %v8053_v11 = vpop.f32.mrb[106].mxu0 }
 0x812   : >> { %v8140_v36 = vadd.f32 %v22108_v6, %v8115_v16  ;;  %v8116_v54 = vadd.f32 %v8053_v11, %v22061_v44  ;;  %v17110_v43 = vpop.f32.mrb[107].mxu0 }
 0x814   : >> { %v8141_v55 = vadd.f32 %v22108_v6, %v8116_v54  ;;  %18394 = vtanh.f32 %v8140_v36 }
 0x816   : >> { %18396 = vtanh.f32 %v8141_v55  ;;  %v18391_v63 = vpop.eup %18390 }
 0x817   : >> { %v8058_v62 = vpop.f32.mrb[108].mxu0 }
 0x818   : >> { %v18393_v41 = vpop.eup %18392  ;;  %v8117_v46 = vadd.f32 %v8058_v62, %v22064_v59  ;;  %v17113_v51 = vpop.f32.mrb[109].mxu0 }
 0x819   : >> { %v8174_v2 = vpack.c.bf16 %v18393_v41, %v18391_v63  ;;  %v8061_v39 = vpop.f32.mrb[110].mxu0 }
 0x81a   : >> { %v8142_v22 = vadd.f32 %v22108_v6, %v8117_v46  ;;  %v8118_v30 = vadd.f32 %v8061_v39, %v22067_v12  ;;  %v17114_v32 = vpop.f32.mrb[111].mxu0 }
 0x81b   : >> { %8186 = vst [vmem:[%s22122_s21] sm:$0xff] %v8174_v2 }
 0x81c   : >> { %v8143_v44 = vadd.f32 %v22108_v6, %v8118_v30  ;;  %18398 = vtanh.f32 %v8142_v22 }
 0x81e   : >> { %18400 = vtanh.f32 %v8143_v44  ;;  %v18395_v8 = vpop.eup %18394 }
 0x81f   : >> { %v8066_v60 = vpop.f32.mrb[112].mxu0 }
 0x820   : >> { %v18397_v59 = vpop.eup %18396  ;;  %v8119_v53 = vadd.f32 %v8066_v60, %v22070_v35  ;;  %v17117_v5 = vpop.f32.mrb[113].mxu0 }
 0x821   : >> { %v8175_v58 = vpack.c.bf16 %v18397_v59, %v18395_v8  ;;  %v8069_v61 = vpop.f32.mrb[114].mxu0 }
 0x822   : >> { %v8144_v12 = vadd.f32 %v22108_v6, %v8119_v53  ;;  %v8120_v47 = vadd.f32 %v8069_v61, %v22073_v23  ;;  %v17118_v26 = vpop.f32.mrb[115].mxu0 }
 0x823   : >> { %8187 = vst [vmem:[%s22122_s21 + $0x8] sm:$0xff] %v8175_v58 }
 0x824   : >> { %v8145_v10 = vadd.f32 %v22108_v6, %v8120_v47  ;;  %18402 = vtanh.f32 %v8144_v12 }
 0x826   : >> { %18404 = vtanh.f32 %v8145_v10  ;;  %v18399_v17 = vpop.eup %18398 }
 0x827   : >> { %v8074_v3 = vpop.f32.mrb[116].mxu0 }
 0x828   : >> { %v18401_v0 = vpop.eup %18400  ;;  %v8121_v29 = vadd.f32 %v8074_v3, %v22076_v9  ;;  %v17121_v35 = vpop.f32.mrb[117].mxu0 }
 0x829   : >> { %v8176_v25 = vpack.c.bf16 %v18401_v0, %v18399_v17  ;;  %v8077_v48 = vpop.f32.mrb[118].mxu0 }
 0x82a   : >> { %v8146_v31 = vadd.f32 %v22108_v6, %v8121_v29  ;;  %v8122_v37 = vadd.f32 %v8077_v48, %v22079_v50  ;;  %v17122_v23 = vpop.f32.mrb[119].mxu0 }
 0x82b   : >> { %8188 = vst [vmem:[%s22122_s21 + $0x10] sm:$0xff] %v8176_v25 }
 0x82c   : >> { %v8147_v13 = vadd.f32 %v22108_v6, %v8122_v37  ;;  %18406 = vtanh.f32 %v8146_v31 }
 0x82e   : >> { %18408 = vtanh.f32 %v8147_v13  ;;  %v18403_v33 = vpop.eup %18402 }
 0x82f   : >> { %v8082_v57 = vpop.f32.mrb[120].mxu0 }
 0x830   : >> { %v18405_v56 = vpop.eup %18404  ;;  %v8123_v20 = vadd.f32 %v8082_v57, %v22082_v42  ;;  %v17125_v9 = vpop.f32.mrb[121].mxu0 }
 0x831   : >> { %v8177_v27 = vpack.c.bf16 %v18405_v56, %v18403_v33  ;;  %v8085_v40 = vpop.f32.mrb[122].mxu0 }
 0x832   : >> { %v8148_v28 = vadd.f32 %v22108_v6, %v8123_v20  ;;  %v8124_v14 = vadd.f32 %v8085_v40, %v22085_v38  ;;  %v17126_v50 = vpop.f32.mrb[123].mxu0  ;;  %v18429_v20 = vld [vmem:[%s23788_s6 + $0x4] ss:$36 sps:$4 sm:$0xff] (%p447_p11)  }
 0x833   : >> { %8189 = vst [vmem:[%s22122_s21 + $0x18] sm:$0xff] %v8177_v27  ;;  %9008 = vmatprep.mubr.bf16.mxu0 (%p447_p11), %v18429_v20  ;;  %v18432_v27 = vld [vmem:[%s23788_s6 + $0xc] ss:$36 sps:$4 sm:$0xff] (%p447_p11)   ;;  %v18459_v20 = vld [vmem:[%s23788_s6 + $0x174] ss:$36 sps:$4 sm:$0xff] (%p447_p11)  }
 0x834   : >> { %v8149_v7 = vadd.f32 %v22108_v6, %v8124_v14  ;;  %18410 = vtanh.f32 %v8148_v28  ;;  %9144 = vmatprep.mubr.bf16.mxu1 (%p447_p11), %v18432_v27  ;;  %v18886_v27 = vmov (%p447_p11), 0.0  }
 0x836   : >> { %18412 = vtanh.f32 %v8149_v7  ;;  %v18407_v45 = vpop.eup %18406 }
 0x837   : >> { %v8090_v18 = vpop.f32.mrb[124].mxu0 }
 0x838   : >> { %v18409_v24 = vpop.eup %18408  ;;  %v8125_v19 = vadd.f32 %v8090_v18, %v22088_v34  ;;  %v17129_v42 = vpop.f32.mrb[125].mxu0 }
 0x839   : >> { %v8178_v16 = vpack.c.bf16 %v18409_v24, %v18407_v45  ;;  %v8093_v49 = vpop.f32.mrb[126].mxu0 }
 0x83a   : >> { %v8150_v11 = vadd.f32 %v22108_v6, %v8125_v19  ;;  %v8126_v36 = vadd.f32 %v8093_v49, %v22091_v15  ;;  %v17130_v38 = vpop.f32.mrb[127].mxu0 }
 0x83b   : >> { %8190 = vst [vmem:[%s22122_s21 + $0x20] sm:$0xff] %v8178_v16  ;;  %v18427_v38 = vld [vmem:[%s23788_s6] ss:$36 sps:$4 sm:$0xff] (%p447_p11)  }
 0x83c   : >> { %v8151_v54 = vadd.f32 %v22108_v6, %v8126_v36  ;;  %18414 = vtanh.f32 %v8150_v11 }
 0x83e   : >> { %18416 = vtanh.f32 %v8151_v54  ;;  %v18411_v43 = vpop.eup %18410 }
 0x83f   : >> { %v8098_v55 = vpop.f32.mrb[128].mxu0 }
 0x840   : >> { %v18413_v63 = vpop.eup %18412  ;;  %v8127_v62 = vadd.f32 %v8098_v55, %v22094_v4  ;;  %v17133_v34 = vpop.f32.mrb[129].mxu0  ;;  %v18433_v55 = vld [vmem:[%s23788_s6 + $0x4c] ss:$36 sps:$4 sm:$0xff] (%p447_p11)  }
 0x841   : >> { %v8179_v41 = vpack.c.bf16 %v18413_v63, %v18411_v43  ;;  %v8101_v46 = vpop.f32.mrb[130].mxu0  ;;  %v18430_v43 = vld [vmem:[%s23788_s6 + $0x8] ss:$36 sps:$4 sm:$0xff] (%p447_p11)  }
 0x842   : >> { %v8152_v51 = vadd.f32 %v22108_v6, %v8127_v62  ;;  %v8128_v2 = vadd.f32 %v8101_v46, %v22097_v52  ;;  %v17134_v15 = vpop.f32.mrb[131].mxu0  ;;  %v18435_v62 = vld [vmem:[%s23788_s6 + $0x54] ss:$36 sps:$4 sm:$0xff] (%p447_p11)  }
 0x843   : >> { %8191 = vst [vmem:[%s22122_s21 + $0x28] sm:$0xff] %v8179_v41  ;;  %v18439_v15 = vld [vmem:[%s23788_s6 + $0x94] ss:$36 sps:$4 sm:$0xff] (%p447_p11)  }
 0x844   : >> { %v8153_v39 = vadd.f32 %v22108_v6, %v8128_v2  ;;  %18418 = vtanh.f32 %v8152_v51  ;;  %v18437_v51 = vld [vmem:[%s23788_s6 + $0x48] ss:$36 sps:$4 sm:$0xff] (%p447_p11)   ;;  %v18438_v2 = vld [vmem:[%s23788_s6 + $0x50] ss:$36 sps:$4 sm:$0xff] (%p447_p11)  }
 0x846   : >> { %18420 = vtanh.f32 %v8153_v39  ;;  %v18415_v22 = vpop.eup %18414  ;;  %v18441_v39 = vld [vmem:[%s23788_s6 + $0x9c] ss:$36 sps:$4 sm:$0xff] (%p447_p11)  }
 0x847   : >> { %v8106_v30 = vpop.f32.mrb[132].mxu0 }
 0x848   : >> { %v18417_v32 = vpop.eup %18416  ;;  %v8129_v4 = vadd.f32 %v8106_v30, %v22100_v21  ;;  %v17137_v44 = vpop.f32.mrb[133].mxu0 }
 0x849   : >> { %v8180_v8 = vpack.c.bf16 %v18417_v32, %v18415_v22  ;;  %v8109_v60 = vpop.f32.mrb[134].mxu0 }
 0x84a   : >> { %v8154_v59 = vadd.f32 %v22108_v6, %v8129_v4  ;;  %v8130_v52 = vadd.f32 %v8109_v60, %v22103_v1  ;;  %v17138_v53 = vpop.f32.mrb[135].mxu0 }
 0x84b   : >> { %8192 = vst [vmem:[%s22122_s21 + $0x30] sm:$0xff] %v8180_v8  ;;  %v18443_v8 = vld [vmem:[%s23788_s6 + $0x90] ss:$36 sps:$4 sm:$0xff] (%p447_p11)  }
 0x84c   : >> { %v8155_v5 = vadd.f32 %v22108_v6, %v8130_v52  ;;  %18422 = vtanh.f32 %v8154_v59  ;;  %v18444_v59 = vld [vmem:[%s23788_s6 + $0x98] ss:$36 sps:$4 sm:$0xff] (%p447_p11)  }
 0x84e   : >> { %18424 = vtanh.f32 %v8155_v5  ;;  %v18419_v58 = vpop.eup %18418  ;;  %v18445_v5 = vld [vmem:[%s23788_s6 + $0xdc] ss:$36 sps:$4 sm:$0xff] (%p447_p11)  }
 0x850   : >> { %v18421_v61 = vpop.eup %18420 }
 0x851   : >> { %v8181_v12 = vpack.c.bf16 %v18421_v61, %v18419_v58  ;;  %v18447_v58 = vld [vmem:[%s23788_s6 + $0xe4] ss:$36 sps:$4 sm:$0xff] (%p447_p11)  }
 0x853   : >> { %8193 = vst [vmem:[%s22122_s21 + $0x38] sm:$0xff] %v8181_v12 }
 0x855   : > { %449 = sbr.rel (!%p447_p11) target bundleno = 30 (0x1e), region = 164 }
 0x856   : >> { %v18423_v47 = vpop.eup %18422 }
 0x858   : >> { %v18425_v21 = vpop.eup %18424 }
 0x859   : >> { %v8182_v26 = vpack.c.bf16 %v18425_v21, %v18423_v47 }
 0x85b   : >> { %8194 = vst [vmem:[%s22122_s21 + $0x40] sm:$0xff] %v8182_v26  ;;  %s12564_s21 = scalar_lea.sflag (%p447_p11), [#allocation5], %s23810_s29 }
 0x862   : > { %v8203_v1 = vld [vmem:[#allocation3 + $0x40] sm:$0xff]  ;;  %v8204_v3 = vld [vmem:[#allocation3 + $0x48] sm:$0xff]  ;;  %v8205_v25 = vld [vmem:[#allocation3 + $0x50] sm:$0xff] }
 0x863   : > { %v8219_v10 = vld [vmem:[#allocation3 + $0xc0] sm:$0xff]  ;;  %14969 = vmatprep.subr.bf16.mxu0 %v8203_v1  ;;  %v8220_v0 = vld [vmem:[#allocation3 + $0xc8] sm:$0xff]  ;;  %v8221_v48 = vld [vmem:[#allocation3 + $0xd0] sm:$0xff] }
 0x864   : > { %v8195_v17 = vld [vmem:[#allocation3] sm:$0xff]  ;;  %15063 = vmatprep.subr.bf16.mxu1 %v8219_v10  ;;  %v8196_v29 = vld [vmem:[#allocation3 + $0x8] sm:$0xff]  ;;  %v8197_v31 = vld [vmem:[#allocation3 + $0x10] sm:$0xff] }
 0x865   : > { %v8211_v6 = vld [vmem:[#allocation3 + $0x80] sm:$0xff]  ;;  %14970 = vmatpush3.bf16.msra.mxu0 %v8195_v17  ;;  %v8212_v35 = vld [vmem:[#allocation3 + $0x88] sm:$0xff]  ;;  %v8213_v37 = vld [vmem:[#allocation3 + $0x90] sm:$0xff] }
 0x866   : > { %15064 = vmatpush3.bf16.msra.mxu1 %v8211_v6  ;;  %14971 = vmatprep.subr.bf16.mxu0 %v8204_v3  ;;  %v8206_v23 = vld [vmem:[#allocation3 + $0x58] sm:$0xff]  ;;  %v8207_v56 = vld [vmem:[#allocation3 + $0x60] sm:$0xff]  ;;  %v8208_v14 = vld [vmem:[#allocation3 + $0x68] sm:$0xff] }
 0x867   : > { %15065 = vmatprep.subr.bf16.mxu1 %v8220_v0  ;;  %v8222_v13 = vld [vmem:[#allocation3 + $0xd8] sm:$0xff]  ;;  %v8223_v9 = vld [vmem:[#allocation3 + $0xe0] sm:$0xff]  ;;  %v8224_v50 = vld [vmem:[#allocation3 + $0xe8] sm:$0xff] }
 0x868   : > { %v8198_v33 = vld [vmem:[#allocation3 + $0x18] sm:$0xff]  ;;  %v8199_v40 = vld [vmem:[#allocation3 + $0x20] sm:$0xff]  ;;  %v8200_v7 = vld [vmem:[#allocation3 + $0x28] sm:$0xff] }
 0x869   : > { %14972 = vmatpush3.bf16.msra.mxu0 %v8196_v29  ;;  %v8214_v57 = vld [vmem:[#allocation3 + $0x98] sm:$0xff]  ;;  %v8215_v28 = vld [vmem:[#allocation3 + $0xa0] sm:$0xff]  ;;  %v8216_v45 = vld [vmem:[#allocation3 + $0xa8] sm:$0xff] }
 0x86a   : > { %15066 = vmatpush3.bf16.msra.mxu1 %v8212_v35  ;;  %14973 = vmatprep.subr.bf16.mxu0 %v8205_v25  ;;  %v8209_v18 = vld [vmem:[#allocation3 + $0x70] sm:$0xff]  ;;  %v8210_v16 = vld [vmem:[#allocation3 + $0x78] sm:$0xff]  ;;  %v8235_v54 = vld [vmem:[#allocation3 + $0x140] sm:$0xff] }
 0x86b   : > { %15067 = vmatprep.subr.bf16.mxu1 %v8221_v48  ;;  %v8225_v24 = vld [vmem:[#allocation3 + $0xf0] sm:$0xff]  ;;  %v8226_v49 = vld [vmem:[#allocation3 + $0xf8] sm:$0xff]  ;;  %v8227_v63 = vld [vmem:[#allocation3 + $0x100] sm:$0xff] }
 0x86c   : > { %v8201_v19 = vld [vmem:[#allocation3 + $0x30] sm:$0xff]  ;;  %v8202_v11 = vld [vmem:[#allocation3 + $0x38] sm:$0xff]  ;;  %v8236_v34 = vld [vmem:[#allocation3 + $0x148] sm:$0xff] }
 0x86d   : > { %14974 = vmatpush3.bf16.msra.mxu0 %v8197_v31  ;;  %v8217_v42 = vld [vmem:[#allocation3 + $0xb0] sm:$0xff]  ;;  %v8218_v36 = vld [vmem:[#allocation3 + $0xb8] sm:$0xff]  ;;  %v8228_v41 = vld [vmem:[#allocation3 + $0x108] sm:$0xff] }
 0x86e   : > { %15068 = vmatpush3.bf16.msra.mxu1 %v8213_v37  ;;  %14975 = vmatprep.subr.bf16.mxu0 %v8206_v23  ;;  %v8237_v46 = vld [vmem:[#allocation3 + $0x150] sm:$0xff]  ;;  %v8238_v30 = vld [vmem:[#allocation3 + $0x158] sm:$0xff]  ;;  %v8251_v32 = vld [vmem:[#allocation3 + $0x1c0] sm:$0xff] }
 0x86f   : > { %15069 = vmatprep.subr.bf16.mxu1 %v8222_v13  ;;  %v8229_v22 = vld [vmem:[#allocation3 + $0x110] sm:$0xff]  ;;  %v8243_v4 = vld [vmem:[#allocation3 + $0x180] sm:$0xff]  ;;  %v8252_v44 = vld [vmem:[#allocation3 + $0x1c8] sm:$0xff] }
 0x870   : > { %v8230_v60 = vld [vmem:[#allocation3 + $0x118] sm:$0xff]  ;;  %v8239_v52 = vld [vmem:[#allocation3 + $0x160] sm:$0xff]  ;;  %v8244_v53 = vld [vmem:[#allocation3 + $0x188] sm:$0xff] }
 0x871   : > { %14976 = vmatpush3.bf16.msra.mxu0 %v8198_v33  ;;  %v8231_v61 = vld [vmem:[#allocation3 + $0x120] sm:$0xff]  ;;  %v8253_v12 = vld [vmem:[#allocation3 + $0x1d0] sm:$0xff]  ;;  %v8240_v47 = vld [vmem:[#allocation3 + $0x168] sm:$0xff] }
 0x872   : > { %15070 = vmatpush3.bf16.msra.mxu1 %v8214_v57  ;;  %14977 = vmatprep.subr.bf16.mxu0 %v8207_v56  ;;  %v8245_v21 = vld [vmem:[#allocation3 + $0x190] sm:$0xff]  ;;  %v8254_v26 = vld [vmem:[#allocation3 + $0x1d8] sm:$0xff]  ;;  %v18450_v10 = vld [vmem:[%s23788_s6 + $0xe0] ss:$36 sps:$4 sm:$0xff]  }
 0x873   : > { %15071 = vmatprep.subr.bf16.mxu1 %v8223_v9  ;;  %v18449_v1 = vld [vmem:[%s23788_s6 + $0xd8] ss:$36 sps:$4 sm:$0xff]   ;;  %v8232_v17 = vld [vmem:[#allocation3 + $0x128] sm:$0xff]  ;;  %v8241_v6 = vld [vmem:[#allocation3 + $0x170] sm:$0xff] }
 0x874   : > { %v8246_v3 = vld [vmem:[#allocation3 + $0x198] sm:$0xff]  ;;  %v18451_v0 = vld [vmem:[%s23788_s6 + $0x124] ss:$36 sps:$4 sm:$0xff]   ;;  %v18453_v29 = vld [vmem:[%s23788_s6 + $0x12c] ss:$36 sps:$4 sm:$0xff]  }
 0x875   : > { %14978 = vmatpush3.bf16.msra.mxu0 %v8199_v40  ;;  %v8233_v35 = vld [vmem:[#allocation3 + $0x130] sm:$0xff]  ;;  %v8255_v25 = vld [vmem:[#allocation3 + $0x1e0] sm:$0xff]  ;;  %v8242_v48 = vld [vmem:[#allocation3 + $0x178] sm:$0xff] }
 0x876   : > { %15072 = vmatpush3.bf16.msra.mxu1 %v8215_v28  ;;  %14979 = vmatprep.subr.bf16.mxu0 %v8208_v14  ;;  %v8247_v31 = vld [vmem:[#allocation3 + $0x1a0] sm:$0xff]  ;;  %v8256_v37 = vld [vmem:[#allocation3 + $0x1e8] sm:$0xff]  ;;  %v8234_v33 = vld [vmem:[#allocation3 + $0x138] sm:$0xff] }
 0x877   : > { %15073 = vmatprep.subr.bf16.mxu1 %v8224_v50  ;;  %v18455_v23 = vld [vmem:[%s23788_s6 + $0x120] ss:$36 sps:$4 sm:$0xff]   ;;  %v18456_v13 = vld [vmem:[%s23788_s6 + $0x128] ss:$36 sps:$4 sm:$0xff]   ;;  %v8257_v9 = vld [vmem:[#allocation3 + $0x1f0] sm:$0xff] }
 0x878   : > { %v8248_v57 = vld [vmem:[#allocation3 + $0x1a8] sm:$0xff]  ;;  %v8249_v40 = vld [vmem:[#allocation3 + $0x1b0] sm:$0xff]  ;;  %v8258_v28 = vld [vmem:[#allocation3 + $0x1f8] sm:$0xff] }
 0x879   : > { %14980 = vmatpush3.bf16.msra.mxu0 %v8200_v7  ;;  %v18457_v56 = vld [vmem:[%s23788_s6 + $0x16c] ss:$36 sps:$4 sm:$0xff]   ;;  %v18463_v7 = vld [vmem:[%s23788_s6 + $0x1b4] ss:$36 sps:$4 sm:$0xff]  }
 0x87a   : > { %15074 = vmatpush3.bf16.msra.mxu1 %v8216_v45  ;;  %14981 = vmatprep.subr.bf16.mxu0 %v8209_v18  ;;  %v18461_v14 = vld [vmem:[%s23788_s6 + $0x168] ss:$36 sps:$4 sm:$0xff]   ;;  %v18462_v50 = vld [vmem:[%s23788_s6 + $0x170] ss:$36 sps:$4 sm:$0xff]   ;;  %v8250_v45 = vld [vmem:[#allocation3 + $0x1b8] sm:$0xff] }
 0x87b   : > { %15075 = vmatprep.subr.bf16.mxu1 %v8225_v24  ;;  %v18465_v18 = vld [vmem:[%s23788_s6 + $0x1bc] ss:$36 sps:$4 sm:$0xff]   ;;  %v18467_v24 = vld [vmem:[%s23788_s6 + $0x1b0] ss:$36 sps:$4 sm:$0xff]  }
 0x87d   : > { %14982 = vmatpush3.bf16.msra.mxu0 %v8201_v19  ;;  %v18468_v19 = vld [vmem:[%s23788_s6 + $0x1b8] ss:$36 sps:$4 sm:$0xff]  }
 0x87e   : > { %15076 = vmatpush3.bf16.msra.mxu1 %v8217_v42  ;;  %14983 = vmatprep.subr.bf16.mxu0 %v8210_v16  ;;  %v18469_v42 = vld [vmem:[%s23788_s6 + $0x1fc] ss:$36 sps:$4 sm:$0xff]   ;;  %v18471_v16 = vld [vmem:[%s23788_s6 + $0x204] ss:$36 sps:$4 sm:$0xff]  }
 0x87f   : > { %15077 = vmatprep.subr.bf16.mxu1 %v8226_v49  ;;  %v18473_v49 = vld [vmem:[%s23788_s6 + $0x1f8] ss:$36 sps:$4 sm:$0xff]  }
 0x881   : > { %14984 = vmatpush3.bf16.msra.mxu0 %v8202_v11  ;;  %v18474_v11 = vld [vmem:[%s23788_s6 + $0x200] ss:$36 sps:$4 sm:$0xff]  }
 0x882   : > { %15078 = vmatpush3.bf16.msra.mxu1 %v8218_v36  ;;  %15157 = vmatprep.subr.bf16.mxu0 %v8235_v54  ;;  %v18475_v36 = vld [vmem:[%s23788_s6 + $0x244] ss:$36 sps:$4 sm:$0xff]  }
 0x883   : > { %15251 = vmatprep.subr.bf16.mxu1 %v8251_v32  ;;  %v18479_v54 = vld [vmem:[%s23788_s6 + $0x240] ss:$36 sps:$4 sm:$0xff]   ;;  %v18497_v32 = vld [vmem:[%s23788_s6 + $0x318] ss:$36 sps:$4 sm:$0xff]  }
 0x884   : > { %9009 = vmatmul.mubr.bf16.vlgmr.msra.gmra.mrb[0].mxu0 %v18427_v38  ;;  %v18477_v38 = vld [vmem:[%s23788_s6 + $0x24c] ss:$36 sps:$4 sm:$0xff]  }
 0x885   : > { %9145 = vmatmul.mubr.bf16.vlgmr.msra.gmra.mrb[0].mxu1 %v18430_v43  ;;  %15158 = vmatpush3.bf16.msra.mxu0 %v8227_v63  ;;  %v18480_v43 = vld [vmem:[%s23788_s6 + $0x248] ss:$36 sps:$4 sm:$0xff]   ;;  %v18483_v63 = vld [vmem:[%s23788_s6 + $0x294] ss:$36 sps:$4 sm:$0xff]  }
 0x886   : > { %9016 = vmatprep.mubr.bf16.mxu0 %v18433_v55  ;;  %9152 = vmatprep.mubr.bf16.mxu1 %v18435_v62  ;;  %v18481_v55 = vld [vmem:[%s23788_s6 + $0x28c] ss:$36 sps:$4 sm:$0xff]  }
 0x887   : > { %15159 = vmatprep.subr.bf16.mxu0 %v8236_v34  ;;  %15252 = vmatpush3.bf16.msra.mxu1 %v8243_v4  ;;  %v18485_v62 = vld [vmem:[%s23788_s6 + $0x288] ss:$36 sps:$4 sm:$0xff]   ;;  %v18486_v34 = vld [vmem:[%s23788_s6 + $0x290] ss:$36 sps:$4 sm:$0xff]   ;;  %v18498_v4 = vld [vmem:[%s23788_s6 + $0x320] ss:$36 sps:$4 sm:$0xff]  }
 0x888   : > { %15253 = vmatprep.subr.bf16.mxu1 %v8252_v44 }
 0x889   : > { %15160 = vmatpush3.bf16.msra.mxu0 %v8228_v41  ;;  %v18487_v41 = vld [vmem:[%s23788_s6 + $0x2d4] ss:$36 sps:$4 sm:$0xff]  }
 0x88a   : > { %15161 = vmatprep.subr.bf16.mxu0 %v8237_v46  ;;  %v18489_v46 = vld [vmem:[%s23788_s6 + $0x2dc] ss:$36 sps:$4 sm:$0xff]  }
 0x88b   : > { %15254 = vmatpush3.bf16.msra.mxu1 %v8244_v53 }
 0x88c   : > { %9017 = vmatmul.mubr.bf16.gmra.mrb[4].mxu0 %v18437_v51  ;;  %15255 = vmatprep.subr.bf16.mxu1 %v8253_v12  ;;  %v18491_v51 = vld [vmem:[%s23788_s6 + $0x2d0] ss:$36 sps:$4 sm:$0xff]   ;;  %v8259_v12 = vld [vmem:[#allocation3 + $0x200] sm:$0xff] }
 0x88d   : > { %9153 = vmatmul.mubr.bf16.gmra.mrb[4].mxu1 %v18438_v2  ;;  %9024 = vmatprep.mubr.bf16.mxu0 %v18439_v15  ;;  %v18492_v2 = vld [vmem:[%s23788_s6 + $0x2d8] ss:$36 sps:$4 sm:$0xff]  }
 0x88e   : > { %9160 = vmatprep.mubr.bf16.mxu1 %v18441_v39  ;;  %15162 = vmatpush3.bf16.msra.mxu0 %v8229_v22  ;;  %v18493_v15 = vld [vmem:[%s23788_s6 + $0x31c] ss:$36 sps:$4 sm:$0xff]   ;;  %v18495_v39 = vld [vmem:[%s23788_s6 + $0x324] ss:$36 sps:$4 sm:$0xff]  }
 0x88f   : > { %15163 = vmatprep.subr.bf16.mxu0 %v8238_v30  ;;  %15256 = vmatpush3.bf16.msra.mxu1 %v8245_v21  ;;  %v8387_v22 = vld [vmem:[%s23788_s6 + $0x360] sm:$0xff]  ;;  %v8388_v30 = vld [vmem:[%s23788_s6 + $0x368] sm:$0xff] }
 0x890   : > { %15257 = vmatprep.subr.bf16.mxu1 %v8254_v26  ;;  %v13561_v44 = vcombine.high %v8387_v22, %v8387_v22  ;;  %v13562_v53 = vcombine.low %v8388_v30, %v8388_v30  ;;  %v8260_v21 = vld [vmem:[#allocation3 + $0x208] sm:$0xff]  ;;  %v18511_v26 = vld [vmem:[%s23788_s6 + $0x58] ss:$36 sps:$4 sm:$0xff]  }
 0x892   : > { %15164 = vmatpush3.bf16.msra.mxu0 %v8230_v60  ;;  %v18505_v60 = vld [vmem:[%s23788_s6 + $0x14] ss:$36 sps:$4 sm:$0xff]  }
 0x893   : > { %15165 = vmatprep.subr.bf16.mxu0 %v8239_v52  ;;  %15258 = vmatpush3.bf16.msra.mxu1 %v8246_v3  ;;  %v13560_v52 = vcombine.low %v8387_v22, %v8387_v22  ;;  %v8262_v3 = vld [vmem:[#allocation3 + $0x218] sm:$0xff] }
 0x894   : > { %9025 = vmatmul.mubr.bf16.gmra.mrb[8].mxu0 %v18443_v8  ;;  %15259 = vmatprep.subr.bf16.mxu1 %v8255_v25  ;;  %v13563_v8 = vcombine.high %v8388_v30, %v8388_v30  ;;  %v18524_v25 = vld [vmem:[%s23788_s6 + $0xf4] ss:$36 sps:$4 sm:$0xff]   ;;  %v18571_v30 = vld [vmem:[%s23788_s6 + $0x328] ss:$36 sps:$4 sm:$0xff]  }
 0x895   : > { %9161 = vmatmul.mubr.bf16.gmra.mrb[8].mxu1 %v18444_v59  ;;  %9032 = vmatprep.mubr.bf16.mxu0 %v18445_v5  ;;  %v18508_v59 = vld [vmem:[%s23788_s6 + $0x1c] ss:$36 sps:$4 sm:$0xff]   ;;  %v18503_v5 = vld [vmem:[%s23788_s6 + $0x10] ss:$36 sps:$4 sm:$0xff]  }
 0x896   : > { %9168 = vmatprep.mubr.bf16.mxu1 %v18447_v58  ;;  %15166 = vmatpush3.bf16.msra.mxu0 %v8231_v61  ;;  %v18506_v58 = vld [vmem:[%s23788_s6 + $0x18] ss:$36 sps:$4 sm:$0xff]  }
 0x897   : > { %15167 = vmatprep.subr.bf16.mxu0 %v8240_v47  ;;  %15260 = vmatpush3.bf16.msra.mxu1 %v8247_v31  ;;  %v18509_v61 = vld [vmem:[%s23788_s6 + $0x5c] ss:$36 sps:$4 sm:$0xff]   ;;  %v18512_v47 = vld [vmem:[%s23788_s6 + $0x64] ss:$36 sps:$4 sm:$0xff]  }
 0x898   : > { %15261 = vmatprep.subr.bf16.mxu1 %v8256_v37  ;;  %v8264_v31 = vld [vmem:[#allocation3 + $0x228] sm:$0xff]  ;;  %v8390_v22 = vld [vmem:[%s23788_s6 + $0x378] sm:$0xff] }
 0x899   : > { %v18523_v37 = vld [vmem:[%s23788_s6 + $0xe8] ss:$36 sps:$4 sm:$0xff]  }
 0x89a   : > { %15168 = vmatpush3.bf16.msra.mxu0 %v8232_v17  ;;  %v18518_v17 = vld [vmem:[%s23788_s6 + $0xac] ss:$36 sps:$4 sm:$0xff]  }
 0x89b   : > { %15169 = vmatprep.subr.bf16.mxu0 %v8241_v6  ;;  %15262 = vmatpush3.bf16.msra.mxu1 %v8248_v57  ;;  %v8261_v6 = vld [vmem:[#allocation3 + $0x210] sm:$0xff] }
 0x89c   : > { %9033 = vmatmul.mubr.bf16.gmra.mrb[12].mxu0 %v18449_v1  ;;  %15263 = vmatprep.subr.bf16.mxu1 %v8257_v9  ;;  %v18514_v1 = vld [vmem:[%s23788_s6 + $0x60] ss:$36 sps:$4 sm:$0xff]   ;;  %v8265_v57 = vld [vmem:[#allocation3 + $0x230] sm:$0xff]  ;;  %v18532_v9 = vld [vmem:[%s23788_s6 + $0x138] ss:$36 sps:$4 sm:$0xff]  }
 0x89d   : > { %9169 = vmatmul.mubr.bf16.gmra.mrb[12].mxu1 %v18450_v10  ;;  %9040 = vmatprep.mubr.bf16.mxu0 %v18451_v0  ;;  %v18515_v10 = vld [vmem:[%s23788_s6 + $0xa4] ss:$36 sps:$4 sm:$0xff]  }
 0x89e   : > { %9176 = vmatprep.mubr.bf16.mxu1 %v18453_v29  ;;  %15170 = vmatpush3.bf16.msra.mxu0 %v8233_v35  ;;  %v18517_v0 = vld [vmem:[%s23788_s6 + $0xa0] ss:$36 sps:$4 sm:$0xff]   ;;  %v18520_v29 = vld [vmem:[%s23788_s6 + $0xa8] ss:$36 sps:$4 sm:$0xff]  }
 0x89f   : > { %15171 = vmatprep.subr.bf16.mxu0 %v8242_v48  ;;  %15264 = vmatpush3.bf16.msra.mxu1 %v8249_v40  ;;  %v18521_v35 = vld [vmem:[%s23788_s6 + $0xec] ss:$36 sps:$4 sm:$0xff]   ;;  %v8263_v48 = vld [vmem:[#allocation3 + $0x220] sm:$0xff] }
 0x8a0   : > { %15265 = vmatprep.subr.bf16.mxu1 %v8258_v28  ;;  %v18533_v40 = vld [vmem:[%s23788_s6 + $0x17c] ss:$36 sps:$4 sm:$0xff]   ;;  %v18536_v28 = vld [vmem:[%s23788_s6 + $0x184] ss:$36 sps:$4 sm:$0xff]  }
 0x8a2   : > { %15172 = vmatpush3.bf16.msra.mxu0 %v8234_v33  ;;  %v18530_v33 = vld [vmem:[%s23788_s6 + $0x13c] ss:$36 sps:$4 sm:$0xff]  }
 0x8a3   : > { %17139 = vmatprep.subr.bf16.mxu0 %v18886_v27  ;;  %15266 = vmatpush3.bf16.msra.mxu1 %v8250_v45  ;;  %v18542_v45 = vld [vmem:[%s23788_s6 + $0x1cc] ss:$36 sps:$4 sm:$0xff]  }
 0x8a4   : > { %9041 = vmatmul.mubr.bf16.gmra.mrb[16].mxu0 %v18455_v23  ;;  %17207 = vmatprep.subr.bf16.mxu1 %v18886_v27  ;;  %v18526_v23 = vld [vmem:[%s23788_s6 + $0xf0] ss:$36 sps:$4 sm:$0xff]  }
 0x8a5   : > { %9177 = vmatmul.mubr.bf16.gmra.mrb[16].mxu1 %v18456_v13  ;;  %9048 = vmatprep.mubr.bf16.mxu0 %v18457_v56  ;;  %v18527_v13 = vld [vmem:[%s23788_s6 + $0x134] ss:$36 sps:$4 sm:$0xff]  }
 0x8a6   : > { %9184 = vmatprep.mubr.bf16.mxu1 %v18459_v20  ;;  %v8266_v56 = vld [vmem:[#allocation3 + $0x238] sm:$0xff]  ;;  %v18529_v20 = vld [vmem:[%s23788_s6 + $0x130] ss:$36 sps:$4 sm:$0xff]  }
 0x8ac   : > { %9049 = vmatmul.mubr.bf16.gmra.mrb[20].mxu0 %v18461_v14  ;;  %v18535_v14 = vld [vmem:[%s23788_s6 + $0x178] ss:$36 sps:$4 sm:$0xff]  }
 0x8ad   : > { %9185 = vmatmul.mubr.bf16.gmra.mrb[20].mxu1 %v18462_v50  ;;  %9056 = vmatprep.mubr.bf16.mxu0 %v18463_v7  ;;  %v18538_v50 = vld [vmem:[%s23788_s6 + $0x180] ss:$36 sps:$4 sm:$0xff]  }
 0x8ae   : > { %9192 = vmatprep.mubr.bf16.mxu1 %v18465_v18  ;;  %v18539_v7 = vld [vmem:[%s23788_s6 + $0x1c4] ss:$36 sps:$4 sm:$0xff]  }
 0x8af   : > { %v18541_v18 = vld [vmem:[%s23788_s6 + $0x1c0] ss:$36 sps:$4 sm:$0xff]  }
 0x8b4   : > { %9057 = vmatmul.mubr.bf16.gmra.mrb[24].mxu0 %v18467_v24  ;;  %v18544_v24 = vld [vmem:[%s23788_s6 + $0x1c8] ss:$36 sps:$4 sm:$0xff]  }
 0x8b5   : > { %9193 = vmatmul.mubr.bf16.gmra.mrb[24].mxu1 %v18468_v19  ;;  %9064 = vmatprep.mubr.bf16.mxu0 %v18469_v42  ;;  %v18545_v19 = vld [vmem:[%s23788_s6 + $0x20c] ss:$36 sps:$4 sm:$0xff]   ;;  %v18548_v42 = vld [vmem:[%s23788_s6 + $0x214] ss:$36 sps:$4 sm:$0xff]  }
 0x8b6   : > { %9200 = vmatprep.mubr.bf16.mxu1 %v18471_v16  ;;  %v18547_v16 = vld [vmem:[%s23788_s6 + $0x208] ss:$36 sps:$4 sm:$0xff]  }
 0x8bc   : > { %9065 = vmatmul.mubr.bf16.gmra.mrb[28].mxu0 %v18473_v49  ;;  %v18550_v49 = vld [vmem:[%s23788_s6 + $0x210] ss:$36 sps:$4 sm:$0xff]  }
 0x8bd   : > { %9201 = vmatmul.mubr.bf16.gmra.mrb[28].mxu1 %v18474_v11  ;;  %9072 = vmatprep.mubr.bf16.mxu0 %v18475_v36  ;;  %v18551_v11 = vld [vmem:[%s23788_s6 + $0x254] ss:$36 sps:$4 sm:$0xff]   ;;  %v18554_v36 = vld [vmem:[%s23788_s6 + $0x25c] ss:$36 sps:$4 sm:$0xff]  }
 0x8be   : > { %9208 = vmatprep.mubr.bf16.mxu1 %v18477_v38  ;;  %v18553_v38 = vld [vmem:[%s23788_s6 + $0x250] ss:$36 sps:$4 sm:$0xff]  }
 0x8c4   : > { %9073 = vmatmul.mubr.bf16.gmra.mrb[32].mxu0 %v18479_v54  ;;  %v18556_v54 = vld [vmem:[%s23788_s6 + $0x258] ss:$36 sps:$4 sm:$0xff]  }
 0x8c5   : > { %9209 = vmatmul.mubr.bf16.gmra.mrb[32].mxu1 %v18480_v43  ;;  %9080 = vmatprep.mubr.bf16.mxu0 %v18481_v55  ;;  %v18557_v43 = vld [vmem:[%s23788_s6 + $0x29c] ss:$36 sps:$4 sm:$0xff]   ;;  %v18560_v55 = vld [vmem:[%s23788_s6 + $0x2a4] ss:$36 sps:$4 sm:$0xff]  }
 0x8c6   : > { %9216 = vmatprep.mubr.bf16.mxu1 %v18483_v63  ;;  %v18559_v63 = vld [vmem:[%s23788_s6 + $0x298] ss:$36 sps:$4 sm:$0xff]  }
 0x8cc   : > { %9081 = vmatmul.mubr.bf16.gmra.mrb[36].mxu0 %v18485_v62  ;;  %v18562_v62 = vld [vmem:[%s23788_s6 + $0x2a0] ss:$36 sps:$4 sm:$0xff]  }
 0x8cd   : > { %9217 = vmatmul.mubr.bf16.gmra.mrb[36].mxu1 %v18486_v34  ;;  %9088 = vmatprep.mubr.bf16.mxu0 %v18487_v41  ;;  %v18563_v34 = vld [vmem:[%s23788_s6 + $0x2e4] ss:$36 sps:$4 sm:$0xff]   ;;  %v18566_v41 = vld [vmem:[%s23788_s6 + $0x2ec] ss:$36 sps:$4 sm:$0xff]  }
 0x8ce   : > { %9224 = vmatprep.mubr.bf16.mxu1 %v18489_v46  ;;  %v18565_v46 = vld [vmem:[%s23788_s6 + $0x2e0] ss:$36 sps:$4 sm:$0xff]  }
 0x8d4   : > { %9089 = vmatmul.mubr.bf16.gmra.mrb[40].mxu0 %v18491_v51  ;;  %v18568_v51 = vld [vmem:[%s23788_s6 + $0x2e8] ss:$36 sps:$4 sm:$0xff]  }
 0x8d5   : > { %9225 = vmatmul.mubr.bf16.gmra.mrb[40].mxu1 %v18492_v2  ;;  %9096 = vmatprep.mubr.bf16.mxu0 %v18493_v15  ;;  %v18569_v2 = vld [vmem:[%s23788_s6 + $0x32c] ss:$36 sps:$4 sm:$0xff]   ;;  %v18572_v15 = vld [vmem:[%s23788_s6 + $0x334] ss:$36 sps:$4 sm:$0xff]  }
 0x8d6   : > { %9232 = vmatprep.mubr.bf16.mxu1 %v18495_v39  ;;  %v8389_v39 = vld [vmem:[%s23788_s6 + $0x370] sm:$0xff] }
 0x8dc   : > { %9097 = vmatmul.mubr.bf16.gmra.mrb[44].mxu0 %v18497_v32  ;;  %v18574_v32 = vld [vmem:[%s23788_s6 + $0x330] ss:$36 sps:$4 sm:$0xff]  }
 0x8dd   : > { %9233 = vmatmul.mubr.bf16.gmra.mrb[44].mxu1 %v18498_v4  ;;  %9104 = vmatprep.mubr.bf16.mxu0 %v13561_v44  ;;  %v13565_v4 = vcombine.high %v8389_v39, %v8389_v39  ;;  %v13567_v44 = vcombine.high %v8390_v22, %v8390_v22 }
 0x8de   : > { %9240 = vmatprep.mubr.bf16.mxu1 %v13563_v8  ;;  %v18592_v8 = vld [vmem:[%s23789_s7 + $0x40] sm:$0xff]  }
 0x8e4   : > { %9105 = vmatmul.mubr.bf16.gmra.mrb[48].mxu0 %v13560_v52  ;;  %v18579_v52 = vld [vmem:[%s23788_s6 + $0x20] ss:$36 sps:$4 sm:$0xff]  }
 0x8e5   : > { %9241 = vmatmul.mubr.bf16.gmra.mrb[48].mxu1 %v13562_v53  ;;  %9280 = vmatprep.mubr.bf16.mxu0 %v18505_v60  ;;  %v13564_v60 = vcombine.low %v8389_v39, %v8389_v39  ;;  %v18593_v53 = vld [vmem:[%s23789_s7 + $0x48] sm:$0xff]  }
 0x8e6   : > { %9416 = vmatprep.mubr.bf16.mxu1 %v18508_v59  ;;  %v13566_v59 = vcombine.low %v8390_v22, %v8390_v22 }
 0x8ec   : > { %9281 = vmatmul.mubr.bf16.vlgmr.msra.gmra.mrb[52].mxu0 %v18503_v5  ;;  %v18580_v5 = vld [vmem:[%s23788_s6 + $0x68] ss:$36 sps:$4 sm:$0xff]  }
 0x8ed   : > { %9417 = vmatmul.mubr.bf16.vlgmr.msra.gmra.mrb[52].mxu1 %v18506_v58  ;;  %17140 = vmatpush3.bf16.msra.mxu0 %v8259_v12 }
 0x8ee   : > { %9288 = vmatprep.mubr.bf16.mxu0 %v18509_v61  ;;  %9424 = vmatprep.mubr.bf16.mxu1 %v18512_v47 }
 0x8ef   : > { %17141 = vmatprep.subr.bf16.mxu0 %v18886_v27  ;;  %17208 = vmatpush3.bf16.msra.mxu1 %v18592_v8 }
 0x8f0   : > { %17209 = vmatprep.subr.bf16.mxu1 %v18886_v27 }
 0x8f1   : > { %17142 = vmatpush3.bf16.msra.mxu0 %v8260_v21 }
 0x8f2   : > { %17143 = vmatprep.subr.bf16.mxu0 %v18886_v27 }
 0x8f3   : > { %17210 = vmatpush3.bf16.msra.mxu1 %v18593_v53 }
 0x8f4   : > { %9289 = vmatmul.mubr.bf16.gmra.mrb[56].mxu0 %v18511_v26  ;;  %17211 = vmatprep.subr.bf16.mxu1 %v18886_v27 }
 0x8f5   : > { %9425 = vmatmul.mubr.bf16.gmra.mrb[56].mxu1 %v18514_v1  ;;  %9296 = vmatprep.mubr.bf16.mxu0 %v18515_v10 }
 0x8f6   : > { %9432 = vmatprep.mubr.bf16.mxu1 %v18518_v17  ;;  %17144 = vmatpush3.bf16.msra.mxu0 %v8261_v6 }
 0x8f7   : > { %17145 = vmatprep.subr.bf16.mxu0 %v18886_v27 }
 0x8fa   : > { %17146 = vmatpush3.bf16.msra.mxu0 %v8262_v3 }
 0x8fb   : > { %17147 = vmatprep.subr.bf16.mxu0 %v18886_v27 }
 0x8fc   : > { %9297 = vmatmul.mubr.bf16.gmra.mrb[60].mxu0 %v18517_v0 }
 0x8fd   : > { %9433 = vmatmul.mubr.bf16.gmra.mrb[60].mxu1 %v18520_v29  ;;  %9304 = vmatprep.mubr.bf16.mxu0 %v18521_v35 }
 0x8fe   : > { %9440 = vmatprep.mubr.bf16.mxu1 %v18524_v25  ;;  %17148 = vmatpush3.bf16.msra.mxu0 %v8263_v48 }
 0x8ff   : > { %17149 = vmatprep.subr.bf16.mxu0 %v18886_v27 }
 0x902   : > { %17150 = vmatpush3.bf16.msra.mxu0 %v8264_v31 }
 0x903   : > { %17151 = vmatprep.subr.bf16.mxu0 %v18886_v27 }
 0x904   : > { %9305 = vmatmul.mubr.bf16.gmra.mrb[64].mxu0 %v18523_v37 }
 0x905   : > { %9441 = vmatmul.mubr.bf16.gmra.mrb[64].mxu1 %v18526_v23  ;;  %9312 = vmatprep.mubr.bf16.mxu0 %v18527_v13  ;;  %v18581_v23 = vld [vmem:[%s23788_s6 + $0xb0] ss:$36 sps:$4 sm:$0xff]  }
 0x906   : > { %9448 = vmatprep.mubr.bf16.mxu1 %v18530_v33  ;;  %17152 = vmatpush3.bf16.msra.mxu0 %v8265_v57 }
 0x907   : > { %17153 = vmatprep.subr.bf16.mxu0 %v18886_v27 }
 0x90a   : > { %17154 = vmatpush3.bf16.msra.mxu0 %v8266_v56 }
 0x90b   : > { %17287 = vmatprep.subr.bf16.mxu0 %v18886_v27 }
 0x90c   : > { %9313 = vmatmul.mubr.bf16.gmra.mrb[68].mxu0 %v18529_v20 }
 0x90d   : > { %9449 = vmatmul.mubr.bf16.gmra.mrb[68].mxu1 %v18532_v9  ;;  %9320 = vmatprep.mubr.bf16.mxu0 %v18533_v40 }
 0x90e   : > { %9456 = vmatprep.mubr.bf16.mxu1 %v18536_v28 }
 0x914   : > { %9321 = vmatmul.mubr.bf16.gmra.mrb[72].mxu0 %v18535_v14 }
 0x915   : > { %9457 = vmatmul.mubr.bf16.gmra.mrb[72].mxu1 %v18538_v50  ;;  %9328 = vmatprep.mubr.bf16.mxu0 %v18539_v7  ;;  %v18594_v50 = vld [vmem:[%s23789_s7 + $0x50] sm:$0xff]  }
 0x916   : > { %9464 = vmatprep.mubr.bf16.mxu1 %v18542_v45  ;;  %17212 = vmatpush3.bf16.msra.mxu1 %v18594_v50 }
 0x917   : > { %17213 = vmatprep.subr.bf16.mxu1 %v18886_v27 }
 0x91c   : > { %9329 = vmatmul.mubr.bf16.gmra.mrb[76].mxu0 %v18541_v18 }
 0x91d   : > { %9465 = vmatmul.mubr.bf16.gmra.mrb[76].mxu1 %v18544_v24  ;;  %9336 = vmatprep.mubr.bf16.mxu0 %v18545_v19 }
 0x91e   : > { %9472 = vmatprep.mubr.bf16.mxu1 %v18548_v42  ;;  %v18582_v42 = vld [vmem:[%s23788_s6 + $0xf8] ss:$36 sps:$4 sm:$0xff]  }
 0x924   : > { %9337 = vmatmul.mubr.bf16.gmra.mrb[80].mxu0 %v18547_v16 }
 0x925   : > { %9473 = vmatmul.mubr.bf16.gmra.mrb[80].mxu1 %v18550_v49  ;;  %9344 = vmatprep.mubr.bf16.mxu0 %v18551_v11 }
 0x926   : > { %9480 = vmatprep.mubr.bf16.mxu1 %v18554_v36 }
 0x92c   : > { %9345 = vmatmul.mubr.bf16.gmra.mrb[84].mxu0 %v18553_v38 }
 0x92d   : > { %9481 = vmatmul.mubr.bf16.gmra.mrb[84].mxu1 %v18556_v54  ;;  %9352 = vmatprep.mubr.bf16.mxu0 %v18557_v43 }
 0x92e   : > { %9488 = vmatprep.mubr.bf16.mxu1 %v18560_v55 }
 0x934   : > { %9353 = vmatmul.mubr.bf16.gmra.mrb[88].mxu0 %v18559_v63 }
 0x935   : > { %9489 = vmatmul.mubr.bf16.gmra.mrb[88].mxu1 %v18562_v62  ;;  %9360 = vmatprep.mubr.bf16.mxu0 %v18563_v34  ;;  %v18595_v34 = vld [vmem:[%s23789_s7 + $0x58] sm:$0xff]  }
 0x936   : > { %9496 = vmatprep.mubr.bf16.mxu1 %v18566_v41  ;;  %17214 = vmatpush3.bf16.msra.mxu1 %v18595_v34 }
 0x937   : > { %17215 = vmatprep.subr.bf16.mxu1 %v18886_v27 }
 0x93c   : > { %9361 = vmatmul.mubr.bf16.gmra.mrb[92].mxu0 %v18565_v46 }
 0x93d   : > { %9497 = vmatmul.mubr.bf16.gmra.mrb[92].mxu1 %v18568_v51  ;;  %9368 = vmatprep.mubr.bf16.mxu0 %v18569_v2 }
 0x93e   : > { %9504 = vmatprep.mubr.bf16.mxu1 %v18572_v15  ;;  %v18583_v15 = vld [vmem:[%s23788_s6 + $0x140] ss:$36 sps:$4 sm:$0xff]  }
 0x944   : > { %9369 = vmatmul.mubr.bf16.gmra.mrb[96].mxu0 %v18571_v30 }
 0x945   : > { %9505 = vmatmul.mubr.bf16.gmra.mrb[96].mxu1 %v18574_v32  ;;  %9376 = vmatprep.mubr.bf16.mxu0 %v13565_v4 }
 0x946   : > { %9512 = vmatprep.mubr.bf16.mxu1 %v13567_v44 }
 0x94c   : > { %9377 = vmatmul.mubr.bf16.gmra.mrb[100].mxu0 %v13564_v60 }
 0x94d   : > { %9513 = vmatmul.mubr.bf16.gmra.mrb[100].mxu1 %v13566_v59  ;;  %17155 = vmatprep.mubr.msk.bf16.mxu0 %vm18887_vm3, %v18886_v27 }
 0x94e   : > { %17223 = vmatprep.mubr.msk.bf16.mxu1 %vm18887_vm3, %v18886_v27 }
 0x954   : > { %17156 = vmatmul.mubr.bf16.vlgmr.msra.gmra.mrb[104].mxu0 %v18579_v52 }
 0x955   : > { %17159 = vmatprep.mubr.msk.bf16.mxu0 %vm18887_vm3, %v18886_v27 }
 0x957   : > { %v14985_v58 = vpop.f32.mrb[0].mxu0 }
 0x958   : > { %v15079_v61 = vpop.f32.mrb[0].mxu1  ;;  %v14986_v12 = vpop.f32.mrb[1].mxu0 }
 0x959   : > { %v15080_v47 = vpop.f32.mrb[1].mxu1  ;;  %v14987_v21 = vadd.f32 %v14986_v12, %v14985_v58  ;;  %v14988_v1 = vpop.f32.mrb[2].mxu0  ;;  %v18584_v12 = vld [vmem:[%s23788_s6 + $0x188] ss:$36 sps:$4 sm:$0xff]  }
 0x95a   : > { %v15081_v26 = vadd.f32 %v15080_v47, %v15079_v61  ;;  %v15082_v10 = vpop.f32.mrb[2].mxu1  ;;  %v14989_v17 = vpop.f32.mrb[3].mxu0 }
 0x95b   : > { %v15083_v6 = vpop.f32.mrb[3].mxu1  ;;  %v14990_v0 = vadd.f32 %v14989_v17, %v14988_v1 }
 0x95c   : > { %v22491_v3 = vadd.f32 %v15081_v26, %v14987_v21  ;;  %v15084_v29 = vadd.f32 %v15083_v6, %v15082_v10  ;;  %17160 = vmatmul.mubr.bf16.gmra.mrb[108].mxu0 %v18580_v5 }
 0x95d   : > { %17163 = vmatprep.mubr.msk.bf16.mxu0 %vm18887_vm3, %v18886_v27 }
 0x95e   : > { %v22493_v35 = vadd.f32 %v15084_v29, %v14990_v0 }
 0x95f   : > { %v14991_v25 = vpop.f32.mrb[4].mxu0 }
 0x960   : > { %v15085_v48 = vpop.f32.mrb[4].mxu1  ;;  %v14992_v31 = vpop.f32.mrb[5].mxu0 }
 0x961   : > { %v15086_v37 = vpop.f32.mrb[5].mxu1  ;;  %v14993_v13 = vadd.f32 %v14992_v31, %v14991_v25  ;;  %v14994_v57 = vpop.f32.mrb[6].mxu0 }
 0x962   : > { %v15087_v33 = vadd.f32 %v15086_v37, %v15085_v48  ;;  %v15088_v56 = vpop.f32.mrb[6].mxu1  ;;  %v14995_v20 = vpop.f32.mrb[7].mxu0  ;;  %v18596_v48 = vld [vmem:[%s23789_s7 + $0x60] sm:$0xff]  }
 0x963   : > { %v15089_v9 = vpop.f32.mrb[7].mxu1  ;;  %v14996_v28 = vadd.f32 %v14995_v20, %v14994_v57  ;;  %17216 = vmatpush3.bf16.msra.mxu1 %v18596_v48 }
 0x964   : > { %v22500_v40 = vadd.f32 %v15087_v33, %v14993_v13  ;;  %v15090_v14 = vadd.f32 %v15089_v9, %v15088_v56  ;;  %17164 = vmatmul.mubr.bf16.gmra.mrb[112].mxu0 %v18581_v23  ;;  %v18585_v33 = vld [vmem:[%s23788_s6 + $0x1d0] ss:$36 sps:$4 sm:$0xff]   ;;  %17217 = vmatprep.subr.bf16.mxu1 %v18886_v27 }
 0x965   : > { %17167 = vmatprep.mubr.msk.bf16.mxu0 %vm18887_vm3, %v18886_v27 }
 0x966   : > { %v22505_v7 = vadd.f32 %v15090_v14, %v14996_v28 }
 0x967   : > { %v14997_v45 = vpop.f32.mrb[8].mxu0 }
 0x968   : > { %v15091_v18 = vpop.f32.mrb[8].mxu1  ;;  %v14998_v24 = vpop.f32.mrb[9].mxu0 }
 0x969   : > { %v15092_v19 = vpop.f32.mrb[9].mxu1  ;;  %v14999_v16 = vadd.f32 %v14998_v24, %v14997_v45  ;;  %v15000_v11 = vpop.f32.mrb[10].mxu0 }
 0x96a   : > { %v15093_v49 = vadd.f32 %v15092_v19, %v15091_v18  ;;  %v15094_v36 = vpop.f32.mrb[10].mxu1  ;;  %v15001_v38 = vpop.f32.mrb[11].mxu0 }
 0x96b   : > { %v15095_v54 = vpop.f32.mrb[11].mxu1  ;;  %v15002_v55 = vadd.f32 %v15001_v38, %v15000_v11  ;;  %v18586_v11 = vld [vmem:[%s23788_s6 + $0x218] ss:$36 sps:$4 sm:$0xff]  }
 0x96c   : > { %v22513_v43 = vadd.f32 %v15093_v49, %v14999_v16  ;;  %v15096_v63 = vadd.f32 %v15095_v54, %v15094_v36  ;;  %17168 = vmatmul.mubr.bf16.gmra.mrb[116].mxu0 %v18582_v42 }
 0x96d   : > { %17171 = vmatprep.mubr.msk.bf16.mxu0 %vm18887_vm3, %v18886_v27 }
 0x96e   : > { %v22515_v62 = vadd.f32 %v15096_v63, %v15002_v55 }
 0x96f   : > { %v15003_v41 = vpop.f32.mrb[12].mxu0 }
 0x970   : > { %v15097_v46 = vpop.f32.mrb[12].mxu1  ;;  %v15004_v51 = vpop.f32.mrb[13].mxu0 }
 0x971   : > { %v15098_v2 = vpop.f32.mrb[13].mxu1  ;;  %v15005_v39 = vadd.f32 %v15004_v51, %v15003_v41  ;;  %v15006_v30 = vpop.f32.mrb[14].mxu0 }
 0x972   : > { %v15099_v22 = vadd.f32 %v15098_v2, %v15097_v46  ;;  %v15100_v32 = vpop.f32.mrb[14].mxu1  ;;  %v15007_v4 = vpop.f32.mrb[15].mxu0  ;;  %v18597_v2 = vld [vmem:[%s23789_s7 + $0x68] sm:$0xff]  }
 0x973   : > { %v15101_v44 = vpop.f32.mrb[15].mxu1  ;;  %v15008_v60 = vadd.f32 %v15007_v4, %v15006_v30  ;;  %17218 = vmatpush3.bf16.msra.mxu1 %v18597_v2  ;;  %v18587_v4 = vld [vmem:[%s23788_s6 + $0x260] ss:$36 sps:$4 sm:$0xff]   ;;  %v18601_v2 = vld [vmem:[%s23789_s7 + $0x78] sm:$0xff]  }
 0x974   : > { %v22526_v8 = vadd.f32 %v15099_v22, %v15005_v39  ;;  %v15102_v59 = vadd.f32 %v15101_v44, %v15100_v32  ;;  %17172 = vmatmul.mubr.bf16.gmra.mrb[120].mxu0 %v18583_v15  ;;  %17219 = vmatprep.subr.bf16.mxu1 %v18886_v27 }
 0x975   : > { %17175 = vmatprep.mubr.msk.bf16.mxu0 %vm18887_vm3, %v18886_v27 }
 0x976   : > { %v22528_v52 = vadd.f32 %v15102_v59, %v15008_v60 }
 0x977   : > { %v15009_v53 = vpop.f32.mrb[16].mxu0 }
 0x978   : > { %v15103_v5 = vpop.f32.mrb[16].mxu1  ;;  %v15010_v58 = vpop.f32.mrb[17].mxu0 }
 0x979   : > { %v15104_v61 = vpop.f32.mrb[17].mxu1  ;;  %v15011_v47 = vadd.f32 %v15010_v58, %v15009_v53  ;;  %v15012_v26 = vpop.f32.mrb[18].mxu0 }
 0x97a   : > { %v15105_v21 = vadd.f32 %v15104_v61, %v15103_v5  ;;  %v15106_v1 = vpop.f32.mrb[18].mxu1  ;;  %v15013_v10 = vpop.f32.mrb[19].mxu0 }
 0x97b   : > { %v15107_v17 = vpop.f32.mrb[19].mxu1  ;;  %v15014_v0 = vadd.f32 %v15013_v10, %v15012_v26  ;;  %v18598_v26 = vld [vmem:[%s23789_s7 + $0x70] sm:$0xff]  }
 0x97c   : > { %v22535_v6 = vadd.f32 %v15105_v21, %v15011_v47  ;;  %v15108_v29 = vadd.f32 %v15107_v17, %v15106_v1  ;;  %17176 = vmatmul.mubr.bf16.gmra.mrb[124].mxu0 %v18584_v12  ;;  %17220 = vmatpush3.bf16.msra.mxu1 %v18598_v26  ;;  %v18604_v26 = vld [vmem:[%s23789_s7 + $0x120] sm:$0xff]  }
 0x97d   : > { %17179 = vmatprep.mubr.msk.bf16.mxu0 %vm18887_vm3, %v18886_v27  ;;  %17221 = vmatprep.subr.bf16.mxu1 %v18886_v27 }
 0x97e   : > { %v22537_v25 = vadd.f32 %v15108_v29, %v15014_v0  ;;  %v18588_v29 = vld [vmem:[%s23788_s6 + $0x2a8] ss:$36 sps:$4 sm:$0xff]  }
 0x97f   : > { %v15015_v31 = vpop.f32.mrb[20].mxu0 }
 0x980   : > { %v15109_v37 = vpop.f32.mrb[20].mxu1  ;;  %v15016_v23 = vpop.f32.mrb[21].mxu0  ;;  %17222 = vmatpush3.bf16.msra.mxu1 %v18601_v2 }
 0x981   : > { %v15110_v13 = vpop.f32.mrb[21].mxu1  ;;  %v15017_v57 = vadd.f32 %v15016_v23, %v15015_v31  ;;  %v15018_v20 = vpop.f32.mrb[22].mxu0  ;;  %17227 = vmatprep.subr.bf16.mxu1 %v18886_v27 }
 0x982   : > { %v15111_v56 = vadd.f32 %v15110_v13, %v15109_v37  ;;  %v15112_v9 = vpop.f32.mrb[22].mxu1  ;;  %v15019_v28 = vpop.f32.mrb[23].mxu0 }
 0x983   : > { %v15113_v14 = vpop.f32.mrb[23].mxu1  ;;  %v15020_v45 = vadd.f32 %v15019_v28, %v15018_v20 }
 0x984   : > { %v22548_v50 = vadd.f32 %v15111_v56, %v15017_v57  ;;  %v15114_v18 = vadd.f32 %v15113_v14, %v15112_v9  ;;  %17180 = vmatmul.mubr.bf16.gmra.mrb[128].mxu0 %v18585_v33  ;;  %v18599_v57 = vld [vmem:[%s23789_s7 + $0x100] sm:$0xff]   ;;  %v18600_v14 = vld [vmem:[%s23789_s7 + $0x108] sm:$0xff]  }
 0x985   : > { %17183 = vmatprep.mubr.msk.bf16.mxu0 %vm18887_vm3, %v18886_v27  ;;  %17288 = vmatpush3.bf16.msra.mxu0 %v18599_v57 }
 0x986   : > { %v22550_v24 = vadd.f32 %v15114_v18, %v15020_v45  ;;  %17289 = vmatprep.subr.bf16.mxu0 %v18886_v27 }
 0x987   : > { %v15021_v19 = vpop.f32.mrb[24].mxu0 }
 0x988   : > { %v15115_v42 = vpop.f32.mrb[24].mxu1  ;;  %v15022_v16 = vpop.f32.mrb[25].mxu0 }
 0x989   : > { %v15116_v49 = vpop.f32.mrb[25].mxu1  ;;  %v15023_v36 = vadd.f32 %v15022_v16, %v15021_v19  ;;  %v15024_v54 = vpop.f32.mrb[26].mxu0  ;;  %v18589_v16 = vld [vmem:[%s23788_s6 + $0x2f0] ss:$36 sps:$4 sm:$0xff]   ;;  %17290 = vmatpush3.bf16.msra.mxu0 %v18600_v14 }
 0x98a   : > { %v15117_v38 = vadd.f32 %v15116_v49, %v15115_v42  ;;  %v15118_v55 = vpop.f32.mrb[26].mxu1  ;;  %v15025_v63 = vpop.f32.mrb[27].mxu0  ;;  %17291 = vmatprep.subr.bf16.mxu0 %v18886_v27 }
 0x98b   : > { %v15119_v34 = vpop.f32.mrb[27].mxu1  ;;  %v15026_v46 = vadd.f32 %v15025_v63, %v15024_v54  ;;  %v18602_v63 = vld [vmem:[%s23789_s7 + $0x110] sm:$0xff]  }
 0x98c   : > { %v22557_v41 = vadd.f32 %v15117_v38, %v15023_v36  ;;  %v15120_v51 = vadd.f32 %v15119_v34, %v15118_v55  ;;  %17184 = vmatmul.mubr.bf16.gmra.mrb[132].mxu0 %v18586_v11 }
 0x98d   : > { %17187 = vmatprep.mubr.msk.bf16.mxu0 %vm18887_vm3, %v18886_v27  ;;  %17292 = vmatpush3.bf16.msra.mxu0 %v18602_v63 }
 0x98e   : > { %v22562_v15 = vadd.f32 %v15120_v51, %v15026_v46  ;;  %17293 = vmatprep.subr.bf16.mxu0 %v18886_v27 }
 0x98f   : > { %v15027_v39 = vpop.f32.mrb[28].mxu0 }
 0x990   : > { %v15121_v22 = vpop.f32.mrb[28].mxu1  ;;  %v15028_v30 = vpop.f32.mrb[29].mxu0 }
 0x991   : > { %v15122_v32 = vpop.f32.mrb[29].mxu1  ;;  %v15029_v44 = vadd.f32 %v15028_v30, %v15027_v39  ;;  %v15030_v59 = vpop.f32.mrb[30].mxu0 }
 0x992   : > { %v15123_v60 = vadd.f32 %v15122_v32, %v15121_v22  ;;  %v15124_v53 = vpop.f32.mrb[30].mxu1  ;;  %v15031_v5 = vpop.f32.mrb[31].mxu0  ;;  %v18603_v22 = vld [vmem:[%s23789_s7 + $0x118] sm:$0xff]  }
 0x993   : > { %v15125_v58 = vpop.f32.mrb[31].mxu1  ;;  %v15032_v12 = vadd.f32 %v15031_v5, %v15030_v59  ;;  %17294 = vmatpush3.bf16.msra.mxu0 %v18603_v22 }
 0x994   : > { %v22570_v61 = vadd.f32 %v15123_v60, %v15029_v44  ;;  %v15126_v47 = vadd.f32 %v15125_v58, %v15124_v53  ;;  %17188 = vmatmul.mubr.bf16.gmra.mrb[136].mxu0 %v18587_v4  ;;  %v18590_v60 = vld [vmem:[%s23788_s6 + $0x338] ss:$36 sps:$4 sm:$0xff]   ;;  %17295 = vmatprep.subr.bf16.mxu0 %v18886_v27 }
 0x995   : > { %17191 = vmatprep.mubr.msk.bf16.mxu0 %vm18887_vm3, %v18886_v27 }
 0x996   : > { %v22572_v21 = vadd.f32 %v15126_v47, %v15032_v12 }
 0x997   : > { %v15033_v1 = vpop.f32.mrb[32].mxu0  ;;  %17296 = vmatpush3.bf16.msra.mxu0 %v18604_v26 }
 0x998   : > { %v15127_v10 = vpop.f32.mrb[32].mxu1  ;;  %v15034_v17 = vpop.f32.mrb[33].mxu0  ;;  %17297 = vmatprep.subr.bf16.mxu0 %v18886_v27 }
 0x999   : > { %v15128_v0 = vpop.f32.mrb[33].mxu1  ;;  %v15035_v48 = vadd.f32 %v15034_v17, %v15033_v1  ;;  %v15036_v37 = vpop.f32.mrb[34].mxu0 }
 0x99a   : > { %v15129_v31 = vadd.f32 %v15128_v0, %v15127_v10  ;;  %v15130_v23 = vpop.f32.mrb[34].mxu1  ;;  %v15037_v13 = vpop.f32.mrb[35].mxu0 }
 0x99b   : > { %v15131_v33 = vpop.f32.mrb[35].mxu1  ;;  %v15038_v20 = vadd.f32 %v15037_v13, %v15036_v37  ;;  %v18591_v13 = vld [vmem:[%s23788_s6 + $0x380] ss:$0 sps:$4 sm:$0xff]  }
 0x99c   : > { %v22586_v56 = vadd.f32 %v15129_v31, %v15035_v48  ;;  %v15132_v9 = vadd.f32 %v15131_v33, %v15130_v23  ;;  %17192 = vmatmul.mubr.bf16.gmra.mrb[140].mxu0 %v18588_v29  ;;  %v18606_v31 = vld [vmem:[%s23789_s7 + $0x128] sm:$0xff]  }
 0x99d   : > { %17195 = vmatprep.mubr.msk.bf16.mxu0 %vm18887_vm3, %v18886_v27  ;;  %17298 = vmatpush3.bf16.msra.mxu0 %v18606_v31 }
 0x99e   : > { %v22588_v28 = vadd.f32 %v15132_v9, %v15038_v20  ;;  %17299 = vmatprep.subr.bf16.mxu0 %v18886_v27 }
 0x99f   : > { %v15039_v45 = vpop.f32.mrb[36].mxu0 }
 0x9a0   : > { %v15133_v18 = vpop.f32.mrb[36].mxu1  ;;  %v15040_v19 = vpop.f32.mrb[37].mxu0 }
 0x9a1   : > { %v15134_v42 = vpop.f32.mrb[37].mxu1  ;;  %v15041_v49 = vadd.f32 %v15040_v19, %v15039_v45  ;;  %v15042_v36 = vpop.f32.mrb[38].mxu0 }
 0x9a2   : > { %v15135_v11 = vadd.f32 %v15134_v42, %v15133_v18  ;;  %v15136_v38 = vpop.f32.mrb[38].mxu1  ;;  %v15043_v54 = vpop.f32.mrb[39].mxu0 }
 0x9a3   : > { %v15137_v55 = vpop.f32.mrb[39].mxu1  ;;  %v15044_v46 = vadd.f32 %v15043_v54, %v15042_v36 }
 0x9a4   : > { %v22603_v34 = vadd.f32 %v15135_v11, %v15041_v49  ;;  %v15138_v51 = vadd.f32 %v15137_v55, %v15136_v38  ;;  %17196 = vmatmul.mubr.bf16.gmra.mrb[144].mxu0 %v18589_v16  ;;  %v18608_v16 = vld [vmem:[%s23789_s7 + $0x130] sm:$0xff]   ;;  %v18610_v38 = vld [vmem:[%s23789_s7 + $0x138] sm:$0xff]  }
 0x9a5   : > { %17199 = vmatprep.mubr.msk.bf16.mxu0 %vm18887_vm3, %v18886_v27  ;;  %17300 = vmatpush3.bf16.msra.mxu0 %v18608_v16 }
 0x9a6   : > { %v22608_v39 = vadd.f32 %v15138_v51, %v15044_v46  ;;  %17301 = vmatprep.subr.bf16.mxu0 %v18886_v27 }
 0x9a7   : > { %v15045_v30 = vpop.f32.mrb[40].mxu0 }
 0x9a8   : > { %v15139_v32 = vpop.f32.mrb[40].mxu1  ;;  %v15046_v4 = vpop.f32.mrb[41].mxu0 }
 0x9a9   : > { %v15140_v44 = vpop.f32.mrb[41].mxu1  ;;  %v15047_v59 = vadd.f32 %v15046_v4, %v15045_v30  ;;  %v15048_v5 = vpop.f32.mrb[42].mxu0  ;;  %17302 = vmatpush3.bf16.msra.mxu0 %v18610_v38 }
 0x9aa   : > { %v15141_v53 = vadd.f32 %v15140_v44, %v15139_v32  ;;  %v15142_v58 = vpop.f32.mrb[42].mxu1  ;;  %v15049_v12 = vpop.f32.mrb[43].mxu0  ;;  %17327 = vmatprep.subr.bf16.mxu0 %v18886_v27 }
 0x9ab   : > { %v15143_v47 = vpop.f32.mrb[43].mxu1  ;;  %v15050_v10 = vadd.f32 %v15049_v12, %v15048_v5 }
 0x9ac   : > { %v22623_v1 = vadd.f32 %v15141_v53, %v15047_v59  ;;  %v15144_v17 = vadd.f32 %v15143_v47, %v15142_v58  ;;  %17200 = vmatmul.mubr.bf16.gmra.mrb[148].mxu0 %v18590_v60 }
 0x9ad   : > { %17203 = vmatprep.mubr.msk.bf16.mxu0 %vm18887_vm3, %v18886_v27 }
 0x9ae   : > { %v22626_v0 = vadd.f32 %v15144_v17, %v15050_v10 }
 0x9af   : > { %v15051_v29 = vpop.f32.mrb[44].mxu0 }
 0x9b0   : > { %v15145_v48 = vpop.f32.mrb[44].mxu1  ;;  %v15052_v37 = vpop.f32.mrb[45].mxu0 }
 0x9b1   : > { %v15146_v23 = vpop.f32.mrb[45].mxu1  ;;  %v15053_v33 = vadd.f32 %v15052_v37, %v15051_v29  ;;  %v15054_v20 = vpop.f32.mrb[46].mxu0 }
 0x9b2   : > { %v15147_v57 = vadd.f32 %v15146_v23, %v15145_v48  ;;  %v15148_v9 = vpop.f32.mrb[46].mxu1  ;;  %v15055_v14 = vpop.f32.mrb[47].mxu0 }
 0x9b3   : > { %v15149_v45 = vpop.f32.mrb[47].mxu1  ;;  %v15056_v19 = vadd.f32 %v15055_v14, %v15054_v20 }
 0x9b4   : > { %v22637_v18 = vadd.f32 %v15147_v57, %v15053_v33  ;;  %v15150_v42 = vadd.f32 %v15149_v45, %v15148_v9  ;;  %17204 = vmatmul.mubr.bf16.gmra.mrb[152].mxu0 %v18591_v13 }
 0x9b5   : > { %17303 = vmatprep.mubr.msk.bf16.mxu0 %vm18887_vm3, %v18886_v27 }
 0x9b6   : > { %v22643_v49 = vadd.f32 %v15150_v42, %v15056_v19 }
 0x9b7   : > { %v15057_v11 = vpop.f32.mrb[48].mxu0 }
 0x9b8   : > { %v15151_v36 = vpop.f32.mrb[48].mxu1  ;;  %v15058_v54 = vpop.f32.mrb[49].mxu0 }
 0x9b9   : > { %v15152_v55 = vpop.f32.mrb[49].mxu1  ;;  %v15059_v63 = vadd.f32 %v15058_v54, %v15057_v11  ;;  %v15060_v51 = vpop.f32.mrb[50].mxu0 }
 0x9ba   : > { %v15153_v46 = vadd.f32 %v15152_v55, %v15151_v36  ;;  %v15154_v2 = vpop.f32.mrb[50].mxu1  ;;  %v15061_v22 = vpop.f32.mrb[51].mxu0 }
 0x9bb   : > { %v15155_v30 = vpop.f32.mrb[51].mxu1 }
 0x9bc   : > { %v22651_v32 = vadd.f32 %v15153_v46, %v15059_v63 }
 0x9bf   : > { %v15173_v4 = vpop.f32.mrb[52].mxu0 }
 0x9c0   : > { %v15267_v44 = vpop.f32.mrb[52].mxu1  ;;  %v15174_v60 = vpop.f32.mrb[53].mxu0 }
 0x9c1   : > { %v15268_v59 = vpop.f32.mrb[53].mxu1  ;;  %v15175_v53 = vadd.f32 %v15174_v60, %v15173_v4  ;;  %v15176_v5 = vpop.f32.mrb[54].mxu0 }
 0x9c2   : > { %v15269_v58 = vadd.f32 %v15268_v59, %v15267_v44  ;;  %v15270_v12 = vpop.f32.mrb[54].mxu1  ;;  %v15177_v47 = vpop.f32.mrb[55].mxu0 }
 0x9c3   : > { %v15271_v26 = vpop.f32.mrb[55].mxu1  ;;  %v9283_v10 = vadd.f32 %v15175_v53, %v22491_v3  ;;  %v15178_v17 = vadd.f32 %v15177_v47, %v15176_v5 }
 0x9c4   : > { %v15272_v29 = vadd.f32 %v15271_v26, %v15270_v12 }
 0x9c5   : > { %v9286_v48 = vadd.f32 %v15178_v17, %v22493_v35  ;;  %v22656_v31 = vadd.f32 %v15269_v58, %v9283_v10 }
 0x9c7   : > { %v15179_v37 = vpop.f32.mrb[56].mxu0  ;;  %v22658_v13 = vadd.f32 %v15272_v29, %v9286_v48 }
 0x9c8   : > { %v15273_v23 = vpop.f32.mrb[56].mxu1  ;;  %v15180_v33 = vpop.f32.mrb[57].mxu0 }
 0x9c9   : > { %v15274_v57 = vpop.f32.mrb[57].mxu1  ;;  %v15181_v20 = vadd.f32 %v15180_v33, %v15179_v37  ;;  %v15182_v9 = vpop.f32.mrb[58].mxu0 }
 0x9ca   : > { %v15275_v14 = vadd.f32 %v15274_v57, %v15273_v23  ;;  %v15276_v45 = vpop.f32.mrb[58].mxu1  ;;  %v15183_v19 = vpop.f32.mrb[59].mxu0 }
 0x9cb   : > { %v15277_v42 = vpop.f32.mrb[59].mxu1  ;;  %v9291_v3 = vadd.f32 %v15181_v20, %v22500_v40  ;;  %v15184_v16 = vadd.f32 %v15183_v19, %v15182_v9 }
 0x9cc   : > { %v15278_v11 = vadd.f32 %v15277_v42, %v15276_v45 }
 0x9cd   : > { %v9294_v35 = vadd.f32 %v15184_v16, %v22505_v7  ;;  %v22662_v36 = vadd.f32 %v15275_v14, %v9291_v3 }
 0x9cf   : > { %v15185_v38 = vpop.f32.mrb[60].mxu0  ;;  %v22664_v55 = vadd.f32 %v15278_v11, %v9294_v35 }
 0x9d0   : > { %v15279_v54 = vpop.f32.mrb[60].mxu1  ;;  %v15186_v63 = vpop.f32.mrb[61].mxu0 }
 0x9d1   : > { %v15280_v46 = vpop.f32.mrb[61].mxu1  ;;  %v15187_v51 = vadd.f32 %v15186_v63, %v15185_v38  ;;  %v15188_v2 = vpop.f32.mrb[62].mxu0 }
 0x9d2   : > { %v15281_v22 = vadd.f32 %v15280_v46, %v15279_v54  ;;  %v15282_v30 = vpop.f32.mrb[62].mxu1  ;;  %v15189_v4 = vpop.f32.mrb[63].mxu0 }
 0x9d3   : > { %v15283_v44 = vpop.f32.mrb[63].mxu1  ;;  %v9299_v40 = vadd.f32 %v15187_v51, %v22513_v43  ;;  %v15190_v60 = vadd.f32 %v15189_v4, %v15188_v2 }
 0x9d4   : > { %v15284_v59 = vadd.f32 %v15283_v44, %v15282_v30 }
 0x9d5   : > { %v9302_v7 = vadd.f32 %v15190_v60, %v22515_v62  ;;  %v22668_v53 = vadd.f32 %v15281_v22, %v9299_v40 }
 0x9d7   : > { %v15191_v5 = vpop.f32.mrb[64].mxu0  ;;  %v22670_v12 = vadd.f32 %v15284_v59, %v9302_v7 }
 0x9d8   : > { %v15285_v58 = vpop.f32.mrb[64].mxu1  ;;  %v15192_v47 = vpop.f32.mrb[65].mxu0 }
 0x9d9   : > { %v15286_v26 = vpop.f32.mrb[65].mxu1  ;;  %v15193_v10 = vadd.f32 %v15192_v47, %v15191_v5  ;;  %v15194_v17 = vpop.f32.mrb[66].mxu0 }
 0x9da   : > { %v15287_v29 = vadd.f32 %v15286_v26, %v15285_v58  ;;  %v15288_v48 = vpop.f32.mrb[66].mxu1  ;;  %v15195_v37 = vpop.f32.mrb[67].mxu0 }
 0x9db   : > { %v15289_v23 = vpop.f32.mrb[67].mxu1  ;;  %v9307_v43 = vadd.f32 %v15193_v10, %v22526_v8  ;;  %v15196_v33 = vadd.f32 %v15195_v37, %v15194_v17 }
 0x9dc   : > { %v15290_v57 = vadd.f32 %v15289_v23, %v15288_v48 }
 0x9dd   : > { %v9310_v62 = vadd.f32 %v15196_v33, %v22528_v52  ;;  %v22674_v20 = vadd.f32 %v15287_v29, %v9307_v43 }
 0x9df   : > { %v15197_v9 = vpop.f32.mrb[68].mxu0  ;;  %v22676_v45 = vadd.f32 %v15290_v57, %v9310_v62 }
 0x9e0   : > { %v15291_v14 = vpop.f32.mrb[68].mxu1  ;;  %v15198_v19 = vpop.f32.mrb[69].mxu0 }
 0x9e1   : > { %v15292_v42 = vpop.f32.mrb[69].mxu1  ;;  %v15199_v3 = vadd.f32 %v15198_v19, %v15197_v9  ;;  %v15200_v16 = vpop.f32.mrb[70].mxu0 }
 0x9e2   : > { %v15293_v11 = vadd.f32 %v15292_v42, %v15291_v14  ;;  %v15294_v35 = vpop.f32.mrb[70].mxu1  ;;  %v15201_v38 = vpop.f32.mrb[71].mxu0 }
 0x9e3   : > { %v15295_v54 = vpop.f32.mrb[71].mxu1  ;;  %v9315_v8 = vadd.f32 %v15199_v3, %v22535_v6  ;;  %v15202_v63 = vadd.f32 %v15201_v38, %v15200_v16 }
 0x9e4   : > { %v15296_v46 = vadd.f32 %v15295_v54, %v15294_v35 }
 0x9e5   : > { %v9318_v52 = vadd.f32 %v15202_v63, %v22537_v25  ;;  %v22680_v51 = vadd.f32 %v15293_v11, %v9315_v8 }
 0x9e7   : > { %v15203_v2 = vpop.f32.mrb[72].mxu0  ;;  %v22682_v30 = vadd.f32 %v15296_v46, %v9318_v52 }
 0x9e8   : > { %v15297_v22 = vpop.f32.mrb[72].mxu1  ;;  %v15204_v4 = vpop.f32.mrb[73].mxu0 }
 0x9e9   : > { %v15298_v44 = vpop.f32.mrb[73].mxu1  ;;  %v15205_v40 = vadd.f32 %v15204_v4, %v15203_v2  ;;  %v15206_v60 = vpop.f32.mrb[74].mxu0 }
 0x9ea   : > { %v15299_v59 = vadd.f32 %v15298_v44, %v15297_v22  ;;  %v15300_v7 = vpop.f32.mrb[74].mxu1  ;;  %v15207_v5 = vpop.f32.mrb[75].mxu0 }
 0x9eb   : > { %v15301_v58 = vpop.f32.mrb[75].mxu1  ;;  %v9323_v6 = vadd.f32 %v15205_v40, %v22548_v50  ;;  %v15208_v47 = vadd.f32 %v15207_v5, %v15206_v60 }
 0x9ec   : > { %v15302_v26 = vadd.f32 %v15301_v58, %v15300_v7 }
 0x9ed   : > { %v9326_v25 = vadd.f32 %v15208_v47, %v22550_v24  ;;  %v22686_v10 = vadd.f32 %v15299_v59, %v9323_v6 }
 0x9ef   : > { %v15209_v17 = vpop.f32.mrb[76].mxu0  ;;  %v22688_v48 = vadd.f32 %v15302_v26, %v9326_v25 }
 0x9f0   : > { %v15303_v29 = vpop.f32.mrb[76].mxu1  ;;  %v15210_v37 = vpop.f32.mrb[77].mxu0 }
 0x9f1   : > { %v15304_v23 = vpop.f32.mrb[77].mxu1  ;;  %v15211_v43 = vadd.f32 %v15210_v37, %v15209_v17  ;;  %v15212_v33 = vpop.f32.mrb[78].mxu0 }
 0x9f2   : > { %v15305_v57 = vadd.f32 %v15304_v23, %v15303_v29  ;;  %v15306_v62 = vpop.f32.mrb[78].mxu1  ;;  %v15213_v9 = vpop.f32.mrb[79].mxu0 }
 0x9f3   : > { %v15307_v14 = vpop.f32.mrb[79].mxu1  ;;  %v9331_v50 = vadd.f32 %v15211_v43, %v22557_v41  ;;  %v15214_v19 = vadd.f32 %v15213_v9, %v15212_v33 }
 0x9f4   : > { %v15308_v42 = vadd.f32 %v15307_v14, %v15306_v62 }
 0x9f5   : > { %v9334_v24 = vadd.f32 %v15214_v19, %v22562_v15  ;;  %v22692_v3 = vadd.f32 %v15305_v57, %v9331_v50 }
 0x9f7   : > { %v15215_v16 = vpop.f32.mrb[80].mxu0  ;;  %v22694_v35 = vadd.f32 %v15308_v42, %v9334_v24 }
 0x9f8   : > { %v15309_v11 = vpop.f32.mrb[80].mxu1  ;;  %v15216_v38 = vpop.f32.mrb[81].mxu0 }
 0x9f9   : > { %v15310_v54 = vpop.f32.mrb[81].mxu1  ;;  %v15217_v8 = vadd.f32 %v15216_v38, %v15215_v16  ;;  %v15218_v63 = vpop.f32.mrb[82].mxu0 }
 0x9fa   : > { %v15311_v46 = vadd.f32 %v15310_v54, %v15309_v11  ;;  %v15312_v52 = vpop.f32.mrb[82].mxu1  ;;  %v15219_v2 = vpop.f32.mrb[83].mxu0 }
 0x9fb   : > { %v15313_v22 = vpop.f32.mrb[83].mxu1  ;;  %v9339_v41 = vadd.f32 %v15217_v8, %v22570_v61  ;;  %v15220_v4 = vadd.f32 %v15219_v2, %v15218_v63 }
 0x9fc   : > { %v15314_v44 = vadd.f32 %v15313_v22, %v15312_v52 }
 0x9fd   : > { %v9342_v15 = vadd.f32 %v15220_v4, %v22572_v21  ;;  %v22698_v40 = vadd.f32 %v15311_v46, %v9339_v41 }
 0x9ff   : > { %v15221_v60 = vpop.f32.mrb[84].mxu0  ;;  %v22700_v7 = vadd.f32 %v15314_v44, %v9342_v15 }
 0xa00   : > { %v15315_v59 = vpop.f32.mrb[84].mxu1  ;;  %v15222_v5 = vpop.f32.mrb[85].mxu0 }
 0xa01   : > { %v15316_v58 = vpop.f32.mrb[85].mxu1  ;;  %v15223_v6 = vadd.f32 %v15222_v5, %v15221_v60  ;;  %v15224_v47 = vpop.f32.mrb[86].mxu0 }
 0xa02   : > { %v15317_v26 = vadd.f32 %v15316_v58, %v15315_v59  ;;  %v15318_v25 = vpop.f32.mrb[86].mxu1  ;;  %v15225_v17 = vpop.f32.mrb[87].mxu0 }
 0xa03   : > { %v15319_v29 = vpop.f32.mrb[87].mxu1  ;;  %v9347_v61 = vadd.f32 %v15223_v6, %v22586_v56  ;;  %v15226_v37 = vadd.f32 %v15225_v17, %v15224_v47 }
 0xa04   : > { %v15320_v23 = vadd.f32 %v15319_v29, %v15318_v25 }
 0xa05   : > { %v9350_v21 = vadd.f32 %v15226_v37, %v22588_v28  ;;  %v22704_v43 = vadd.f32 %v15317_v26, %v9347_v61 }
 0xa07   : > { %v15227_v33 = vpop.f32.mrb[88].mxu0  ;;  %v22706_v62 = vadd.f32 %v15320_v23, %v9350_v21 }
 0xa08   : > { %v15321_v57 = vpop.f32.mrb[88].mxu1  ;;  %v15228_v9 = vpop.f32.mrb[89].mxu0 }
 0xa09   : > { %v15322_v14 = vpop.f32.mrb[89].mxu1  ;;  %v15229_v50 = vadd.f32 %v15228_v9, %v15227_v33  ;;  %v15230_v19 = vpop.f32.mrb[90].mxu0 }
 0xa0a   : > { %v15323_v42 = vadd.f32 %v15322_v14, %v15321_v57  ;;  %v15324_v24 = vpop.f32.mrb[90].mxu1  ;;  %v15231_v16 = vpop.f32.mrb[91].mxu0 }
 0xa0b   : > { %v15325_v11 = vpop.f32.mrb[91].mxu1  ;;  %v9355_v56 = vadd.f32 %v15229_v50, %v22603_v34  ;;  %v15232_v38 = vadd.f32 %v15231_v16, %v15230_v19 }
 0xa0c   : > { %v15326_v54 = vadd.f32 %v15325_v11, %v15324_v24 }
 0xa0d   : > { %v9358_v28 = vadd.f32 %v15232_v38, %v22608_v39  ;;  %v22710_v8 = vadd.f32 %v15323_v42, %v9355_v56 }
 0xa0f   : > { %v15233_v63 = vpop.f32.mrb[92].mxu0  ;;  %v22712_v52 = vadd.f32 %v15326_v54, %v9358_v28 }
 0xa10   : > { %v15327_v46 = vpop.f32.mrb[92].mxu1  ;;  %v15234_v2 = vpop.f32.mrb[93].mxu0 }
 0xa11   : > { %v15328_v22 = vpop.f32.mrb[93].mxu1  ;;  %v15235_v41 = vadd.f32 %v15234_v2, %v15233_v63  ;;  %v15236_v4 = vpop.f32.mrb[94].mxu0 }
 0xa12   : > { %v15329_v44 = vadd.f32 %v15328_v22, %v15327_v46  ;;  %v15330_v15 = vpop.f32.mrb[94].mxu1  ;;  %v15237_v60 = vpop.f32.mrb[95].mxu0 }
 0xa13   : > { %v15331_v59 = vpop.f32.mrb[95].mxu1  ;;  %v9363_v34 = vadd.f32 %v15235_v41, %v22623_v1  ;;  %v15238_v5 = vadd.f32 %v15237_v60, %v15236_v4  ;;  %v18605_v60 = vld [vmem:[%s23789_s7] sm:$0xff]  }
 0xa14   : > { %v15332_v58 = vadd.f32 %v15331_v59, %v15330_v15 }
 0xa15   : > { %v9366_v39 = vadd.f32 %v15238_v5, %v22626_v0  ;;  %v22716_v6 = vadd.f32 %v15329_v44, %v9363_v34 }
 0xa17   : > { %v15239_v47 = vpop.f32.mrb[96].mxu0  ;;  %v22718_v25 = vadd.f32 %v15332_v58, %v9366_v39 }
 0xa18   : > { %v15333_v26 = vpop.f32.mrb[96].mxu1  ;;  %v15240_v17 = vpop.f32.mrb[97].mxu0 }
 0xa19   : > { %v15334_v29 = vpop.f32.mrb[97].mxu1  ;;  %v15241_v61 = vadd.f32 %v15240_v17, %v15239_v47  ;;  %v15242_v37 = vpop.f32.mrb[98].mxu0  ;;  %v18609_v47 = vld [vmem:[%s23789_s7 + $0x10] sm:$0xff]  }
 0xa1a   : > { %v15335_v23 = vadd.f32 %v15334_v29, %v15333_v26  ;;  %v15336_v21 = vpop.f32.mrb[98].mxu1  ;;  %v15243_v33 = vpop.f32.mrb[99].mxu0 }
 0xa1b   : > { %v15337_v57 = vpop.f32.mrb[99].mxu1  ;;  %v9371_v1 = vadd.f32 %v15241_v61, %v22637_v18  ;;  %v15244_v9 = vadd.f32 %v15243_v33, %v15242_v37  ;;  %v18612_v61 = vld [vmem:[%s23789_s7 + $0x180] sm:$0xff]  }
 0xa1c   : > { %v15338_v14 = vadd.f32 %v15337_v57, %v15336_v21  ;;  %v18613_v33 = vld [vmem:[%s23789_s7 + $0x20] sm:$0xff]   ;;  %v18615_v57 = vld [vmem:[%s23789_s7 + $0x28] sm:$0xff]  }
 0xa1d   : > { %v9374_v0 = vadd.f32 %v15244_v9, %v22643_v49  ;;  %v22722_v50 = vadd.f32 %v15335_v23, %v9371_v1 }
 0xa1f   : > { %v15245_v19 = vpop.f32.mrb[100].mxu0  ;;  %v22724_v24 = vadd.f32 %v15338_v14, %v9374_v0  ;;  %v18616_v0 = vld [vmem:[%s23789_s7 + $0x190] sm:$0xff]  }
 0xa20   : > { %v15339_v42 = vpop.f32.mrb[100].mxu1  ;;  %v15246_v16 = vpop.f32.mrb[101].mxu0 }
 0xa21   : > { %v15340_v11 = vpop.f32.mrb[101].mxu1  ;;  %v15247_v56 = vadd.f32 %v15246_v16, %v15245_v19  ;;  %v15248_v38 = vpop.f32.mrb[102].mxu0  ;;  %v18618_v16 = vld [vmem:[%s23789_s7 + $0x198] sm:$0xff]  }
 0xa22   : > { %v15341_v54 = vadd.f32 %v15340_v11, %v15339_v42  ;;  %v15342_v28 = vpop.f32.mrb[102].mxu1  ;;  %v15249_v63 = vpop.f32.mrb[103].mxu0  ;;  %v18619_v11 = vld [vmem:[%s23789_s7 + $0x38] sm:$0xff]  }
 0xa23   : > { %v15343_v46 = vpop.f32.mrb[103].mxu1  ;;  %v9379_v18 = vadd.f32 %v15247_v56, %v22651_v32  ;;  %v18607_v32 = vld [vmem:[%s23789_s7 + $0x8] sm:$0xff]   ;;  %v18620_v28 = vld [vmem:[%s23789_s7 + $0x1a0] sm:$0xff]  }
 0xa25   : > { %v22727_v2 = vadd.f32 %v15341_v54, %v9379_v18 }
 0xa27   : > { %v9554_v22 = vpop.f32.mrb[104].mxu0 }
 0xa28   : > { %v22730_v49 = vadd.f32 %v9554_v22, %v22656_v31  ;;  %v17157_v41 = vpop.f32.mrb[105].mxu0  ;;  %v18622_v22 = vld [vmem:[%s23789_s7 + $0x1a8] sm:$0xff]  }
 0xa29   : > { %v9557_v4 = vpop.f32.mrb[106].mxu0  ;;  %v18623_v41 = vld [vmem:[%s23789_s7 + $0x88] sm:$0xff]  }
 0xa2a   : > { %v9558_v44 = vadd.f32 %v9557_v4, %v22658_v13  ;;  %v17158_v15 = vpop.f32.mrb[107].mxu0  ;;  %v9656_v18 = vpack.c.bf16 %v22730_v49, %v22730_v49 }
 0xa2b   : > { %v18624_v15 = vld [vmem:[%s23789_s7 + $0x1b0] sm:$0xff]  }
 0xa2c   : > { %v9673_v59 = vpack.c.bf16 %v9558_v44, %v9558_v44 }
 0xa2e   : > { %17224 = vmatmul.mubr.bf16.vlgmr.msra.gmra.mrb[104].mxu1 %v9673_v59 }
 0xa2f   : > { %17228 = vmatpush3.bf16.msra.mxu1 %v18605_v60  ;;  %v9562_v34 = vpop.f32.mrb[108].mxu0  ;;  %17243 = vmatprep.mubr.msk.bf16.mxu1 %vm18887_vm3, %v18886_v27 }
 0xa30   : > { %v22742_v31 = vadd.f32 %v9562_v34, %v22662_v36  ;;  %v17161_v13 = vpop.f32.mrb[109].mxu0  ;;  %17229 = vmatprep.subr.bf16.mxu1 %v18886_v27  ;;  %v18611_v36 = vld [vmem:[%s23789_s7 + $0x18] sm:$0xff]  }
 0xa31   : > { %v9565_v5 = vpop.f32.mrb[110].mxu0  ;;  %v18626_v34 = vld [vmem:[%s23789_s7 + $0x1b8] sm:$0xff]  }
 0xa32   : > { %v22746_v58 = vadd.f32 %v9565_v5, %v22664_v55  ;;  %v17162_v39 = vpop.f32.mrb[111].mxu0 }
 0xa33   : > { %17230 = vmatpush3.bf16.msra.mxu1 %v18607_v32  ;;  %v18627_v32 = vld [vmem:[%s23789_s7 + $0x98] sm:$0xff]  }
 0xa34   : > { %17231 = vmatprep.subr.bf16.mxu1 %v18886_v27 }
 0xa37   : > { %17232 = vmatpush3.bf16.msra.mxu1 %v18609_v47  ;;  %v9570_v26 = vpop.f32.mrb[112].mxu0  ;;  %v18628_v47 = vld [vmem:[%s23789_s7 + $0x200] sm:$0xff]  }
 0xa38   : > { %v9571_v17 = vadd.f32 %v9570_v26, %v22668_v53  ;;  %v17165_v29 = vpop.f32.mrb[113].mxu0  ;;  %17233 = vmatprep.subr.bf16.mxu1 %v18886_v27  ;;  %v18614_v53 = vld [vmem:[%s23789_s7 + $0x188] sm:$0xff]  }
 0xa39   : > { %v9573_v55 = vpop.f32.mrb[114].mxu0  ;;  %v18630_v29 = vld [vmem:[%s23789_s7 + $0x208] sm:$0xff]  }
 0xa3a   : > { %v10081_v37 = vpack.c.bf16 %v9571_v17, %v9571_v17  ;;  %v22761_v23 = vadd.f32 %v9573_v55, %v22670_v12  ;;  %v17166_v21 = vpop.f32.mrb[115].mxu0  ;;  %v18631_v55 = vld [vmem:[%s23789_s7 + $0xa8] sm:$0xff]  }
 0xa3b   : > { %17234 = vmatpush3.bf16.msra.mxu1 %v18611_v36 }
 0xa3c   : > { %17304 = vmatmul.mubr.bf16.vlgmr.msra.gmra.mrb[156].mxu0 %v10081_v37  ;;  %17235 = vmatprep.subr.bf16.mxu1 %v18886_v27 }
 0xa3d   : > { %17328 = vmatpush3.bf16.msra.mxu0 %v18612_v61  ;;  %17343 = vmatprep.mubr.msk.bf16.mxu0 %vm18887_vm3, %v18886_v27 }
 0xa3e   : > { %17329 = vmatprep.subr.bf16.mxu0 %v18886_v27 }
 0xa3f   : > { %17236 = vmatpush3.bf16.msra.mxu1 %v18613_v33  ;;  %v9578_v12 = vpop.f32.mrb[116].mxu0  ;;  %v18632_v33 = vld [vmem:[%s23789_s7 + $0x210] sm:$0xff]  }
 0xa40   : > { %v22777_v1 = vadd.f32 %v9578_v12, %v22674_v20  ;;  %v17169_v9 = vpop.f32.mrb[117].mxu0  ;;  %17237 = vmatprep.subr.bf16.mxu1 %v18886_v27  ;;  %v18617_v20 = vld [vmem:[%s23789_s7 + $0x30] sm:$0xff]  }
 0xa41   : > { %17330 = vmatpush3.bf16.msra.mxu0 %v18614_v53  ;;  %v9581_v14 = vpop.f32.mrb[118].mxu0 }
 0xa42   : > { %v22784_v19 = vadd.f32 %v9581_v14, %v22676_v45  ;;  %17331 = vmatprep.subr.bf16.mxu0 %v18886_v27  ;;  %v17170_v42 = vpop.f32.mrb[119].mxu0  ;;  %v10295_v26 = vpack.c.bf16 %v22777_v1, %v22777_v1  ;;  %v18635_v1 = vld [vmem:[%s23789_s7 + $0xb8] sm:$0xff]  }
 0xa43   : > { %17238 = vmatpush3.bf16.msra.mxu1 %v18615_v57  ;;  %v18634_v57 = vld [vmem:[%s23789_s7 + $0x218] sm:$0xff]   ;;  %v18636_v42 = vld [vmem:[%s23789_s7 + $0x220] sm:$0xff]  }
 0xa44   : > { %17239 = vmatprep.subr.bf16.mxu1 %v18886_v27 }
 0xa45   : > { %17332 = vmatpush3.bf16.msra.mxu0 %v18616_v0 }
 0xa46   : > { %17333 = vmatprep.subr.bf16.mxu0 %v18886_v27 }
 0xa47   : > { %17240 = vmatpush3.bf16.msra.mxu1 %v18617_v20  ;;  %v9586_v45 = vpop.f32.mrb[120].mxu0 }
 0xa48   : > { %v22799_v56 = vadd.f32 %v9586_v45, %v22680_v51  ;;  %v17173_v38 = vpop.f32.mrb[121].mxu0  ;;  %17241 = vmatprep.subr.bf16.mxu1 %v18886_v27  ;;  %v18621_v51 = vld [vmem:[%s23789_s7 + $0x80] sm:$0xff]   ;;  %v9867_v45 = vpack.c.bf16 %v22742_v31, %v22742_v31 }
 0xa49   : > { %17334 = vmatpush3.bf16.msra.mxu0 %v18618_v16  ;;  %v9589_v54 = vpop.f32.mrb[122].mxu0  ;;  %v18639_v38 = vld [vmem:[%s23789_s7 + $0xc8] sm:$0xff]  }
 0xa4a   : > { %v22806_v63 = vadd.f32 %v9589_v54, %v22682_v30  ;;  %17335 = vmatprep.subr.bf16.mxu0 %v18886_v27  ;;  %v17174_v46 = vpop.f32.mrb[123].mxu0 }
 0xa4b   : > { %17242 = vmatpush3.bf16.msra.mxu1 %v18619_v11  ;;  %v18638_v11 = vld [vmem:[%s23789_s7 + $0x228] sm:$0xff]   ;;  %v18640_v46 = vld [vmem:[%s23789_s7 + $0x230] sm:$0xff]  }
 0xa4c   : > { %17247 = vmatprep.subr.bf16.mxu1 %v18886_v27 }
 0xa4d   : > { %17336 = vmatpush3.bf16.msra.mxu0 %v18620_v28 }
 0xa4e   : > { %17244 = vmatmul.mubr.bf16.vlgmr.msra.gmra.mrb[108].mxu1 %v9656_v18  ;;  %17337 = vmatprep.subr.bf16.mxu0 %v18886_v27 }
 0xa4f   : > { %17248 = vmatpush3.bf16.msra.mxu1 %v18621_v51  ;;  %v9594_v30 = vpop.f32.mrb[124].mxu0  ;;  %17263 = vmatprep.mubr.msk.bf16.mxu1 %vm18887_vm3, %v18886_v27 }
 0xa50   : > { %v22825_v49 = vadd.f32 %v9594_v30, %v22686_v10  ;;  %v17177_v4 = vpop.f32.mrb[125].mxu0  ;;  %17249 = vmatprep.subr.bf16.mxu1 %v18886_v27  ;;  %v18625_v10 = vld [vmem:[%s23789_s7 + $0x90] sm:$0xff]   ;;  %v18643_v30 = vld [vmem:[%s23789_s7 + $0xd8] sm:$0xff]  }
 0xa51   : > { %17338 = vmatpush3.bf16.msra.mxu0 %v18622_v22  ;;  %v9597_v44 = vpop.f32.mrb[126].mxu0  ;;  %v18642_v22 = vld [vmem:[%s23789_s7 + $0x238] sm:$0xff]  }
 0xa52   : > { %v22832_v60 = vadd.f32 %v9597_v44, %v22688_v48  ;;  %17339 = vmatprep.subr.bf16.mxu0 %v18886_v27  ;;  %v17178_v59 = vpop.f32.mrb[127].mxu0 }
 0xa53   : > { %17250 = vmatpush3.bf16.msra.mxu1 %v18623_v41  ;;  %v10509_v59 = vpack.c.bf16 %v22799_v56, %v22799_v56  ;;  %v18647_v56 = vld [vmem:[%s23789_s7 + $0xe8] sm:$0xff]  }
 0xa54   : > { %17251 = vmatprep.subr.bf16.mxu1 %v18886_v27 }
 0xa55   : > { %17340 = vmatpush3.bf16.msra.mxu0 %v18624_v15  ;;  %v18644_v15 = vld [vmem:[%s23789_s7 + $0x280] sm:$0xff]  }
 0xa56   : > { %17341 = vmatprep.subr.bf16.mxu0 %v18886_v27 }
 0xa57   : > { %17252 = vmatpush3.bf16.msra.mxu1 %v18625_v10  ;;  %v9602_v48 = vpop.f32.mrb[128].mxu0 }
 0xa58   : > { %v22847_v13 = vadd.f32 %v9602_v48, %v22692_v3  ;;  %v17181_v5 = vpop.f32.mrb[129].mxu0  ;;  %17253 = vmatprep.subr.bf16.mxu1 %v18886_v27  ;;  %v18629_v3 = vld [vmem:[%s23789_s7 + $0xa0] sm:$0xff]   ;;  %v18646_v48 = vld [vmem:[%s23789_s7 + $0x288] sm:$0xff]  }
 0xa59   : > { %17342 = vmatpush3.bf16.msra.mxu0 %v18626_v34  ;;  %v9605_v39 = vpop.f32.mrb[130].mxu0 }
 0xa5a   : > { %v22856_v36 = vadd.f32 %v9605_v39, %v22694_v35  ;;  %17367 = vmatprep.subr.bf16.mxu0 %v18886_v27  ;;  %v17182_v17 = vpop.f32.mrb[131].mxu0 }
 0xa5b   : > { %17254 = vmatpush3.bf16.msra.mxu1 %v18627_v32 }
 0xa5c   : > { %17344 = vmatmul.mubr.bf16.vlgmr.msra.gmra.mrb[160].mxu0 %v10295_v26  ;;  %17255 = vmatprep.subr.bf16.mxu1 %v18886_v27 }
 0xa5d   : > { %17368 = vmatpush3.bf16.msra.mxu0 %v18628_v47  ;;  %17383 = vmatprep.mubr.msk.bf16.mxu0 %vm18887_vm3, %v18886_v27  ;;  %v18648_v47 = vld [vmem:[%s23789_s7 + $0x290] sm:$0xff]  }
 0xa5e   : > { %17369 = vmatprep.subr.bf16.mxu0 %v18886_v27 }
 0xa5f   : > { %17256 = vmatpush3.bf16.msra.mxu1 %v18629_v3  ;;  %v9610_v35 = vpop.f32.mrb[132].mxu0  ;;  %v18650_v3 = vld [vmem:[%s23789_s7 + $0x298] sm:$0xff]  }
 0xa60   : > { %v22873_v61 = vadd.f32 %v9610_v35, %v22698_v40  ;;  %v17185_v37 = vpop.f32.mrb[133].mxu0  ;;  %17257 = vmatprep.subr.bf16.mxu1 %v18886_v27  ;;  %v18633_v40 = vld [vmem:[%s23789_s7 + $0xb0] sm:$0xff]  }
 0xa61   : > { %17370 = vmatpush3.bf16.msra.mxu0 %v18630_v29  ;;  %v9613_v21 = vpop.f32.mrb[134].mxu0  ;;  %v18651_v29 = vld [vmem:[%s23789_s7 + $0xf8] sm:$0xff]   ;;  %v18652_v37 = vld [vmem:[%s23789_s7 + $0x2a0] sm:$0xff]  }
 0xa62   : > { %v22880_v53 = vadd.f32 %v9613_v21, %v22700_v7  ;;  %17371 = vmatprep.subr.bf16.mxu0 %v18886_v27  ;;  %v17186_v12 = vpop.f32.mrb[135].mxu0 }
 0xa63   : > { %17258 = vmatpush3.bf16.msra.mxu1 %v18631_v55  ;;  %v18653_v12 = vld [vmem:[%s23789_s7 + $0x140] sm:$0xff]  }
 0xa64   : > { %17259 = vmatprep.subr.bf16.mxu1 %v18886_v27 }
 0xa65   : > { %17372 = vmatpush3.bf16.msra.mxu0 %v18632_v33 }
 0xa66   : > { %17373 = vmatprep.subr.bf16.mxu0 %v18886_v27 }
 0xa67   : > { %17260 = vmatpush3.bf16.msra.mxu1 %v18633_v40  ;;  %v9618_v7 = vpop.f32.mrb[136].mxu0  ;;  %v18654_v40 = vld [vmem:[%s23789_s7 + $0x2a8] sm:$0xff]  }
 0xa68   : > { %v22895_v9 = vadd.f32 %v9618_v7, %v22704_v43  ;;  %v17189_v14 = vpop.f32.mrb[137].mxu0  ;;  %17261 = vmatprep.subr.bf16.mxu1 %v18886_v27  ;;  %v18637_v43 = vld [vmem:[%s23789_s7 + $0xc0] sm:$0xff]   ;;  %v18657_v7 = vld [vmem:[%s23789_s7 + $0x150] sm:$0xff]  }
 0xa69   : > { %17374 = vmatpush3.bf16.msra.mxu0 %v18634_v57  ;;  %v9621_v0 = vpop.f32.mrb[138].mxu0  ;;  %v18655_v57 = vld [vmem:[%s23789_s7 + $0x148] sm:$0xff]   ;;  %v18659_v14 = vld [vmem:[%s23789_s7 + $0x158] sm:$0xff]  }
 0xa6a   : > { %v22902_v20 = vadd.f32 %v9621_v0, %v22706_v62  ;;  %17375 = vmatprep.subr.bf16.mxu0 %v18886_v27  ;;  %v17190_v16 = vpop.f32.mrb[139].mxu0  ;;  %v18660_v0 = vld [vmem:[%s23789_s7 + $0x300] sm:$0xff]  }
 0xa6b   : > { %17262 = vmatpush3.bf16.msra.mxu1 %v18635_v1  ;;  %v18658_v1 = vld [vmem:[%s23789_s7 + $0x2b8] sm:$0xff]   ;;  %v18661_v16 = vld [vmem:[%s23789_s7 + $0x160] sm:$0xff]  }
 0xa6c   : > { %17267 = vmatprep.subr.bf16.mxu1 %v18886_v27 }
 0xa6d   : > { %17376 = vmatpush3.bf16.msra.mxu0 %v18636_v42  ;;  %v10723_v42 = vpack.c.bf16 %v22825_v49, %v22825_v49  ;;  %v18663_v49 = vld [vmem:[%s23789_s7 + $0x168] sm:$0xff]  }
 0xa6e   : > { %17264 = vmatmul.mubr.bf16.vlgmr.msra.gmra.mrb[112].mxu1 %v9867_v45  ;;  %17377 = vmatprep.subr.bf16.mxu0 %v18886_v27  ;;  %v18664_v45 = vld [vmem:[%s23789_s7 + $0x310] sm:$0xff]  }
 0xa6f   : > { %17268 = vmatpush3.bf16.msra.mxu1 %v18637_v43  ;;  %v9626_v62 = vpop.f32.mrb[140].mxu0  ;;  %17283 = vmatprep.mubr.msk.bf16.mxu1 %vm18887_vm3, %v18886_v27  ;;  %v18662_v43 = vld [vmem:[%s23789_s7 + $0x308] sm:$0xff]  }
 0xa70   : > { %v22921_v31 = vadd.f32 %v9626_v62, %v22710_v8  ;;  %v17193_v54 = vpop.f32.mrb[141].mxu0  ;;  %17269 = vmatprep.subr.bf16.mxu1 %v18886_v27  ;;  %v18641_v8 = vld [vmem:[%s23789_s7 + $0xd0] sm:$0xff]   ;;  %v18666_v62 = vld [vmem:[%s23789_s7 + $0x318] sm:$0xff]  }
 0xa71   : > { %17378 = vmatpush3.bf16.msra.mxu0 %v18638_v11  ;;  %v9629_v28 = vpop.f32.mrb[142].mxu0  ;;  %v18665_v11 = vld [vmem:[%s23789_s7 + $0x170] sm:$0xff]   ;;  %v18668_v54 = vld [vmem:[%s23789_s7 + $0x320] sm:$0xff]  }
 0xa72   : > { %v22928_v51 = vadd.f32 %v9629_v28, %v22712_v52  ;;  %17379 = vmatprep.subr.bf16.mxu0 %v18886_v27  ;;  %v17194_v18 = vpop.f32.mrb[143].mxu0  ;;  %v18669_v28 = vld [vmem:[%s23789_s7 + $0x1c0] sm:$0xff]  }
 0xa73   : > { %17270 = vmatpush3.bf16.msra.mxu1 %v18639_v38  ;;  %v18667_v38 = vld [vmem:[%s23789_s7 + $0x178] sm:$0xff]   ;;  %v18670_v18 = vld [vmem:[%s23789_s7 + $0x328] sm:$0xff]  }
 0xa74   : > { %17271 = vmatprep.subr.bf16.mxu1 %v18886_v27 }
 0xa75   : > { %17380 = vmatpush3.bf16.msra.mxu0 %v18640_v46  ;;  %v10188_v46 = vpack.c.bf16 %v22761_v23, %v22761_v23  ;;  %v18672_v23 = vld [vmem:[%s23789_s7 + $0x330] sm:$0xff]  }
 0xa76   : > { %17381 = vmatprep.subr.bf16.mxu0 %v18886_v27 }
 0xa77   : > { %17272 = vmatpush3.bf16.msra.mxu1 %v18641_v8  ;;  %v9634_v52 = vpop.f32.mrb[144].mxu0  ;;  %v18671_v8 = vld [vmem:[%s23789_s7 + $0x1c8] sm:$0xff]  }
 0xa78   : > { %v22943_v41 = vadd.f32 %v9634_v52, %v22716_v6  ;;  %v17197_v4 = vpop.f32.mrb[145].mxu0  ;;  %17273 = vmatprep.subr.bf16.mxu1 %v18886_v27  ;;  %v18645_v6 = vld [vmem:[%s23789_s7 + $0xe0] sm:$0xff]   ;;  %v18674_v52 = vld [vmem:[%s23789_s7 + $0x338] sm:$0xff]  }
 0xa79   : > { %17382 = vmatpush3.bf16.msra.mxu0 %v18642_v22  ;;  %v9637_v44 = vpop.f32.mrb[146].mxu0  ;;  %v18673_v22 = vld [vmem:[%s23789_s7 + $0x1d0] sm:$0xff]   ;;  %v18676_v4 = vld [vmem:[%s23789_s7 + $0x380] sm:$0xff]  }
 0xa7a   : > { %v22952_v10 = vadd.f32 %v9637_v44, %v22718_v25  ;;  %17407 = vmatprep.subr.bf16.mxu0 %v18886_v27  ;;  %v17198_v34 = vpop.f32.mrb[147].mxu0  ;;  %v10937_v44 = vpack.c.bf16 %v22847_v13, %v22847_v13  ;;  %v18679_v13 = vld [vmem:[%s23789_s7 + $0x1e8] sm:$0xff]  }
 0xa7b   : > { %17274 = vmatpush3.bf16.msra.mxu1 %v18643_v30  ;;  %v18675_v30 = vld [vmem:[%s23789_s7 + $0x1d8] sm:$0xff]   ;;  %v18680_v34 = vld [vmem:[%s23789_s7 + $0x390] sm:$0xff]  }
 0xa7c   : > { %17384 = vmatmul.mubr.bf16.vlgmr.msra.gmra.mrb[164].mxu0 %v10509_v59  ;;  %17275 = vmatprep.subr.bf16.mxu1 %v18886_v27  ;;  %v18678_v59 = vld [vmem:[%s23789_s7 + $0x388] sm:$0xff]  }
 0xa7d   : > { %17408 = vmatpush3.bf16.msra.mxu0 %v18644_v15  ;;  %17423 = vmatprep.mubr.msk.bf16.mxu0 %vm18887_vm3, %v18886_v27  ;;  %v18677_v15 = vld [vmem:[%s23789_s7 + $0x1e0] sm:$0xff]  }
 0xa7e   : > { %17409 = vmatprep.subr.bf16.mxu0 %v18886_v27 }
 0xa7f   : > { %17276 = vmatpush3.bf16.msra.mxu1 %v18645_v6  ;;  %v9642_v25 = vpop.f32.mrb[148].mxu0  ;;  %v18681_v6 = vld [vmem:[%s23789_s7 + $0x1f0] sm:$0xff]  }
 0xa80   : > { %v22969_v32 = vadd.f32 %v9642_v25, %v22722_v50  ;;  %v17201_v5 = vpop.f32.mrb[149].mxu0  ;;  %17277 = vmatprep.subr.bf16.mxu1 %v18886_v27  ;;  %v18649_v50 = vld [vmem:[%s23789_s7 + $0xf0] sm:$0xff]   ;;  %v18683_v25 = vld [vmem:[%s23789_s7 + $0x1f8] sm:$0xff]  }
 0xa81   : > { %17410 = vmatpush3.bf16.msra.mxu0 %v18646_v48  ;;  %v9645_v39 = vpop.f32.mrb[150].mxu0  ;;  %v18682_v48 = vld [vmem:[%s23789_s7 + $0x398] sm:$0xff]   ;;  %v18685_v5 = vld [vmem:[%s23789_s7 + $0x240] sm:$0xff]  }
 0xa82   : > { %v22976_v26 = vadd.f32 %v9645_v39, %v22724_v24  ;;  %17411 = vmatprep.subr.bf16.mxu0 %v18886_v27  ;;  %v17202_v17 = vpop.f32.mrb[151].mxu0  ;;  %v10402_v39 = vpack.c.bf16 %v22784_v19, %v22784_v19  ;;  %v18688_v19 = vld [vmem:[%s23789_s7 + $0x3b0] sm:$0xff]  }
 0xa83   : > { %17278 = vmatpush3.bf16.msra.mxu1 %v18647_v56  ;;  %v18684_v56 = vld [vmem:[%s23789_s7 + $0x3a0] sm:$0xff]   ;;  %v18687_v17 = vld [vmem:[%s23789_s7 + $0x248] sm:$0xff]  }
 0xa84   : > { %17279 = vmatprep.subr.bf16.mxu1 %v18886_v27 }
 0xa85   : > { %17412 = vmatpush3.bf16.msra.mxu0 %v18648_v47  ;;  %v18686_v47 = vld [vmem:[%s23789_s7 + $0x3a8] sm:$0xff]  }
 0xa86   : > { %17413 = vmatprep.subr.bf16.mxu0 %v18886_v27 }
 0xa87   : > { %17280 = vmatpush3.bf16.msra.mxu1 %v18649_v50  ;;  %v9650_v24 = vpop.f32.mrb[152].mxu0  ;;  %v18689_v50 = vld [vmem:[%s23789_s7 + $0x250] sm:$0xff]  }
 0xa88   : > { %v22991_v35 = vadd.f32 %v9650_v24, %v22727_v2  ;;  %17281 = vmatprep.subr.bf16.mxu1 %v18886_v27  ;;  %v17205_v55 = vpop.f32.mrb[153].mxu0  ;;  %v9974_v2 = vpack.c.bf16 %v22746_v58, %v22746_v58  ;;  %v18656_v58 = vld [vmem:[%s23789_s7 + $0x2b0] sm:$0xff]   ;;  %v18691_v24 = vld [vmem:[%s23789_s7 + $0x258] sm:$0xff]  }
 0xa89   : > { %17414 = vmatpush3.bf16.msra.mxu0 %v18650_v3  ;;  %v9653_v21 = vpop.f32.mrb[154].mxu0  ;;  %v18690_v3 = vld [vmem:[%s23789_s7 + $0x3b8] sm:$0xff]   ;;  %v11151_v55 = vpack.c.bf16 %v22873_v61, %v22873_v61  ;;  %v18695_v61 = vld [vmem:[%s23789_s7 + $0x268] sm:$0xff]  }
 0xa8a   : > { %17415 = vmatprep.subr.bf16.mxu0 %v18886_v27  ;;  %v17206_v33 = vpop.f32.mrb[155].mxu0  ;;  %v18694_v21 = vld [vmem:[%s23789_s7 + $0x408] sm:$0xff]  }
 0xa8b   : > { %17282 = vmatpush3.bf16.msra.mxu1 %v18651_v29  ;;  %v18692_v29 = vld [vmem:[%s23789_s7 + $0x400] sm:$0xff]   ;;  %v18696_v33 = vld [vmem:[%s23789_s7 + $0x410] sm:$0xff]  }
 0xa8c   : > { %17307 = vmatprep.subr.bf16.mxu1 %v18886_v27 }
 0xa8d   : > { %17416 = vmatpush3.bf16.msra.mxu0 %v18652_v37  ;;  %v18693_v37 = vld [vmem:[%s23789_s7 + $0x260] sm:$0xff]  }
 0xa8e   : > { %17284 = vmatmul.mubr.bf16.vlgmr.msra.gmra.mrb[116].mxu1 %v9974_v2  ;;  %17417 = vmatprep.subr.bf16.mxu0 %v18886_v27  ;;  %v18698_v2 = vld [vmem:[%s23789_s7 + $0x418] sm:$0xff]  }
 0xa8f   : > { %17308 = vmatpush3.bf16.msra.mxu1 %v18653_v12  ;;  %17323 = vmatprep.mubr.msk.bf16.mxu1 %vm18887_vm3, %v18886_v27  ;;  %v18697_v12 = vld [vmem:[%s23789_s7 + $0x270] sm:$0xff]  }
 0xa90   : > { %17309 = vmatprep.subr.bf16.mxu1 %v18886_v27 }
 0xa91   : > { %17418 = vmatpush3.bf16.msra.mxu0 %v18654_v40  ;;  %v18699_v40 = vld [vmem:[%s23789_s7 + $0x278] sm:$0xff]  }
 0xa92   : > { %17419 = vmatprep.subr.bf16.mxu0 %v18886_v27 }
 0xa93   : > { %17310 = vmatpush3.bf16.msra.mxu1 %v18655_v57  ;;  %v18700_v57 = vld [vmem:[%s23789_s7 + $0x420] sm:$0xff]  }
 0xa94   : > { %17311 = vmatprep.subr.bf16.mxu1 %v18886_v27 }
 0xa95   : > { %17420 = vmatpush3.bf16.msra.mxu0 %v18656_v58  ;;  %v18701_v58 = vld [vmem:[%s23789_s7 + $0x2c0] sm:$0xff]  }
 0xa96   : > { %17421 = vmatprep.subr.bf16.mxu0 %v18886_v27 }
 0xa97   : > { %17312 = vmatpush3.bf16.msra.mxu1 %v18657_v7  ;;  %v10616_v7 = vpack.c.bf16 %v22806_v63, %v22806_v63  ;;  %v18704_v63 = vld [vmem:[%s23789_s7 + $0x430] sm:$0xff]  }
 0xa98   : > { %17313 = vmatprep.subr.bf16.mxu1 %v18886_v27 }
 0xa99   : > { %17422 = vmatpush3.bf16.msra.mxu0 %v18658_v1  ;;  %v18702_v1 = vld [vmem:[%s23789_s7 + $0x428] sm:$0xff]  }
 0xa9a   : > { %17447 = vmatprep.subr.bf16.mxu0 %v18886_v27 }
 0xa9b   : > { %17314 = vmatpush3.bf16.msra.mxu1 %v18659_v14  ;;  %v18703_v14 = vld [vmem:[%s23789_s7 + $0x2c8] sm:$0xff]  }
 0xa9c   : > { %17424 = vmatmul.mubr.bf16.vlgmr.msra.gmra.mrb[168].mxu0 %v10723_v42  ;;  %17315 = vmatprep.subr.bf16.mxu1 %v18886_v27  ;;  %v18706_v42 = vld [vmem:[%s23789_s7 + $0x438] sm:$0xff]  }
 0xa9d   : > { %17448 = vmatpush3.bf16.msra.mxu0 %v18660_v0  ;;  %17463 = vmatprep.mubr.msk.bf16.mxu0 %vm18887_vm3, %v18886_v27  ;;  %v18705_v0 = vld [vmem:[%s23789_s7 + $0x2d0] sm:$0xff]  }
 0xa9e   : > { %17449 = vmatprep.subr.bf16.mxu0 %v18886_v27 }
 0xa9f   : > { %17316 = vmatpush3.bf16.msra.mxu1 %v18661_v16  ;;  %v18707_v16 = vld [vmem:[%s23789_s7 + $0x2d8] sm:$0xff]  }
 0xaa0   : > { %17317 = vmatprep.subr.bf16.mxu1 %v18886_v27 }
 0xaa1   : > { %17450 = vmatpush3.bf16.msra.mxu0 %v18662_v43  ;;  %v18708_v43 = vld [vmem:[%s23789_s7 + $0x480] sm:$0xff]  }
 0xaa2   : > { %17451 = vmatprep.subr.bf16.mxu0 %v18886_v27 }
 0xaa3   : > { %17318 = vmatpush3.bf16.msra.mxu1 %v18663_v49  ;;  %v11365_v49 = vpack.c.bf16 %v22895_v9, %v22895_v9  ;;  %v18711_v9 = vld [vmem:[%s23789_s7 + $0x2e8] sm:$0xff]  }
 0xaa4   : > { %17319 = vmatprep.subr.bf16.mxu1 %v18886_v27 }
 0xaa5   : > { %17452 = vmatpush3.bf16.msra.mxu0 %v18664_v45  ;;  %v18709_v45 = vld [vmem:[%s23789_s7 + $0x2e0] sm:$0xff]  }
 0xaa6   : > { %17453 = vmatprep.subr.bf16.mxu0 %v18886_v27 }
 0xaa7   : > { %17320 = vmatpush3.bf16.msra.mxu1 %v18665_v11  ;;  %v18710_v11 = vld [vmem:[%s23789_s7 + $0x488] sm:$0xff]  }
 0xaa8   : > { %17321 = vmatprep.subr.bf16.mxu1 %v18886_v27 }
 0xaa9   : > { %17454 = vmatpush3.bf16.msra.mxu0 %v18666_v62 }
 0xaaa   : > { %17455 = vmatprep.subr.bf16.mxu0 %v18886_v27 }
 0xaab   : > { %17322 = vmatpush3.bf16.msra.mxu1 %v18667_v38  ;;  %v18712_v38 = vld [vmem:[%s23789_s7 + $0x490] sm:$0xff]  }
 0xaac   : > { %17347 = vmatprep.subr.bf16.mxu1 %v18886_v27 }
 0xaad   : > { %17456 = vmatpush3.bf16.msra.mxu0 %v18668_v54 }
 0xaae   : > { %17324 = vmatmul.mubr.bf16.vlgmr.msra.gmra.mrb[120].mxu1 %v10188_v46  ;;  %17457 = vmatprep.subr.bf16.mxu0 %v18886_v27  ;;  %v18713_v46 = vld [vmem:[%s23789_s7 + $0x2f0] sm:$0xff]  }
 0xaaf   : > { %17348 = vmatpush3.bf16.msra.mxu1 %v18669_v28  ;;  %17363 = vmatprep.mubr.msk.bf16.mxu1 %vm18887_vm3, %v18886_v27 }
 0xab0   : > { %17349 = vmatprep.subr.bf16.mxu1 %v18886_v27 }
 0xab1   : > { %17458 = vmatpush3.bf16.msra.mxu0 %v18670_v18 }
 0xab2   : > { %17459 = vmatprep.subr.bf16.mxu0 %v18886_v27 }
 0xab3   : > { %17350 = vmatpush3.bf16.msra.mxu1 %v18671_v8  ;;  %v18714_v8 = vld [vmem:[%s23789_s7 + $0x498] sm:$0xff]  }
 0xab4   : > { %17351 = vmatprep.subr.bf16.mxu1 %v18886_v27 }
 0xab5   : > { %17460 = vmatpush3.bf16.msra.mxu0 %v18672_v23  ;;  %v18715_v23 = vld [vmem:[%s23789_s7 + $0x2f8] sm:$0xff]  }
 0xab6   : > { %17461 = vmatprep.subr.bf16.mxu0 %v18886_v27 }
 0xab7   : > { %17352 = vmatpush3.bf16.msra.mxu1 %v18673_v22  ;;  %v18716_v22 = vld [vmem:[%s23789_s7 + $0x4a0] sm:$0xff]  }
 0xab8   : > { %17353 = vmatprep.subr.bf16.mxu1 %v18886_v27 }
 0xab9   : > { %17462 = vmatpush3.bf16.msra.mxu0 %v18674_v52  ;;  %v18717_v52 = vld [vmem:[%s23789_s7 + $0x340] sm:$0xff]  }
 0xaba   : > { %17487 = vmatprep.subr.bf16.mxu0 %v18886_v27 }
 0xabb   : > { %17354 = vmatpush3.bf16.msra.mxu1 %v18675_v30  ;;  %v10830_v30 = vpack.c.bf16 %v22832_v60, %v22832_v60 }
 0xabc   : > { %17464 = vmatmul.mubr.bf16.vlgmr.msra.gmra.mrb[172].mxu0 %v10937_v44  ;;  %17355 = vmatprep.subr.bf16.mxu1 %v18886_v27 }
 0xabd   : > { %17488 = vmatpush3.bf16.msra.mxu0 %v18676_v4  ;;  %17503 = vmatprep.mubr.msk.bf16.mxu0 %vm18887_vm3, %v18886_v27  ;;  %v18718_v4 = vld [vmem:[%s23789_s7 + $0x4a8] sm:$0xff]  }
 0xabe   : > { %17489 = vmatprep.subr.bf16.mxu0 %v18886_v27 }
 0xabf   : > { %17356 = vmatpush3.bf16.msra.mxu1 %v18677_v15  ;;  %v18719_v15 = vld [vmem:[%s23789_s7 + $0x348] sm:$0xff]  }
 0xac0   : > { %17357 = vmatprep.subr.bf16.mxu1 %v18886_v27 }
 0xac1   : > { %17490 = vmatpush3.bf16.msra.mxu0 %v18678_v59 }
 0xac2   : > { %17491 = vmatprep.subr.bf16.mxu0 %v18886_v27 }
 0xac3   : > { %17358 = vmatpush3.bf16.msra.mxu1 %v18679_v13  ;;  %v18720_v13 = vld [vmem:[%s23789_s7 + $0x4b0] sm:$0xff]  }
 0xac4   : > { %17359 = vmatprep.subr.bf16.mxu1 %v18886_v27 }
 0xac5   : > { %17492 = vmatpush3.bf16.msra.mxu0 %v18680_v34 }
 0xac6   : > { %17493 = vmatprep.subr.bf16.mxu0 %v18886_v27 }
 0xac7   : > { %17360 = vmatpush3.bf16.msra.mxu1 %v18681_v6  ;;  %v18721_v6 = vld [vmem:[%s23789_s7 + $0x350] sm:$0xff]  }
 0xac8   : > { %17361 = vmatprep.subr.bf16.mxu1 %v18886_v27 }
 0xac9   : > { %17494 = vmatpush3.bf16.msra.mxu0 %v18682_v48  ;;  %v18722_v48 = vld [vmem:[%s23789_s7 + $0x4b8] sm:$0xff]  }
 0xaca   : > { %17495 = vmatprep.subr.bf16.mxu0 %v18886_v27 }
 0xacb   : > { %17362 = vmatpush3.bf16.msra.mxu1 %v18683_v25  ;;  %v18723_v25 = vld [vmem:[%s23789_s7 + $0x358] sm:$0xff]  }
 0xacc   : > { %17387 = vmatprep.subr.bf16.mxu1 %v18886_v27 }
 0xacd   : > { %17496 = vmatpush3.bf16.msra.mxu0 %v18684_v56  ;;  %v18724_v56 = vld [vmem:[%s23789_s7 + $0x500] sm:$0xff]  }
 0xace   : > { %17364 = vmatmul.mubr.bf16.vlgmr.msra.gmra.mrb[124].mxu1 %v10402_v39  ;;  %17497 = vmatprep.subr.bf16.mxu0 %v18886_v27  ;;  %v18725_v39 = vld [vmem:[%s23789_s7 + $0x360] sm:$0xff]  }
 0xacf   : > { %17388 = vmatpush3.bf16.msra.mxu1 %v18685_v5  ;;  %17403 = vmatprep.mubr.msk.bf16.mxu1 %vm18887_vm3, %v18886_v27  ;;  %v11579_v5 = vpack.c.bf16 %v22921_v31, %v22921_v31  ;;  %v18727_v31 = vld [vmem:[%s23789_s7 + $0x368] sm:$0xff]  }
 0xad0   : > { %17389 = vmatprep.subr.bf16.mxu1 %v18886_v27 }
 0xad1   : > { %17498 = vmatpush3.bf16.msra.mxu0 %v18686_v47  ;;  %v18726_v47 = vld [vmem:[%s23789_s7 + $0x508] sm:$0xff]  }
 0xad2   : > { %17499 = vmatprep.subr.bf16.mxu0 %v18886_v27 }
 0xad3   : > { %17390 = vmatpush3.bf16.msra.mxu1 %v18687_v17 }
 0xad4   : > { %17391 = vmatprep.subr.bf16.mxu1 %v18886_v27 }
 0xad5   : > { %17500 = vmatpush3.bf16.msra.mxu0 %v18688_v19  ;;  %v18728_v19 = vld [vmem:[%s23789_s7 + $0x510] sm:$0xff]  }
 0xad6   : > { %17501 = vmatprep.subr.bf16.mxu0 %v18886_v27 }
 0xad7   : > { %17392 = vmatpush3.bf16.msra.mxu1 %v18689_v50 }
 0xad8   : > { %17393 = vmatprep.subr.bf16.mxu1 %v18886_v27 }
 0xad9   : > { %17502 = vmatpush3.bf16.msra.mxu0 %v18690_v3 }
 0xada   : > { %17527 = vmatprep.subr.bf16.mxu0 %v18886_v27 }
 0xadb   : > { %17394 = vmatpush3.bf16.msra.mxu1 %v18691_v24 }
 0xadc   : > { %17504 = vmatmul.mubr.bf16.vlgmr.msra.gmra.mrb[176].mxu0 %v11151_v55  ;;  %17395 = vmatprep.subr.bf16.mxu1 %v18886_v27 }
 0xadd   : > { %17528 = vmatpush3.bf16.msra.mxu0 %v18692_v29  ;;  %17543 = vmatprep.mubr.msk.bf16.mxu0 %vm18887_vm3, %v18886_v27  ;;  %v18729_v29 = vld [vmem:[%s23789_s7 + $0x370] sm:$0xff]  }
 0xade   : > { %17529 = vmatprep.subr.bf16.mxu0 %v18886_v27 }
 0xadf   : > { %17396 = vmatpush3.bf16.msra.mxu1 %v18693_v37  ;;  %v18730_v37 = vld [vmem:[%s23789_s7 + $0x518] sm:$0xff]  }
 0xae0   : > { %17397 = vmatprep.subr.bf16.mxu1 %v18886_v27 }
 0xae1   : > { %17530 = vmatpush3.bf16.msra.mxu0 %v18694_v21  ;;  %v18731_v21 = vld [vmem:[%s23789_s7 + $0x378] sm:$0xff]  }
 0xae2   : > { %17531 = vmatprep.subr.bf16.mxu0 %v18886_v27 }
 0xae3   : > { %17398 = vmatpush3.bf16.msra.mxu1 %v18695_v61  ;;  %v18732_v61 = vld [vmem:[%s23789_s7 + $0x520] sm:$0xff]  }
 0xae4   : > { %17399 = vmatprep.subr.bf16.mxu1 %v18886_v27 }
 0xae5   : > { %17532 = vmatpush3.bf16.msra.mxu0 %v18696_v33  ;;  %v18733_v33 = vld [vmem:[%s23789_s7 + $0x3c0] sm:$0xff]  }
 0xae6   : > { %17533 = vmatprep.subr.bf16.mxu0 %v18886_v27 }
 0xae7   : > { %17400 = vmatpush3.bf16.msra.mxu1 %v18697_v12  ;;  %v11044_v12 = vpack.c.bf16 %v22856_v36, %v22856_v36 }
 0xae8   : > { %17401 = vmatprep.subr.bf16.mxu1 %v18886_v27 }
 0xae9   : > { %17534 = vmatpush3.bf16.msra.mxu0 %v18698_v2  ;;  %v18734_v2 = vld [vmem:[%s23789_s7 + $0x528] sm:$0xff]  }
 0xaea   : > { %17535 = vmatprep.subr.bf16.mxu0 %v18886_v27 }
 0xaeb   : > { %17402 = vmatpush3.bf16.msra.mxu1 %v18699_v40 }
 0xaec   : > { %17427 = vmatprep.subr.bf16.mxu1 %v18886_v27 }
 0xaed   : > { %17536 = vmatpush3.bf16.msra.mxu0 %v18700_v57  ;;  %v18735_v57 = vld [vmem:[%s23789_s7 + $0x3c8] sm:$0xff]  }
 0xaee   : > { %17404 = vmatmul.mubr.bf16.vlgmr.msra.gmra.mrb[128].mxu1 %v10616_v7  ;;  %17537 = vmatprep.subr.bf16.mxu0 %v18886_v27  ;;  %v18736_v7 = vld [vmem:[%s23789_s7 + $0x530] sm:$0xff]  }
 0xaef   : > { %17428 = vmatpush3.bf16.msra.mxu1 %v18701_v58  ;;  %17443 = vmatprep.mubr.msk.bf16.mxu1 %vm18887_vm3, %v18886_v27 }
 0xaf0   : > { %17429 = vmatprep.subr.bf16.mxu1 %v18886_v27 }
 0xaf1   : > { %17538 = vmatpush3.bf16.msra.mxu0 %v18702_v1 }
 0xaf2   : > { %17539 = vmatprep.subr.bf16.mxu0 %v18886_v27 }
 0xaf3   : > { %17430 = vmatpush3.bf16.msra.mxu1 %v18703_v14  ;;  %v18737_v14 = vld [vmem:[%s23789_s7 + $0x3d0] sm:$0xff]  }
 0xaf4   : > { %17431 = vmatprep.subr.bf16.mxu1 %v18886_v27 }
 0xaf5   : > { %17540 = vmatpush3.bf16.msra.mxu0 %v18704_v63  ;;  %v18738_v63 = vld [vmem:[%s23789_s7 + $0x538] sm:$0xff]  }
 0xaf6   : > { %17541 = vmatprep.subr.bf16.mxu0 %v18886_v27 }
 0xaf7   : > { %17432 = vmatpush3.bf16.msra.mxu1 %v18705_v0  ;;  %v18739_v0 = vld [vmem:[%s23789_s7 + $0x3d8] sm:$0xff]  }
 0xaf8   : > { %17433 = vmatprep.subr.bf16.mxu1 %v18886_v27 }
 0xaf9   : > { %17542 = vmatpush3.bf16.msra.mxu0 %v18706_v42  ;;  %v18740_v42 = vld [vmem:[%s23789_s7 + $0x580] sm:$0xff]  }
 0xafa   : > { %17567 = vmatprep.subr.bf16.mxu0 %v18886_v27 }
 0xafb   : > { %17434 = vmatpush3.bf16.msra.mxu1 %v18707_v16  ;;  %v11793_v16 = vpack.c.bf16 %v22943_v41, %v22943_v41  ;;  %v18743_v41 = vld [vmem:[%s23789_s7 + $0x3e8] sm:$0xff]  }
 0xafc   : > { %17544 = vmatmul.mubr.bf16.vlgmr.msra.gmra.mrb[180].mxu0 %v11365_v49  ;;  %17435 = vmatprep.subr.bf16.mxu1 %v18886_v27  ;;  %v18742_v49 = vld [vmem:[%s23789_s7 + $0x588] sm:$0xff]  }
 0xafd   : > { %17568 = vmatpush3.bf16.msra.mxu0 %v18708_v43  ;;  %17583 = vmatprep.mubr.msk.bf16.mxu0 %vm18887_vm3, %v18886_v27  ;;  %v18741_v43 = vld [vmem:[%s23789_s7 + $0x3e0] sm:$0xff]  }
 0xafe   : > { %17569 = vmatprep.subr.bf16.mxu0 %v18886_v27 }
 0xaff   : > { %17436 = vmatpush3.bf16.msra.mxu1 %v18709_v45 }
 0xb00   : > { %17437 = vmatprep.subr.bf16.mxu1 %v18886_v27 }
 0xb01   : > { %17570 = vmatpush3.bf16.msra.mxu0 %v18710_v11  ;;  %v23266_v62 = vpop.f32.mrb[104].mxu1  ;;  %v18744_v11 = vld [vmem:[%s23789_s7 + $0x590] sm:$0xff]  }
 0xb02   : > { %v17225_v54 = vpop.f32.mrb[105].mxu1  ;;  %17571 = vmatprep.subr.bf16.mxu0 %v18886_v27 }
 0xb03   : > { %17438 = vmatpush3.bf16.msra.mxu1 %v18711_v9  ;;  %v9776_v28 = vpop.f32.mrb[106].mxu1  ;;  %v18745_v54 = vld [vmem:[%s23789_s7 + $0x3f0] sm:$0xff]  }
 0xb04   : > { %v17226_v18 = vpop.f32.mrb[107].mxu1  ;;  %17439 = vmatprep.subr.bf16.mxu1 %v18886_v27 }
 0xb05   : > { %17572 = vmatpush3.bf16.msra.mxu0 %v18712_v38  ;;  %v18747_v18 = vld [vmem:[%s23789_s7 + $0x3f8] sm:$0xff]  }
 0xb06   : > { %17573 = vmatprep.subr.bf16.mxu0 %v18886_v27 }
 0xb07   : > { %17440 = vmatpush3.bf16.msra.mxu1 %v18713_v46  ;;  %v18746_v46 = vld [vmem:[%s23789_s7 + $0x598] sm:$0xff]  }
 0xb08   : > { %17441 = vmatprep.subr.bf16.mxu1 %v18886_v27 }
 0xb09   : > { %17574 = vmatpush3.bf16.msra.mxu0 %v18714_v8  ;;  %v18748_v8 = vld [vmem:[%s23789_s7 + $0x5a0] sm:$0xff]  }
 0xb0a   : > { %17575 = vmatprep.subr.bf16.mxu0 %v18886_v27 }
 0xb0b   : > { %17442 = vmatpush3.bf16.msra.mxu1 %v18715_v23  ;;  %v18749_v23 = vld [vmem:[%s23789_s7 + $0x440] sm:$0xff]  }
 0xb0c   : > { %17467 = vmatprep.subr.bf16.mxu1 %v18886_v27 }
 0xb0d   : > { %17576 = vmatpush3.bf16.msra.mxu0 %v18716_v22  ;;  %v11258_v22 = vpack.c.bf16 %v22880_v53, %v22880_v53 }
 0xb0e   : > { %17444 = vmatmul.mubr.bf16.vlgmr.msra.gmra.mrb[132].mxu1 %v10830_v30  ;;  %17577 = vmatprep.subr.bf16.mxu0 %v18886_v27 }
 0xb0f   : > { %17468 = vmatpush3.bf16.msra.mxu1 %v18717_v52  ;;  %v23298_v44 = vpop.f32.mrb[156].mxu0  ;;  %17483 = vmatprep.mubr.msk.bf16.mxu1 %vm18887_vm3, %v18886_v27  ;;  %v18750_v52 = vld [vmem:[%s23789_s7 + $0x5a8] sm:$0xff]  }
 0xb10   : > { %v17305_v60 = vpop.f32.mrb[157].mxu0  ;;  %17469 = vmatprep.subr.bf16.mxu1 %v18886_v27 }
 0xb11   : > { %17578 = vmatpush3.bf16.msra.mxu0 %v18718_v4  ;;  %v10184_v59 = vpop.f32.mrb[158].mxu0  ;;  %v18751_v4 = vld [vmem:[%s23789_s7 + $0x448] sm:$0xff]   ;;  %v18752_v60 = vld [vmem:[%s23789_s7 + $0x5b0] sm:$0xff]  }
 0xb12   : > { %v17306_v34 = vpop.f32.mrb[159].mxu0  ;;  %17579 = vmatprep.subr.bf16.mxu0 %v18886_v27 }
 0xb13   : > { %17470 = vmatpush3.bf16.msra.mxu1 %v18719_v15  ;;  %v18754_v34 = vld [vmem:[%s23789_s7 + $0x5b8] sm:$0xff]  }
 0xb14   : > { %17471 = vmatprep.subr.bf16.mxu1 %v18886_v27 }
 0xb15   : > { %17580 = vmatpush3.bf16.msra.mxu0 %v18720_v13  ;;  %v18753_v13 = vld [vmem:[%s23789_s7 + $0x450] sm:$0xff]  }
 0xb16   : > { %17581 = vmatprep.subr.bf16.mxu0 %v18886_v27 }
 0xb17   : > { %17472 = vmatpush3.bf16.msra.mxu1 %v18721_v6  ;;  %v18755_v6 = vld [vmem:[%s23789_s7 + $0x458] sm:$0xff]  }
 0xb18   : > { %17473 = vmatprep.subr.bf16.mxu1 %v18886_v27 }
 0xb19   : > { %17582 = vmatpush3.bf16.msra.mxu0 %v18722_v48  ;;  %v18756_v48 = vld [vmem:[%s23789_s7 + $0x600] sm:$0xff]  }
 0xb1a   : > { %17607 = vmatprep.subr.bf16.mxu0 %v18886_v27 }
 0xb1b   : > { %17474 = vmatpush3.bf16.msra.mxu1 %v18723_v25  ;;  %v12007_v25 = vpack.c.bf16 %v22969_v32, %v22969_v32  ;;  %v18759_v32 = vld [vmem:[%s23789_s7 + $0x468] sm:$0xff]  }
 0xb1c   : > { %17584 = vmatmul.mubr.bf16.vlgmr.msra.gmra.mrb[184].mxu0 %v11579_v5  ;;  %17475 = vmatprep.subr.bf16.mxu1 %v18886_v27  ;;  %v18758_v5 = vld [vmem:[%s23789_s7 + $0x608] sm:$0xff]  }
 0xb1d   : > { %17608 = vmatpush3.bf16.msra.mxu0 %v18724_v56  ;;  %17623 = vmatprep.mubr.msk.bf16.mxu0 %vm18887_vm3, %v18886_v27  ;;  %v18757_v56 = vld [vmem:[%s23789_s7 + $0x460] sm:$0xff]  }
 0xb1e   : > { %17609 = vmatprep.subr.bf16.mxu0 %v18886_v27 }
 0xb1f   : > { %17476 = vmatpush3.bf16.msra.mxu1 %v18725_v39 }
 0xb20   : > { %17477 = vmatprep.subr.bf16.mxu1 %v18886_v27 }
 0xb21   : > { %v9861_v17 = vpop.f32.mrb[108].mxu1  ;;  %17610 = vmatpush3.bf16.msra.mxu0 %v18726_v47  ;;  %v18760_v47 = vld [vmem:[%s23789_s7 + $0x610] sm:$0xff]  }
 0xb22   : > { %v23346_v50 = vadd.f32 %v9861_v17, %v23266_v62  ;;  %v17245_v3 = vpop.f32.mrb[109].mxu1  ;;  %17611 = vmatprep.subr.bf16.mxu0 %v18886_v27 }
 0xb23   : > { %v9864_v24 = vpop.f32.mrb[110].mxu1  ;;  %17478 = vmatpush3.bf16.msra.mxu1 %v18727_v31 }
 0xb24   : > { %v17246_v55 = vpop.f32.mrb[111].mxu1  ;;  %17479 = vmatprep.subr.bf16.mxu1 %v18886_v27 }
 0xb25   : > { %17612 = vmatpush3.bf16.msra.mxu0 %v18728_v19  ;;  %v18763_v55 = vld [vmem:[%s23789_s7 + $0x478] sm:$0xff]  }
 0xb26   : > { %17613 = vmatprep.subr.bf16.mxu0 %v18886_v27 }
 0xb27   : > { %17480 = vmatpush3.bf16.msra.mxu1 %v18729_v29  ;;  %v18762_v29 = vld [vmem:[%s23789_s7 + $0x618] sm:$0xff]  }
 0xb28   : > { %17481 = vmatprep.subr.bf16.mxu1 %v18886_v27 }
 0xb29   : > { %17614 = vmatpush3.bf16.msra.mxu0 %v18730_v37  ;;  %v18764_v37 = vld [vmem:[%s23789_s7 + $0x620] sm:$0xff]  }
 0xb2a   : > { %17615 = vmatprep.subr.bf16.mxu0 %v18886_v27 }
 0xb2b   : > { %17482 = vmatpush3.bf16.msra.mxu1 %v18731_v21  ;;  %v11472_v21 = vpack.c.bf16 %v22902_v20, %v22902_v20 }
 0xb2c   : > { %17507 = vmatprep.subr.bf16.mxu1 %v18886_v27 }
 0xb2d   : > { %17616 = vmatpush3.bf16.msra.mxu0 %v18732_v61  ;;  %v18766_v61 = vld [vmem:[%s23789_s7 + $0x628] sm:$0xff]  }
 0xb2e   : > { %17484 = vmatmul.mubr.bf16.vlgmr.msra.gmra.mrb[136].mxu1 %v11044_v12  ;;  %17617 = vmatprep.subr.bf16.mxu0 %v18886_v27  ;;  %v18767_v12 = vld [vmem:[%s23789_s7 + $0x4c8] sm:$0xff]  }
 0xb2f   : > { %v23375_v40 = vpop.f32.mrb[160].mxu0  ;;  %17508 = vmatpush3.bf16.msra.mxu1 %v18733_v33  ;;  %17523 = vmatprep.mubr.msk.bf16.mxu1 %vm18887_vm3, %v18886_v27 }
 0xb30   : > { %v17345_v36 = vpop.f32.mrb[161].mxu0  ;;  %17509 = vmatprep.subr.bf16.mxu1 %v18886_v27 }
 0xb31   : > { %v10398_v58 = vpop.f32.mrb[162].mxu0  ;;  %17618 = vmatpush3.bf16.msra.mxu0 %v18734_v2 }
 0xb32   : > { %v17346_v1 = vpop.f32.mrb[163].mxu0  ;;  %17619 = vmatprep.subr.bf16.mxu0 %v18886_v27  ;;  %v18769_v58 = vld [vmem:[%s23789_s7 + $0x4d0] sm:$0xff]  }
 0xb33   : > { %17510 = vmatpush3.bf16.msra.mxu1 %v18735_v57  ;;  %v18768_v57 = vld [vmem:[%s23789_s7 + $0x630] sm:$0xff]   ;;  %v18771_v1 = vld [vmem:[%s23789_s7 + $0x4d8] sm:$0xff]  }
 0xb34   : > { %17511 = vmatprep.subr.bf16.mxu1 %v18886_v27 }
 0xb35   : > { %17620 = vmatpush3.bf16.msra.mxu0 %v18736_v7  ;;  %v18770_v7 = vld [vmem:[%s23789_s7 + $0x638] sm:$0xff]  }
 0xb36   : > { %17621 = vmatprep.subr.bf16.mxu0 %v18886_v27 }
 0xb37   : > { %17512 = vmatpush3.bf16.msra.mxu1 %v18737_v14  ;;  %v12221_v14 = vpack.c.bf16 %v22991_v35, %v22991_v35 }
 0xb38   : > { %17513 = vmatprep.subr.bf16.mxu1 %v18886_v27 }
 0xb39   : > { %17622 = vmatpush3.bf16.msra.mxu0 %v18738_v63  ;;  %v18772_v63 = vld [vmem:[%s23789_s7 + $0x4e0] sm:$0xff]  }
 0xb3a   : > { %17647 = vmatprep.subr.bf16.mxu0 %v18886_v27 }
 0xb3b   : > { %17514 = vmatpush3.bf16.msra.mxu1 %v18739_v0  ;;  %v18773_v0 = vld [vmem:[%s23789_s7 + $0x4e8] sm:$0xff]  }
 0xb3c   : > { %17624 = vmatmul.mubr.bf16.vlgmr.msra.gmra.mrb[188].mxu0 %v11793_v16  ;;  %17515 = vmatprep.subr.bf16.mxu1 %v18886_v27 }
 0xb3d   : > { %17648 = vmatpush3.bf16.msra.mxu0 %v18740_v42  ;;  %17663 = vmatprep.mubr.msk.bf16.mxu0 %vm18887_vm3, %v18886_v27 }
 0xb3e   : > { %17649 = vmatprep.subr.bf16.mxu0 %v18886_v27 }
 0xb3f   : > { %17516 = vmatpush3.bf16.msra.mxu1 %v18741_v43 }
 0xb40   : > { %17517 = vmatprep.subr.bf16.mxu1 %v18886_v27 }
 0xb41   : > { %v9967_v45 = vpop.f32.mrb[112].mxu1  ;;  %17650 = vmatpush3.bf16.msra.mxu0 %v18742_v49  ;;  %v18774_v49 = vld [vmem:[%s23789_s7 + $0x4f0] sm:$0xff]  }
 0xb42   : > { %v23423_v9 = vadd.f32 %v9967_v45, %v23346_v50  ;;  %v17265_v62 = vpop.f32.mrb[113].mxu1  ;;  %17651 = vmatprep.subr.bf16.mxu0 %v18886_v27  ;;  %v18761_v50 = vld [vmem:[%s23789_s7 + $0x470] sm:$0xff]  }
 0xb43   : > { %v9970_v38 = vpop.f32.mrb[114].mxu1  ;;  %17518 = vmatpush3.bf16.msra.mxu1 %v18743_v41  ;;  %v11686_v62 = vpack.c.bf16 %v22928_v51, %v22928_v51  ;;  %v18778_v51 = vld [vmem:[%s23789_s7 + $0x550] sm:$0xff]  }
 0xb44   : > { %v17266_v28 = vpop.f32.mrb[115].mxu1  ;;  %17519 = vmatprep.subr.bf16.mxu1 %v18886_v27 }
 0xb45   : > { %17652 = vmatpush3.bf16.msra.mxu0 %v18744_v11  ;;  %v18775_v11 = vld [vmem:[%s23789_s7 + $0x4f8] sm:$0xff]  }
 0xb46   : > { %17653 = vmatprep.subr.bf16.mxu0 %v18886_v27 }
 0xb47   : > { %17520 = vmatpush3.bf16.msra.mxu1 %v18745_v54 }
 0xb48   : > { %17521 = vmatprep.subr.bf16.mxu1 %v18886_v27 }
 0xb49   : > { %17654 = vmatpush3.bf16.msra.mxu0 %v18746_v46 }
 0xb4a   : > { %17655 = vmatprep.subr.bf16.mxu0 %v18886_v27 }
 0xb4b   : > { %17522 = vmatpush3.bf16.msra.mxu1 %v18747_v18  ;;  %v18779_v18 = vld [vmem:[%s23789_s7 + $0x558] sm:$0xff]  }
 0xb4c   : > { %17547 = vmatprep.subr.bf16.mxu1 %v18886_v27 }
 0xb4d   : > { %17656 = vmatpush3.bf16.msra.mxu0 %v18748_v8  ;;  %v18780_v8 = vld [vmem:[%s23789_s7 + $0x560] sm:$0xff]  }
 0xb4e   : > { %17524 = vmatmul.mubr.bf16.vlgmr.msra.gmra.mrb[140].mxu1 %v11258_v22  ;;  %17657 = vmatprep.subr.bf16.mxu0 %v18886_v27 }
 0xb4f   : > { %v23452_v30 = vpop.f32.mrb[164].mxu0  ;;  %17548 = vmatpush3.bf16.msra.mxu1 %v18749_v23  ;;  %17563 = vmatprep.mubr.msk.bf16.mxu1 %vm18887_vm3, %v18886_v27  ;;  %v18781_v23 = vld [vmem:[%s23789_s7 + $0x568] sm:$0xff]  }
 0xb50   : > { %v17385_v53 = vpop.f32.mrb[165].mxu0  ;;  %17549 = vmatprep.subr.bf16.mxu1 %v18886_v27 }
 0xb51   : > { %v10612_v15 = vpop.f32.mrb[166].mxu0  ;;  %17658 = vmatpush3.bf16.msra.mxu0 %v18750_v52 }
 0xb52   : > { %v17386_v59 = vpop.f32.mrb[167].mxu0  ;;  %17659 = vmatprep.subr.bf16.mxu0 %v18886_v27  ;;  %v18782_v15 = vld [vmem:[%s23789_s7 + $0x570] sm:$0xff]  }
 0xb53   : > { %17550 = vmatpush3.bf16.msra.mxu1 %v18751_v4 }
 0xb54   : > { %17551 = vmatprep.subr.bf16.mxu1 %v18886_v27 }
 0xb55   : > { %17660 = vmatpush3.bf16.msra.mxu0 %v18752_v60 }
 0xb56   : > { %17661 = vmatprep.subr.bf16.mxu0 %v18886_v27 }
 0xb57   : > { %17552 = vmatpush3.bf16.msra.mxu1 %v18753_v13  ;;  %v18783_v13 = vld [vmem:[%s23789_s7 + $0x578] sm:$0xff]  }
 0xb58   : > { %17553 = vmatprep.subr.bf16.mxu1 %v18886_v27 }
 0xb59   : > { %17662 = vmatpush3.bf16.msra.mxu0 %v18754_v34  ;;  %v18784_v34 = vld [vmem:[%s23789_s7 + $0x5c0] sm:$0xff]  }
 0xb5a   : > { %17687 = vmatprep.subr.bf16.mxu0 %v18886_v27 }
 0xb5b   : > { %17554 = vmatpush3.bf16.msra.mxu1 %v18755_v6  ;;  %v11900_v6 = vpack.c.bf16 %v22952_v10, %v22952_v10  ;;  %v18786_v10 = vld [vmem:[%s23789_s7 + $0x5d0] sm:$0xff]  }
 0xb5c   : > { %17664 = vmatmul.mubr.bf16.vlgmr.msra.gmra.mrb[192].mxu0 %v12007_v25  ;;  %17555 = vmatprep.subr.bf16.mxu1 %v18886_v27 }
 0xb5d   : > { %17688 = vmatpush3.bf16.msra.mxu0 %v18756_v48  ;;  %17703 = vmatprep.mubr.msk.bf16.mxu0 %vm18887_vm3, %v18886_v27 }
 0xb5e   : > { %17689 = vmatprep.subr.bf16.mxu0 %v18886_v27 }
 0xb5f   : > { %17556 = vmatpush3.bf16.msra.mxu1 %v18757_v56 }
 0xb60   : > { %17557 = vmatprep.subr.bf16.mxu1 %v18886_v27 }
 0xb61   : > { %v10074_v39 = vpop.f32.mrb[116].mxu1  ;;  %17690 = vmatpush3.bf16.msra.mxu0 %v18758_v5 }
 0xb62   : > { %v10080_v31 = vadd.f32 %v10074_v39, %v23423_v9  ;;  %v17285_v17 = vpop.f32.mrb[117].mxu1  ;;  %17691 = vmatprep.subr.bf16.mxu0 %v18886_v27  ;;  %v18776_v9 = vld [vmem:[%s23789_s7 + $0x540] sm:$0xff]  }
 0xb63   : > { %v10077_v19 = vpop.f32.mrb[118].mxu1  ;;  %17558 = vmatpush3.bf16.msra.mxu1 %v18759_v32  ;;  %v18787_v32 = vld [vmem:[%s23789_s7 + $0x5d8] sm:$0xff]   ;;  %v18788_v39 = vld [vmem:[%s23789_s7 + $0x5e0] sm:$0xff]  }
 0xb64   : > { %v17286_v3 = vpop.f32.mrb[119].mxu1  ;;  %17559 = vmatprep.subr.bf16.mxu1 %v18886_v27  ;;  %v10187_v24 = vadd.f32 %v23298_v44, %v10080_v31  ;;  %v18765_v44 = vld [vmem:[%s23789_s7 + $0x4c0] sm:$0xff]  }
 0xb65   : > { %17692 = vmatpush3.bf16.msra.mxu0 %v18760_v47  ;;  %v18789_v47 = vld [vmem:[%s23789_s7 + $0x5e8] sm:$0xff]   ;;  %v18790_v3 = vld [vmem:[%s23789_s7 + $0x5f0] sm:$0xff]  }
 0xb66   : > { %17693 = vmatprep.subr.bf16.mxu0 %v18886_v27 }
 0xb67   : > { %17560 = vmatpush3.bf16.msra.mxu1 %v18761_v50 }
 0xb68   : > { %17561 = vmatprep.subr.bf16.mxu1 %v18886_v27 }
 0xb69   : > { %17694 = vmatpush3.bf16.msra.mxu0 %v18762_v29 }
 0xb6a   : > { %17695 = vmatprep.subr.bf16.mxu0 %v18886_v27 }
 0xb6b   : > { %17562 = vmatpush3.bf16.msra.mxu1 %v18763_v55  ;;  %v18791_v55 = vld [vmem:[%s23789_s7 + $0x5f8] sm:$0xff]  }
 0xb6c   : > { %17587 = vmatprep.subr.bf16.mxu1 %v18886_v27 }
 0xb6d   : > { %17696 = vmatpush3.bf16.msra.mxu0 %v18764_v37  ;;  %v12114_v37 = vpack.c.bf16 %v22976_v26, %v22976_v26 }
 0xb6e   : > { %17564 = vmatmul.mubr.bf16.vlgmr.msra.gmra.mrb[144].mxu1 %v11472_v21  ;;  %17697 = vmatprep.subr.bf16.mxu0 %v18886_v27 }
 0xb6f   : > { %v23528_v33 = vpop.f32.mrb[168].mxu0  ;;  %17588 = vmatpush3.bf16.msra.mxu1 %v18765_v44  ;;  %17603 = vmatprep.mubr.msk.bf16.mxu1 %vm18887_vm3, %v18886_v27 }
 0xb70   : > { %v17425_v20 = vpop.f32.mrb[169].mxu0  ;;  %17589 = vmatprep.subr.bf16.mxu1 %v18886_v27 }
 0xb71   : > { %v10826_v2 = vpop.f32.mrb[170].mxu0  ;;  %17698 = vmatpush3.bf16.msra.mxu0 %v18766_v61 }
 0xb72   : > { %v17426_v36 = vpop.f32.mrb[171].mxu0  ;;  %17699 = vmatprep.subr.bf16.mxu0 %v18886_v27 }
 0xb73   : > { %17590 = vmatpush3.bf16.msra.mxu1 %v18767_v12 }
 0xb74   : > { %17591 = vmatprep.subr.bf16.mxu1 %v18886_v27 }
 0xb75   : > { %17700 = vmatpush3.bf16.msra.mxu0 %v18768_v57 }
 0xb76   : > { %17701 = vmatprep.subr.bf16.mxu0 %v18886_v27 }
 0xb77   : > { %17592 = vmatpush3.bf16.msra.mxu1 %v18769_v58 }
 0xb78   : > { %17593 = vmatprep.subr.bf16.mxu1 %v18886_v27 }
 0xb79   : > { %17702 = vmatpush3.bf16.msra.mxu0 %v18770_v7 }
 0xb7a   : > { %17727 = vmatprep.subr.bf16.mxu0 %v18886_v27 }
 0xb7b   : > { %17594 = vmatpush3.bf16.msra.mxu1 %v18771_v1 }
 0xb7c   : > { %17704 = vmatmul.mubr.bf16.vlgmr.msra.gmra.mrb[196].mxu0 %v12221_v14  ;;  %17595 = vmatprep.subr.bf16.mxu1 %v18886_v27 }
 0xb7d   : > { %17743 = vmatprep.mubr.msk.bf16.mxu0 %vm18887_vm3, %v18886_v27 }
 0xb7f   : > { %17596 = vmatpush3.bf16.msra.mxu1 %v18772_v63 }
 0xb80   : > { %17597 = vmatprep.subr.bf16.mxu1 %v18886_v27 }
 0xb81   : > { %v10288_v35 = vpop.f32.mrb[120].mxu1 }
 0xb82   : > { %v10294_v42 = vadd.f32 %v10288_v35, %v10187_v24  ;;  %v17325_v16 = vpop.f32.mrb[121].mxu1 }
 0xb83   : > { %v10291_v43 = vpop.f32.mrb[122].mxu1  ;;  %17598 = vmatpush3.bf16.msra.mxu1 %v18773_v0 }
 0xb84   : > { %v17326_v41 = vpop.f32.mrb[123].mxu1  ;;  %17599 = vmatprep.subr.bf16.mxu1 %v18886_v27  ;;  %v10401_v45 = vadd.f32 %v23375_v40, %v10294_v42  ;;  %v18777_v40 = vld [vmem:[%s23789_s7 + $0x548] sm:$0xff]  }
 0xb85   : > { %v18793_v41 = vld [vmem:[%s23791_s9 + $0x8] sm:$0xff]  }
 0xb87   : > { %17600 = vmatpush3.bf16.msra.mxu1 %v18774_v49  ;;  %v18792_v49 = vld [vmem:[%s23791_s9] sm:$0xff]  }
 0xb88   : > { %17601 = vmatprep.subr.bf16.mxu1 %v18886_v27 }
 0xb8b   : > { %17602 = vmatpush3.bf16.msra.mxu1 %v18775_v11 }
 0xb8c   : > { %17627 = vmatprep.subr.bf16.mxu1 %v18886_v27 }
 0xb8e   : > { %17604 = vmatmul.mubr.bf16.vlgmr.msra.gmra.mrb[148].mxu1 %v11686_v62 }
 0xb8f   : > { %v23580_v38 = vpop.f32.mrb[172].mxu0  ;;  %17628 = vmatpush3.bf16.msra.mxu1 %v18776_v9  ;;  %17643 = vmatprep.mubr.msk.bf16.mxu1 %vm18887_vm3, %v18886_v27 }
 0xb90   : > { %v17465_v54 = vpop.f32.mrb[173].mxu0  ;;  %17629 = vmatprep.subr.bf16.mxu1 %v18886_v27 }
 0xb91   : > { %v11040_v28 = vpop.f32.mrb[174].mxu0 }
 0xb92   : > { %v17466_v46 = vpop.f32.mrb[175].mxu0 }
 0xb93   : > { %17630 = vmatpush3.bf16.msra.mxu1 %v18777_v40  ;;  %v18795_v40 = vld [vmem:[%s23791_s9 + $0x18] sm:$0xff]  }
 0xb94   : > { %17631 = vmatprep.subr.bf16.mxu1 %v18886_v27 }
 0xb97   : > { %17632 = vmatpush3.bf16.msra.mxu1 %v18778_v51 }
 0xb98   : > { %17633 = vmatprep.subr.bf16.mxu1 %v18886_v27 }
 0xb9b   : > { %17634 = vmatpush3.bf16.msra.mxu1 %v18779_v18 }
 0xb9c   : > { %17635 = vmatprep.subr.bf16.mxu1 %v18886_v27 }
 0xb9f   : > { %17636 = vmatpush3.bf16.msra.mxu1 %v18780_v8 }
 0xba0   : > { %17637 = vmatprep.subr.bf16.mxu1 %v18886_v27 }
 0xba1   : > { %v10502_v22 = vpop.f32.mrb[124].mxu1 }
 0xba2   : > { %v10508_v52 = vadd.f32 %v10502_v22, %v10401_v45  ;;  %v17365_v4 = vpop.f32.mrb[125].mxu1  ;;  %v18794_v45 = vld [vmem:[%s23791_s9 + $0x10] sm:$0xff]   ;;  %v18797_v22 = vld [vmem:[%s23791_s9 + $0x28] sm:$0xff]  }
 0xba3   : > { %v10505_v53 = vpop.f32.mrb[126].mxu1  ;;  %17638 = vmatpush3.bf16.msra.mxu1 %v18781_v23  ;;  %v18796_v23 = vld [vmem:[%s23791_s9 + $0x20] sm:$0xff]   ;;  %v18799_v4 = vld [vmem:[%s23791_s9 + $0x38] sm:$0xff]  }
 0xba4   : > { %v17366_v60 = vpop.f32.mrb[127].mxu1  ;;  %17639 = vmatprep.subr.bf16.mxu1 %v18886_v27  ;;  %v10615_v59 = vadd.f32 %v23452_v30, %v10508_v52  ;;  %v18785_v30 = vld [vmem:[%s23789_s7 + $0x5c8] sm:$0xff]   ;;  %v18798_v52 = vld [vmem:[%s23791_s9 + $0x30] sm:$0xff]  }
 0xba7   : > { %17640 = vmatpush3.bf16.msra.mxu1 %v18782_v15 }
 0xba8   : > { %17641 = vmatprep.subr.bf16.mxu1 %v18886_v27 }
 0xbab   : > { %17642 = vmatpush3.bf16.msra.mxu1 %v18783_v13  ;;  %v18800_v13 = vld [vmem:[%s23793_s11] sm:$0xff]  }
 0xbac   : > { %17667 = vmatprep.subr.bf16.mxu1 %v18886_v27  ;;  %17728 = vmatpush3.bf16.msra.mxu0 %v18800_v13 }
 0xbad   : > { %17729 = vmatprep.subr.bf16.mxu0 %v18886_v27 }
 0xbae   : > { %17644 = vmatmul.mubr.bf16.vlgmr.msra.gmra.mrb[152].mxu1 %v11900_v6  ;;  %v18802_v6 = vld [vmem:[%s23793_s11 + $0x10] sm:$0xff]  }
 0xbaf   : > { %v11251_v48 = vpop.f32.mrb[176].mxu0  ;;  %17668 = vmatpush3.bf16.msra.mxu1 %v18784_v34  ;;  %17683 = vmatprep.mubr.msk.bf16.mxu1 %vm18887_vm3, %v18886_v27  ;;  %v18801_v34 = vld [vmem:[%s23793_s11 + $0x8] sm:$0xff]  }
 0xbb0   : > { %v17505_v25 = vpop.f32.mrb[177].mxu0  ;;  %17669 = vmatprep.subr.bf16.mxu1 %v18886_v27  ;;  %17730 = vmatpush3.bf16.msra.mxu0 %v18801_v34 }
 0xbb1   : > { %v11254_v56 = vpop.f32.mrb[178].mxu0  ;;  %17731 = vmatprep.subr.bf16.mxu0 %v18886_v27 }
 0xbb2   : > { %v17506_v5 = vpop.f32.mrb[179].mxu0 }
 0xbb3   : > { %17670 = vmatpush3.bf16.msra.mxu1 %v18785_v30 }
 0xbb4   : > { %17671 = vmatprep.subr.bf16.mxu1 %v18886_v27  ;;  %17732 = vmatpush3.bf16.msra.mxu0 %v18802_v6 }
 0xbb5   : > { %17733 = vmatprep.subr.bf16.mxu0 %v18886_v27 }
 0xbb7   : > { %17672 = vmatpush3.bf16.msra.mxu1 %v18786_v10 }
 0xbb8   : > { %17673 = vmatprep.subr.bf16.mxu1 %v18886_v27 }
 0xbbb   : > { %17674 = vmatpush3.bf16.msra.mxu1 %v18787_v32 }
 0xbbc   : > { %17675 = vmatprep.subr.bf16.mxu1 %v18886_v27 }
 0xbbf   : > { %17676 = vmatpush3.bf16.msra.mxu1 %v18788_v39 }
 0xbc0   : > { %17677 = vmatprep.subr.bf16.mxu1 %v18886_v27 }
 0xbc1   : > { %v10716_v31 = vpop.f32.mrb[128].mxu1 }
 0xbc2   : > { %v10722_v17 = vadd.f32 %v10716_v31, %v10615_v59  ;;  %v17405_v19 = vpop.f32.mrb[129].mxu1 }
 0xbc3   : > { %v10719_v50 = vpop.f32.mrb[130].mxu1  ;;  %17678 = vmatpush3.bf16.msra.mxu1 %v18789_v47 }
 0xbc4   : > { %v17406_v24 = vpop.f32.mrb[131].mxu1  ;;  %17679 = vmatprep.subr.bf16.mxu1 %v18886_v27  ;;  %v10829_v29 = vadd.f32 %v23528_v33, %v10722_v17 }
 0xbc7   : > { %17680 = vmatpush3.bf16.msra.mxu1 %v18790_v3 }
 0xbc8   : > { %17681 = vmatprep.subr.bf16.mxu1 %v18886_v27 }
 0xbcb   : > { %17682 = vmatpush3.bf16.msra.mxu1 %v18791_v55 }
 0xbcc   : > { %17707 = vmatprep.subr.bf16.mxu1 %v18886_v27 }
 0xbce   : > { %17684 = vmatmul.mubr.bf16.vlgmr.msra.gmra.mrb[156].mxu1 %v12114_v37 }
 0xbcf   : > { %v11465_v44 = vpop.f32.mrb[180].mxu0  ;;  %17723 = vmatprep.mubr.msk.bf16.mxu1 %vm18887_vm3, %v18886_v27  ;;  %17708 = vmatpush3.bf16.msra.mxu1 %v18792_v49 }
 0xbd0   : > { %v17545_v21 = vpop.f32.mrb[181].mxu0  ;;  %17709 = vmatprep.subr.bf16.mxu1 %v18886_v27 }
 0xbd1   : > { %v11468_v61 = vpop.f32.mrb[182].mxu0 }
 0xbd2   : > { %v17546_v33 = vpop.f32.mrb[183].mxu0 }
 0xbd3   : > { %17710 = vmatpush3.bf16.msra.mxu1 %v18793_v41 }
 0xbd4   : > { %17711 = vmatprep.subr.bf16.mxu1 %v18886_v27 }
 0xbd7   : > { %17712 = vmatpush3.bf16.msra.mxu1 %v18794_v45 }
 0xbd8   : > { %17713 = vmatprep.subr.bf16.mxu1 %v18886_v27 }
 0xbdb   : > { %17714 = vmatpush3.bf16.msra.mxu1 %v18795_v40 }
 0xbdc   : > { %17715 = vmatprep.subr.bf16.mxu1 %v18886_v27 }
 0xbdf   : > { %17716 = vmatpush3.bf16.msra.mxu1 %v18796_v23 }
 0xbe0   : > { %17717 = vmatprep.subr.bf16.mxu1 %v18886_v27 }
 0xbe1   : > { %v10930_v12 = vpop.f32.mrb[132].mxu1 }
 0xbe2   : > { %v10936_v20 = vadd.f32 %v10930_v12, %v10829_v29  ;;  %v17445_v2 = vpop.f32.mrb[133].mxu1 }
 0xbe3   : > { %v10933_v57 = vpop.f32.mrb[134].mxu1  ;;  %17718 = vmatpush3.bf16.msra.mxu1 %v18797_v22 }
 0xbe4   : > { %v17446_v36 = vpop.f32.mrb[135].mxu1  ;;  %v11043_v58 = vadd.f32 %v23580_v38, %v10936_v20  ;;  %17719 = vmatprep.subr.bf16.mxu1 %v18886_v27 }
 0xbe5   : > { %v14153_v36 = vld [vmem:[%s23790_s8] ss:$0 sm:$0xff] }
 0xbe7   : > { %17720 = vmatpush3.bf16.msra.mxu1 %v18798_v52 }
 0xbe8   : > { %17721 = vmatprep.subr.bf16.mxu1 %v18886_v27 }
 0xbeb   : > { %17722 = vmatpush3.bf16.msra.mxu1 %v18799_v4 }
 0xbef   : > { %v23656_v7 = vpop.f32.mrb[184].mxu0 }
 0xbf0   : > { %v17585_v26 = vpop.f32.mrb[185].mxu0 }
 0xbf1   : > { %v11682_v1 = vpop.f32.mrb[186].mxu0 }
 0xbf2   : > { %v17586_v14 = vpop.f32.mrb[187].mxu0 }
 0xc01   : > { %v11144_v63 = vpop.f32.mrb[136].mxu1 }
 0xc02   : > { %v11150_v0 = vadd.f32 %v11144_v63, %v11043_v58  ;;  %v17485_v35 = vpop.f32.mrb[137].mxu1 }
 0xc03   : > { %v11147_v42 = vpop.f32.mrb[138].mxu1  ;;  %v18805_v35 = vld [vmem:[%s23793_s11 + $0x28] sm:$0xff]  }
 0xc04   : > { %v17486_v16 = vpop.f32.mrb[139].mxu1  ;;  %v11257_v43 = vadd.f32 %v11251_v48, %v11150_v0  ;;  %v18803_v48 = vld [vmem:[%s23793_s11 + $0x18] sm:$0xff]   ;;  %v18804_v0 = vld [vmem:[%s23793_s11 + $0x20] sm:$0xff]   ;;  %v18806_v42 = vld [vmem:[%s23793_s11 + $0x30] sm:$0xff]  }
 0xc05   : > { %17734 = vmatpush3.bf16.msra.mxu0 %v18803_v48  ;;  %v18807_v16 = vld [vmem:[%s23793_s11 + $0x38] sm:$0xff]  }
 0xc06   : > { %17735 = vmatprep.subr.bf16.mxu0 %v18886_v27 }
 0xc09   : > { %17736 = vmatpush3.bf16.msra.mxu0 %v18804_v0 }
 0xc0a   : > { %17737 = vmatprep.subr.bf16.mxu0 %v18886_v27 }
 0xc0d   : > { %17738 = vmatpush3.bf16.msra.mxu0 %v18805_v35 }
 0xc0e   : > { %17739 = vmatprep.subr.bf16.mxu0 %v18886_v27 }
 0xc0f   : > { %v11893_v11 = vpop.f32.mrb[188].mxu0 }
 0xc10   : > { %v17625_v9 = vpop.f32.mrb[189].mxu0 }
 0xc11   : > { %v11896_v62 = vpop.f32.mrb[190].mxu0  ;;  %17740 = vmatpush3.bf16.msra.mxu0 %v18806_v42 }
 0xc12   : > { %v17626_v38 = vpop.f32.mrb[191].mxu0  ;;  %17741 = vmatprep.subr.bf16.mxu0 %v18886_v27  ;;  %v14163_v27 = vld [vmem:[%s23794_s12] ss:$0 sm:$0xff] }
 0xc15   : > { %17742 = vmatpush3.bf16.msra.mxu0 %v18807_v16 }
 0xc21   : > { %v11358_v54 = vpop.f32.mrb[140].mxu1 }
 0xc22   : > { %v11364_v28 = vadd.f32 %v11358_v54, %v11257_v43  ;;  %v17525_v46 = vpop.f32.mrb[141].mxu1  ;;  %v14154_v43 = vld [vmem:[%s23792_s10] ss:$0 sm:$0xff] }
 0xc23   : > { %v11361_v51 = vpop.f32.mrb[142].mxu1 }
 0xc24   : > { %v17526_v18 = vpop.f32.mrb[143].mxu1  ;;  %v11471_v8 = vadd.f32 %v11465_v44, %v11364_v28 }
 0xc2f   : > { %v12107_v53 = vpop.f32.mrb[192].mxu0 }
 0xc30   : > { %v17665_v15 = vpop.f32.mrb[193].mxu0 }
 0xc31   : > { %v12110_v60 = vpop.f32.mrb[194].mxu0 }
 0xc32   : > { %v17666_v59 = vpop.f32.mrb[195].mxu0 }
 0xc41   : > { %v11572_v30 = vpop.f32.mrb[144].mxu1 }
 0xc42   : > { %v11578_v25 = vadd.f32 %v11572_v30, %v11471_v8  ;;  %v17565_v56 = vpop.f32.mrb[145].mxu1 }
 0xc43   : > { %v11575_v5 = vpop.f32.mrb[146].mxu1 }
 0xc44   : > { %v17566_v10 = vpop.f32.mrb[147].mxu1  ;;  %v11685_v32 = vadd.f32 %v23656_v7, %v11578_v25 }
 0xc4f   : > { %v12321_v39 = vpop.f32.mrb[196].mxu0 }
 0xc50   : > { %v17705_v47 = vpop.f32.mrb[197].mxu0 }
 0xc51   : > { %v12324_v31 = vpop.f32.mrb[198].mxu0 }
 0xc52   : > { %v17706_v17 = vpop.f32.mrb[199].mxu0 }
 0xc61   : > { %v11786_v19 = vpop.f32.mrb[148].mxu1 }
 0xc62   : > { %v11792_v50 = vadd.f32 %v11786_v19, %v11685_v32  ;;  %v17605_v3 = vpop.f32.mrb[149].mxu1 }
 0xc63   : > { %v11789_v24 = vpop.f32.mrb[150].mxu1 }
 0xc64   : > { %v17606_v29 = vpop.f32.mrb[151].mxu1  ;;  %v11899_v55 = vadd.f32 %v11893_v11, %v11792_v50 }
 0xc81   : > { %v12000_v37 = vpop.f32.mrb[152].mxu1 }
 0xc82   : > { %v12006_v44 = vadd.f32 %v12000_v37, %v11899_v55  ;;  %v17645_v21 = vpop.f32.mrb[153].mxu1 }
 0xc83   : > { %v12003_v61 = vpop.f32.mrb[154].mxu1 }
 0xc84   : > { %v17646_v33 = vpop.f32.mrb[155].mxu1  ;;  %v12113_v12 = vadd.f32 %v12107_v53, %v12006_v44 }
 0xca1   : > { %v12214_v20 = vpop.f32.mrb[156].mxu1 }
 0xca2   : > { %v12220_v2 = vadd.f32 %v12214_v20, %v12113_v12  ;;  %v17685_v57 = vpop.f32.mrb[157].mxu1 }
 0xca3   : > { %v12217_v58 = vpop.f32.mrb[158].mxu1 }
 0xca4   : > { %v12327_v7 = vadd.f32 %v12321_v39, %v12220_v2  ;;  %v17686_v26 = vpop.f32.mrb[159].mxu1 }
 0xca6   : > { %v12335_v1 = vadd.f32 %v14153_v36, %v12327_v7 }
 0xca8   : > { %18808 = vtanh.f32 %v12335_v1 }
 0xcb2   : > { %v18809_v14 = vpop.eup %18808 }
 0xcb3   : > { %v12337_v63 = vpack.c.bf16 %v18809_v14, %v18809_v14 }
 0xcb5   : > { %17724 = vmatmul.mubr.bf16.vlgmr.msra.gmra.mrb[160].mxu1 %v12337_v63 }
 0xd88   : > { %v12443_v49 = vpop.f32.mrb[160].mxu1 }
 0xd89   : > { %v12444_v41 = vadd.f32 %v14154_v43, %v12443_v49  ;;  %v17725_v45 = vpop.f32.mrb[161].mxu1 }
 0xd8a   : > { %v12446_v11 = vpop.f32.mrb[162].mxu1 }
 0xd8b   : > { %18810 = vtanh.f32 %v12444_v41  ;;  %v17726_v9 = vpop.f32.mrb[163].mxu1 }
 0xd95   : > { %v18811_v62 = vpop.eup %18810 }
 0xd96   : > { %v12450_v38 = vpack.c.bf16 %v18811_v62, %v18811_v62 }
 0xd98   : > { %17744 = vmatmul.mubr.bf16.vlgmr.msra.gmra.mrb[200].mxu0 %v12450_v38 }
 0xe6b   : > { %v12556_v40 = vpop.f32.mrb[200].mxu0 }
 0xe6c   : > { %v12557_v54 = vadd.f32 %v14163_v27, %v12556_v40  ;;  %v17745_v28 = vpop.f32.mrb[201].mxu0 }
 0xe6d   : > { %v12559_v46 = vpop.f32.mrb[202].mxu0 }
 0xe6e   : > { %12562 = vst [vmem:[%s23809_s30] sm:$0xff] %v12557_v54  ;;  %v17746_v51 = vpop.f32.mrb[203].mxu0 }
 0xe6f   : > { %18825 = shalt.err (!%p18822_p4)
}
 0xe70   : > { %s18826_s22 = scalar_lea.hbm %s23736_s2, 128  ;;  %s18830_s16 = scalar_lea.hbm %s23795_s13, 256 }
 0xe71   : > { %p18827_p7 = scmp.ne.s32.totalorder %s23736_s2, %s18826_s22  ;;  %p18831_p10 = scmp.lt.u32.totalorder %s23736_s2, %s23795_s13 }
 0xe72   : > { %p18832_p11 = scmp.lt.u32.totalorder %s18830_s16, %s18826_s22  ;;  %p18834_p13 = scmp.lt.u32.totalorder %s18826_s22, %s23736_s2 }
 0xe73   : > { %p18828_p8 = pnand %p18827_p7, %p18997_p5 }
 0xe74   : > { %p18833_p12 = por %p18832_p11, %p18831_p10 }
 0xe75   : > { %p18829_p9 = pneg %p18828_p8 }
 0xe76   : > { %p18835_p0 = por %p18834_p13, %p18833_p12 }
 0xe78   : > { %p18836_p1 = pnand %p18835_p0, %p18829_p9 }
 0xe7a   : > { %18839 = shalt.err (!%p18836_p1)
}
 0xe7b   : > { %17752 = dma.vmem_to_hbm [thread:$0]  (%p18997_p5), %s23738_s0, 128, %s23736_s2, %s12564_s21  }
 0xe7c PF: > { %p17758_p2 = scmp.ge.s32.totalorder %s18878_s28, 2  ;;  %s12589_s29 = sand.u32 1, %s18866_s25  }
 0xe7d   : > { %s12590_s17 = scalar_lea.sflag [#allocation5], %s12589_s29 }
 0xe7e   : > { %p17755_p3 = pnand %p17758_p2, %p19001_p6 }
 0xe80   : > { %18861 = dma.done.wait (!%p17755_p3), %s12590_s17, 128  }
 0xe81   : > { %18863 = vsyncadd (!%p17755_p3), %s12590_s17, 4294967168  ;;  %s23811_s15 = sld [smem:[#allocation7_spill]]  ;;  %s23812_s27 = sld [smem:[#allocation8_spill]] }
 0xe82   : > { %p23_p4 = scmp.ge.s32.totalorder %s18984_s14, 4   ;;  %s23813_s25 = smov %s18870_s26 }
 0xe83   : > { %s23815_s28 = smov %s18984_s14 }
 0xe84   :  { %25 = sbr.rel (!%p23_p4) target bundleno = 7 (0x7), region = 175 }
 0xe87   : > { %s23814_s26 = smov %s23811_s15 }
 0xe8b   :  { %12595 = vsyncpa [#allocation5], 1 }
 0xe8c   :  { %12597 = vsyncpa [#allocation5 + $0x1], 1 }

</bundles_post_ra>
